<compile_context>
chip_gen: v6e
topology: v6e:2x2x1
jax: 0.10.0
libtpu: 0.0.40
codegen_flags: <defaults>
</compile_context>

<pallas_src>
import functools
from typing import NamedTuple

import jax
import jax.numpy as jnp
from jax.experimental import pallas as pl
from jax.experimental.pallas import tpu as pltpu


def _round_up(n: int, m: int) -> int:
    return ((n + m - 1) // m) * m


class TimeEmbeddingParams(NamedTuple):
    w1p: jax.Array   # (Kp, Hp) bf16, zero-padded
    b1p: jax.Array   # (1, Hp)  f32,  zero-padded
    w2p: jax.Array   # (Hp, Np) bf16, zero-padded
    b2p: jax.Array   # (1, Np)  f32,  zero-padded
    n_embd: int
    hidden: int


def prepare_time_embedding_params(w1, b1, w2, b2, *, weight_dtype=jnp.bfloat16):
    """Pad + cast the Linear weights ONCE (hoisted out of the per-step call).

    w1: (n_embd, 4n), b1: (4n,), w2: (4n, n_embd), b2: (n_embd,) -- already transposed
    to (in_features, out_features) relative to the PyTorch nn.Linear weight.
    """
    n_embd, hidden = w1.shape
    assert w2.shape == (hidden, n_embd)
    Kp = _round_up(n_embd, 128)   # K of matmul-1, N of matmul-2 (output lanes)
    Hp = _round_up(hidden, 128)
    Np = Kp
    w1p = jnp.zeros((Kp, Hp), weight_dtype).at[:n_embd, :hidden].set(
        w1.astype(weight_dtype))
    b1p = jnp.zeros((1, Hp), jnp.float32).at[:, :hidden].set(
        b1.reshape(1, hidden).astype(jnp.float32))
    w2p = jnp.zeros((Hp, Np), weight_dtype).at[:hidden, :n_embd].set(
        w2.astype(weight_dtype))
    b2p = jnp.zeros((1, Np), jnp.float32).at[:, :n_embd].set(
        b2.reshape(1, n_embd).astype(jnp.float32))
    return TimeEmbeddingParams(w1p, b1p, w2p, b2p, n_embd, hidden)


def time_embedding_kernel(x_ref, w1_ref, b1_ref, w2_ref, b2_ref, o_ref):
    # matmul-1 on the MXU: bf16 x bf16 -> f32 accumulation. The astype is a no-op
    # (wrapper already feeds bf16 x); kept only for dtype robustness.
    h = jnp.dot(x_ref[...].astype(w1_ref.dtype), w1_ref[...],
                preferred_element_type=jnp.float32) + b1_ref[...]
    # SiLU in f32 (sigmoid goes to the EUP slot; keep f32 for the v5e VPU/EUP path).
    h = h * jax.nn.sigmoid(h)
    # matmul-2: cast activations to the weight dtype only for the MXU feed.
    y = jnp.dot(h.astype(w2_ref.dtype), w2_ref[...],
                preferred_element_type=jnp.float32) + b2_ref[...]
    o_ref[...] = y.astype(o_ref.dtype)


def _default_row_tile() -> int:
    """128 on v5e (4x128^2 MXU, 1 vst slot), 256 on v6e/v7x (256-wide MXU)."""
    try:
        kind = jax.devices()[0].device_kind.lower()
    except Exception:
        return 128
    return 128 if "v5" in kind else 256


def _weight_block_spec(shape, *, single_buffer: bool):
    # Constant index_map -> the block stays VMEM-resident across grid steps; request
    # single-buffering so the (unused) second buffer doesn't waste ~2 MiB of VMEM.
    if single_buffer and hasattr(pl, "Buffered"):
        return pl.BlockSpec(shape, lambda i: (0, 0), pipeline_mode=pl.Buffered(1))
    return pl.BlockSpec(shape, lambda i: (0, 0))


_SINGLE_BUFFER_WEIGHTS_OK = None  # resolved (and cached) on first call


def time_embedding(x, params: TimeEmbeddingParams, *, row_tile=None,
                   act_dtype=jnp.bfloat16, out_dtype=None, keep_padded=False):
    """x: (B, n_embd) timestep embedding input; params from prepare_time_embedding_params."""
    global _SINGLE_BUFFER_WEIGHTS_OK

    B, n_embd = x.shape
    assert n_embd == params.n_embd
    Kp, Hp = params.w1p.shape
    Np = params.w2p.shape[1]
    out_dtype = act_dtype if out_dtype is None else out_dtype
    if row_tile is None:
        row_tile = _default_row_tile()

    # Row tiling: one tile if the batch is small (grid=(1,) -> no intra-kernel
    # pipelining, the op is weight-HBM-bound); otherwise row tiles sharded across
    # TensorCores via the "parallel" grid axis for compute-bound batches.
    if B <= row_tile:
        TB = _round_up(max(B, 1), 16)
        Bp = TB
    else:
        TB = row_tile
        Bp = _round_up(B, TB)

    # x: cast to bf16 + zero-pad once in the wrapper (zeros contribute nothing through
    # both matmuls and SiLU(0)=0); weights arrive pre-padded.
    xp = jnp.zeros((Bp, Kp), act_dtype).at[:B, :n_embd].set(x.astype(act_dtype))

    flops = 2 * Bp * Kp * Hp + 2 * Bp * Hp * Np
    bytes_accessed = (
        xp.size * xp.dtype.itemsize
        + params.w1p.size * params.w1p.dtype.itemsize
        + params.b1p.size * params.b1p.dtype.itemsize
        + params.w2p.size * params.w2p.dtype.itemsize
        + params.b2p.size * params.b2p.dtype.itemsize
        + Bp * Np * jnp.dtype(out_dtype).itemsize)
    cost = pl.CostEstimate(flops=flops, transcendentals=Bp * Hp,
                           bytes_accessed=bytes_accessed)

    def _call(single_buffer_weights: bool):
        wspec = functools.partial(_weight_block_spec,
                                  single_buffer=single_buffer_weights)
        return pl.pallas_call(
            time_embedding_kernel,
            out_shape=jax.ShapeDtypeStruct((Bp, Np), out_dtype),
            grid=(Bp // TB,),
            in_specs=[
                pl.BlockSpec((TB, Kp), lambda i: (i, 0)),   # x rows tiled on the grid
                wspec((Kp, Hp)),                            # weights: VMEM-resident,
                wspec((1, Hp)),                             #   single-buffered
                wspec((Hp, Np)),
                wspec((1, Np)),
            ],
            out_specs=pl.BlockSpec((TB, Np), lambda i: (i, 0)),
            compiler_params=pltpu.CompilerParams(
                dimension_semantics=("parallel",)),
            cost_estimate=cost,
        )(xp, params.w1p, params.b1p, params.w2p, params.b2p)

    if _SINGLE_BUFFER_WEIGHTS_OK is not False:
        try:
            out = _call(True)
            _SINGLE_BUFFER_WEIGHTS_OK = True
        except Exception:
            # This Pallas/Mosaic build rejected pipeline_mode=pl.Buffered(1);
            # fall back to the (known-good) default double-buffered weights.
            _SINGLE_BUFFER_WEIGHTS_OK = False
            out = _call(False)
    else:
        out = _call(False)

    if keep_padded:
        # Lane-dense (Bp, Np) layout for downstream consumers. NOTE: padded batch rows
        # are NOT zero (x_pad=0 -> SiLU(b1) @ w2 + b2); padded lanes [n_embd:Np] ARE
        # zero. Slice real rows/lanes at the model boundary only.
        return out
    return out[:B, :n_embd]


def reference(x, w1, b1, w2, b2, weight_dtype=jnp.bfloat16):
    # Mimic the kernel's bf16 weight/activation quantization with f32 accumulation.
    hi = jax.lax.Precision.HIGHEST
    xq = x.astype(weight_dtype).astype(jnp.float32)
    w1q = w1.astype(weight_dtype).astype(jnp.float32)
    w2q = w2.astype(weight_dtype).astype(jnp.float32)
    h = jnp.dot(xq, w1q, precision=hi) + b1.reshape(1, -1)
    h = h * jax.nn.sigmoid(h)
    h = h.astype(weight_dtype).astype(jnp.float32)
    return jnp.dot(h, w2q, precision=hi) + b2.reshape(1, -1)


if __name__ == "__main__":
    key = jax.random.PRNGKey(0)
    # Production SD config from the spec: TimeEmbedding(320); batched timesteps.
    B = 64
    n_embd = 320
    hidden = 4 * n_embd  # 1280

    k_x, k_w1, k_b1, k_w2, k_b2 = jax.random.split(key, 5)
    x = jax.random.normal(k_x, (B, n_embd), dtype=jnp.float32)
    # Deterministic synthetic parameters (PyTorch-style uniform fan-in init scale).
    w1 = jax.random.uniform(k_w1, (n_embd, hidden), jnp.float32,
                            -1.0 / n_embd ** 0.5, 1.0 / n_embd ** 0.5)
    b1 = jax.random.uniform(k_b1, (hidden,), jnp.float32,
                            -1.0 / n_embd ** 0.5, 1.0 / n_embd ** 0.5)
    w2 = jax.random.uniform(k_w2, (hidden, n_embd), jnp.float32,
                            -1.0 / hidden ** 0.5, 1.0 / hidden ** 0.5)
    b2 = jax.random.uniform(k_b2, (n_embd,), jnp.float32,
                            -1.0 / hidden ** 0.5, 1.0 / hidden ** 0.5)

    # Pad + cast weights ONCE (hoisted out of the per-step path).
    params = prepare_time_embedding_params(w1, b1, w2, b2)
    params = jax.block_until_ready(params)

    # Per-step call: keep the lane-dense padded layout, slice at the model boundary.
    out_padded = time_embedding(x, params, keep_padded=True)
    out_padded = jax.block_until_ready(out_padded)
    out = out_padded[:B, :n_embd].astype(jnp.float32)

    ref = reference(x, w1, b1, w2, b2)
    assert out.shape == (B, n_embd)
    assert jnp.allclose(out, ref, atol=2e-2, rtol=2e-2), "mismatch vs reference"

    print("KERNEL_OK")
</pallas_src>

<mosaic_0001>
module attributes {stable_mosaic.version = 11 : i64} {
  func.func @time_embedding_kernel(%arg0: i32, %arg1: memref<64x384xbf16, #tpu.memory_space<vmem>>, %arg2: memref<384x1280xbf16, #tpu.memory_space<vmem>>, %arg3: memref<1x1280xf32, #tpu.memory_space<vmem>>, %arg4: memref<1280x384xbf16, #tpu.memory_space<vmem>>, %arg5: memref<1x384xf32, #tpu.memory_space<vmem>>, %arg6: memref<64x384xbf16, #tpu.memory_space<vmem>>) attributes {dimension_semantics = [#tpu.dimension_semantics<parallel>], iteration_bounds = array<i64: 1>, scalar_prefetch = 0 : i64, scratch_operands = 0 : i64, tpu.core_type = #tpu.core_type<tc>, window_params = [{transform_indices = @transform_0, window_bounds = array<i64: 64, 384>}, {pipeline_mode = #tpu.pipeline_mode<synchronous>, transform_indices = @transform_1, window_bounds = array<i64: 384, 1280>}, {pipeline_mode = #tpu.pipeline_mode<synchronous>, transform_indices = @transform_2, window_bounds = array<i64: 1, 1280>}, {pipeline_mode = #tpu.pipeline_mode<synchronous>, transform_indices = @transform_3, window_bounds = array<i64: 1280, 384>}, {pipeline_mode = #tpu.pipeline_mode<synchronous>, transform_indices = @transform_4, window_bounds = array<i64: 1, 384>}, {transform_indices = @transform_5, window_bounds = array<i64: 64, 384>}]} {
    %c0 = arith.constant 0 : index
    %c0_0 = arith.constant 0 : index
    %0 = vector.load %arg1[%c0, %c0_0] : memref<64x384xbf16, #tpu.memory_space<vmem>>, vector<64x384xbf16>
    %c0_1 = arith.constant 0 : index
    %c0_2 = arith.constant 0 : index
    %1 = vector.load %arg2[%c0_1, %c0_2] : memref<384x1280xbf16, #tpu.memory_space<vmem>>, vector<384x1280xbf16>
    %cst = arith.constant dense<0.000000e+00> : vector<64x1280xf32>
    %2 = tpu.matmul %0, %1, %cst {dimension_numbers = #tpu.dot_dimension_numbers<[1], [0], [0], [1], [0, 0, 1, 1], [], []>} : vector<64x384xbf16>, vector<384x1280xbf16>, vector<64x1280xf32> -> vector<64x1280xf32>
    %c0_3 = arith.constant 0 : index
    %c0_4 = arith.constant 0 : index
    %3 = vector.load %arg3[%c0_3, %c0_4] : memref<1x1280xf32, #tpu.memory_space<vmem>>, vector<1x1280xf32>
    %4 = vector.broadcast %3 : vector<1x1280xf32> to vector<64x1280xf32>
    %5 = arith.addf %2, %4 : vector<64x1280xf32>
    %6 = arith.negf %5 : vector<64x1280xf32>
    %7 = math.exp %6 : vector<64x1280xf32>
    %cst_5 = arith.constant 1.000000e+00 : f32
    %8 = vector.broadcast %cst_5 : f32 to vector<64x1280xf32>
    %9 = arith.addf %8, %7 : vector<64x1280xf32>
    %10 = arith.divf %8, %9 : vector<64x1280xf32>
    %11 = arith.mulf %5, %10 : vector<64x1280xf32>
    %12 = arith.truncf %11 : vector<64x1280xf32> to vector<64x1280xbf16>
    %c0_6 = arith.constant 0 : index
    %c0_7 = arith.constant 0 : index
    %13 = vector.load %arg4[%c0_6, %c0_7] : memref<1280x384xbf16, #tpu.memory_space<vmem>>, vector<1280x384xbf16>
    %cst_8 = arith.constant dense<0.000000e+00> : vector<64x384xf32>
    %14 = tpu.matmul %12, %13, %cst_8 {dimension_numbers = #tpu.dot_dimension_numbers<[1], [0], [0], [1], [0, 0, 1, 1], [], []>} : vector<64x1280xbf16>, vector<1280x384xbf16>, vector<64x384xf32> -> vector<64x384xf32>
    %c0_9 = arith.constant 0 : index
    %c0_10 = arith.constant 0 : index
    %15 = vector.load %arg5[%c0_9, %c0_10] : memref<1x384xf32, #tpu.memory_space<vmem>>, vector<1x384xf32>
    %16 = vector.broadcast %15 : vector<1x384xf32> to vector<64x384xf32>
    %17 = arith.addf %14, %16 : vector<64x384xf32>
    %18 = arith.truncf %17 : vector<64x384xf32> to vector<64x384xbf16>
    %c0_11 = arith.constant 0 : index
    %c0_12 = arith.constant 0 : index
    %19 = vector.load %arg6[%c0_11, %c0_12] : memref<64x384xbf16, #tpu.memory_space<vmem>>, vector<64x384xbf16>
    tpu.vector_store %arg6[%c0_11, %c0_12], %18 {strides = array<i32>} : memref<64x384xbf16, #tpu.memory_space<vmem>>, vector<64x384xbf16>,
    return
  }
  func.func @transform_0(%arg0: i32) -> (i32, i32) {
    %c0_i32 = arith.constant 0 : i32
    %c0_i32_0 = arith.constant 0 : i32
    return %arg0, %c0_i32 : i32, i32
  }
  func.func @transform_1(%arg0: i32) -> (i32, i32) {
    %c0_i32 = arith.constant 0 : i32
    %c0_i32_0 = arith.constant 0 : i32
    %c0_i32_1 = arith.constant 0 : i32
    return %c0_i32, %c0_i32_0 : i32, i32
  }
  func.func @transform_2(%arg0: i32) -> (i32, i32) {
    %c0_i32 = arith.constant 0 : i32
    %c0_i32_0 = arith.constant 0 : i32
    %c0_i32_1 = arith.constant 0 : i32
    return %c0_i32, %c0_i32_0 : i32, i32
  }
  func.func @transform_3(%arg0: i32) -> (i32, i32) {
    %c0_i32 = arith.constant 0 : i32
    %c0_i32_0 = arith.constant 0 : i32
    %c0_i32_1 = arith.constant 0 : i32
    return %c0_i32, %c0_i32_0 : i32, i32
  }
  func.func @transform_4(%arg0: i32) -> (i32, i32) {
    %c0_i32 = arith.constant 0 : i32
    %c0_i32_0 = arith.constant 0 : i32
    %c0_i32_1 = arith.constant 0 : i32
    return %c0_i32, %c0_i32_0 : i32, i32
  }
  func.func @transform_5(%arg0: i32) -> (i32, i32) {
    %c0_i32 = arith.constant 0 : i32
    %c0_i32_0 = arith.constant 0 : i32
    return %arg0, %c0_i32 : i32, i32
  }
}

module attributes {stable_mosaic.version = 11 : i64} {
  func.func @time_embedding_kernel(%arg0: i32, %arg1: memref<64x384xbf16, #tpu.memory_space<vmem>>, %arg2: memref<384x1280xbf16, #tpu.memory_space<vmem>>, %arg3: memref<1x1280xf32, #tpu.memory_space<vmem>>, %arg4: memref<1280x384xbf16, #tpu.memory_space<vmem>>, %arg5: memref<1x384xf32, #tpu.memory_space<vmem>>, %arg6: memref<64x384xbf16, #tpu.memory_space<vmem>>) attributes {dimension_semantics = [#tpu.dimension_semantics<parallel>], iteration_bounds = array<i64: 1>, scalar_prefetch = 0 : i64, scratch_operands = 0 : i64, tpu.core_type = #tpu.core_type<tc>, window_params = [{transform_indices = @transform_0, window_bounds = array<i64: 64, 384>}, {pipeline_mode = #tpu.pipeline_mode<synchronous>, transform_indices = @transform_1, window_bounds = array<i64: 384, 1280>}, {pipeline_mode = #tpu.pipeline_mode<synchronous>, transform_indices = @transform_2, window_bounds = array<i64: 1, 1280>}, {pipeline_mode = #tpu.pipeline_mode<synchronous>, transform_indices = @transform_3, window_bounds = array<i64: 1280, 384>}, {pipeline_mode = #tpu.pipeline_mode<synchronous>, transform_indices = @transform_4, window_bounds = array<i64: 1, 384>}, {transform_indices = @transform_5, window_bounds = array<i64: 64, 384>}]} {
    %c0 = arith.constant 0 : index
    %c0_0 = arith.constant 0 : index
    %0 = vector.load %arg1[%c0, %c0_0] : memref<64x384xbf16, #tpu.memory_space<vmem>>, vector<64x384xbf16>
    %c0_1 = arith.constant 0 : index
    %c0_2 = arith.constant 0 : index
    %1 = vector.load %arg2[%c0_1, %c0_2] : memref<384x1280xbf16, #tpu.memory_space<vmem>>, vector<384x1280xbf16>
    %cst = arith.constant dense<0.000000e+00> : vector<64x1280xf32>
    %2 = tpu.matmul %0, %1, %cst {dimension_numbers = #tpu.dot_dimension_numbers<[1], [0], [0], [1], [0, 0, 1, 1], [], []>} : vector<64x384xbf16>, vector<384x1280xbf16>, vector<64x1280xf32> -> vector<64x1280xf32>
    %c0_3 = arith.constant 0 : index
    %c0_4 = arith.constant 0 : index
    %3 = vector.load %arg3[%c0_3, %c0_4] : memref<1x1280xf32, #tpu.memory_space<vmem>>, vector<1x1280xf32>
    %4 = vector.broadcast %3 : vector<1x1280xf32> to vector<64x1280xf32>
    %5 = arith.addf %2, %4 : vector<64x1280xf32>
    %6 = arith.negf %5 : vector<64x1280xf32>
    %7 = math.exp %6 : vector<64x1280xf32>
    %cst_5 = arith.constant 1.000000e+00 : f32
    %8 = vector.broadcast %cst_5 : f32 to vector<64x1280xf32>
    %9 = arith.addf %8, %7 : vector<64x1280xf32>
    %10 = arith.divf %8, %9 : vector<64x1280xf32>
    %11 = arith.mulf %5, %10 : vector<64x1280xf32>
    %12 = arith.truncf %11 : vector<64x1280xf32> to vector<64x1280xbf16>
    %c0_6 = arith.constant 0 : index
    %c0_7 = arith.constant 0 : index
    %13 = vector.load %arg4[%c0_6, %c0_7] : memref<1280x384xbf16, #tpu.memory_space<vmem>>, vector<1280x384xbf16>
    %cst_8 = arith.constant dense<0.000000e+00> : vector<64x384xf32>
    %14 = tpu.matmul %12, %13, %cst_8 {dimension_numbers = #tpu.dot_dimension_numbers<[1], [0], [0], [1], [0, 0, 1, 1], [], []>} : vector<64x1280xbf16>, vector<1280x384xbf16>, vector<64x384xf32> -> vector<64x384xf32>
    %c0_9 = arith.constant 0 : index
    %c0_10 = arith.constant 0 : index
    %15 = vector.load %arg5[%c0_9, %c0_10] : memref<1x384xf32, #tpu.memory_space<vmem>>, vector<1x384xf32>
    %16 = vector.broadcast %15 : vector<1x384xf32> to vector<64x384xf32>
    %17 = arith.addf %14, %16 : vector<64x384xf32>
    %18 = arith.truncf %17 : vector<64x384xf32> to vector<64x384xbf16>
    %c0_11 = arith.constant 0 : index
    %c0_12 = arith.constant 0 : index
    %19 = vector.load %arg6[%c0_11, %c0_12] : memref<64x384xbf16, #tpu.memory_space<vmem>>, vector<64x384xbf16>
    tpu.vector_store %arg6[%c0_11, %c0_12], %18 {strides = array<i32>} : memref<64x384xbf16, #tpu.memory_space<vmem>>, vector<64x384xbf16>,
    return
  }
  func.func @transform_0(%arg0: i32) -> (i32, i32) {
    %c0_i32 = arith.constant 0 : i32
    %c0_i32_0 = arith.constant 0 : i32
    return %arg0, %c0_i32 : i32, i32
  }
  func.func @transform_1(%arg0: i32) -> (i32, i32) {
    %c0_i32 = arith.constant 0 : i32
    %c0_i32_0 = arith.constant 0 : i32
    %c0_i32_1 = arith.constant 0 : i32
    return %c0_i32, %c0_i32_0 : i32, i32
  }
  func.func @transform_2(%arg0: i32) -> (i32, i32) {
    %c0_i32 = arith.constant 0 : i32
    %c0_i32_0 = arith.constant 0 : i32
    %c0_i32_1 = arith.constant 0 : i32
    return %c0_i32, %c0_i32_0 : i32, i32
  }
  func.func @transform_3(%arg0: i32) -> (i32, i32) {
    %c0_i32 = arith.constant 0 : i32
    %c0_i32_0 = arith.constant 0 : i32
    %c0_i32_1 = arith.constant 0 : i32
    return %c0_i32, %c0_i32_0 : i32, i32
  }
  func.func @transform_4(%arg0: i32) -> (i32, i32) {
    %c0_i32 = arith.constant 0 : i32
    %c0_i32_0 = arith.constant 0 : i32
    %c0_i32_1 = arith.constant 0 : i32
    return %c0_i32, %c0_i32_0 : i32, i32
  }
  func.func @transform_5(%arg0: i32) -> (i32, i32) {
    %c0_i32 = arith.constant 0 : i32
    %c0_i32_0 = arith.constant 0 : i32
    return %arg0, %c0_i32 : i32, i32
  }
}

</mosaic_0001>

<bundles_post_ra>
// kernel: tpu_custom_call.1
= control target key start
LH: loop header
LB: loop body
LE: loop exit
PB: predicated region body
PF: predicated region fallthrough
CT: control target
= control target key end

     0   :  { %10 = vsyncpa [#allocation3], 0  ;;  %s8573_s0 = inlined_call_operand.hbm [shape: bf16[64,384], index: 0, kind: input, shape index: {}]   ;;  %s8574_s1 = inlined_call_operand.hbm [shape: bf16[384,1280], index: 1, kind: input, shape index: {}]   ;;  %s8575_s2 = inlined_call_operand.hbm [shape: f32[1,1280], index: 2, kind: input, shape index: {}]   ;;  %s8576_s3 = inlined_call_operand.hbm [shape: bf16[1280,384], index: 3, kind: input, shape index: {}]   ;;  %s8577_s4 = inlined_call_operand.vmem [shape: f32[1,384], index: 4, kind: input, shape index: {}]   ;;  %s8578_s5 = inlined_call_operand.hbm [shape: bf16[64,384], index: 5, kind: output, shape index: {}]  }
   0x1   :  { %11 = vsyncpa [#allocation6], 0 }
   0x2   :  { %12 = vsyncpa [#allocation9], 0 }
   0x3   :  { %13 = vsyncpa [#allocation4], 0  ;;  %s7352_s18 = smov [#allocation5]  }
   0x4   :  { %s31_s19 = sshll.u32 %s7352_s18, 4  ;;  %s32_s19 = int_to_ptr.vmem [resolvable:$true] %s31_s19 }
   0x5   :  { %s7252_s20 = scalar_lea.vmem %s32_s19, 30720  ;;  %p7257_p1 = scmp.lt.s32.totalorder %s32_s19, %s32_s19 }
   0x6   :  { %p7253_p0 = scmp.ne.s32.totalorder %s32_s19, %s7252_s20  ;;  %p7258_p2 = scmp.lt.s32.totalorder %s7252_s20, %s7252_s20 }
   0x8   :  { %p7259_p3 = por %p7258_p2, %p7257_p1 }
   0xa   :  { %p7260_p4 = pnand %p7259_p3, %p7253_p0 }
   0xc   :  { %7263 = shalt.err (!%p7260_p4)
}
   0xd   :  { %s7353_s21 = smov 640   ;;  %s7354_s22 = smov 40  }
   0xe   :  { %37 = dma.hbm_to_vmem [thread:$0]  %s8574_s1, 30720, %s32_s19, [#allocation6], %s7353_s21, %s7353_s21, %s7354_s22  }
   0xf   :  { %s7355_s25 = smov [#allocation2]  }
  0x10   :  { %s19_s26 = sshll.u32 %s7355_s25, 4  ;;  %s20_s26 = int_to_ptr.vmem [resolvable:$true] %s19_s26 }
  0x11   :  { %s7272_s27 = scalar_lea.vmem %s20_s26, 1536  ;;  %p7277_p6 = scmp.lt.s32.totalorder %s20_s26, %s20_s26 }
  0x12   :  { %p7273_p5 = scmp.ne.s32.totalorder %s20_s26, %s7272_s27  ;;  %p7278_p7 = scmp.lt.s32.totalorder %s7272_s27, %s7272_s27 }
  0x14   :  { %p7279_p8 = por %p7278_p7, %p7277_p6 }
  0x16   :  { %p7280_p9 = pnand %p7279_p8, %p7273_p5 }
  0x18   :  { %7283 = shalt.err (!%p7280_p9)
}
  0x19   :  { %s7356_s28 = smov 192   ;;  %s7357_s29 = smov 12  }
  0x1a   :  { %25 = dma.hbm_to_vmem [thread:$0]  %s8573_s0, 1536, %s20_s26, [#allocation3], %s7356_s28, %s7356_s28, %s7357_s29  }
  0x1b   :  { %s7358_s1 = smov [#allocation7]   ;;  %s7359_s8 = smov [#allocation8]  }
  0x1c   :  { %s44_s7 = sshll.u32 %s7358_s1, 4  ;;  %s53_s9 = sshll.u32 %s7359_s8, 4  ;;  %s45_s7 = int_to_ptr.vmem [resolvable:$true] %s44_s7  ;;  %s54_s9 = int_to_ptr.vmem [resolvable:$true] %s53_s9 }
  0x1d   :  { %s7292_s10 = scalar_lea.vmem %s45_s7, 160  ;;  %p7297_p11 = scmp.lt.s32.totalorder %s45_s7, %s45_s7 }
  0x1e   :  { %p7293_p10 = scmp.ne.s32.totalorder %s45_s7, %s7292_s10  ;;  %p7298_p12 = scmp.lt.s32.totalorder %s7292_s10, %s7292_s10 }
  0x20   :  { %p7299_p13 = por %p7298_p12, %p7297_p11 }
  0x22   :  { %p7300_p0 = pnand %p7299_p13, %p7293_p10 }
  0x24   :  { %7303 = shalt.err (!%p7300_p0)
}
  0x25   :  { %47 = dma.hbm_to_vmem [thread:$0]  %s8575_s2, 160, %s45_s7, [#allocation6]  }
  0x26   :  { %s7312_s13 = scalar_lea.vmem %s54_s9, 30720  ;;  %p7317_p2 = scmp.lt.s32.totalorder %s54_s9, %s54_s9 }
  0x27   :  { %p7313_p1 = scmp.ne.s32.totalorder %s54_s9, %s7312_s13  ;;  %p7318_p3 = scmp.lt.s32.totalorder %s7312_s13, %s7312_s13 }
  0x29   :  { %p7319_p4 = por %p7318_p3, %p7317_p2 }
  0x2b   :  { %p7320_p5 = pnand %p7319_p4, %p7313_p1 }
  0x2d   :  { %7323 = shalt.err (!%p7320_p5)
}
  0x2e   :  { %59 = dma.hbm_to_vmem [thread:$0]  %s8576_s3, 30720, %s54_s9, [#allocation9], %s7356_s28, %s7356_s28, %s7357_s29  }
  0x2f   :  { %7344 = dma.done.wait [#allocation3], 1536  }
  0x30   :  { %7345 = vsyncadd [#allocation3], 4294965760 }
  0x31   :  { %7346 = dma.done.wait [#allocation6], 30880  }
  0x32   :  { %7347 = vsyncadd [#allocation6], 4294936416 }
  0x33   :  { %7348 = dma.done.wait [#allocation9], 30720  }
  0x34   :  { %7349 = vsyncadd [#allocation9], 4294936576  ;;  %v7360_v0 = vmov 0   ;;  %v6215_v1 = vld [vmem:[#allocation5 + $0x234] ss:$40 sps:$4 sm:$0xff]  }
  0x35   :  { %1754 = vmatprep.mubr.bf16.mxu1 %v7360_v0  ;;  %v6217_v2 = vld [vmem:[#allocation5 + $0x734] ss:$40 sps:$4 sm:$0xff]   ;;  %1649 = vmatprep.subr.bf16.mxu0 %v6215_v1  ;;  %v6219_v3 = vld [vmem:[#allocation5 + $0x230] ss:$40 sps:$4 sm:$0xff]   ;;  %v6221_v5 = vld [vmem:[#allocation5 + $0x1e4] ss:$40 sps:$4 sm:$0xff]  }
  0x36   :  { %v6220_v4 = vld [vmem:[#allocation5 + $0x730] ss:$40 sps:$4 sm:$0xff]   ;;  %1722 = vmatprep.subr.bf16.mxu1 %v6217_v2  ;;  %1650 = vmatpush1.bf16.msra.mxu0 %v6219_v3  ;;  %v6223_v6 = vld [vmem:[#allocation5 + $0x6e4] ss:$40 sps:$4 sm:$0xff]   ;;  %v6225_v7 = vld [vmem:[#allocation5 + $0x1e0] ss:$40 sps:$4 sm:$0xff]  }
  0x37   :  { %1723 = vmatpush1.bf16.msra.mxu1 %v6220_v4  ;;  %1651 = vmatprep.subr.bf16.mxu0 %v6221_v5  ;;  %v6226_v8 = vld [vmem:[#allocation5 + $0x6e0] ss:$40 sps:$4 sm:$0xff]   ;;  %v6227_v9 = vld [vmem:[#allocation5 + $0x194] ss:$40 sps:$4 sm:$0xff]   ;;  %v6231_v11 = vld [vmem:[#allocation5 + $0x190] ss:$40 sps:$4 sm:$0xff]  }
  0x38   :  { %1724 = vmatprep.subr.bf16.mxu1 %v6223_v6  ;;  %v6229_v10 = vld [vmem:[#allocation5 + $0x694] ss:$40 sps:$4 sm:$0xff]   ;;  %v6232_v12 = vld [vmem:[#allocation5 + $0x690] ss:$40 sps:$4 sm:$0xff]   ;;  %v6233_v13 = vld [vmem:[#allocation5 + $0x144] ss:$40 sps:$4 sm:$0xff]  }
  0x39   :  { %v6235_v14 = vld [vmem:[#allocation5 + $0x644] ss:$40 sps:$4 sm:$0xff]   ;;  %v6237_v15 = vld [vmem:[#allocation5 + $0x140] ss:$40 sps:$4 sm:$0xff]   ;;  %v6239_v17 = vld [vmem:[#allocation5 + $0xf4] ss:$40 sps:$4 sm:$0xff]  }
  0x3a   :  { %1652 = vmatpush1.bf16.msra.mxu0 %v6225_v7  ;;  %v6238_v16 = vld [vmem:[#allocation5 + $0x640] ss:$40 sps:$4 sm:$0xff]   ;;  %v6241_v18 = vld [vmem:[#allocation5 + $0x5f4] ss:$40 sps:$4 sm:$0xff]   ;;  %v6243_v19 = vld [vmem:[#allocation5 + $0xf0] ss:$40 sps:$4 sm:$0xff]  }
  0x3b   :  { %1725 = vmatpush1.bf16.msra.mxu1 %v6226_v8  ;;  %1653 = vmatprep.subr.bf16.mxu0 %v6227_v9  ;;  %v6244_v20 = vld [vmem:[#allocation5 + $0x5f0] ss:$40 sps:$4 sm:$0xff]   ;;  %v6245_v21 = vld [vmem:[#allocation5 + $0xa4] ss:$40 sps:$4 sm:$0xff]   ;;  %v6249_v23 = vld [vmem:[#allocation5 + $0xa0] ss:$40 sps:$4 sm:$0xff]  }
  0x3c   :  { %1726 = vmatprep.subr.bf16.mxu1 %v6229_v10  ;;  %v6247_v22 = vld [vmem:[#allocation5 + $0x5a4] ss:$40 sps:$4 sm:$0xff]   ;;  %v6250_v24 = vld [vmem:[#allocation5 + $0x5a0] ss:$40 sps:$4 sm:$0xff]   ;;  %v6251_v25 = vld [vmem:[#allocation5 + $0x54] ss:$40 sps:$4 sm:$0xff]  }
  0x3d   :  { %v6253_v26 = vld [vmem:[#allocation5 + $0x554] ss:$40 sps:$4 sm:$0xff]   ;;  %v6255_v27 = vld [vmem:[#allocation5 + $0x50] ss:$40 sps:$4 sm:$0xff]   ;;  %v6257_v29 = vld [vmem:[#allocation5 + $0x4] ss:$40 sps:$4 sm:$0xff]  }
  0x3e   :  { %1654 = vmatpush1.bf16.msra.mxu0 %v6231_v11  ;;  %v6256_v28 = vld [vmem:[#allocation5 + $0x550] ss:$40 sps:$4 sm:$0xff]   ;;  %v6259_v30 = vld [vmem:[#allocation5 + $0x504] ss:$40 sps:$4 sm:$0xff]   ;;  %v6261_v31 = vld [vmem:[#allocation5] ss:$40 sps:$4 sm:$0xff]  }
  0x3f   :  { %1727 = vmatpush1.bf16.msra.mxu1 %v6232_v12  ;;  %1655 = vmatprep.subr.bf16.mxu0 %v6233_v13  ;;  %v6262_v32 = vld [vmem:[#allocation5 + $0x500] ss:$40 sps:$4 sm:$0xff]   ;;  %v6263_v33 = vld [vmem:[#allocation5 + $0x4b4] ss:$40 sps:$4 sm:$0xff]   ;;  %v6268_v37 = vld [vmem:[#allocation5 + $0x4b0] ss:$40 sps:$4 sm:$0xff]  }
  0x40   :  { %1728 = vmatprep.subr.bf16.mxu1 %v6235_v14  ;;  %v6267_v34 = vld [vmem:[#allocation5 + $0x23c] ss:$40 sps:$4 sm:$0xff]   ;;  %v7411_v35 = vld [vmem:[#allocation2 + $0x8] ss:$12 sps:$4 sm:$0xff]   ;;  %v6265_v36 = vld [vmem:[#allocation5 + $0x238] ss:$40 sps:$4 sm:$0xff]  }
  0x41   :  { %v6270_v38 = vld [vmem:[#allocation5 + $0x464] ss:$40 sps:$4 sm:$0xff]   ;;  %v6272_v40 = vld [vmem:[#allocation5 + $0x1e8] ss:$40 sps:$4 sm:$0xff]   ;;  %v6276_v42 = vld [vmem:[#allocation5 + $0x414] ss:$40 sps:$4 sm:$0xff]  }
  0x42   :  { %1656 = vmatpush1.bf16.msra.mxu0 %v6237_v15  ;;  %v6274_v39 = vld [vmem:[#allocation5 + $0x1ec] ss:$40 sps:$4 sm:$0xff]   ;;  %v6275_v41 = vld [vmem:[#allocation5 + $0x460] ss:$40 sps:$4 sm:$0xff]   ;;  %v6280_v43 = vld [vmem:[#allocation5 + $0x19c] ss:$40 sps:$4 sm:$0xff]  }
  0x43   :  { %1729 = vmatpush1.bf16.msra.mxu1 %v6238_v16  ;;  %1657 = vmatprep.subr.bf16.mxu0 %v6239_v17  ;;  %v6278_v44 = vld [vmem:[#allocation5 + $0x198] ss:$40 sps:$4 sm:$0xff]   ;;  %v6282_v46 = vld [vmem:[#allocation5 + $0x3c4] ss:$40 sps:$4 sm:$0xff]   ;;  %v6284_v48 = vld [vmem:[#allocation5 + $0x148] ss:$40 sps:$4 sm:$0xff]  }
  0x44   :  { %1730 = vmatprep.subr.bf16.mxu1 %v6241_v18  ;;  %v6281_v45 = vld [vmem:[#allocation5 + $0x410] ss:$40 sps:$4 sm:$0xff]   ;;  %v6286_v47 = vld [vmem:[#allocation5 + $0x14c] ss:$40 sps:$4 sm:$0xff]   ;;  %v6287_v49 = vld [vmem:[#allocation5 + $0x3c0] ss:$40 sps:$4 sm:$0xff]  }
  0x45   :  { %v6288_v50 = vld [vmem:[#allocation5 + $0x374] ss:$40 sps:$4 sm:$0xff]   ;;  %v7415_v51 = vld [vmem:[#allocation2 + $0x4] ss:$12 sps:$4 sm:$0xff]   ;;  %v6290_v53 = vld [vmem:[#allocation5 + $0xf8] ss:$40 sps:$4 sm:$0xff]  }
  0x46   :  { %1658 = vmatpush1.bf16.msra.mxu0 %v6243_v19  ;;  %v6292_v52 = vld [vmem:[#allocation5 + $0xfc] ss:$40 sps:$4 sm:$0xff]   ;;  %1681 = vmatprep.mubr.bf16.mxu0 %v7415_v51  ;;  %v6293_v54 = vld [vmem:[#allocation5 + $0x370] ss:$40 sps:$4 sm:$0xff]   ;;  %v6298_v56 = vld [vmem:[#allocation5 + $0xac] ss:$40 sps:$4 sm:$0xff]  }
  0x47   :  { %1731 = vmatpush1.bf16.msra.mxu1 %v6244_v20  ;;  %1659 = vmatprep.subr.bf16.mxu0 %v6245_v21  ;;  %v6294_v55 = vld [vmem:[#allocation5 + $0x324] ss:$40 sps:$4 sm:$0xff]   ;;  %v6296_v57 = vld [vmem:[#allocation5 + $0xa8] ss:$40 sps:$4 sm:$0xff]   ;;  %v6300_v60 = vld [vmem:[#allocation5 + $0x2d4] ss:$40 sps:$4 sm:$0xff]  }
  0x48   :  { %1732 = vmatprep.subr.bf16.mxu1 %v6247_v22  ;;  %v6299_v58 = vld [vmem:[#allocation5 + $0x320] ss:$40 sps:$4 sm:$0xff]   ;;  %v6304_v61 = vld [vmem:[#allocation5 + $0x5c] ss:$40 sps:$4 sm:$0xff]   ;;  %v6305_v63 = vld [vmem:[#allocation5 + $0x2d0] ss:$40 sps:$4 sm:$0xff]  }
  0x49   :  { %v7418_v59 = vld [vmem:[#allocation2 + $0x20] ss:$12 sps:$4 sm:$0xff]   ;;  %v6308_v3 = vld [vmem:[#allocation5 + $0x8] ss:$40 sps:$4 sm:$0xff]   ;;  %v7422_v5 = vld [vmem:[#allocation2 + $0x38] ss:$12 sps:$4 sm:$0xff]  }
  0x4a   :  { %1660 = vmatpush1.bf16.msra.mxu0 %v6249_v23  ;;  %v6302_v62 = vld [vmem:[#allocation5 + $0x58] ss:$40 sps:$4 sm:$0xff]   ;;  %v6306_v1 = vld [vmem:[#allocation5 + $0x284] ss:$40 sps:$4 sm:$0xff]   ;;  %v6321_v13 = vld [vmem:[#allocation5 + $0x468] ss:$40 sps:$4 sm:$0xff]  }
  0x4b   :  { %1733 = vmatpush1.bf16.msra.mxu1 %v6250_v24  ;;  %1661 = vmatprep.subr.bf16.mxu0 %v6251_v25  ;;  %v6310_v2 = vld [vmem:[#allocation5 + $0xc] ss:$40 sps:$4 sm:$0xff]   ;;  %v6311_v4 = vld [vmem:[#allocation5 + $0x280] ss:$40 sps:$4 sm:$0xff]   ;;  %v6317_v6 = vld [vmem:[#allocation5 + $0x4bc] ss:$40 sps:$4 sm:$0xff]  }
  0x4c   :  { %1734 = vmatprep.subr.bf16.mxu1 %v6253_v26  ;;  %v6320_v7 = vld [vmem:[#allocation5 + $0x73c] ss:$40 sps:$4 sm:$0xff]   ;;  %v7424_v8 = vld [vmem:[#allocation2] ss:$12 sps:$4 sm:$0xff]   ;;  %v6324_v14 = vld [vmem:[#allocation5 + $0x6e8] ss:$40 sps:$4 sm:$0xff]  }
  0x4d   :  { %v6315_v9 = vld [vmem:[#allocation5 + $0x4b8] ss:$40 sps:$4 sm:$0xff]   ;;  %v6323_v11 = vld [vmem:[#allocation5 + $0x46c] ss:$40 sps:$4 sm:$0xff]   ;;  %v7428_v15 = vld [vmem:[#allocation2 + $0x1c] ss:$12 sps:$4 sm:$0xff]  }
  0x4e   :  { %1662 = vmatpush1.bf16.msra.mxu0 %v6255_v27  ;;  %v6318_v10 = vld [vmem:[#allocation5 + $0x738] ss:$40 sps:$4 sm:$0xff]   ;;  %v6326_v12 = vld [vmem:[#allocation5 + $0x6ec] ss:$40 sps:$4 sm:$0xff]   ;;  %v7431_v16 = vld [vmem:[#allocation2 + $0x50] ss:$12 sps:$4 sm:$0xff]  }
  0x4f   :  { %1735 = vmatpush1.bf16.msra.mxu1 %v6256_v28  ;;  %1663 = vmatprep.subr.bf16.mxu0 %v6257_v29  ;;  %v6333_v17 = vld [vmem:[#allocation5 + $0x41c] ss:$40 sps:$4 sm:$0xff]   ;;  %v6331_v20 = vld [vmem:[#allocation5 + $0x418] ss:$40 sps:$4 sm:$0xff]   ;;  %v6339_v22 = vld [vmem:[#allocation5 + $0x3cc] ss:$40 sps:$4 sm:$0xff]  }
  0x50   :  { %1736 = vmatprep.subr.bf16.mxu1 %v6259_v30  ;;  %v6336_v18 = vld [vmem:[#allocation5 + $0x69c] ss:$40 sps:$4 sm:$0xff]   ;;  %v6334_v21 = vld [vmem:[#allocation5 + $0x698] ss:$40 sps:$4 sm:$0xff]   ;;  %v6342_v23 = vld [vmem:[#allocation5 + $0x64c] ss:$40 sps:$4 sm:$0xff]  }
  0x51   :  { %v7434_v19 = vld [vmem:[#allocation2 + $0x18] ss:$12 sps:$4 sm:$0xff]   ;;  %v7438_v24 = vld [vmem:[#allocation2 + $0x34] ss:$12 sps:$4 sm:$0xff]   ;;  %v6337_v25 = vld [vmem:[#allocation5 + $0x3c8] ss:$40 sps:$4 sm:$0xff]  }
  0x52   :  { %1664 = vmatpush1.bf16.msra.mxu0 %v6261_v31  ;;  %v6340_v26 = vld [vmem:[#allocation5 + $0x648] ss:$40 sps:$4 sm:$0xff]   ;;  %v6349_v27 = vld [vmem:[#allocation5 + $0x37c] ss:$40 sps:$4 sm:$0xff]   ;;  %v6347_v30 = vld [vmem:[#allocation5 + $0x378] ss:$40 sps:$4 sm:$0xff]  }
  0x53   :  { %1737 = vmatpush1.bf16.msra.mxu1 %v6262_v32  ;;  %1665 = vmatprep.subr.bf16.mxu0 %v6263_v33  ;;  %v6352_v28 = vld [vmem:[#allocation5 + $0x5fc] ss:$40 sps:$4 sm:$0xff]   ;;  %v6350_v31 = vld [vmem:[#allocation5 + $0x5f8] ss:$40 sps:$4 sm:$0xff]   ;;  %v6355_v32 = vld [vmem:[#allocation5 + $0x32c] ss:$40 sps:$4 sm:$0xff]  }
  0x54   :  { %1795 = vmatprep.subr.bf16.mxu1 %v6267_v34  ;;  %v7442_v29 = vld [vmem:[#allocation2 + $0x30] ss:$12 sps:$4 sm:$0xff]   ;;  %v6358_v33 = vld [vmem:[#allocation5 + $0x5ac] ss:$40 sps:$4 sm:$0xff]  }
  0x55   :  { %v7444_v34 = vld [vmem:[#allocation2 + $0x4c] ss:$12 sps:$4 sm:$0xff]  }
  0x56   :  { %1755 = vmatmul.mubr.bf16.vlgmr.msra.gmra.mxu1 %v7411_v35  ;;  %1666 = vmatpush2.bf16.msra.mxu0 %v6268_v37  ;;  %v6356_v37 = vld [vmem:[#allocation5 + $0x5a8] ss:$40 sps:$4 sm:$0xff]  }
  0x57   :  { %1796 = vmatpush1.bf16.msra.mxu1 %v6265_v36  ;;  %1667 = vmatprep.subr.bf16.mxu0 %v6270_v38  ;;  %v6353_v36 = vld [vmem:[#allocation5 + $0x328] ss:$40 sps:$4 sm:$0xff]   ;;  %v6365_v38 = vld [vmem:[#allocation5 + $0x2dc] ss:$40 sps:$4 sm:$0xff]  }
  0x58   :  { %1797 = vmatprep.subr.bf16.mxu1 %v6274_v39  ;;  %1764 = vmatprep.mubr.bf16.mxu1 %v7360_v0  ;;  %v6368_v39 = vld [vmem:[#allocation5 + $0x55c] ss:$40 sps:$4 sm:$0xff]  }
  0x5a   :  { %1668 = vmatpush2.bf16.msra.mxu0 %v6275_v41  ;;  %v6363_v41 = vld [vmem:[#allocation5 + $0x2d8] ss:$40 sps:$4 sm:$0xff]  }
  0x5b   :  { %1798 = vmatpush1.bf16.msra.mxu1 %v6272_v40  ;;  %1669 = vmatprep.subr.bf16.mxu0 %v6276_v42  ;;  %v7448_v40 = vld [vmem:[#allocation2 + $0x48] ss:$12 sps:$4 sm:$0xff]   ;;  %v6366_v42 = vld [vmem:[#allocation5 + $0x558] ss:$40 sps:$4 sm:$0xff]  }
  0x5c   :  { %1799 = vmatprep.subr.bf16.mxu1 %v6280_v43  ;;  %v6371_v43 = vld [vmem:[#allocation5 + $0x28c] ss:$40 sps:$4 sm:$0xff]  }
  0x5e   :  { %1670 = vmatpush2.bf16.msra.mxu0 %v6281_v45  ;;  %1765 = vmatmul.mubr.bf16.gmra.mxu1 %v7418_v59  ;;  %v6369_v45 = vld [vmem:[#allocation5 + $0x288] ss:$40 sps:$4 sm:$0xff]  }
  0x5f   :  { %1800 = vmatpush1.bf16.msra.mxu1 %v6278_v44  ;;  %1671 = vmatprep.subr.bf16.mxu0 %v6282_v46  ;;  %v6374_v44 = vld [vmem:[#allocation5 + $0x50c] ss:$40 sps:$4 sm:$0xff]   ;;  %v6372_v46 = vld [vmem:[#allocation5 + $0x508] ss:$40 sps:$4 sm:$0xff]  }
  0x60   :  { %1801 = vmatprep.subr.bf16.mxu1 %v6286_v47  ;;  %1774 = vmatprep.mubr.bf16.mxu1 %v7360_v0  ;;  %v6377_v47 = vld [vmem:[#allocation5 + $0x244] ss:$40 sps:$4 sm:$0xff]  }
  0x62   :  { %1672 = vmatpush2.bf16.msra.mxu0 %v6287_v49  ;;  %v6375_v49 = vld [vmem:[#allocation5 + $0x240] ss:$40 sps:$4 sm:$0xff]  }
  0x63   :  { %1802 = vmatpush1.bf16.msra.mxu1 %v6284_v48  ;;  %1673 = vmatprep.subr.bf16.mxu0 %v6288_v50  ;;  %v6380_v48 = vld [vmem:[#allocation5 + $0x744] ss:$40 sps:$4 sm:$0xff]   ;;  %v6378_v50 = vld [vmem:[#allocation5 + $0x740] ss:$40 sps:$4 sm:$0xff]  }
  0x64   :  { %1803 = vmatprep.subr.bf16.mxu1 %v6292_v52  ;;  %v6383_v52 = vld [vmem:[#allocation5 + $0x1f4] ss:$40 sps:$4 sm:$0xff]  }
  0x66   :  { %1674 = vmatpush2.bf16.msra.mxu0 %v6293_v54  ;;  %1775 = vmatmul.mubr.bf16.gmra.mxu1 %v7422_v5  ;;  %v6381_v54 = vld [vmem:[#allocation5 + $0x1f0] ss:$40 sps:$4 sm:$0xff]  }
  0x67   :  { %1804 = vmatpush1.bf16.msra.mxu1 %v6290_v53  ;;  %1675 = vmatprep.subr.bf16.mxu0 %v6294_v55  ;;  %v6386_v53 = vld [vmem:[#allocation5 + $0x6f4] ss:$40 sps:$4 sm:$0xff]   ;;  %v6384_v55 = vld [vmem:[#allocation5 + $0x6f0] ss:$40 sps:$4 sm:$0xff]  }
  0x68   :  { %1805 = vmatprep.subr.bf16.mxu1 %v6298_v56  ;;  %1784 = vmatprep.mubr.bf16.mxu1 %v7360_v0  ;;  %v6389_v56 = vld [vmem:[#allocation5 + $0x1a4] ss:$40 sps:$4 sm:$0xff]  }
  0x6a   :  { %1676 = vmatpush2.bf16.msra.mxu0 %v6299_v58  ;;  %v6387_v58 = vld [vmem:[#allocation5 + $0x1a0] ss:$40 sps:$4 sm:$0xff]  }
  0x6b   :  { %1806 = vmatpush1.bf16.msra.mxu1 %v6296_v57  ;;  %1677 = vmatprep.subr.bf16.mxu0 %v6300_v60  ;;  %v6392_v57 = vld [vmem:[#allocation5 + $0x6a4] ss:$40 sps:$4 sm:$0xff]   ;;  %v6390_v60 = vld [vmem:[#allocation5 + $0x6a0] ss:$40 sps:$4 sm:$0xff]  }
  0x6c   :  { %1807 = vmatprep.subr.bf16.mxu1 %v6304_v61  ;;  %v6395_v61 = vld [vmem:[#allocation5 + $0x154] ss:$40 sps:$4 sm:$0xff]  }
  0x6e   :  { %1678 = vmatpush2.bf16.msra.mxu0 %v6305_v63  ;;  %1785 = vmatmul.mubr.bf16.gmra.mxu1 %v7431_v16  ;;  %v6393_v63 = vld [vmem:[#allocation5 + $0x150] ss:$40 sps:$4 sm:$0xff]  }
  0x6f   :  { %1808 = vmatpush1.bf16.msra.mxu1 %v6302_v62  ;;  %1679 = vmatprep.subr.bf16.mxu0 %v6306_v1  ;;  %v6398_v62 = vld [vmem:[#allocation5 + $0x654] ss:$40 sps:$4 sm:$0xff]   ;;  %v6396_v1 = vld [vmem:[#allocation5 + $0x650] ss:$40 sps:$4 sm:$0xff]  }
  0x70   :  { %1809 = vmatprep.subr.bf16.mxu1 %v6310_v2  ;;  %1827 = vmatprep.mubr.bf16.mxu1 %v7415_v51  ;;  %v6401_v2 = vld [vmem:[#allocation5 + $0x104] ss:$40 sps:$4 sm:$0xff]  }
  0x72   :  { %1680 = vmatpush2.bf16.msra.mxu0 %v6311_v4  ;;  %v6399_v4 = vld [vmem:[#allocation5 + $0x100] ss:$40 sps:$4 sm:$0xff]  }
  0x73   :  { %1810 = vmatpush1.bf16.msra.mxu1 %v6308_v3  ;;  %1868 = vmatprep.subr.bf16.mxu0 %v6320_v7  ;;  %v6404_v3 = vld [vmem:[#allocation5 + $0x604] ss:$40 sps:$4 sm:$0xff]   ;;  %v6407_v7 = vld [vmem:[#allocation5 + $0xb4] ss:$40 sps:$4 sm:$0xff]  }
  0x74   :  { %1811 = vmatprep.subr.bf16.mxu1 %v6317_v6  ;;  %v6402_v6 = vld [vmem:[#allocation5 + $0x600] ss:$40 sps:$4 sm:$0xff]  }
  0x75   :  { %1682 = vmatmul.mubr.bf16.vlgmr.msra.gmra.mxu0 %v7424_v8 }
  0x76   :  { %1869 = vmatpush1.bf16.msra.mxu0 %v6318_v10  ;;  %1691 = vmatprep.mubr.bf16.mxu0 %v7428_v15  ;;  %v6405_v10 = vld [vmem:[#allocation5 + $0xb0] ss:$40 sps:$4 sm:$0xff]  }
  0x77   :  { %1812 = vmatpush2.bf16.msra.mxu1 %v6315_v9  ;;  %1870 = vmatprep.subr.bf16.mxu0 %v6326_v12  ;;  %v6410_v9 = vld [vmem:[#allocation5 + $0x5b4] ss:$40 sps:$4 sm:$0xff]   ;;  %v6413_v12 = vld [vmem:[#allocation5 + $0x64] ss:$40 sps:$4 sm:$0xff]  }
  0x78   :  { %1813 = vmatprep.subr.bf16.mxu1 %v6323_v11  ;;  %v6408_v11 = vld [vmem:[#allocation5 + $0x5b0] ss:$40 sps:$4 sm:$0xff]  }
  0x7a   :  { %1871 = vmatpush1.bf16.msra.mxu0 %v6324_v14  ;;  %v6411_v14 = vld [vmem:[#allocation5 + $0x60] ss:$40 sps:$4 sm:$0xff]  }
  0x7b   :  { %1814 = vmatpush2.bf16.msra.mxu1 %v6321_v13  ;;  %1872 = vmatprep.subr.bf16.mxu0 %v6336_v18  ;;  %v6416_v13 = vld [vmem:[#allocation5 + $0x564] ss:$40 sps:$4 sm:$0xff]   ;;  %v6419_v18 = vld [vmem:[#allocation5 + $0x14] ss:$40 sps:$4 sm:$0xff]  }
  0x7c   :  { %1815 = vmatprep.subr.bf16.mxu1 %v6333_v17  ;;  %v6414_v17 = vld [vmem:[#allocation5 + $0x560] ss:$40 sps:$4 sm:$0xff]  }
  0x7d   :  { %1692 = vmatmul.mubr.bf16.gmra.mxu0 %v7434_v19 }
  0x7e   :  { %1873 = vmatpush1.bf16.msra.mxu0 %v6334_v21  ;;  %1701 = vmatprep.mubr.bf16.mxu0 %v7438_v24  ;;  %v6417_v21 = vld [vmem:[#allocation5 + $0x10] ss:$40 sps:$4 sm:$0xff]  }
  0x7f   :  { %1816 = vmatpush2.bf16.msra.mxu1 %v6331_v20  ;;  %1874 = vmatprep.subr.bf16.mxu0 %v6342_v23  ;;  %v6422_v20 = vld [vmem:[#allocation5 + $0x514] ss:$40 sps:$4 sm:$0xff]   ;;  %v6425_v23 = vld [vmem:[#allocation5 + $0x4c4] ss:$40 sps:$4 sm:$0xff]  }
  0x80   :  { %1817 = vmatprep.subr.bf16.mxu1 %v6339_v22  ;;  %v6420_v22 = vld [vmem:[#allocation5 + $0x510] ss:$40 sps:$4 sm:$0xff]  }
  0x82   :  { %1875 = vmatpush1.bf16.msra.mxu0 %v6340_v26  ;;  %v6423_v26 = vld [vmem:[#allocation5 + $0x4c0] ss:$40 sps:$4 sm:$0xff]  }
  0x83   :  { %1818 = vmatpush2.bf16.msra.mxu1 %v6337_v25  ;;  %1876 = vmatprep.subr.bf16.mxu0 %v6352_v28  ;;  %v6428_v25 = vld [vmem:[#allocation5 + $0x24c] ss:$40 sps:$4 sm:$0xff]  }
  0x84   :  { %1819 = vmatprep.subr.bf16.mxu1 %v6349_v27  ;;  %v6426_v27 = vld [vmem:[#allocation5 + $0x248] ss:$40 sps:$4 sm:$0xff]   ;;  %v6431_v28 = vld [vmem:[#allocation5 + $0x474] ss:$40 sps:$4 sm:$0xff]  }
  0x85   :  { %1702 = vmatmul.mubr.bf16.gmra.mxu0 %v7442_v29 }
  0x86   :  { %1877 = vmatpush1.bf16.msra.mxu0 %v6350_v31  ;;  %1711 = vmatprep.mubr.bf16.mxu0 %v7444_v34  ;;  %v6429_v31 = vld [vmem:[#allocation5 + $0x470] ss:$40 sps:$4 sm:$0xff]  }
  0x87   :  { %1820 = vmatpush2.bf16.msra.mxu1 %v6347_v30  ;;  %1878 = vmatprep.subr.bf16.mxu0 %v6358_v33  ;;  %v6434_v30 = vld [vmem:[#allocation5 + $0x1fc] ss:$40 sps:$4 sm:$0xff]  }
  0x88   :  { %1821 = vmatprep.subr.bf16.mxu1 %v6355_v32  ;;  %v6432_v32 = vld [vmem:[#allocation5 + $0x1f8] ss:$40 sps:$4 sm:$0xff]   ;;  %v6437_v33 = vld [vmem:[#allocation5 + $0x424] ss:$40 sps:$4 sm:$0xff]  }
  0x8a   :  { %1879 = vmatpush1.bf16.msra.mxu0 %v6356_v37  ;;  %v6435_v37 = vld [vmem:[#allocation5 + $0x420] ss:$40 sps:$4 sm:$0xff]  }
  0x8b   :  { %1822 = vmatpush2.bf16.msra.mxu1 %v6353_v36  ;;  %1880 = vmatprep.subr.bf16.mxu0 %v6368_v39  ;;  %v6440_v36 = vld [vmem:[#allocation5 + $0x1ac] ss:$40 sps:$4 sm:$0xff]  }
  0x8c   :  { %1823 = vmatprep.subr.bf16.mxu1 %v6365_v38  ;;  %v6438_v38 = vld [vmem:[#allocation5 + $0x1a8] ss:$40 sps:$4 sm:$0xff]   ;;  %v6443_v39 = vld [vmem:[#allocation5 + $0x3d4] ss:$40 sps:$4 sm:$0xff]  }
  0x8d   :  { %1712 = vmatmul.mubr.bf16.gmra.mxu0 %v7448_v40 }
  0x8e   :  { %1881 = vmatpush1.bf16.msra.mxu0 %v6366_v42  ;;  %1900 = vmatprep.mubr.bf16.mxu0 %v7360_v0  ;;  %v6441_v42 = vld [vmem:[#allocation5 + $0x3d0] ss:$40 sps:$4 sm:$0xff]  }
  0x8f   :  { %1824 = vmatpush2.bf16.msra.mxu1 %v6363_v41  ;;  %1882 = vmatprep.subr.bf16.mxu0 %v6374_v44  ;;  %v6446_v41 = vld [vmem:[#allocation5 + $0x15c] ss:$40 sps:$4 sm:$0xff]   ;;  %v6452_v44 = vld [vmem:[#allocation5 + $0x10c] ss:$40 sps:$4 sm:$0xff]  }
  0x90   :  { %1825 = vmatprep.subr.bf16.mxu1 %v6371_v43  ;;  %v6449_v43 = vld [vmem:[#allocation5 + $0x384] ss:$40 sps:$4 sm:$0xff]  }
  0x92   :  { %1883 = vmatpush1.bf16.msra.mxu0 %v6372_v46  ;;  %v6450_v46 = vld [vmem:[#allocation5 + $0x108] ss:$40 sps:$4 sm:$0xff]  }
  0x93   :  { %1826 = vmatpush2.bf16.msra.mxu1 %v6369_v45  ;;  %1941 = vmatprep.subr.bf16.mxu0 %v6377_v47  ;;  %v6447_v45 = vld [vmem:[#allocation5 + $0x380] ss:$40 sps:$4 sm:$0xff]   ;;  %v6455_v47 = vld [vmem:[#allocation5 + $0x334] ss:$40 sps:$4 sm:$0xff]  }
  0x94   :  { %2014 = vmatprep.subr.bf16.mxu1 %v6380_v48  ;;  %v6458_v48 = vld [vmem:[#allocation5 + $0xbc] ss:$40 sps:$4 sm:$0xff]  }
  0x95   :  { %1901 = vmatmul.mubr.bf16.vlgmr.msra.gmra.mxu0 %v7411_v35 }
  0x96   :  { %1828 = vmatmul.mubr.bf16.vlgmr.msra.gmra.mxu1 %v7424_v8  ;;  %1942 = vmatpush1.bf16.msra.mxu0 %v6375_v49  ;;  %v6453_v49 = vld [vmem:[#allocation5 + $0x330] ss:$40 sps:$4 sm:$0xff]  }
  0x97   :  { %2015 = vmatpush1.bf16.msra.mxu1 %v6378_v50  ;;  %1943 = vmatprep.subr.bf16.mxu0 %v6383_v52  ;;  %v6456_v50 = vld [vmem:[#allocation5 + $0xb8] ss:$40 sps:$4 sm:$0xff]   ;;  %v6464_v52 = vld [vmem:[#allocation5 + $0x6c] ss:$40 sps:$4 sm:$0xff]  }
  0x98   :  { %2016 = vmatprep.subr.bf16.mxu1 %v6386_v53  ;;  %1837 = vmatprep.mubr.bf16.mxu1 %v7428_v15  ;;  %v6459_v53 = vld [vmem:[#allocation5 + $0x2e0] ss:$40 sps:$4 sm:$0xff]  }
  0x99   :  { %1910 = vmatprep.mubr.bf16.mxu0 %v7360_v0 }
  0x9a   :  { %1944 = vmatpush1.bf16.msra.mxu0 %v6381_v54  ;;  %v6462_v54 = vld [vmem:[#allocation5 + $0x68] ss:$40 sps:$4 sm:$0xff]  }
  0x9b   :  { %2017 = vmatpush1.bf16.msra.mxu1 %v6384_v55  ;;  %1945 = vmatprep.subr.bf16.mxu0 %v6389_v56  ;;  %v6467_v55 = vld [vmem:[#allocation5 + $0x294] ss:$40 sps:$4 sm:$0xff]  }
  0x9c   :  { %2018 = vmatprep.subr.bf16.mxu1 %v6392_v57  ;;  %v6470_v56 = vld [vmem:[#allocation5 + $0x1c] ss:$40 sps:$4 sm:$0xff]   ;;  %v6465_v57 = vld [vmem:[#allocation5 + $0x290] ss:$40 sps:$4 sm:$0xff]  }
  0x9d   :  { %1911 = vmatmul.mubr.bf16.gmra.mxu0 %v7418_v59 }
  0x9e   :  { %1838 = vmatmul.mubr.bf16.gmra.mxu1 %v7434_v19  ;;  %1946 = vmatpush1.bf16.msra.mxu0 %v6387_v58  ;;  %v6468_v58 = vld [vmem:[#allocation5 + $0x18] ss:$40 sps:$4 sm:$0xff]  }
  0x9f   :  { %2019 = vmatpush1.bf16.msra.mxu1 %v6390_v60  ;;  %1947 = vmatprep.subr.bf16.mxu0 %v6395_v61  ;;  %v6476_v60 = vld [vmem:[#allocation5 + $0x74c] ss:$40 sps:$4 sm:$0xff]   ;;  %v6471_v61 = vld [vmem:[#allocation5 + $0x4c8] ss:$40 sps:$4 sm:$0xff]  }
  0xa0   :  { %2020 = vmatprep.subr.bf16.mxu1 %v6398_v62  ;;  %1847 = vmatprep.mubr.bf16.mxu1 %v7438_v24  ;;  %v6474_v62 = vld [vmem:[#allocation5 + $0x748] ss:$40 sps:$4 sm:$0xff]  }
  0xa1   :  { %1920 = vmatprep.mubr.bf16.mxu0 %v7360_v0 }
  0xa2   :  { %1948 = vmatpush1.bf16.msra.mxu0 %v6393_v63  ;;  %v6479_v63 = vld [vmem:[#allocation5 + $0x47c] ss:$40 sps:$4 sm:$0xff]  }
  0xa3   :  { %2021 = vmatpush1.bf16.msra.mxu1 %v6396_v1  ;;  %1949 = vmatprep.subr.bf16.mxu0 %v6401_v2  ;;  %v6482_v1 = vld [vmem:[#allocation5 + $0x6fc] ss:$40 sps:$4 sm:$0xff]   ;;  %v6477_v2 = vld [vmem:[#allocation5 + $0x478] ss:$40 sps:$4 sm:$0xff]  }
  0xa4   :  { %2022 = vmatprep.subr.bf16.mxu1 %v6404_v3  ;;  %v6485_v3 = vld [vmem:[#allocation5 + $0x42c] ss:$40 sps:$4 sm:$0xff]  }
  0xa5   :  { %1921 = vmatmul.mubr.bf16.gmra.mxu0 %v7422_v5 }
  0xa6   :  { %1848 = vmatmul.mubr.bf16.gmra.mxu1 %v7442_v29  ;;  %1950 = vmatpush1.bf16.msra.mxu0 %v6399_v4  ;;  %v6488_v4 = vld [vmem:[#allocation5 + $0x6ac] ss:$40 sps:$4 sm:$0xff]  }
  0xa7   :  { %2023 = vmatpush1.bf16.msra.mxu1 %v6402_v6  ;;  %1951 = vmatprep.subr.bf16.mxu0 %v6407_v7  ;;  %v6486_v6 = vld [vmem:[#allocation5 + $0x6a8] ss:$40 sps:$4 sm:$0xff]   ;;  %v6491_v7 = vld [vmem:[#allocation5 + $0x3dc] ss:$40 sps:$4 sm:$0xff]  }
  0xa8   :  { %2024 = vmatprep.subr.bf16.mxu1 %v6410_v9  ;;  %1857 = vmatprep.mubr.bf16.mxu1 %v7444_v34  ;;  %v6494_v9 = vld [vmem:[#allocation5 + $0x65c] ss:$40 sps:$4 sm:$0xff]  }
  0xa9   :  { %1930 = vmatprep.mubr.bf16.mxu0 %v7360_v0 }
  0xaa   :  { %1952 = vmatpush1.bf16.msra.mxu0 %v6405_v10  ;;  %v6492_v10 = vld [vmem:[#allocation5 + $0x658] ss:$40 sps:$4 sm:$0xff]  }
  0xab   :  { %2025 = vmatpush1.bf16.msra.mxu1 %v6408_v11  ;;  %1953 = vmatprep.subr.bf16.mxu0 %v6413_v12  ;;  %v6497_v11 = vld [vmem:[#allocation5 + $0x38c] ss:$40 sps:$4 sm:$0xff]  }
  0xac   :  { %2026 = vmatprep.subr.bf16.mxu1 %v6416_v13  ;;  %v6500_v12 = vld [vmem:[#allocation5 + $0x60c] ss:$40 sps:$4 sm:$0xff]   ;;  %v6495_v13 = vld [vmem:[#allocation5 + $0x388] ss:$40 sps:$4 sm:$0xff]  }
  0xad   :  { %1931 = vmatmul.mubr.bf16.gmra.mxu0 %v7431_v16 }
  0xae   :  { %1858 = vmatmul.mubr.bf16.gmra.mxu1 %v7448_v40  ;;  %1954 = vmatpush1.bf16.msra.mxu0 %v6411_v14  ;;  %v6498_v14 = vld [vmem:[#allocation5 + $0x608] ss:$40 sps:$4 sm:$0xff]  }
  0xaf   :  { %2027 = vmatpush1.bf16.msra.mxu1 %v6414_v17  ;;  %1955 = vmatprep.subr.bf16.mxu0 %v6419_v18  ;;  %v6503_v17 = vld [vmem:[#allocation5 + $0x33c] ss:$40 sps:$4 sm:$0xff]  }
  0xb0   :  { %2028 = vmatprep.subr.bf16.mxu1 %v6422_v20  ;;  %2046 = vmatprep.mubr.bf16.mxu1 %v7360_v0  ;;  %v6506_v18 = vld [vmem:[#allocation5 + $0x5bc] ss:$40 sps:$4 sm:$0xff]   ;;  %v6501_v20 = vld [vmem:[#allocation5 + $0x338] ss:$40 sps:$4 sm:$0xff]  }
  0xb1   :  { %1973 = vmatprep.mubr.bf16.mxu0 %v7415_v51 }
  0xb2   :  { %1956 = vmatpush1.bf16.msra.mxu0 %v6417_v21  ;;  %v6504_v21 = vld [vmem:[#allocation5 + $0x5b8] ss:$40 sps:$4 sm:$0xff]  }
  0xb3   :  { %2029 = vmatpush1.bf16.msra.mxu1 %v6420_v22  ;;  %1957 = vmatprep.subr.bf16.mxu0 %v6425_v23  ;;  %v6509_v22 = vld [vmem:[#allocation5 + $0x2ec] ss:$40 sps:$4 sm:$0xff]  }
  0xb4   :  { %2087 = vmatprep.subr.bf16.mxu1 %v6428_v25  ;;  %v6512_v23 = vld [vmem:[#allocation5 + $0x56c] ss:$40 sps:$4 sm:$0xff]   ;;  %v6507_v25 = vld [vmem:[#allocation5 + $0x2e8] ss:$40 sps:$4 sm:$0xff]  }
  0xb6   :  { %2047 = vmatmul.mubr.bf16.vlgmr.msra.gmra.mxu1 %v7411_v35  ;;  %1958 = vmatpush2.bf16.msra.mxu0 %v6423_v26  ;;  %v6444_v35 = vld [vmem:[#allocation5 + $0x158] ss:$40 sps:$4 sm:$0xff]   ;;  %v6510_v26 = vld [vmem:[#allocation5 + $0x568] ss:$40 sps:$4 sm:$0xff]  }
  0xb7   :  { %2088 = vmatpush1.bf16.msra.mxu1 %v6426_v27  ;;  %1959 = vmatprep.subr.bf16.mxu0 %v6431_v28  ;;  %v6515_v27 = vld [vmem:[#allocation5 + $0x29c] ss:$40 sps:$4 sm:$0xff]  }
  0xb8   :  { %2089 = vmatprep.subr.bf16.mxu1 %v6434_v30  ;;  %2056 = vmatprep.mubr.bf16.mxu1 %v7360_v0  ;;  %v6518_v28 = vld [vmem:[#allocation5 + $0x51c] ss:$40 sps:$4 sm:$0xff]   ;;  %v6513_v30 = vld [vmem:[#allocation5 + $0x298] ss:$40 sps:$4 sm:$0xff]  }
  0xba   :  { %1960 = vmatpush2.bf16.msra.mxu0 %v6429_v31  ;;  %v6516_v31 = vld [vmem:[#allocation5 + $0x518] ss:$40 sps:$4 sm:$0xff]  }
  0xbb   :  { %2090 = vmatpush1.bf16.msra.mxu1 %v6432_v32  ;;  %1961 = vmatprep.subr.bf16.mxu0 %v6437_v33  ;;  %v6521_v32 = vld [vmem:[#allocation5 + $0x254] ss:$40 sps:$4 sm:$0xff]  }
  0xbc   :  { %2091 = vmatprep.subr.bf16.mxu1 %v6440_v36  ;;  %v6536_v33 = vld [vmem:[#allocation5 + $0x754] ss:$40 sps:$4 sm:$0xff]   ;;  %v6519_v36 = vld [vmem:[#allocation5 + $0x250] ss:$40 sps:$4 sm:$0xff]  }
  0xbe   :  { %2057 = vmatmul.mubr.bf16.gmra.mxu1 %v7418_v59  ;;  %1962 = vmatpush2.bf16.msra.mxu0 %v6435_v37  ;;  %v6461_v59 = vld [vmem:[#allocation5 + $0x2e4] ss:$40 sps:$4 sm:$0xff]  }
  0xbf   :  { %2092 = vmatpush1.bf16.msra.mxu1 %v6438_v38  ;;  %1963 = vmatprep.subr.bf16.mxu0 %v6443_v39  ;;  %v6524_v37 = vld [vmem:[#allocation5 + $0x204] ss:$40 sps:$4 sm:$0xff]   ;;  %v6534_v38 = vld [vmem:[#allocation5 + $0x750] ss:$40 sps:$4 sm:$0xff]  }
  0xc0   :  { %2093 = vmatprep.subr.bf16.mxu1 %v6446_v41  ;;  %2066 = vmatprep.mubr.bf16.mxu1 %v7360_v0  ;;  %v7484_v39 = vld [vmem:[#allocation2] ss:$12 sps:$4 sm:$0xff]   ;;  %v7487_v41 = vld [vmem:[#allocation2 + $0x8] ss:$12 sps:$4 sm:$0xff]  }
  0xc2   :  { %1964 = vmatpush2.bf16.msra.mxu0 %v6441_v42  ;;  %v6542_v42 = vld [vmem:[#allocation5 + $0x704] ss:$40 sps:$4 sm:$0xff]  }
  0xc3   :  { %2094 = vmatpush1.bf16.msra.mxu1 %v6444_v35  ;;  %1965 = vmatprep.subr.bf16.mxu0 %v6449_v43  ;;  %v6522_v35 = vld [vmem:[#allocation5 + $0x200] ss:$40 sps:$4 sm:$0xff]   ;;  %v6527_v43 = vld [vmem:[#allocation5 + $0x1b4] ss:$40 sps:$4 sm:$0xff]  }
  0xc4   :  { %2095 = vmatprep.subr.bf16.mxu1 %v6452_v44  ;;  %v6540_v44 = vld [vmem:[#allocation5 + $0x700] ss:$40 sps:$4 sm:$0xff]  }
  0xc6   :  { %2067 = vmatmul.mubr.bf16.gmra.mxu1 %v7422_v5  ;;  %1966 = vmatpush2.bf16.msra.mxu0 %v6447_v45  ;;  %v6473_v5 = vld [vmem:[#allocation5 + $0x4cc] ss:$40 sps:$4 sm:$0xff]   ;;  %v6525_v45 = vld [vmem:[#allocation5 + $0x1b0] ss:$40 sps:$4 sm:$0xff]  }
  0xc7   :  { %2096 = vmatpush1.bf16.msra.mxu1 %v6450_v46  ;;  %1967 = vmatprep.subr.bf16.mxu0 %v6455_v47  ;;  %v6530_v46 = vld [vmem:[#allocation5 + $0x164] ss:$40 sps:$4 sm:$0xff]   ;;  %v6528_v47 = vld [vmem:[#allocation5 + $0x160] ss:$40 sps:$4 sm:$0xff]  }
  0xc8   :  { %2097 = vmatprep.subr.bf16.mxu1 %v6458_v48  ;;  %2076 = vmatprep.mubr.bf16.mxu1 %v7360_v0  ;;  %v6548_v48 = vld [vmem:[#allocation5 + $0x6b4] ss:$40 sps:$4 sm:$0xff]  }
  0xca   :  { %1968 = vmatpush2.bf16.msra.mxu0 %v6453_v49  ;;  %v7493_v49 = vld [vmem:[#allocation2 + $0x20] ss:$12 sps:$4 sm:$0xff]  }
  0xcb   :  { %2098 = vmatpush1.bf16.msra.mxu1 %v6456_v50  ;;  %1969 = vmatprep.subr.bf16.mxu0 %v6461_v59  ;;  %v6554_v50 = vld [vmem:[#allocation5 + $0x664] ss:$40 sps:$4 sm:$0xff]   ;;  %v6533_v59 = vld [vmem:[#allocation5 + $0x114] ss:$40 sps:$4 sm:$0xff]  }
  0xcc   :  { %2099 = vmatprep.subr.bf16.mxu1 %v6464_v52  ;;  %v6531_v52 = vld [vmem:[#allocation5 + $0x110] ss:$40 sps:$4 sm:$0xff]  }
  0xce   :  { %2077 = vmatmul.mubr.bf16.gmra.mxu1 %v7431_v16  ;;  %1970 = vmatpush2.bf16.msra.mxu0 %v6459_v53  ;;  %v6480_v16 = vld [vmem:[#allocation5 + $0x6f8] ss:$40 sps:$4 sm:$0xff]  }
  0xcf   :  { %2100 = vmatpush1.bf16.msra.mxu1 %v6462_v54  ;;  %1971 = vmatprep.subr.bf16.mxu0 %v6467_v55  ;;  %v6552_v53 = vld [vmem:[#allocation5 + $0x660] ss:$40 sps:$4 sm:$0xff]   ;;  %v7499_v54 = vld [vmem:[#allocation2 + $0x38] ss:$12 sps:$4 sm:$0xff]  }
  0xd0   :  { %2101 = vmatprep.subr.bf16.mxu1 %v6470_v56  ;;  %2119 = vmatprep.mubr.bf16.mxu1 %v7415_v51  ;;  %v6483_v51 = vld [vmem:[#allocation5 + $0x428] ss:$40 sps:$4 sm:$0xff]   ;;  %v6545_v56 = vld [vmem:[#allocation5 + $0x74] ss:$40 sps:$4 sm:$0xff]  }
  0xd1   :  { %v6537_v55 = vld [vmem:[#allocation5 + $0xc0] ss:$40 sps:$4 sm:$0xff]  }
  0xd2   :  { %1972 = vmatpush2.bf16.msra.mxu0 %v6465_v57  ;;  %v6558_v57 = vld [vmem:[#allocation5 + $0x610] ss:$40 sps:$4 sm:$0xff]  }
  0xd3   :  { %2102 = vmatpush1.bf16.msra.mxu1 %v6468_v58  ;;  %2160 = vmatprep.subr.bf16.mxu0 %v6476_v60  ;;  %v6543_v58 = vld [vmem:[#allocation5 + $0x70] ss:$40 sps:$4 sm:$0xff]   ;;  %v6566_v60 = vld [vmem:[#allocation5 + $0x5c4] ss:$40 sps:$4 sm:$0xff]  }
  0xd4   :  { %2103 = vmatprep.subr.bf16.mxu1 %v6473_v5  ;;  %v6551_v5 = vld [vmem:[#allocation5 + $0x24] ss:$40 sps:$4 sm:$0xff]  }
  0xd5   :  { %1974 = vmatmul.mubr.bf16.vlgmr.msra.gmra.mxu0 %v7424_v8  ;;  %v6489_v8 = vld [vmem:[#allocation5 + $0x3d8] ss:$40 sps:$4 sm:$0xff]  }
  0xd6   :  { %2161 = vmatpush1.bf16.msra.mxu0 %v6474_v62  ;;  %1983 = vmatprep.mubr.bf16.mxu0 %v7428_v15  ;;  %v7505_v62 = vld [vmem:[#allocation2 + $0x50] ss:$12 sps:$4 sm:$0xff]  }
  0xd7   :  { %2104 = vmatpush2.bf16.msra.mxu1 %v6471_v61  ;;  %2162 = vmatprep.subr.bf16.mxu0 %v6482_v1  ;;  %v6549_v61 = vld [vmem:[#allocation5 + $0x20] ss:$40 sps:$4 sm:$0xff]   ;;  %v6570_v1 = vld [vmem:[#allocation5 + $0x570] ss:$40 sps:$4 sm:$0xff]  }
  0xd8   :  { %2105 = vmatprep.subr.bf16.mxu1 %v6479_v63  ;;  %v6572_v63 = vld [vmem:[#allocation5 + $0x574] ss:$40 sps:$4 sm:$0xff]  }
  0xda   :  { %2163 = vmatpush1.bf16.msra.mxu0 %v6480_v16  ;;  %v7236_v16 = vld [vmem:[#allocation2 + $0x4] ss:$12 sps:$4 sm:$0xff]  }
  0xdb   :  { %2106 = vmatpush2.bf16.msra.mxu1 %v6477_v2  ;;  %2164 = vmatprep.subr.bf16.mxu0 %v6488_v4  ;;  %v6555_v2 = vld [vmem:[#allocation5 + $0x4d0] ss:$40 sps:$4 sm:$0xff]   ;;  %v6578_v4 = vld [vmem:[#allocation5 + $0x524] ss:$40 sps:$4 sm:$0xff]  }
  0xdc   :  { %2107 = vmatprep.subr.bf16.mxu1 %v6485_v3  ;;  %v6563_v3 = vld [vmem:[#allocation5 + $0x484] ss:$40 sps:$4 sm:$0xff]  }
  0xdd   :  { %1984 = vmatmul.mubr.bf16.gmra.mxu0 %v7434_v19 }
  0xde   :  { %2165 = vmatpush1.bf16.msra.mxu0 %v6486_v6  ;;  %1993 = vmatprep.mubr.bf16.mxu0 %v7438_v24  ;;  %v6569_v6 = vld [vmem:[#allocation5 + $0x434] ss:$40 sps:$4 sm:$0xff]  }
  0xdf   :  { %2108 = vmatpush2.bf16.msra.mxu1 %v6483_v51  ;;  %2166 = vmatprep.subr.bf16.mxu0 %v6494_v9  ;;  %v6561_v51 = vld [vmem:[#allocation5 + $0x480] ss:$40 sps:$4 sm:$0xff]  }
  0xe0   :  { %2109 = vmatprep.subr.bf16.mxu1 %v6491_v7  ;;  %v6584_v7 = vld [vmem:[#allocation8 + $0xac] ss:$12 sps:$4 sm:$0xff]   ;;  %v6582_v9 = vld [vmem:[#allocation8 + $0xa8] ss:$12 sps:$4 sm:$0xff]  }
  0xe2   :  { %2167 = vmatpush1.bf16.msra.mxu0 %v6492_v10  ;;  %v6575_v10 = vld [vmem:[#allocation5 + $0x3e4] ss:$40 sps:$4 sm:$0xff]  }
  0xe3   :  { %2110 = vmatpush2.bf16.msra.mxu1 %v6489_v8  ;;  %2168 = vmatprep.subr.bf16.mxu0 %v6500_v12  ;;  %v6567_v8 = vld [vmem:[#allocation5 + $0x430] ss:$40 sps:$4 sm:$0xff]  }
  0xe4   :  { %2111 = vmatprep.subr.bf16.mxu1 %v6497_v11  ;;  %v6590_v11 = vld [vmem:[#allocation8 + $0x94] ss:$12 sps:$4 sm:$0xff]   ;;  %v6588_v12 = vld [vmem:[#allocation8 + $0x90] ss:$12 sps:$4 sm:$0xff]  }
  0xe5   :  { %1994 = vmatmul.mubr.bf16.gmra.mxu0 %v7442_v29 }
  0xe6   :  { %2169 = vmatpush1.bf16.msra.mxu0 %v6498_v14  ;;  %2003 = vmatprep.mubr.bf16.mxu0 %v7444_v34  ;;  %v6573_v14 = vld [vmem:[#allocation5 + $0x3e0] ss:$40 sps:$4 sm:$0xff]  }
  0xe7   :  { %2112 = vmatpush2.bf16.msra.mxu1 %v6495_v13  ;;  %2170 = vmatprep.subr.bf16.mxu0 %v6506_v18  ;;  %v6596_v18 = vld [vmem:[#allocation8 + $0x7c] ss:$12 sps:$4 sm:$0xff]  }
  0xe8   :  { %2113 = vmatprep.subr.bf16.mxu1 %v6503_v17  ;;  %v6581_v17 = vld [vmem:[#allocation5 + $0x394] ss:$40 sps:$4 sm:$0xff]  }
  0xea   :  { %2171 = vmatpush1.bf16.msra.mxu0 %v6504_v21 }
  0xeb   :  { %2114 = vmatpush2.bf16.msra.mxu1 %v6501_v20  ;;  %2172 = vmatprep.subr.bf16.mxu0 %v6512_v23  ;;  %v6594_v20 = vld [vmem:[#allocation8 + $0x78] ss:$12 sps:$4 sm:$0xff]  }
  0xec   :  { %2115 = vmatprep.subr.bf16.mxu1 %v6509_v22  ;;  %v6579_v22 = vld [vmem:[#allocation5 + $0x390] ss:$40 sps:$4 sm:$0xff]   ;;  %v6587_v23 = vld [vmem:[#allocation5 + $0x344] ss:$40 sps:$4 sm:$0xff]  }
  0xed   :  { %2004 = vmatmul.mubr.bf16.gmra.mxu0 %v7448_v40 }
  0xee   :  { %2173 = vmatpush1.bf16.msra.mxu0 %v6510_v26  ;;  %2192 = vmatprep.mubr.bf16.mxu0 %v7360_v0  ;;  %v6600_v26 = vld [vmem:[#allocation8 + $0x60] ss:$12 sps:$4 sm:$0xff]  }
  0xef   :  { %2116 = vmatpush2.bf16.msra.mxu1 %v6507_v25  ;;  %2174 = vmatprep.subr.bf16.mxu0 %v6518_v28  ;;  %v6602_v25 = vld [vmem:[#allocation8 + $0x64] ss:$12 sps:$4 sm:$0xff]   ;;  %v335_v28 = vlaneseq }
  0xf0   :  { %2117 = vmatprep.subr.bf16.mxu1 %v6515_v27 }
  0xf2   :  { %2175 = vmatpush1.bf16.msra.mxu0 %v6516_v31  ;;  %v6605_v31 = vld [vmem:[#allocation8 + $0x4c] ss:$12 sps:$4 sm:$0xff]  }
  0xf3   :  { %2118 = vmatpush2.bf16.msra.mxu1 %v6513_v30  ;;  %2233 = vmatprep.subr.bf16.mxu0 %v6521_v32  ;;  %v6585_v30 = vld [vmem:[#allocation5 + $0x340] ss:$40 sps:$4 sm:$0xff]   ;;  %v6593_v32 = vld [vmem:[#allocation5 + $0x2f4] ss:$40 sps:$4 sm:$0xff]  }
  0xf4   :  { %2306 = vmatprep.subr.bf16.mxu1 %v6536_v33 }
  0xf5   :  { %2193 = vmatmul.mubr.bf16.vlgmr.msra.gmra.mxu0 %v7487_v41 }
  0xf6   :  { %2120 = vmatmul.mubr.bf16.vlgmr.msra.gmra.mxu1 %v7484_v39  ;;  %2234 = vmatpush1.bf16.msra.mxu0 %v6519_v36  ;;  %v6603_v36 = vld [vmem:[#allocation8 + $0x48] ss:$12 sps:$4 sm:$0xff]  }
  0xf7   :  { %2129 = vmatprep.mubr.bf16.mxu1 %v7428_v15  ;;  %2235 = vmatprep.subr.bf16.mxu0 %v6524_v37  ;;  %v6546_v15 = vld [vmem:[#allocation5 + $0x6b0] ss:$40 sps:$4 sm:$0xff]   ;;  %v7521_v37 = vshrl.u32 %v335_v28, 7 }
  0xf8   :  { %2202 = vmatprep.mubr.bf16.mxu0 %v7360_v0  ;;  %2307 = vmatpush1.bf16.msra.mxu1 %v6534_v38 }
  0xf9   :  { %2308 = vmatprep.subr.bf16.mxu1 %v6542_v42  ;;  %8586 = vst [vmem:[#allocation15_spill] sm:$0xff] %v7521_v37  ;;  %v6608_v42 = vld [vmem:[#allocation8 + $0x34] ss:$12 sps:$4 sm:$0xff]  }
  0xfa   :  { %2236 = vmatpush1.bf16.msra.mxu0 %v6522_v35  ;;  %v6599_v35 = vld [vmem:[#allocation5 + $0x2a4] ss:$40 sps:$4 sm:$0xff]  }
  0xfb   :  { %2237 = vmatprep.subr.bf16.mxu0 %v6527_v43  ;;  %v6606_v43 = vld [vmem:[#allocation8 + $0x30] ss:$12 sps:$4 sm:$0xff]  }
  0xfc   :  { %2309 = vmatpush1.bf16.msra.mxu1 %v6540_v44 }
  0xfd   :  { %2203 = vmatmul.mubr.bf16.gmra.mxu0 %v7493_v49  ;;  %2310 = vmatprep.subr.bf16.mxu1 %v6548_v48  ;;  %v6611_v48 = vld [vmem:[#allocation8 + $0x1c] ss:$12 sps:$4 sm:$0xff]  }
  0xfe   :  { %2130 = vmatmul.mubr.bf16.gmra.mxu1 %v7434_v19  ;;  %2238 = vmatpush1.bf16.msra.mxu0 %v6525_v45  ;;  %v6539_v19 = vld [vmem:[#allocation5 + $0xc4] ss:$40 sps:$4 sm:$0xff]   ;;  %v6597_v45 = vld [vmem:[#allocation5 + $0x2a0] ss:$40 sps:$4 sm:$0xff]  }
  0xff   :  { %2139 = vmatprep.mubr.bf16.mxu1 %v7438_v24  ;;  %2239 = vmatprep.subr.bf16.mxu0 %v6530_v46  ;;  %v6560_v24 = vld [vmem:[#allocation5 + $0x614] ss:$40 sps:$4 sm:$0xff]   ;;  %v7529_v46 = vld [vmem:[#allocation7] sm:$0xff] }
 0x100   :  { %2212 = vmatprep.mubr.bf16.mxu0 %v7360_v0  ;;  %2311 = vmatpush1.bf16.msra.mxu1 %v6546_v15  ;;  %v6609_v15 = vld [vmem:[#allocation8 + $0x18] ss:$12 sps:$4 sm:$0xff]  }
 0x101   :  { %2312 = vmatprep.subr.bf16.mxu1 %v6554_v50  ;;  %v6620_v50 = vld [vmem:[#allocation8 + $0x22c] ss:$12 sps:$4 sm:$0xff]  }
 0x102   :  { %2240 = vmatpush1.bf16.msra.mxu0 %v6528_v47  ;;  %v7532_v47 = vsub.s32 0, %v7521_v37 }
 0x103   :  { %2241 = vmatprep.subr.bf16.mxu0 %v6533_v59  ;;  %v7537_v59 = vsub.s32 1, %v7521_v37 }
 0x104   :  { %2313 = vmatpush1.bf16.msra.mxu1 %v6552_v53  ;;  %v6612_v53 = vld [vmem:[#allocation8] ss:$12 sps:$4 sm:$0xff]  }
 0x105   :  { %2213 = vmatmul.mubr.bf16.gmra.mxu0 %v7499_v54  ;;  %2314 = vmatprep.subr.bf16.mxu1 %v6560_v24  ;;  %v6626_v24 = vld [vmem:[#allocation8 + $0x214] ss:$12 sps:$4 sm:$0xff]  }
 0x106   :  { %2140 = vmatmul.mubr.bf16.gmra.mxu1 %v7442_v29  ;;  %2242 = vmatpush1.bf16.msra.mxu0 %v6531_v52  ;;  %v6564_v29 = vld [vmem:[#allocation5 + $0x5c0] ss:$40 sps:$4 sm:$0xff]   ;;  %v6614_v52 = vld [vmem:[#allocation8 + $0x4] ss:$12 sps:$4 sm:$0xff]  }
 0x107   :  { %2149 = vmatprep.mubr.bf16.mxu1 %v7444_v34  ;;  %2243 = vmatprep.subr.bf16.mxu0 %v6539_v19  ;;  %v6557_v34 = vld [vmem:[#allocation5 + $0x4d4] ss:$40 sps:$4 sm:$0xff]   ;;  %v7543_v19 = vrot.slane %v7529_v46, %v7532_v47 }
 0x108   :  { %2222 = vmatprep.mubr.bf16.mxu0 %v7360_v0  ;;  %2315 = vmatpush1.bf16.msra.mxu1 %v6558_v57 }
 0x109   :  { %2316 = vmatprep.subr.bf16.mxu1 %v6566_v60  ;;  %v6615_v60 = vld [vmem:[#allocation8 + $0x168] ss:$12 sps:$4 sm:$0xff]  }
 0x10a   :  { %2244 = vmatpush1.bf16.msra.mxu0 %v6537_v55  ;;  %v7548_v55 = vrot.slane %v7529_v46, %v7537_v59 }
 0x10b   :  { %2245 = vmatprep.subr.bf16.mxu0 %v6545_v56 }
 0x10c   :  { %2317 = vmatpush1.bf16.msra.mxu1 %v6564_v29  ;;  %v7237_v29 = vld [vmem:[#allocation2 + $0x1c] ss:$12 sps:$4 sm:$0xff]  }
 0x10d   :  { %2223 = vmatmul.mubr.bf16.gmra.mxu0 %v7505_v62  ;;  %2318 = vmatprep.subr.bf16.mxu1 %v6572_v63 }
 0x10e   :  { %2150 = vmatmul.mubr.bf16.gmra.mxu1 %v7448_v40  ;;  %2246 = vmatpush1.bf16.msra.mxu0 %v6543_v58  ;;  %v6576_v40 = vld [vmem:[#allocation5 + $0x520] ss:$40 sps:$4 sm:$0xff]  }
 0x10f   :  { %2247 = vmatprep.subr.bf16.mxu0 %v6551_v5  ;;  %2338 = vmatprep.mubr.bf16.mxu1 %v7360_v0  ;;  %v6617_v58 = vld [vmem:[#allocation8 + $0x16c] ss:$12 sps:$4 sm:$0xff]  }
 0x110   :  { %2265 = vmatprep.mubr.bf16.mxu0 %v7236_v16  ;;  %2319 = vmatpush1.bf16.msra.mxu1 %v6570_v1  ;;  %v6623_v16 = vld [vmem:[#allocation8 + $0x154] ss:$12 sps:$4 sm:$0xff]  }
 0x111   :  { %2320 = vmatprep.subr.bf16.mxu1 %v6578_v4 }
 0x112   :  { %2248 = vmatpush1.bf16.msra.mxu0 %v6549_v61  ;;  %v6624_v61 = vld [vmem:[#allocation8 + $0x210] ss:$12 sps:$4 sm:$0xff]  }
 0x113   :  { %2249 = vmatprep.subr.bf16.mxu0 %v6557_v34 }
 0x114   :  { %2321 = vmatpush1.bf16.msra.mxu1 %v6576_v40 }
 0x115   :  { %4596 = vmatprep.subr.bf16.mxu1 %v6584_v7  ;;  %v6638_v7 = vld [vmem:[#allocation8 + $0x1e4] ss:$12 sps:$4 sm:$0xff]  }
 0x116   :  { %2250 = vmatpush2.bf16.msra.mxu0 %v6555_v2  ;;  %v7509_v13 = vpop.f32.mrf.mxu1 }
 0x117   :  { %2251 = vmatprep.subr.bf16.mxu0 %v6563_v3  ;;  %2339 = vmatmul.mubr.bf16.vlgmr.msra.gmra.mxu1 %v7487_v41  ;;  %v6591_v41 = vld [vmem:[#allocation5 + $0x2f0] ss:$40 sps:$4 sm:$0xff]  }
 0x118   :  { %4597 = vmatpush1.bf16.msra.mxu1 %v6582_v9  ;;  %2348 = vmatprep.mubr.bf16.mxu1 %v7360_v0  ;;  %v7513_v21 = vpop.f32.mrf.mxu1 }
 0x119   :  { %4598 = vmatprep.subr.bf16.mxu1 %v6590_v11 }
 0x11a   :  { %2252 = vmatpush2.bf16.msra.mxu0 %v6561_v51  ;;  %v7515_v27 = vpop.f32.mrf.mxu1  ;;  %v6621_v51 = vld [vmem:[#allocation8 + $0x150] ss:$12 sps:$4 sm:$0xff]  }
 0x11b   :  { %2253 = vmatprep.subr.bf16.mxu0 %v6569_v6  ;;  %v6630_v6 = vld [vmem:[#allocation8 + $0x1f8] ss:$12 sps:$4 sm:$0xff]  }
 0x11c   :  { %4599 = vmatpush1.bf16.msra.mxu1 %v6588_v12  ;;  %v7519_v33 = vpop.f32.mrf.mxu1 }
 0x11d   :  { %4600 = vmatprep.subr.bf16.mxu1 %v6596_v18 }
 0x11e   :  { %2254 = vmatpush2.bf16.msra.mxu0 %v6567_v8  ;;  %v7523_v38 = vpop.f32.mrf.mxu1 }
 0x11f   :  { %2255 = vmatprep.subr.bf16.mxu0 %v6575_v10  ;;  %2349 = vmatmul.mubr.bf16.gmra.mxu1 %v7493_v49 }
 0x120   :  { %4601 = vmatpush1.bf16.msra.mxu1 %v6594_v20  ;;  %2358 = vmatprep.mubr.bf16.mxu1 %v7360_v0  ;;  %v7525_v44 = vpop.f32.mrf.mxu1 }
 0x121   :  { %4602 = vmatprep.subr.bf16.mxu1 %v6602_v25  ;;  %v6636_v25 = vld [vmem:[#allocation8 + $0x1e0] ss:$12 sps:$4 sm:$0xff]  }
 0x122   :  { %2256 = vmatpush2.bf16.msra.mxu0 %v6573_v14  ;;  %v7534_v49 = vpop.f32.mrf.mxu1 }
 0x123   :  { %2257 = vmatprep.subr.bf16.mxu0 %v6581_v17  ;;  %v6629_v17 = vld [vmem:[#allocation8 + $0x13c] ss:$12 sps:$4 sm:$0xff]  }
 0x124   :  { %4603 = vmatpush1.bf16.msra.mxu1 %v6600_v26  ;;  %v6644_v26 = vld [vmem:[#allocation8 + $0x1cc] ss:$12 sps:$4 sm:$0xff]  }
 0x125   :  { %4604 = vmatprep.subr.bf16.mxu1 %v6605_v31 }
 0x126   :  { %2258 = vmatpush2.bf16.msra.mxu0 %v6579_v22  ;;  %v7239_v22 = vld [vmem:[#allocation2 + $0x34] ss:$12 sps:$4 sm:$0xff]  }
 0x127   :  { %2259 = vmatprep.subr.bf16.mxu0 %v6587_v23  ;;  %2359 = vmatmul.mubr.bf16.gmra.mxu1 %v7499_v54  ;;  %v6618_v54 = vld [vmem:[#allocation8 + $0x228] ss:$12 sps:$4 sm:$0xff]   ;;  %v6627_v23 = vld [vmem:[#allocation8 + $0x138] ss:$12 sps:$4 sm:$0xff]  }
 0x128   :  { %4605 = vmatpush1.bf16.msra.mxu1 %v6603_v36  ;;  %2368 = vmatprep.mubr.bf16.mxu1 %v7360_v0  ;;  %v7539_v0 = vpop.f32.mrf.mxu1  ;;  %v6635_v36 = vld [vmem:[#allocation8 + $0x124] ss:$12 sps:$4 sm:$0xff]  }
 0x129   :  { %4606 = vmatprep.subr.bf16.mxu1 %v6608_v42 }
 0x12a   :  { %2260 = vmatpush2.bf16.msra.mxu0 %v6585_v30  ;;  %v7551_v57 = vpop.f32.mrf.mxu1 }
 0x12b   :  { %2261 = vmatprep.subr.bf16.mxu0 %v6593_v32 }
 0x12c   :  { %4607 = vmatpush1.bf16.msra.mxu1 %v6606_v43  ;;  %v7558_v2 = vpop.f32.mrf.mxu1  ;;  %v6633_v43 = vld [vmem:[#allocation8 + $0x120] ss:$12 sps:$4 sm:$0xff]  }
 0x12d   :  { %4608 = vmatprep.subr.bf16.mxu1 %v6611_v48 }
 0x12e   :  { %2262 = vmatpush2.bf16.msra.mxu0 %v6591_v41  ;;  %v7570_v14 = vpop.f32.mrf.mxu1 }
 0x12f   :  { %2263 = vmatprep.subr.bf16.mxu0 %v6599_v35  ;;  %2369 = vmatmul.mubr.bf16.gmra.mxu1 %v7505_v62  ;;  %v6632_v62 = vld [vmem:[#allocation8 + $0x1fc] ss:$12 sps:$4 sm:$0xff]  }
 0x130   :  { %4609 = vmatpush1.bf16.msra.mxu1 %v6609_v15  ;;  %v8579_v15 = vsub.s32 2, %v7521_v37 }
 0x131   :  { %4610 = vmatprep.subr.bf16.mxu1 %v6614_v52 }
 0x132   :  { %2264 = vmatpush2.bf16.msra.mxu0 %v6597_v45  ;;  %v6650_v45 = vld [vmem:[#allocation8 + $0x1b4] ss:$12 sps:$4 sm:$0xff]  }
 0x133   :  { %4669 = vmatprep.subr.bf16.mxu0 %v6620_v50  ;;  %v6641_v50 = vld [vmem:[#allocation8 + $0x10c] ss:$12 sps:$4 sm:$0xff]  }
 0x134   :  { %4611 = vmatpush1.bf16.msra.mxu1 %v6612_v53 }
 0x135   :  { %v1683_v56 = vpop.f32.mrf.mxu0  ;;  %2266 = vmatmul.mubr.bf16.vlgmr.msra.gmra.mxu0 %v7484_v39  ;;  %4612 = vmatprep.subr.bf16.mxu1 %v6617_v58  ;;  %v6648_v58 = vld [vmem:[#allocation8 + $0x1b0] ss:$12 sps:$4 sm:$0xff]  }
 0x136   :  { %v1684_v5 = vadd.f32 %v1683_v56, %v7543_v19  ;;  %2275 = vmatprep.mubr.bf16.mxu0 %v7237_v29  ;;  %4670 = vmatpush1.bf16.msra.mxu0 %v6618_v54 }
 0x137   :  { %v1685_v34 = vpop.f32.mrf.mxu0  ;;  %4671 = vmatprep.subr.bf16.mxu0 %v6626_v24  ;;  %v7240_v24 = vld [vmem:[#allocation2 + $0x30] ss:$12 sps:$4 sm:$0xff]  }
 0x138   :  { %v7555_v63 = vadd.f32 %v7509_v13, %v1684_v5  ;;  %v1686_v1 = vadd.f32 %v1685_v34, %v7548_v55  ;;  %4613 = vmatpush2.bf16.msra.mxu1 %v6615_v60  ;;  %v7238_v13 = vld [vmem:[#allocation2 + $0x18] ss:$12 sps:$4 sm:$0xff]  }
 0x139   :  { %v1687_v39 = vpop.f32.mrf.mxu0  ;;  %4614 = vmatprep.subr.bf16.mxu1 %v6623_v16 }
 0x13a   :  { %v5653_v3 = vmul.f32 -1.442695, %v7555_v63  ;;  %v7562_v4 = vadd.f32 %v7513_v21, %v1686_v1  ;;  %v1688_v40 = vadd.f32 %v1687_v39, %v7543_v19  ;;  %4672 = vmatpush1.bf16.msra.mxu0 %v6624_v61  ;;  %v6639_v61 = vld [vmem:[#allocation8 + $0x108] ss:$12 sps:$4 sm:$0xff]  }
 0x13b   :  { %v1689_v9 = vpop.f32.mrf.mxu0  ;;  %4673 = vmatprep.subr.bf16.mxu0 %v6632_v62  ;;  %v6656_v62 = vld [vmem:[#allocation8 + $0x19c] ss:$12 sps:$4 sm:$0xff]   ;;  %v6647_v1 = vld [vmem:[#allocation8 + $0xf4] ss:$12 sps:$4 sm:$0xff]  }
 0x13c   :  { %6911 = vpow2.f32 %v5653_v3  ;;  %v5654_v8 = vmul.f32 -1.442695, %v7562_v4  ;;  %v7567_v10 = vadd.f32 %v7515_v27, %v1688_v40  ;;  %v1690_v11 = vadd.f32 %v1689_v9, %v7548_v55  ;;  %4615 = vmatpush2.bf16.msra.mxu1 %v6621_v51 }
 0x13d   :  { %v1693_v12 = vpop.f32.mrf.mxu0  ;;  %2276 = vmatmul.mubr.bf16.gmra.mxu0 %v7238_v13  ;;  %4616 = vmatprep.subr.bf16.mxu1 %v6629_v17 }
 0x13e   :  { %6913 = vpow2.f32 %v5654_v8  ;;  %v5663_v18 = vmul.f32 -1.442695, %v7567_v10  ;;  %v7574_v20 = vadd.f32 %v7519_v33, %v1690_v11  ;;  %v1694_v21 = vadd.f32 %v1693_v12, %v7543_v19  ;;  %2285 = vmatprep.mubr.bf16.mxu0 %v7239_v22  ;;  %4674 = vmatpush1.bf16.msra.mxu0 %v6630_v6  ;;  %v7582_v33 = vpop.f32.mrf.mxu1  ;;  %v6654_v6 = vld [vmem:[#allocation8 + $0x198] ss:$12 sps:$4 sm:$0xff]   ;;  %v6645_v11 = vld [vmem:[#allocation8 + $0xf0] ss:$12 sps:$4 sm:$0xff]  }
 0x13f   :  { %v1695_v27 = vpop.f32.mrf.mxu0  ;;  %4675 = vmatprep.subr.bf16.mxu0 %v6638_v7 }
 0x140   :  { %6915 = vpow2.f32 %v5663_v18  ;;  %v5664_v28 = vmul.f32 -1.442695, %v7574_v20  ;;  %v7579_v30 = vadd.f32 %v7523_v38, %v1694_v21  ;;  %v1696_v31 = vadd.f32 %v1695_v27, %v7548_v55  ;;  %v6642_v38 = vld [vmem:[#allocation8 + $0x1c8] ss:$12 sps:$4 sm:$0xff]   ;;  %4617 = vmatpush2.bf16.msra.mxu1 %v6627_v23  ;;  %v7595_v56 = vpop.f32.mrf.mxu1 }
 0x141   :  { %v1697_v32 = vpop.f32.mrf.mxu0  ;;  %4618 = vmatprep.subr.bf16.mxu1 %v6635_v36  ;;  %v349_v18 = vsub.s32 3, %v7521_v37  ;;  %v6653_v21 = vld [vmem:[#allocation8 + $0xdc] ss:$12 sps:$4 sm:$0xff]  }
 0x142   :  { %6917 = vpow2.f32 %v5664_v28  ;;  %v5673_v41 = vmul.f32 -1.442695, %v7579_v30  ;;  %v7586_v42 = vadd.f32 %v7525_v44, %v1696_v31  ;;  %v1698_v35 = vadd.f32 %v1697_v32, %v7543_v19  ;;  %4676 = vmatpush1.bf16.msra.mxu0 %v6636_v25  ;;  %v7607_v51 = vpop.f32.mrf.mxu1  ;;  %v7242_v28 = vld [vmem:[#allocation2 + $0x48] ss:$12 sps:$4 sm:$0xff]  }
 0x143   :  { %v1699_v48 = vpop.f32.mrf.mxu0  ;;  %4677 = vmatprep.subr.bf16.mxu0 %v6644_v26  ;;  %v6660_v32 = vld [vmem:[#allocation8 + $0x180] ss:$12 sps:$4 sm:$0xff]  }
 0x144   :  { %6919 = vpow2.f32 %v5673_v41  ;;  %v5674_v52 = vmul.f32 -1.442695, %v7586_v42  ;;  %v7592_v53 = vadd.f32 %v7534_v49, %v1698_v35  ;;  %v1700_v44 = vadd.f32 %v1699_v48, %v7548_v55  ;;  %v7241_v49 = vld [vmem:[#allocation2 + $0x4c] ss:$12 sps:$4 sm:$0xff]   ;;  %4619 = vmatpush2.bf16.msra.mxu1 %v6633_v43  ;;  %v1790_v31 = vpop.f32.mrf.mxu1 }
 0x145   :  { %v1703_v54 = vpop.f32.mrf.mxu0  ;;  %2286 = vmatmul.mubr.bf16.gmra.mxu0 %v7240_v24  ;;  %4620 = vmatprep.subr.bf16.mxu1 %v6641_v50  ;;  %v6651_v43 = vld [vmem:[#allocation8 + $0xd8] ss:$12 sps:$4 sm:$0xff]  }
 0x146   :  { %6921 = vpow2.f32 %v5674_v52  ;;  %v5683_v5 = vmul.f32 -1.442695, %v7592_v53  ;;  %v7599_v29 = vadd.f32 %v7539_v0, %v1700_v44  ;;  %v1704_v60 = vadd.f32 %v1703_v54, %v7543_v19  ;;  %2295 = vmatprep.mubr.bf16.mxu0 %v7241_v49  ;;  %4678 = vmatpush1.bf16.msra.mxu0 %v6642_v38  ;;  %v6665_v38 = vld [vmem:[#allocation8 + $0x2ec] ss:$12 sps:$4 sm:$0xff]   ;;  %v6659_v50 = vld [vmem:[#allocation8 + $0xc4] ss:$12 sps:$4 sm:$0xff]  }
 0x147   :  { %v1705_v34 = vpop.f32.mrf.mxu0  ;;  %4679 = vmatprep.subr.bf16.mxu0 %v6650_v45 }
 0x148   :  { %6923 = vpow2.f32 %v5683_v5  ;;  %v5684_v39 = vmul.f32 -1.442695, %v7599_v29  ;;  %v7604_v16 = vadd.f32 %v7551_v57, %v1704_v60  ;;  %v1706_v3 = vadd.f32 %v1705_v34, %v7548_v55  ;;  %v6662_v57 = vld [vmem:[#allocation8 + $0x184] ss:$12 sps:$4 sm:$0xff]   ;;  %4621 = vmatpush2.bf16.msra.mxu1 %v6639_v61  ;;  %v1792_v5 = vpop.f32.mrf.mxu1  ;;  %v6663_v60 = vld [vmem:[#allocation8 + $0x2e8] ss:$12 sps:$4 sm:$0xff]  }
 0x149   :  { %v6912_v0 = vpop.eup %6911  ;;  %v1707_v40 = vpop.f32.mrf.mxu0  ;;  %4622 = vmatprep.subr.bf16.mxu1 %v6647_v1  ;;  %v6657_v34 = vld [vmem:[#allocation8 + $0xc0] ss:$12 sps:$4 sm:$0xff]  }
 0x14a   :  { %v2619_v7 = vadd.f32 1.0, %v6912_v0  ;;  %6925 = vpow2.f32 %v5684_v39  ;;  %v5693_v9 = vmul.f32 -1.442695, %v7604_v16  ;;  %v7611_v8 = vadd.f32 %v7558_v2, %v1706_v3  ;;  %4680 = vmatpush1.bf16.msra.mxu0 %v6648_v58  ;;  %v6668_v1 = vld [vmem:[#allocation8 + $0x2d4] ss:$12 sps:$4 sm:$0xff]  }
 0x14b   :  { %v6914_v12 = vpop.eup %6913  ;;  %v1708_v13 = vadd.f32 %v1707_v40, %v7543_v19  ;;  %v1709_v17 = vpop.f32.mrf.mxu0  ;;  %4681 = vmatprep.subr.bf16.mxu0 %v6656_v62  ;;  %v7638_v0 = vrot.slane %v7529_v46, %v8579_v15  ;;  %v7641_v40 = vrot.slane %v7529_v46, %v349_v18 }
 0x14c   :  { %6927 = vrcp.f32 %v2619_v7  ;;  %v2620_v22 = vadd.f32 1.0, %v6914_v12  ;;  %v5694_v23 = vmul.f32 -1.442695, %v7611_v8  ;;  %v1710_v25 = vadd.f32 %v1709_v17, %v7548_v55  ;;  %4623 = vmatpush2.bf16.msra.mxu1 %v6645_v11 }
 0x14d   :  { %v6916_v2 = vpop.eup %6915  ;;  %6929 = vpow2.f32 %v5693_v9  ;;  %v7618_v26 = vadd.f32 %v7570_v14, %v1708_v13  ;;  %v1713_v27 = vpop.f32.mrf.mxu0  ;;  %2296 = vmatmul.mubr.bf16.gmra.mxu0 %v7242_v28  ;;  %4624 = vmatprep.subr.bf16.mxu1 %v6653_v21  ;;  %v6666_v9 = vld [vmem:[#allocation8 + $0x2d0] ss:$12 sps:$4 sm:$0xff]   ;;  %v6689_v13 = vld [vmem:[#allocation8 + $0x3ac] ss:$12 sps:$4 sm:$0xff]  }
 0x14e   :  { %6931 = vrcp.f32 %v2620_v22  ;;  %v2629_v36 = vadd.f32 1.0, %v6916_v2  ;;  %v7621_v41 = vadd.f32 %v7582_v33, %v1710_v25  ;;  %v1714_v35 = vadd.f32 %v1713_v27, %v7543_v19  ;;  %4682 = vmatpush1.bf16.msra.mxu0 %v6654_v6  ;;  %v6671_v21 = vld [vmem:[#allocation8 + $0x2bc] ss:$12 sps:$4 sm:$0xff]  }
 0x14f   :  { %v6918_v45 = vpop.eup %6917  ;;  %6933 = vpow2.f32 %v5694_v23  ;;  %v5703_v14 = vmul.f32 -1.442695, %v7618_v26  ;;  %v1715_v48 = vpop.f32.mrf.mxu0  ;;  %4683 = vmatprep.subr.bf16.mxu0 %v6662_v57 }
 0x150   :  { %6935 = vrcp.f32 %v2629_v36  ;;  %v2630_v52 = vadd.f32 1.0, %v6918_v45  ;;  %v5704_v44 = vmul.f32 -1.442695, %v7621_v41  ;;  %v7627_v54 = vadd.f32 %v7595_v56, %v1714_v35  ;;  %4625 = vmatpush2.bf16.msra.mxu1 %v6651_v43  ;;  %v6669_v43 = vld [vmem:[#allocation8 + $0x2b8] ss:$12 sps:$4 sm:$0xff]  }
 0x151   :  { %v6920_v33 = vpop.eup %6919  ;;  %6937 = vpow2.f32 %v5703_v14  ;;  %v1716_v24 = vadd.f32 %v1715_v48, %v7548_v55  ;;  %v1717_v58 = vpop.f32.mrf.mxu0  ;;  %4626 = vmatprep.subr.bf16.mxu1 %v6659_v50  ;;  %v6674_v48 = vld [vmem:[#allocation8 + $0x2a4] ss:$12 sps:$4 sm:$0xff]  }
 0x152   :  { %6939 = vrcp.f32 %v2630_v52  ;;  %v2639_v49 = vadd.f32 1.0, %v6920_v33  ;;  %v5713_v61 = vmul.f32 -1.442695, %v7627_v54  ;;  %v1718_v62 = vadd.f32 %v1717_v58, %v7543_v19  ;;  %4684 = vmatpush1.bf16.msra.mxu0 %v6660_v32 }
 0x153   :  { %v6922_v56 = vpop.eup %6921  ;;  %6941 = vpow2.f32 %v5704_v44  ;;  %v7633_v39 = vadd.f32 %v7607_v51, %v1716_v24  ;;  %v1719_v3 = vpop.f32.mrf.mxu0  ;;  %4685 = vmatprep.subr.bf16.mxu0 %v6665_v38 }
 0x154   :  { %6943 = vrcp.f32 %v2639_v49  ;;  %v2640_v19 = vadd.f32 1.0, %v6922_v56  ;;  %v7643_v6 = vadd.f32 %v1790_v31, %v1718_v62  ;;  %v1720_v7 = vadd.f32 %v1719_v3, %v7548_v55  ;;  %4627 = vmatpush2.bf16.msra.mxu1 %v6657_v34  ;;  %v6672_v56 = vld [vmem:[#allocation8 + $0x2a0] ss:$12 sps:$4 sm:$0xff]  }
 0x155   :  { %v6924_v51 = vpop.eup %6923  ;;  %6945 = vpow2.f32 %v5713_v61  ;;  %v5714_v11 = vmul.f32 -1.442695, %v7633_v39  ;;  %v1902_v12 = vpop.f32.mrf.mxu0  ;;  %4742 = vmatprep.subr.bf16.mxu1 %v6689_v13 }
 0x156   :  { %v1829_v57 = vpop.f32.mrf.mxu1  ;;  %6947 = vrcp.f32 %v2640_v19  ;;  %v2649_v46 = vadd.f32 1.0, %v6924_v51  ;;  %v5723_v17 = vmul.f32 -1.442695, %v7643_v6  ;;  %v7648_v18 = vadd.f32 %v1792_v5, %v1720_v7  ;;  %4686 = vmatpush2.bf16.msra.mxu0 %v6663_v60  ;;  %v6677_v51 = vld [vmem:[#allocation8 + $0x28c] ss:$12 sps:$4 sm:$0xff]  }
 0x157   :  { %v6926_v22 = vpop.eup %6925  ;;  %6949 = vpow2.f32 %v5714_v11  ;;  %v1830_v55 = vadd.f32 %v1829_v57, %v7638_v0  ;;  %v1904_v25 = vpop.f32.mrf.mxu0  ;;  %4687 = vmatprep.subr.bf16.mxu0 %v6668_v1 }
 0x158   :  { %v1831_v23 = vpop.f32.mrf.mxu1  ;;  %6951 = vrcp.f32 %v2649_v46  ;;  %v2650_v2 = vadd.f32 1.0, %v6926_v22  ;;  %v5724_v27 = vmul.f32 -1.442695, %v7648_v18 }
 0x159   :  { %v1832_v28 = vadd.f32 %v1831_v23, %v7641_v40  ;;  %v6928_v31 = vpop.eup %6927  ;;  %6953 = vpow2.f32 %v5723_v17  ;;  %v7653_v32 = vadd.f32 %v1902_v12, %v1830_v55  ;;  %v1906_v35 = vpop.f32.mrf.mxu0  ;;  %v6675_v23 = vld [vmem:[#allocation8 + $0x288] ss:$12 sps:$4 sm:$0xff]  }
 0x15a   :  { %v1833_v36 = vpop.f32.mrf.mxu1  ;;  %v6930_v38 = vpop.eup %6929  ;;  %6955 = vrcp.f32 %v2650_v2  ;;  %4688 = vmatpush2.bf16.msra.mxu0 %v6666_v9  ;;  %v2859_v57 = vmul.f32 %v6928_v31, %v7555_v63 }
 0x15b   :  { %v7655_v45 = vadd.f32 %v1904_v25, %v1832_v28  ;;  %v1834_v14 = vadd.f32 %v1833_v36, %v7638_v0  ;;  %v6932_v50 = vpop.eup %6931  ;;  %v2659_v52 = vadd.f32 1.0, %v6930_v38  ;;  %6957 = vpow2.f32 %v5724_v27  ;;  %v1908_v24 = vpop.f32.mrf.mxu0  ;;  %4689 = vmatprep.subr.bf16.mxu0 %v6671_v21  ;;  %v6680_v36 = vld [vmem:[#allocation8 + $0x274] ss:$12 sps:$4 sm:$0xff]  }
 0x15c   :  { %v5655_v44 = vmul.f32 -1.442695, %v7653_v32  ;;  %v1835_v33 = vpop.f32.mrf.mxu1  ;;  %v6934_v58 = vpop.eup %6933 }
 0x15d   :  { %v5656_v5 = vmul.f32 -1.442695, %v7655_v45  ;;  %v7660_v60 = vadd.f32 %v1906_v35, %v1834_v14  ;;  %v1836_v49 = vadd.f32 %v1835_v33, %v7641_v40  ;;  %v6936_v61 = vpop.eup %6935  ;;  %6959 = vrcp.f32 %v2659_v52  ;;  %v1912_v1 = vpop.f32.mrf.mxu0  ;;  %v6687_v35 = vld [vmem:[#allocation8 + $0x3a8] ss:$12 sps:$4 sm:$0xff]  }
 0x15e   :  { %v2660_v62 = vadd.f32 1.0, %v6934_v58  ;;  %v1839_v34 = vpop.f32.mrf.mxu1  ;;  %v6938_v3 = vpop.eup %6937  ;;  %v2869_v19 = vmul.f32 %v6936_v61, %v7567_v10  ;;  %6961 = vpow2.f32 %v5655_v44  ;;  %4690 = vmatpush2.bf16.msra.mxu0 %v6669_v43  ;;  %v2860_v10 = vmul.f32 %v6932_v50, %v7562_v4  ;;  %v6692_v14 = vld [vmem:[#allocation8 + $0x394] ss:$12 sps:$4 sm:$0xff]  }
 0x15f   :  { %v5665_v7 = vmul.f32 -1.442695, %v7660_v60  ;;  %v7665_v9 = vadd.f32 %v1908_v24, %v1836_v49  ;;  %v6940_v11 = vpop.eup %6939  ;;  %v2669_v12 = vadd.f32 1.0, %v6938_v3  ;;  %v1840_v13 = vadd.f32 %v1839_v34, %v7638_v0  ;;  %v1914_v17 = vpop.f32.mrf.mxu0  ;;  %4691 = vmatprep.subr.bf16.mxu0 %v6674_v48  ;;  %v6678_v3 = vld [vmem:[#allocation8 + $0x270] ss:$12 sps:$4 sm:$0xff]  }
 0x160   :  { %6963 = vrcp.f32 %v2660_v62  ;;  %v1841_v46 = vpop.f32.mrf.mxu1  ;;  %v6942_v21 = vpop.eup %6941  ;;  %v2870_v22 = vmul.f32 %v6940_v11, %v7574_v20  ;;  %v7675_v38 = vpack.c.bf16 %v2869_v19, %v2859_v57  ;;  %v6683_v57 = vld [vmem:[#allocation8 + $0x25c] ss:$12 sps:$4 sm:$0xff]  }
 0x161   :  { %6965 = vpow2.f32 %v5656_v5  ;;  %v5666_v55 = vmul.f32 -1.442695, %v7665_v9  ;;  %v6944_v25 = vpop.eup %6943  ;;  %v2670_v2 = vadd.f32 1.0, %v6942_v21  ;;  %v1842_v63 = vadd.f32 %v1841_v46, %v7641_v40  ;;  %v1916_v31 = vpop.f32.mrf.mxu0 }
 0x162   :  { %6967 = vrcp.f32 %v2669_v12  ;;  %v7673_v27 = vadd.f32 %v1912_v1, %v1840_v13  ;;  %v1843_v28 = vpop.f32.mrf.mxu1  ;;  %v6946_v43 = vpop.eup %6945  ;;  %v7678_v20 = vpack.c.bf16 %v2870_v22, %v2860_v10  ;;  %4692 = vmatpush2.bf16.msra.mxu0 %v6672_v56  ;;  %v6690_v12 = vld [vmem:[#allocation8 + $0x390] ss:$12 sps:$4 sm:$0xff]  }
 0x163   :  { %6969 = vpow2.f32 %v5665_v7  ;;  %v1844_v4 = vadd.f32 %v1843_v28, %v7638_v0  ;;  %v6948_v48 = vpop.eup %6947  ;;  %v2679_v50 = vadd.f32 1.0, %v6946_v43  ;;  %v7681_v44 = vadd.f32 %v1914_v17, %v1842_v63  ;;  %v1918_v24 = vpop.f32.mrf.mxu0  ;;  %4693 = vmatprep.subr.bf16.mxu0 %v6677_v51  ;;  %v6681_v43 = vld [vmem:[#allocation8 + $0x258] ss:$12 sps:$4 sm:$0xff]  }
 0x164   :  { %6971 = vrcp.f32 %v2670_v2  ;;  %v5675_v52 = vmul.f32 -1.442695, %v7673_v27  ;;  %v1845_v33 = vpop.f32.mrf.mxu1  ;;  %v6950_v58 = vpop.eup %6949  ;;  %4628 = vmatprep.mubr.bf16.mxu1 %v7678_v20  ;;  %v2879_v7 = vmul.f32 %v6944_v25, %v7579_v30  ;;  %v6695_v30 = vld [vmem:[#allocation8 + $0x37c] ss:$12 sps:$4 sm:$0xff]   ;;  %v2880_v63 = vmul.f32 %v6948_v48, %v7586_v42 }
 0x165   :  { %6973 = vpow2.f32 %v5666_v55  ;;  %v1846_v5 = vadd.f32 %v1845_v33, %v7641_v40  ;;  %v7684_v49 = vadd.f32 %v1916_v31, %v1844_v4  ;;  %v6952_v61 = vpop.eup %6951  ;;  %v2680_v62 = vadd.f32 1.0, %v6950_v58  ;;  %4629 = vmatmul.mubr.bf16.vlgmr.msra.gmra.mxu1 %v7675_v38  ;;  %v1922_v56 = vpop.f32.mrf.mxu0 }
 0x166   :  { %6975 = vrcp.f32 %v2679_v50  ;;  %v5676_v34 = vmul.f32 -1.442695, %v7681_v44  ;;  %v1849_v1 = vpop.f32.mrf.mxu1  ;;  %v6954_v19 = vpop.eup %6953  ;;  %4694 = vmatpush2.bf16.msra.mxu0 %v6675_v23  ;;  %4743 = vmatpush1.bf16.msra.mxu1 %v6687_v35  ;;  %v2889_v46 = vmul.f32 %v6952_v61, %v7592_v53  ;;  %v6686_v50 = vld [vmem:[#allocation8 + $0x244] ss:$12 sps:$4 sm:$0xff]  }
 0x167   :  { %6977 = vpow2.f32 %v5675_v52  ;;  %v5685_v51 = vmul.f32 -1.442695, %v7684_v49  ;;  %v1850_v11 = vadd.f32 %v1849_v1, %v7638_v0  ;;  %v6956_v13 = vpop.eup %6955  ;;  %v2689_v17 = vadd.f32 1.0, %v6954_v19  ;;  %v1924_v22 = vpop.f32.mrf.mxu0  ;;  %4695 = vmatprep.subr.bf16.mxu0 %v6680_v36  ;;  %4744 = vmatprep.subr.bf16.mxu1 %v6692_v14  ;;  %v6693_v52 = vld [vmem:[#allocation8 + $0x378] ss:$12 sps:$4 sm:$0xff]  }
 0x168   :  { %6979 = vrcp.f32 %v2680_v62  ;;  %v7693_v21 = vadd.f32 %v1918_v24, %v1846_v5  ;;  %v1851_v10 = vpop.f32.mrf.mxu1  ;;  %v6958_v55 = vpop.eup %6957  ;;  %v2890_v25 = vmul.f32 %v6956_v13, %v7599_v29  ;;  %v7707_v58 = vpack.c.bf16 %v2889_v46, %v2879_v7  ;;  %v6698_v5 = vld [vmem:[#allocation8 + $0x364] ss:$12 sps:$4 sm:$0xff]   ;;  %v6684_v7 = vld [vmem:[#allocation8 + $0x240] ss:$12 sps:$4 sm:$0xff]  }
 0x169   :  { %6981 = vpow2.f32 %v5676_v34  ;;  %v1852_v23 = vadd.f32 %v1851_v10, %v7641_v40  ;;  %v7697_v2 = vadd.f32 %v1922_v56, %v1850_v11  ;;  %v2690_v53 = vadd.f32 1.0, %v6958_v55  ;;  %v1926_v35 = vpop.f32.mrf.mxu0  ;;  %v6696_v11 = vld [vmem:[#allocation8 + $0x360] ss:$12 sps:$4 sm:$0xff]  }
 0x16a   :  { %6983 = vrcp.f32 %v2689_v17  ;;  %v5686_v28 = vmul.f32 -1.442695, %v7693_v21  ;;  %v1853_v31 = vpop.f32.mrf.mxu1  ;;  %v6960_v36 = vpop.eup %6959  ;;  %4696 = vmatpush2.bf16.msra.mxu0 %v6678_v3  ;;  %4745 = vmatpush1.bf16.msra.mxu1 %v6690_v12  ;;  %v7705_v33 = vpack.c.bf16 %v2890_v25, %v2880_v63  ;;  %v6701_v17 = vld [vmem:[#allocation8 + $0x34c] ss:$12 sps:$4 sm:$0xff]  }
 0x16b   :  { %6985 = vpow2.f32 %v5685_v51  ;;  %v5695_v4 = vmul.f32 -1.442695, %v7697_v2  ;;  %v1854_v29 = vadd.f32 %v1853_v31, %v7638_v0  ;;  %v7703_v14 = vadd.f32 %v1924_v22, %v1852_v23  ;;  %v6962_v42 = vpop.eup %6961  ;;  %v1928_v24 = vpop.f32.mrf.mxu0  ;;  %4697 = vmatprep.subr.bf16.mxu0 %v6683_v57  ;;  %4746 = vmatprep.subr.bf16.mxu1 %v6695_v30  ;;  %v6716_v10 = vld [vmem:[#allocation8 + $0x52c] ss:$12 sps:$4 sm:$0xff]  }
 0x16c   :  { %6987 = vrcp.f32 %v2690_v53  ;;  %v1855_v48 = vpop.f32.mrf.mxu1  ;;  %v2621_v62 = vadd.f32 1.0, %v6962_v42  ;;  %4638 = vmatprep.mubr.bf16.mxu1 %v7705_v33  ;;  %v2899_v30 = vmul.f32 %v6960_v36, %v7604_v16 }
 0x16d   :  { %v6964_v61 = vpop.eup %6963  ;;  %6989 = vpow2.f32 %v5686_v28  ;;  %v5696_v34 = vmul.f32 -1.442695, %v7703_v14  ;;  %v1856_v1 = vadd.f32 %v1855_v48, %v7641_v40  ;;  %v7711_v3 = vadd.f32 %v1926_v35, %v1854_v29  ;;  %v1932_v51 = vpop.f32.mrf.mxu0  ;;  %4639 = vmatmul.mubr.bf16.gmra.mxu1 %v7707_v58 }
 0x16e   :  { %v6966_v56 = vpop.eup %6965  ;;  %6991 = vpow2.f32 %v5695_v4  ;;  %v1859_v19 = vpop.f32.mrf.mxu1  ;;  %4698 = vmatpush2.bf16.msra.mxu0 %v6681_v43  ;;  %4747 = vmatpush1.bf16.msra.mxu1 %v6693_v52  ;;  %v2900_v16 = vmul.f32 %v6964_v61, %v7611_v8 }
 0x16f   :  { %v6968_v57 = vpop.eup %6967  ;;  %6993 = vrcp.f32 %v2621_v62  ;;  %v2622_v12 = vadd.f32 1.0, %v6966_v56  ;;  %v1860_v13 = vadd.f32 %v1859_v19, %v7638_v0  ;;  %v7715_v46 = vadd.f32 %v1928_v24, %v1856_v1  ;;  %v1934_v63 = vpop.f32.mrf.mxu0  ;;  %4699 = vmatprep.subr.bf16.mxu0 %v6686_v50  ;;  %4748 = vmatprep.subr.bf16.mxu1 %v6698_v5  ;;  %v6699_v24 = vld [vmem:[#allocation8 + $0x348] ss:$12 sps:$4 sm:$0xff]  }
 0x170   :  { %v6970_v22 = vpop.eup %6969  ;;  %v2909_v55 = vmul.f32 %v6968_v57, %v7618_v26  ;;  %6995 = vpow2.f32 %v5696_v34  ;;  %v5705_v25 = vmul.f32 -1.442695, %v7711_v3  ;;  %v1861_v23 = vpop.f32.mrf.mxu1  ;;  %v6704_v5 = vld [vmem:[#allocation8 + $0x334] ss:$12 sps:$4 sm:$0xff]  }
 0x171   :  { %v6972_v53 = vpop.eup %6971  ;;  %6997 = vrcp.f32 %v2622_v12  ;;  %v2631_v28 = vadd.f32 1.0, %v6970_v22  ;;  %v5706_v31 = vmul.f32 -1.442695, %v7715_v46  ;;  %v1862_v35 = vadd.f32 %v1861_v23, %v7641_v40  ;;  %v1936_v29 = vpop.f32.mrf.mxu0 }
 0x172   :  { %v6974_v43 = vpop.eup %6973  ;;  %v2910_v26 = vmul.f32 %v6972_v53, %v7621_v41  ;;  %6999 = vpow2.f32 %v5705_v25  ;;  %v7725_v36 = vadd.f32 %v1932_v51, %v1860_v13  ;;  %v1863_v4 = vpop.f32.mrf.mxu1  ;;  %4700 = vmatpush2.bf16.msra.mxu0 %v6684_v7  ;;  %v7733_v1 = vpack.c.bf16 %v2909_v55, %v2899_v30  ;;  %4749 = vmatpush1.bf16.msra.mxu1 %v6696_v11  ;;  %v6702_v11 = vld [vmem:[#allocation8 + $0x330] ss:$12 sps:$4 sm:$0xff]  }
 0x173   :  { %v6976_v50 = vpop.eup %6975  ;;  %7001 = vrcp.f32 %v2631_v28  ;;  %v2632_v52 = vadd.f32 1.0, %v6974_v43  ;;  %v1864_v42 = vadd.f32 %v1863_v4, %v7638_v0  ;;  %v7728_v48 = vadd.f32 %v1934_v63, %v1862_v35  ;;  %v1938_v34 = vpop.f32.mrf.mxu0  ;;  %4815 = vmatprep.subr.bf16.mxu0 %v6716_v10  ;;  %4750 = vmatprep.subr.bf16.mxu1 %v6701_v17  ;;  %v6707_v10 = vld [vmem:[#allocation8 + $0x31c] ss:$12 sps:$4 sm:$0xff]  }
 0x174   :  { %v6978_v62 = vpop.eup %6977  ;;  %7003 = vpow2.f32 %v5706_v31  ;;  %v5715_v8 = vmul.f32 -1.442695, %v7725_v36  ;;  %v1865_v41 = vpop.f32.mrf.mxu1  ;;  %v7731_v61 = vpack.c.bf16 %v2910_v26, %v2900_v16  ;;  %v2919_v43 = vmul.f32 %v6976_v50, %v7627_v54  ;;  %v6705_v26 = vld [vmem:[#allocation8 + $0x318] ss:$12 sps:$4 sm:$0xff]   ;;  %v6708_v54 = vld [vmem:[#allocation8 + $0x300] ss:$12 sps:$4 sm:$0xff]  }
 0x175   :  { %v6980_v56 = vpop.eup %6979  ;;  %7005 = vrcp.f32 %v2632_v52  ;;  %v2641_v0 = vadd.f32 1.0, %v6978_v62  ;;  %v5716_v19 = vmul.f32 -1.442695, %v7728_v48  ;;  %v1866_v51 = vadd.f32 %v1865_v41, %v7641_v40  ;;  %v6710_v52 = vld [vmem:[#allocation8 + $0x304] ss:$12 sps:$4 sm:$0xff]  }
 0x176   :  { %v6982_v7 = vpop.eup %6981  ;;  %7007 = vpow2.f32 %v5715_v8  ;;  %v7737_v57 = vadd.f32 %v1936_v29, %v1864_v42  ;;  %4648 = vmatprep.mubr.bf16.mxu1 %v7731_v61  ;;  %v7744_v17 = vpop.f32.mrf.mxu1  ;;  %4751 = vmatpush1.bf16.msra.mxu1 %v6699_v24  ;;  %v2920_v28 = vmul.f32 %v6980_v56, %v7633_v39  ;;  %v6713_v62 = vld [vmem:[#allocation8 + $0x46c] ss:$12 sps:$4 sm:$0xff]  }
 0x177   :  { %v6984_v12 = vpop.eup %6983  ;;  %7009 = vrcp.f32 %v2641_v0  ;;  %v2642_v13 = vadd.f32 1.0, %v6982_v7  ;;  %v7740_v22 = vadd.f32 %v1938_v34, %v1866_v51  ;;  %4649 = vmatmul.mubr.bf16.gmra.mxu1 %v7733_v1  ;;  %4752 = vmatprep.subr.bf16.mxu1 %v6704_v5 }
 0x178   :  { %v6986_v30 = vpop.eup %6985  ;;  %7011 = vpow2.f32 %v5716_v19  ;;  %v5725_v40 = vmul.f32 -1.442695, %v7737_v57  ;;  %v2929_v25 = vmul.f32 %v6984_v12, %v7643_v6  ;;  %v7753_v29 = vpop.f32.mrf.mxu1 }
 0x179   :  { %v6988_v55 = vpop.eup %6987  ;;  %7013 = vrcp.f32 %v2642_v13  ;;  %v2651_v23 = vadd.f32 1.0, %v6986_v30  ;;  %v5726_v63 = vmul.f32 -1.442695, %v7740_v22 }
 0x17a   :  { %v6990_v53 = vpop.eup %6989  ;;  %v2930_v31 = vmul.f32 %v6988_v55, %v7648_v18  ;;  %7015 = vpow2.f32 %v5725_v40  ;;  %4753 = vmatpush1.bf16.msra.mxu1 %v6702_v11  ;;  %v7755_v39 = vpack.c.bf16 %v2929_v25, %v2919_v43  ;;  %v7759_v34 = vpop.f32.mrf.mxu1  ;;  %v6711_v11 = vld [vmem:[#allocation8 + $0x468] ss:$12 sps:$4 sm:$0xff]  }
 0x17b   :  { %v6992_v35 = vpop.eup %6991  ;;  %7017 = vrcp.f32 %v2651_v23  ;;  %v2652_v16 = vadd.f32 1.0, %v6990_v53  ;;  %4754 = vmatprep.subr.bf16.mxu1 %v6707_v10  ;;  %v6714_v10 = vld [vmem:[#allocation8 + $0x528] ss:$12 sps:$4 sm:$0xff]  }
 0x17c   :  { %v6994_v4 = vpop.eup %6993  ;;  %7019 = vpow2.f32 %v5726_v63  ;;  %v7751_v6 = vpack.c.bf16 %v2930_v31, %v2920_v28  ;;  %v2661_v5 = vadd.f32 1.0, %v6992_v35  ;;  %v7765_v55 = vpop.f32.mrf.mxu1  ;;  %v6719_v25 = vld [vmem:[#allocation8 + $0x454] ss:$12 sps:$4 sm:$0xff]   ;;  %v6717_v28 = vld [vmem:[#allocation8 + $0x450] ss:$12 sps:$4 sm:$0xff]  }
 0x17d   :  { %v6996_v42 = vpop.eup %6995  ;;  %7021 = vrcp.f32 %v2652_v16  ;;  %v2861_v40 = vmul.f32 %v6994_v4, %v7653_v32  ;;  %v6722_v31 = vld [vmem:[#allocation8 + $0x514] ss:$12 sps:$4 sm:$0xff]   ;;  %v6720_v32 = vld [vmem:[#allocation8 + $0x510] ss:$12 sps:$4 sm:$0xff]  }
 0x17e   :  { %v6998_v18 = vpop.eup %6997  ;;  %v2662_v24 = vadd.f32 1.0, %v6996_v42  ;;  %4658 = vmatprep.mubr.bf16.mxu1 %v7751_v6  ;;  %4755 = vmatpush1.bf16.msra.mxu1 %v6705_v26  ;;  %v6725_v16 = vld [vmem:[#allocation8 + $0x43c] ss:$12 sps:$4 sm:$0xff]  }
 0x17f   :  { %v7000_v50 = vpop.eup %6999  ;;  %4659 = vmatmul.mubr.bf16.gmra.mxu1 %v7755_v39  ;;  %4756 = vmatprep.subr.bf16.mxu1 %v6710_v52  ;;  %v2862_v12 = vmul.f32 %v6998_v18, %v7655_v45  ;;  %v353_v52 = vsub.s32 4, %v7521_v37 }
 0x180   :  { %v7002_v8 = vpop.eup %7001  ;;  %v2671_v41 = vadd.f32 1.0, %v7000_v50  ;;  %7023 = vrcp.f32 %v2662_v24  ;;  %v357_v50 = vsub.s32 5, %v7521_v37 }
 0x181   :  { %v7004_v56 = vpop.eup %7003  ;;  %v2871_v19 = vmul.f32 %v7002_v8, %v7660_v60  ;;  %v6728_v8 = vld [vmem:[#allocation8 + $0x4fc] ss:$12 sps:$4 sm:$0xff]  }
 0x182   :  { %v7006_v0 = vpop.eup %7005  ;;  %7025 = vrcp.f32 %v2671_v41  ;;  %v2672_v51 = vadd.f32 1.0, %v7004_v56  ;;  %4757 = vmatpush1.bf16.msra.mxu1 %v6708_v54 }
 0x183   :  { %v7008_v7 = vpop.eup %7007  ;;  %v2872_v13 = vmul.f32 %v7006_v0, %v7665_v9  ;;  %7027 = vrcp.f32 %v2661_v5  ;;  %4758 = vmatprep.subr.bf16.mxu1 %v6713_v62  ;;  %v7769_v53 = vpack.c.bf16 %v2871_v19, %v2861_v40  ;;  %v7771_v9 = vpop.f32.mrf.mxu1  ;;  %v6723_v62 = vld [vmem:[#allocation8 + $0x438] ss:$12 sps:$4 sm:$0xff]  }
 0x184   :  { %v7010_v30 = vpop.eup %7009  ;;  %7029 = vrcp.f32 %v2672_v51  ;;  %v2681_v43 = vadd.f32 1.0, %v7008_v7  ;;  %v6726_v0 = vld [vmem:[#allocation8 + $0x4f8] ss:$12 sps:$4 sm:$0xff]  }
 0x185   :  { %v7012_v23 = vpop.eup %7011  ;;  %v7767_v60 = vpack.c.bf16 %v2872_v13, %v2862_v12  ;;  %v7778_v5 = vpop.f32.mrf.mxu1  ;;  %v6731_v19 = vld [vmem:[#allocation8 + $0x424] ss:$12 sps:$4 sm:$0xff]   ;;  %v2881_v51 = vmul.f32 %v7010_v30, %v7673_v27  ;;  %v6737_v40 = vld [vmem:[#allocation8 + $0x40c] ss:$12 sps:$4 sm:$0xff]  }
 0x186   :  { %v7014_v63 = vpop.eup %7013  ;;  %v2682_v45 = vadd.f32 1.0, %v7012_v23  ;;  %4759 = vmatpush2.bf16.msra.mxu1 %v6711_v11  ;;  %v6734_v11 = vld [vmem:[#allocation8 + $0x4e4] ss:$12 sps:$4 sm:$0xff]  }
 0x187   :  { %v7016_v35 = vpop.eup %7015  ;;  %4701 = vmatprep.mubr.bf16.mxu0 %v7767_v60  ;;  %4760 = vmatprep.subr.bf16.mxu1 %v6719_v25  ;;  %v2882_v41 = vmul.f32 %v7014_v63, %v7681_v44  ;;  %v7787_v13 = vpop.f32.mrf.mxu1  ;;  %v6729_v44 = vld [vmem:[#allocation8 + $0x420] ss:$12 sps:$4 sm:$0xff]  }
 0x188   :  { %v7018_v26 = vpop.eup %7017  ;;  %v2691_v4 = vadd.f32 1.0, %v7016_v35  ;;  %4702 = vmatmul.mubr.bf16.vlgmr.msra.gmra.mxu0 %v7769_v53  ;;  %7031 = vrcp.f32 %v2682_v45  ;;  %v7796_v35 = vld [vmem:[#allocation7] sm:$0xff] }
 0x189   :  { %v7020_v42 = vpop.eup %7019  ;;  %4816 = vmatpush1.bf16.msra.mxu0 %v6714_v10  ;;  %v2891_v24 = vmul.f32 %v7018_v26, %v7684_v49  ;;  %v6732_v10 = vld [vmem:[#allocation8 + $0x4e0] ss:$12 sps:$4 sm:$0xff]   ;;  %v7794_v45 = vpop.f32.mrf.mxu1 }
 0x18a   :  { %v7022_v18 = vpop.eup %7021  ;;  %7033 = vrcp.f32 %v2691_v4  ;;  %v2692_v54 = vadd.f32 1.0, %v7020_v42  ;;  %4817 = vmatprep.subr.bf16.mxu0 %v6722_v31  ;;  %4761 = vmatpush2.bf16.msra.mxu1 %v6717_v28  ;;  %v6735_v28 = vld [vmem:[#allocation8 + $0x408] ss:$12 sps:$4 sm:$0xff]   ;;  %v6740_v31 = vld [vmem:[#allocation8 + $0x4cc] ss:$12 sps:$4 sm:$0xff]  }
 0x18b   :  { %v2892_v56 = vmul.f32 %v7022_v18, %v7693_v21  ;;  %7035 = vrcp.f32 %v2681_v43  ;;  %4762 = vmatprep.subr.bf16.mxu1 %v6725_v16  ;;  %v7785_v12 = vpack.c.bf16 %v2891_v24, %v2881_v51  ;;  %v7799_v43 = vrot.slane %v7796_v35, %v353_v52  ;;  %v6743_v16 = vld [vmem:[#allocation8 + $0x3f4] ss:$12 sps:$4 sm:$0xff]   ;;  %v7810_v52 = vpop.f32.mrf.mxu1 }
 0x18c   :  { %7037 = vrcp.f32 %v2692_v54  ;;  %v6746_v18 = vld [vmem:[#allocation8 + $0x4b4] ss:$12 sps:$4 sm:$0xff]  }
 0x18d   :  { %v7783_v49 = vpack.c.bf16 %v2892_v56, %v2882_v41  ;;  %4818 = vmatpush1.bf16.msra.mxu0 %v6720_v32  ;;  %v7024_v7 = vpop.eup %7023  ;;  %v6738_v32 = vld [vmem:[#allocation8 + $0x4c8] ss:$12 sps:$4 sm:$0xff]  }
 0x18e   :  { %4819 = vmatprep.subr.bf16.mxu0 %v6728_v8  ;;  %4763 = vmatpush2.bf16.msra.mxu1 %v6723_v62  ;;  %v2902_v25 = vmul.f32 %v7024_v7, %v7703_v14  ;;  %v7805_v14 = vrot.slane %v7796_v35, %v357_v50  ;;  %v6741_v62 = vld [vmem:[#allocation8 + $0x3f0] ss:$12 sps:$4 sm:$0xff]  }
 0x18f   :  { %v7026_v21 = vpop.eup %7025  ;;  %4711 = vmatprep.mubr.bf16.mxu0 %v7783_v49  ;;  %4764 = vmatprep.subr.bf16.mxu1 %v6731_v19  ;;  %v6749_v19 = vld [vmem:[#allocation8 + $0x3dc] ss:$12 sps:$4 sm:$0xff]  }
 0x190   :  { %v7028_v27 = vpop.eup %7027  ;;  %4712 = vmatmul.mubr.bf16.gmra.mxu0 %v7785_v12  ;;  %v2911_v23 = vmul.f32 %v7026_v21, %v7711_v3  ;;  %v7821_v21 = vpop.f32.mrf.mxu1 }
 0x191   :  { %v7030_v30 = vpop.eup %7029  ;;  %4820 = vmatpush1.bf16.msra.mxu0 %v6726_v0  ;;  %v2901_v26 = vmul.f32 %v7028_v27, %v7697_v2  ;;  %v6744_v0 = vld [vmem:[#allocation8 + $0x4b0] ss:$12 sps:$4 sm:$0xff]  }
 0x192   :  { %v2912_v63 = vmul.f32 %v7030_v30, %v7715_v46  ;;  %4821 = vmatprep.subr.bf16.mxu0 %v6734_v11  ;;  %4765 = vmatpush2.bf16.msra.mxu1 %v6729_v44 }
 0x193   :  { %4766 = vmatprep.subr.bf16.mxu1 %v6737_v40  ;;  %v7808_v42 = vpack.c.bf16 %v2911_v23, %v2901_v26 }
 0x194   :  { %v7802_v4 = vpack.c.bf16 %v2912_v63, %v2902_v25 }
 0x195   :  { %4822 = vmatpush1.bf16.msra.mxu0 %v6732_v10  ;;  %v7032_v3 = vpop.eup %7031  ;;  %v1975_v46 = vpop.f32.mrf.mxu0  ;;  %v6752_v10 = vld [vmem:[#allocation8 + $0x49c] ss:$12 sps:$4 sm:$0xff]  }
 0x196   :  { %4721 = vmatprep.mubr.bf16.mxu0 %v7802_v4  ;;  %4823 = vmatprep.subr.bf16.mxu0 %v6740_v31  ;;  %v1976_v2 = vadd.f32 %v1975_v46, %v7799_v43  ;;  %v2922_v51 = vmul.f32 %v7032_v3, %v7728_v48 }
 0x197   :  { %v7034_v24 = vpop.eup %7033  ;;  %v1977_v50 = vpop.f32.mrf.mxu0  ;;  %4767 = vmatpush2.bf16.msra.mxu1 %v6735_v28  ;;  %v6755_v28 = vld [vmem:[#allocation8 + $0x3c4] ss:$12 sps:$4 sm:$0xff]  }
 0x198   :  { %v7036_v54 = vpop.eup %7035  ;;  %4722 = vmatmul.mubr.bf16.gmra.mxu0 %v7808_v42  ;;  %v7815_v41 = vadd.f32 %v7744_v17, %v1976_v2  ;;  %v1978_v56 = vadd.f32 %v1977_v50, %v7805_v14  ;;  %4768 = vmatprep.subr.bf16.mxu1 %v6743_v16  ;;  %v2931_v7 = vmul.f32 %v7034_v24, %v7737_v57  ;;  %v6747_v57 = vld [vmem:[#allocation8 + $0x3d8] ss:$12 sps:$4 sm:$0xff]   ;;  %v6756_v50 = vld [vmem:[#allocation8 + $0x480] ss:$12 sps:$4 sm:$0xff]  }
 0x199   :  { %v7038_v8 = vpop.eup %7037  ;;  %4824 = vmatpush1.bf16.msra.mxu0 %v6738_v32  ;;  %v1979_v11 = vpop.f32.mrf.mxu0  ;;  %v2921_v30 = vmul.f32 %v7036_v54, %v7725_v36  ;;  %v6758_v16 = vld [vmem:[#allocation8 + $0x484] ss:$12 sps:$4 sm:$0xff]  }
 0x19a   :  { %v2932_v44 = vmul.f32 %v7038_v8, %v7740_v22  ;;  %4825 = vmatprep.subr.bf16.mxu0 %v6746_v18  ;;  %v5657_v17 = vmul.f32 -1.442695, %v7815_v41  ;;  %v7825_v40 = vadd.f32 %v7753_v29, %v1978_v56  ;;  %v1980_v27 = vadd.f32 %v1979_v11, %v7799_v43  ;;  %v6750_v29 = vld [vmem:[#allocation8 + $0x498] ss:$12 sps:$4 sm:$0xff]   ;;  %v7839_v32 = vpop.f32.mrf.mxu1  ;;  %v6753_v18 = vld [vmem:[#allocation8 + $0x3c0] ss:$12 sps:$4 sm:$0xff]  }
 0x19b   :  { %v1981_v25 = vpop.f32.mrf.mxu0  ;;  %4769 = vmatpush2.bf16.msra.mxu1 %v6741_v62  ;;  %v7837_v31 = vpack.c.bf16 %v2931_v7, %v2921_v30  ;;  %v6761_v56 = vld [vmem:[#allocation8 + $0x5ec] ss:$12 sps:$4 sm:$0xff]  }
 0x19c   :  { %v7829_v48 = vpack.c.bf16 %v2932_v44, %v2922_v51  ;;  %7039 = vpow2.f32 %v5657_v17  ;;  %v5658_v22 = vmul.f32 -1.442695, %v7825_v40  ;;  %v7833_v23 = vadd.f32 %v7759_v34, %v1980_v27  ;;  %4770 = vmatprep.subr.bf16.mxu1 %v6749_v19  ;;  %v2074_v8 = vpop.f32.mrf.mxu1 }
 0x19d   :  { %v1982_v63 = vadd.f32 %v1981_v25, %v7805_v14  ;;  %4826 = vmatpush1.bf16.msra.mxu0 %v6744_v0  ;;  %v1985_v36 = vpop.f32.mrf.mxu0 }
 0x19e   :  { %4731 = vmatprep.mubr.bf16.mxu0 %v7829_v48  ;;  %4827 = vmatprep.subr.bf16.mxu0 %v6752_v10  ;;  %7041 = vpow2.f32 %v5658_v22  ;;  %v5667_v26 = vmul.f32 -1.442695, %v7833_v23  ;;  %v1986_v3 = vadd.f32 %v1985_v36, %v7799_v43  ;;  %v6759_v10 = vld [vmem:[#allocation8 + $0x5e8] ss:$12 sps:$4 sm:$0xff]   ;;  %v2078_v27 = vpop.f32.mrf.mxu1 }
 0x19f   :  { %v7843_v34 = vadd.f32 %v7765_v55, %v1982_v63  ;;  %v1987_v46 = vpop.f32.mrf.mxu0  ;;  %4771 = vmatpush2.bf16.msra.mxu1 %v6747_v57  ;;  %v6785_v55 = vld [vmem:[#allocation8 + $0x6ac] ss:$12 sps:$4 sm:$0xff]  }
 0x1a0   :  { %4732 = vmatmul.mubr.bf16.gmra.mxu0 %v7837_v31  ;;  %7043 = vpow2.f32 %v5667_v26  ;;  %v7849_v2 = vadd.f32 %v7771_v9, %v1986_v3  ;;  %v1988_v54 = vadd.f32 %v1987_v46, %v7805_v14  ;;  %4772 = vmatprep.subr.bf16.mxu1 %v6755_v28  ;;  %v6762_v28 = vld [vmem:[#allocation8 + $0x5d0] ss:$12 sps:$4 sm:$0xff]   ;;  %v2080_v26 = vpop.f32.mrf.mxu1 }
 0x1a1   :  { %v5668_v24 = vmul.f32 -1.442695, %v7843_v34  ;;  %4828 = vmatpush1.bf16.msra.mxu0 %v6750_v29  ;;  %v1989_v62 = vpop.f32.mrf.mxu0  ;;  %v6767_v3 = vld [vmem:[#allocation8 + $0x5bc] ss:$12 sps:$4 sm:$0xff]  }
 0x1a2   :  { %4829 = vmatprep.subr.bf16.mxu0 %v6758_v16  ;;  %v5677_v0 = vmul.f32 -1.442695, %v7849_v2  ;;  %v7854_v19 = vadd.f32 %v7778_v5, %v1988_v54  ;;  %v1990_v51 = vadd.f32 %v1989_v62, %v7799_v43  ;;  %v6764_v5 = vld [vmem:[#allocation8 + $0x5d4] ss:$12 sps:$4 sm:$0xff]  }
 0x1a3   :  { %7045 = vpow2.f32 %v5668_v24  ;;  %v1991_v9 = vpop.f32.mrf.mxu0  ;;  %4773 = vmatpush2.bf16.msra.mxu1 %v6753_v18 }
 0x1a4   :  { %7047 = vpow2.f32 %v5677_v0  ;;  %v5678_v7 = vmul.f32 -1.442695, %v7854_v19  ;;  %v7859_v44 = vadd.f32 %v7787_v13, %v1990_v51  ;;  %v1992_v11 = vadd.f32 %v1991_v9, %v7805_v14  ;;  %4888 = vmatprep.subr.bf16.mxu1 %v6785_v55 }
 0x1a5   :  { %4830 = vmatpush1.bf16.msra.mxu0 %v6756_v50  ;;  %v1995_v17 = vpop.f32.mrf.mxu0 }
 0x1a6   :  { %4831 = vmatprep.subr.bf16.mxu0 %v6761_v56  ;;  %7049 = vpow2.f32 %v5678_v7  ;;  %v5687_v30 = vmul.f32 -1.442695, %v7859_v44  ;;  %v7864_v25 = vadd.f32 %v7794_v45, %v1992_v11  ;;  %v1996_v57 = vadd.f32 %v1995_v17, %v7799_v43  ;;  %v6765_v56 = vld [vmem:[#allocation8 + $0x5b8] ss:$12 sps:$4 sm:$0xff]  }
 0x1a7   :  { %v1997_v22 = vpop.f32.mrf.mxu0  ;;  %v6770_v7 = vld [vmem:[#allocation8 + $0x5a4] ss:$12 sps:$4 sm:$0xff]  }
 0x1a8   :  { %7051 = vpow2.f32 %v5687_v30  ;;  %v5688_v13 = vmul.f32 -1.442695, %v7864_v25  ;;  %v7869_v63 = vadd.f32 %v7810_v52, %v1996_v57  ;;  %v1998_v29 = vadd.f32 %v1997_v22, %v7805_v14 }
 0x1a9   :  { %4832 = vmatpush2.bf16.msra.mxu0 %v6759_v10  ;;  %v7040_v36 = vpop.eup %7039  ;;  %v1999_v16 = vpop.f32.mrf.mxu0  ;;  %v361_v22 = vsub.s32 6, %v7521_v37 }
 0x1aa   :  { %4833 = vmatprep.subr.bf16.mxu0 %v6764_v5  ;;  %v2623_v45 = vadd.f32 1.0, %v7040_v36  ;;  %7053 = vpow2.f32 %v5688_v13  ;;  %v5697_v46 = vmul.f32 -1.442695, %v7869_v63  ;;  %v7874_v18 = vadd.f32 %v7821_v21, %v1998_v29  ;;  %v2082_v21 = vpop.f32.mrf.mxu1 }
 0x1ab   :  { %v7042_v24 = vpop.eup %7041  ;;  %v2000_v52 = vadd.f32 %v1999_v16, %v7799_v43  ;;  %v2001_v54 = vpop.f32.mrf.mxu0 }
 0x1ac   :  { %7055 = vrcp.f32 %v2623_v45  ;;  %v2624_v50 = vadd.f32 1.0, %v7042_v24  ;;  %v5698_v55 = vmul.f32 -1.442695, %v7874_v18  ;;  %v2002_v62 = vadd.f32 %v2001_v54, %v7805_v14  ;;  %v2084_v45 = vpop.f32.mrf.mxu1 }
 0x1ad   :  { %4834 = vmatpush2.bf16.msra.mxu0 %v6762_v28  ;;  %v7044_v0 = vpop.eup %7043  ;;  %7057 = vpow2.f32 %v5697_v46  ;;  %v7880_v51 = vadd.f32 %v7839_v32, %v2000_v52  ;;  %v2005_v9 = vpop.f32.mrf.mxu0  ;;  %v365_v32 = vsub.s32 7, %v7521_v37  ;;  %v6773_v46 = vld [vmem:[#allocation8 + $0x58c] ss:$12 sps:$4 sm:$0xff]  }
 0x1ae   :  { %4835 = vmatprep.subr.bf16.mxu0 %v6767_v3  ;;  %7059 = vrcp.f32 %v2624_v50  ;;  %v2633_v11 = vadd.f32 1.0, %v7044_v0  ;;  %v7882_v10 = vadd.f32 %v2074_v8, %v2002_v62  ;;  %v2006_v17 = vadd.f32 %v2005_v9, %v7799_v43  ;;  %v6768_v8 = vld [vmem:[#allocation8 + $0x5a0] ss:$12 sps:$4 sm:$0xff]  }
 0x1af   :  { %7061 = vpow2.f32 %v5698_v55  ;;  %v5707_v30 = vmul.f32 -1.442695, %v7880_v51  ;;  %v2007_v57 = vpop.f32.mrf.mxu0  ;;  %v7897_v62 = vrot.slane %v7796_v35, %v361_v22 }
 0x1b0   :  { %v7046_v5 = vpop.eup %7045  ;;  %7063 = vrcp.f32 %v2633_v11  ;;  %v5708_v29 = vmul.f32 -1.442695, %v7882_v10  ;;  %v7889_v28 = vadd.f32 %v2078_v27, %v2006_v17  ;;  %v2008_v16 = vadd.f32 %v2007_v57, %v7805_v14  ;;  %v6771_v11 = vld [vmem:[#allocation8 + $0x588] ss:$12 sps:$4 sm:$0xff]  }
 0x1b1   :  { %v2634_v13 = vadd.f32 1.0, %v7046_v5  ;;  %4836 = vmatpush2.bf16.msra.mxu0 %v6765_v56  ;;  %v7048_v36 = vpop.eup %7047  ;;  %7065 = vpow2.f32 %v5707_v30  ;;  %v2009_v3 = vpop.f32.mrf.mxu0  ;;  %v7900_v56 = vrot.slane %v7796_v35, %v365_v32  ;;  %v6776_v30 = vld [vmem:[#allocation8 + $0x574] ss:$12 sps:$4 sm:$0xff]  }
 0x1b2   :  { %4837 = vmatprep.subr.bf16.mxu0 %v6770_v7  ;;  %v2643_v24 = vadd.f32 1.0, %v7048_v36  ;;  %v5717_v52 = vmul.f32 -1.442695, %v7889_v28  ;;  %v2010_v54 = vadd.f32 %v2009_v3, %v7799_v43  ;;  %v7894_v27 = vadd.f32 %v2080_v26, %v2008_v16  ;;  %v6774_v16 = vld [vmem:[#allocation8 + $0x570] ss:$12 sps:$4 sm:$0xff]  }
 0x1b3   :  { %7067 = vrcp.f32 %v2634_v13  ;;  %v7050_v50 = vpop.eup %7049  ;;  %v2011_v55 = vpop.f32.mrf.mxu0 }
 0x1b4   :  { %7069 = vpow2.f32 %v5708_v29  ;;  %v2644_v0 = vadd.f32 1.0, %v7050_v50  ;;  %v7902_v9 = vadd.f32 %v2082_v21, %v2010_v54  ;;  %v2012_v7 = vadd.f32 %v2011_v55, %v7805_v14 }
 0x1b5   :  { %7071 = vrcp.f32 %v2643_v24  ;;  %4838 = vmatpush2.bf16.msra.mxu0 %v6768_v8  ;;  %v7052_v43 = vpop.eup %7051  ;;  %v5718_v26 = vmul.f32 -1.442695, %v7894_v27  ;;  %v2194_v5 = vpop.f32.mrf.mxu0 }
 0x1b6   :  { %7073 = vpow2.f32 %v5717_v52  ;;  %v2121_v17 = vpop.f32.mrf.mxu1  ;;  %4839 = vmatprep.subr.bf16.mxu0 %v6773_v46  ;;  %v2653_v57 = vadd.f32 1.0, %v7052_v43  ;;  %v5727_v35 = vmul.f32 -1.442695, %v7902_v9  ;;  %v7907_v22 = vadd.f32 %v2084_v45, %v2012_v7  ;;  %v6779_v52 = vld [vmem:[#allocation8 + $0x55c] ss:$12 sps:$4 sm:$0xff]  }
 0x1b7   :  { %7075 = vrcp.f32 %v2644_v0  ;;  %v7054_v21 = vpop.eup %7053  ;;  %v2122_v14 = vadd.f32 %v2121_v17, %v7897_v62  ;;  %v2196_v13 = vpop.f32.mrf.mxu0 }
 0x1b8   :  { %7077 = vpow2.f32 %v5718_v26  ;;  %v2123_v32 = vpop.f32.mrf.mxu1  ;;  %v2654_v29 = vadd.f32 1.0, %v7054_v21  ;;  %v5728_v8 = vmul.f32 -1.442695, %v7907_v22 }
 0x1b9   :  { %7079 = vrcp.f32 %v2653_v57  ;;  %v2124_v36 = vadd.f32 %v2123_v32, %v7900_v56  ;;  %4840 = vmatpush2.bf16.msra.mxu0 %v6771_v11  ;;  %v7056_v3 = vpop.eup %7055  ;;  %v7912_v46 = vadd.f32 %v2194_v5, %v2122_v14  ;;  %v2198_v24 = vpop.f32.mrf.mxu0 }
 0x1ba   :  { %7081 = vpow2.f32 %v5727_v35  ;;  %v2125_v45 = vpop.f32.mrf.mxu1  ;;  %4841 = vmatprep.subr.bf16.mxu0 %v6776_v30  ;;  %v7058_v54 = vpop.eup %7057  ;;  %v6777_v35 = vld [vmem:[#allocation8 + $0x558] ss:$12 sps:$4 sm:$0xff]  }
 0x1bb   :  { %7083 = vrcp.f32 %v2654_v29  ;;  %v7914_v50 = vadd.f32 %v2196_v13, %v2124_v36  ;;  %v2126_v55 = vadd.f32 %v2125_v45, %v7897_v62  ;;  %v7060_v0 = vpop.eup %7059  ;;  %v2663_v7 = vadd.f32 1.0, %v7058_v54  ;;  %v2200_v26 = vpop.f32.mrf.mxu0  ;;  %v6782_v29 = vld [vmem:[#allocation8 + $0x544] ss:$12 sps:$4 sm:$0xff]  }
 0x1bc   :  { %7085 = vpow2.f32 %v5728_v8  ;;  %v5659_v11 = vmul.f32 -1.442695, %v7912_v46  ;;  %v2127_v43 = vpop.f32.mrf.mxu1  ;;  %v7062_v17 = vpop.eup %7061 }
 0x1bd   :  { %v5660_v5 = vmul.f32 -1.442695, %v7914_v50  ;;  %v7919_v57 = vadd.f32 %v2198_v24, %v2126_v55  ;;  %v2128_v30 = vadd.f32 %v2127_v43, %v7900_v56  ;;  %4842 = vmatpush2.bf16.msra.mxu0 %v6774_v16  ;;  %v7064_v21 = vpop.eup %7063  ;;  %7087 = vrcp.f32 %v2663_v7  ;;  %v2204_v13 = vpop.f32.mrf.mxu0 }
 0x1be   :  { %v2664_v14 = vadd.f32 1.0, %v7062_v17  ;;  %v2131_v32 = vpop.f32.mrf.mxu1  ;;  %4843 = vmatprep.subr.bf16.mxu0 %v6779_v52  ;;  %v7066_v8 = vpop.eup %7065  ;;  %v2873_v36 = vmul.f32 %v7064_v21, %v7833_v23  ;;  %7089 = vpow2.f32 %v5659_v11  ;;  %v2863_v55 = vmul.f32 %v7056_v3, %v7815_v41  ;;  %v6780_v11 = vld [vmem:[#allocation8 + $0x540] ss:$12 sps:$4 sm:$0xff]  }
 0x1bf   :  { %v5669_v45 = vmul.f32 -1.442695, %v7919_v57  ;;  %v7924_v54 = vadd.f32 %v2200_v26, %v2128_v30  ;;  %v2673_v16 = vadd.f32 1.0, %v7066_v8  ;;  %v2132_v7 = vadd.f32 %v2131_v32, %v7897_v62  ;;  %v2206_v17 = vpop.f32.mrf.mxu0  ;;  %v6786_v32 = vld [vmem:[#allocation8 + $0x170] ss:$12 sps:$4 sm:$0xff]  }
 0x1c0   :  { %v7068_v24 = vpop.eup %7067  ;;  %7091 = vrcp.f32 %v2664_v14  ;;  %v2133_v43 = vpop.f32.mrf.mxu1  ;;  %v2864_v52 = vmul.f32 %v7060_v0, %v7825_v40  ;;  %v7934_v40 = vpack.c.bf16 %v2873_v36, %v2863_v55 }
 0x1c1   :  { %v7070_v15 = vpop.eup %7069  ;;  %v2874_v37 = vmul.f32 %v7068_v24, %v7843_v34  ;;  %7093 = vpow2.f32 %v5660_v5  ;;  %v5670_v23 = vmul.f32 -1.442695, %v7924_v54  ;;  %4844 = vmatpush2.bf16.msra.mxu0 %v6777_v35  ;;  %v2134_v41 = vadd.f32 %v2133_v43, %v7900_v56  ;;  %v2208_v14 = vpop.f32.mrf.mxu0  ;;  %v6783_v5 = vld [vmem:[#allocation8 + $0x6a8] ss:$12 sps:$4 sm:$0xff]  }
 0x1c2   :  { %v7072_v26 = vpop.eup %7071  ;;  %7095 = vrcp.f32 %v2673_v16  ;;  %v2674_v30 = vadd.f32 1.0, %v7070_v15  ;;  %v7932_v3 = vadd.f32 %v2204_v13, %v2132_v7  ;;  %v2135_v21 = vpop.f32.mrf.mxu1  ;;  %4845 = vmatprep.subr.bf16.mxu0 %v6782_v29  ;;  %8587 = vst [vmem:[#allocation16_spill] sm:$0xff] %v7934_v40  ;;  %v6790_v29 = vld [vmem:[#allocation8 + $0x694] ss:$12 sps:$4 sm:$0xff]  }
 0x1c3   :  { %v7074_v8 = vpop.eup %7073  ;;  %7097 = vpow2.f32 %v5669_v45  ;;  %v2136_v34 = vadd.f32 %v2135_v21, %v7897_v62  ;;  %v7937_v0 = vpack.c.bf16 %v2874_v37, %v2864_v52  ;;  %v7940_v13 = vadd.f32 %v2206_v17, %v2134_v41  ;;  %v2210_v7 = vpop.f32.mrf.mxu0 }
 0x1c4   :  { %v7076_v35 = vpop.eup %7075  ;;  %7099 = vrcp.f32 %v2674_v30  ;;  %v2683_v15 = vadd.f32 1.0, %v7074_v8  ;;  %v5679_v24 = vmul.f32 -1.442695, %v7932_v3  ;;  %v2137_v16 = vpop.f32.mrf.mxu1 }
 0x1c5   :  { %8588 = vst [vmem:[#allocation17_spill] sm:$0xff] %v7937_v0  ;;  %v7078_v43 = vpop.eup %7077  ;;  %7101 = vpow2.f32 %v5670_v23  ;;  %v2138_v36 = vadd.f32 %v2137_v16, %v7900_v56  ;;  %v7943_v45 = vadd.f32 %v2208_v14, %v2136_v34  ;;  %4774 = vmatprep.mubr.bf16.mxu1 %v7937_v0  ;;  %4846 = vmatpush2.bf16.msra.mxu0 %v6780_v11  ;;  %v5680_v52 = vmul.f32 -1.442695, %v7940_v13  ;;  %v2214_v17 = vpop.f32.mrf.mxu0  ;;  %v6788_v11 = vld [vmem:[#allocation8 + $0x690] ss:$12 sps:$4 sm:$0xff]  }
 0x1c6   :  { %v7080_v37 = vpop.eup %7079  ;;  %7103 = vrcp.f32 %v2683_v15  ;;  %v2684_v55 = vadd.f32 1.0, %v7078_v43  ;;  %v2141_v30 = vpop.f32.mrf.mxu1  ;;  %4775 = vmatmul.mubr.bf16.vlgmr.msra.gmra.mxu1 %v7934_v40  ;;  %6005 = vmatprep.subr.bf16.mxu0 %v6786_v32  ;;  %v2883_v23 = vmul.f32 %v7072_v26, %v7849_v2  ;;  %v6795_v32 = vld [vmem:[#allocation8 + $0x67c] ss:$12 sps:$4 sm:$0xff]  }
 0x1c7   :  { %v7082_v41 = vpop.eup %7081  ;;  %7105 = vpow2.f32 %v5679_v24  ;;  %v5689_v21 = vmul.f32 -1.442695, %v7943_v45  ;;  %v2142_v14 = vadd.f32 %v2141_v30, %v7897_v62  ;;  %4889 = vmatpush1.bf16.msra.mxu1 %v6783_v5  ;;  %v2893_v34 = vmul.f32 %v7080_v37, %v7859_v44  ;;  %v2216_v40 = vpop.f32.mrf.mxu0 }
 0x1c8   :  { %v7084_v8 = vpop.eup %7083  ;;  %7107 = vrcp.f32 %v2684_v55  ;;  %v2693_v15 = vadd.f32 1.0, %v7082_v41  ;;  %v7952_v16 = vadd.f32 %v2210_v7, %v2138_v36  ;;  %v2143_v43 = vpop.f32.mrf.mxu1  ;;  %4890 = vmatprep.subr.bf16.mxu1 %v6790_v29  ;;  %v2884_v5 = vmul.f32 %v7076_v35, %v7854_v19  ;;  %v6793_v35 = vld [vmem:[#allocation8 + $0x678] ss:$12 sps:$4 sm:$0xff]  }
 0x1c9   :  { %v7086_v0 = vpop.eup %7085  ;;  %v2894_v2 = vmul.f32 %v7084_v8, %v7864_v25  ;;  %7109 = vpow2.f32 %v5680_v52  ;;  %v2144_v26 = vadd.f32 %v2143_v43, %v7900_v56  ;;  %v7956_v24 = vadd.f32 %v2214_v17, %v2142_v14  ;;  %v2218_v36 = vpop.f32.mrf.mxu0 }
 0x1ca   :  { %7111 = vrcp.f32 %v2693_v15  ;;  %v2694_v44 = vadd.f32 1.0, %v7086_v0  ;;  %v5690_v37 = vmul.f32 -1.442695, %v7952_v16  ;;  %v2145_v7 = vpop.f32.mrf.mxu1  ;;  %v7088_v55 = vpop.eup %7087  ;;  %v7966_v0 = vpack.c.bf16 %v2893_v34, %v2883_v23 }
 0x1cb   :  { %7113 = vpow2.f32 %v5689_v21  ;;  %v5699_v29 = vmul.f32 -1.442695, %v7956_v24  ;;  %v2146_v30 = vadd.f32 %v2145_v7, %v7897_v62  ;;  %v7962_v25 = vadd.f32 %v2216_v40, %v2144_v26  ;;  %4891 = vmatpush1.bf16.msra.mxu1 %v6788_v11  ;;  %v7090_v52 = vpop.eup %7089  ;;  %v2220_v19 = vpop.f32.mrf.mxu0  ;;  %v6800_v40 = vld [vmem:[#allocation8 + $0x664] ss:$12 sps:$4 sm:$0xff]  }
 0x1cc   :  { %7115 = vrcp.f32 %v2694_v44  ;;  %v2147_v17 = vpop.f32.mrf.mxu1  ;;  %v7964_v41 = vpack.c.bf16 %v2894_v2, %v2884_v5  ;;  %8590 = vst [vmem:[#allocation19_spill] sm:$0xff] %v7966_v0  ;;  %4892 = vmatprep.subr.bf16.mxu1 %v6795_v32  ;;  %v2625_v8 = vadd.f32 1.0, %v7090_v52  ;;  %v6798_v52 = vld [vmem:[#allocation8 + $0x660] ss:$12 sps:$4 sm:$0xff]  }
 0x1cd   :  { %v7092_v14 = vpop.eup %7091  ;;  %7117 = vpow2.f32 %v5690_v37  ;;  %v5700_v21 = vmul.f32 -1.442695, %v7962_v25  ;;  %v2148_v15 = vadd.f32 %v2147_v17, %v7900_v56  ;;  %v7970_v11 = vadd.f32 %v2218_v36, %v2146_v30  ;;  %v2224_v26 = vpop.f32.mrf.mxu0 }
 0x1ce   :  { %8589 = vst [vmem:[#allocation18_spill] sm:$0xff] %v7964_v41  ;;  %v7094_v43 = vpop.eup %7093  ;;  %7119 = vpow2.f32 %v5699_v29  ;;  %4784 = vmatprep.mubr.bf16.mxu1 %v7964_v41  ;;  %v2151_v2 = vpop.f32.mrf.mxu1  ;;  %v2903_v37 = vmul.f32 %v7088_v55, %v7869_v63  ;;  %v2904_v63 = vmul.f32 %v7092_v14, %v7874_v18 }
 0x1cf   :  { %v7096_v23 = vpop.eup %7095  ;;  %7121 = vrcp.f32 %v2625_v8  ;;  %v2626_v34 = vadd.f32 1.0, %v7094_v43  ;;  %v2152_v32 = vadd.f32 %v2151_v2, %v7897_v62  ;;  %v7974_v5 = vadd.f32 %v2220_v19, %v2148_v15  ;;  %4785 = vmatmul.mubr.bf16.gmra.mxu1 %v7966_v0  ;;  %v2226_v30 = vpop.f32.mrf.mxu0  ;;  %v6805_v43 = vld [vmem:[#allocation8 + $0x64c] ss:$12 sps:$4 sm:$0xff]  }
 0x1d0   :  { %v7098_v44 = vpop.eup %7097  ;;  %v2913_v7 = vmul.f32 %v7096_v23, %v7880_v51  ;;  %7123 = vpow2.f32 %v5700_v21  ;;  %v5709_v36 = vmul.f32 -1.442695, %v7970_v11  ;;  %v2153_v29 = vpop.f32.mrf.mxu1  ;;  %4893 = vmatpush1.bf16.msra.mxu1 %v6793_v35 }
 0x1d1   :  { %v7100_v17 = vpop.eup %7099  ;;  %7125 = vrcp.f32 %v2626_v34  ;;  %v2635_v8 = vadd.f32 1.0, %v7098_v44  ;;  %v5710_v19 = vmul.f32 -1.442695, %v7974_v5  ;;  %v2154_v15 = vadd.f32 %v2153_v29, %v7900_v56  ;;  %4894 = vmatprep.subr.bf16.mxu1 %v6800_v40  ;;  %v2228_v35 = vpop.f32.mrf.mxu0 }
 0x1d2   :  { %v7102_v2 = vpop.eup %7101  ;;  %v2914_v51 = vmul.f32 %v7100_v17, %v7882_v10  ;;  %7127 = vpow2.f32 %v5709_v36  ;;  %v7984_v55 = vadd.f32 %v2224_v26, %v2152_v32  ;;  %v2155_v21 = vpop.f32.mrf.mxu1  ;;  %v7992_v14 = vpack.c.bf16 %v2913_v7, %v2903_v37  ;;  %v6803_v26 = vld [vmem:[#allocation8 + $0x648] ss:$12 sps:$4 sm:$0xff]  }
 0x1d3   :  { %v7104_v23 = vpop.eup %7103  ;;  %7129 = vrcp.f32 %v2635_v8  ;;  %v2636_v34 = vadd.f32 1.0, %v7102_v2  ;;  %v2156_v44 = vadd.f32 %v2155_v21, %v7897_v62  ;;  %v7987_v0 = vadd.f32 %v2226_v30, %v2154_v15  ;;  %v2230_v10 = vpop.f32.mrf.mxu0  ;;  %v6810_v30 = vld [vmem:[#allocation8 + $0x634] ss:$12 sps:$4 sm:$0xff]   ;;  %v6815_v21 = vld [vmem:[#allocation8 + $0x61c] ss:$12 sps:$4 sm:$0xff]  }
 0x1d4   :  { %v7106_v29 = vpop.eup %7105  ;;  %7131 = vpow2.f32 %v5710_v19  ;;  %v5719_v40 = vmul.f32 -1.442695, %v7984_v55  ;;  %v2157_v41 = vpop.f32.mrf.mxu1  ;;  %v7990_v18 = vpack.c.bf16 %v2914_v51, %v2904_v63  ;;  %4895 = vmatpush1.bf16.msra.mxu1 %v6798_v52 }
 0x1d5   :  { %v7108_v32 = vpop.eup %7107  ;;  %7133 = vrcp.f32 %v2636_v34  ;;  %v2645_v36 = vadd.f32 1.0, %v7106_v29  ;;  %v5720_v17 = vmul.f32 -1.442695, %v7987_v0  ;;  %v2158_v62 = vadd.f32 %v2157_v41, %v7900_v56  ;;  %4896 = vmatprep.subr.bf16.mxu1 %v6805_v43  ;;  %v6808_v56 = vld [vmem:[#allocation8 + $0x630] ss:$12 sps:$4 sm:$0xff]  }
 0x1d6   :  { %v7110_v8 = vpop.eup %7109  ;;  %7135 = vpow2.f32 %v5719_v40  ;;  %v7996_v19 = vadd.f32 %v2228_v35, %v2156_v44  ;;  %4794 = vmatprep.mubr.bf16.mxu1 %v7990_v18  ;;  %v2924_v34 = vmul.f32 %v7108_v32, %v7894_v27  ;;  %v2923_v40 = vmul.f32 %v7104_v23, %v7889_v28  ;;  %v6820_v27 = vld [vmem:[#allocation8 + $0x604] ss:$12 sps:$4 sm:$0xff]  }
 0x1d7   :  { %v7112_v15 = vpop.eup %7111  ;;  %7137 = vrcp.f32 %v2645_v36  ;;  %v2646_v37 = vadd.f32 1.0, %v7110_v8  ;;  %v7999_v7 = vadd.f32 %v2230_v10, %v2158_v62  ;;  %4795 = vmatmul.mubr.bf16.gmra.mxu1 %v7992_v14  ;;  %v8010_v36 = vpop.f32.mrf.mxu1 }
 0x1d8   :  { %v7114_v52 = vpop.eup %7113  ;;  %7139 = vpow2.f32 %v5720_v17  ;;  %v5729_v2 = vmul.f32 -1.442695, %v7996_v19  ;;  %4897 = vmatpush1.bf16.msra.mxu1 %v6803_v26  ;;  %v2933_v43 = vmul.f32 %v7112_v15, %v7902_v9  ;;  %v6813_v17 = vld [vmem:[#allocation8 + $0x618] ss:$12 sps:$4 sm:$0xff]  }
 0x1d9   :  { %v7116_v41 = vpop.eup %7115  ;;  %7141 = vrcp.f32 %v2646_v37  ;;  %v2655_v63 = vadd.f32 1.0, %v7114_v52  ;;  %v5730_v51 = vmul.f32 -1.442695, %v7999_v7  ;;  %4898 = vmatprep.subr.bf16.mxu1 %v6810_v30  ;;  %v8015_v28 = vpop.f32.mrf.mxu1  ;;  %v6818_v52 = vld [vmem:[#allocation8 + $0x600] ss:$12 sps:$4 sm:$0xff]  }
 0x1da   :  { %v7118_v35 = vpop.eup %7117  ;;  %v2934_v44 = vmul.f32 %v7116_v41, %v7907_v22  ;;  %7143 = vpow2.f32 %v5729_v2  ;;  %v8012_v30 = vpack.c.bf16 %v2933_v43, %v2923_v40  ;;  %v6823_v40 = vld [vmem:[#allocation8 + $0x768] ss:$12 sps:$4 sm:$0xff]  }
 0x1db   :  { %v7120_v29 = vpop.eup %7119  ;;  %7145 = vrcp.f32 %v2655_v63  ;;  %v2656_v10 = vadd.f32 1.0, %v7118_v35 }
 0x1dc   :  { %v7122_v26 = vpop.eup %7121  ;;  %7147 = vpow2.f32 %v5730_v51  ;;  %v8008_v9 = vpack.c.bf16 %v2934_v44, %v2924_v34  ;;  %4899 = vmatpush1.bf16.msra.mxu1 %v6808_v56  ;;  %v2665_v8 = vadd.f32 1.0, %v7120_v29  ;;  %v6825_v56 = vld [vmem:[#allocation8 + $0x76c] ss:$12 sps:$4 sm:$0xff]   ;;  %v8019_v51 = vpop.f32.mrf.mxu1 }
 0x1dd   :  { %v7124_v62 = vpop.eup %7123  ;;  %7149 = vrcp.f32 %v2656_v10  ;;  %4900 = vmatprep.subr.bf16.mxu1 %v6815_v21  ;;  %v2865_v29 = vmul.f32 %v7122_v26, %v7912_v46 }
 0x1de   :  { %v7126_v22 = vpop.eup %7125  ;;  %v2666_v32 = vadd.f32 1.0, %v7124_v62  ;;  %4804 = vmatprep.mubr.bf16.mxu1 %v8008_v9  ;;  %v6830_v62 = vld [vmem:[#allocation8 + $0x754] ss:$12 sps:$4 sm:$0xff]  }
 0x1df   :  { %v7128_v23 = vpop.eup %7127  ;;  %4805 = vmatmul.mubr.bf16.gmra.mxu1 %v8012_v30  ;;  %v2866_v35 = vmul.f32 %v7126_v22, %v7914_v50  ;;  %v6791_v50 = vld [vmem:[#allocation8 + $0x158] ss:$12 sps:$4 sm:$0xff]   ;;  %v8028_v22 = vpop.f32.mrf.mxu1 }
 0x1e0   :  { %v7130_v15 = vpop.eup %7129  ;;  %v2675_v37 = vadd.f32 1.0, %v7128_v23  ;;  %4901 = vmatpush1.bf16.msra.mxu1 %v6813_v17  ;;  %7151 = vrcp.f32 %v2666_v32 }
 0x1e1   :  { %v7132_v2 = vpop.eup %7131  ;;  %4902 = vmatprep.subr.bf16.mxu1 %v6820_v27  ;;  %v2875_v43 = vmul.f32 %v7130_v15, %v7919_v57  ;;  %v6787_v57 = vld [vmem:[#allocation8 + $0xb0] ss:$12 sps:$4 sm:$0xff]  }
 0x1e2   :  { %v7134_v41 = vpop.eup %7133  ;;  %7153 = vrcp.f32 %v2675_v37  ;;  %v2676_v63 = vadd.f32 1.0, %v7132_v2  ;;  %v6828_v15 = vld [vmem:[#allocation8 + $0x750] ss:$12 sps:$4 sm:$0xff]  }
 0x1e3   :  { %v7136_v21 = vpop.eup %7135  ;;  %v2876_v34 = vmul.f32 %v7134_v41, %v7924_v54  ;;  %7155 = vrcp.f32 %v2665_v8  ;;  %v8026_v32 = vpack.c.bf16 %v2875_v43, %v2865_v29  ;;  %v6835_v2 = vld [vmem:[#allocation8 + $0x73c] ss:$12 sps:$4 sm:$0xff]  }
 0x1e4   :  { %v7138_v44 = vpop.eup %7137  ;;  %7157 = vrcp.f32 %v2676_v63  ;;  %4903 = vmatpush1.bf16.msra.mxu1 %v6818_v52  ;;  %v2685_v8 = vadd.f32 1.0, %v7136_v21  ;;  %v6792_v52 = vld [vmem:[#allocation8 + $0x98] ss:$12 sps:$4 sm:$0xff]   ;;  %v6796_v63 = vld [vmem:[#allocation8 + $0x140] ss:$12 sps:$4 sm:$0xff]   ;;  %v8033_v21 = vpop.f32.mrf.mxu1 }
 0x1e5   :  { %v7140_v10 = vpop.eup %7139  ;;  %v8024_v17 = vpack.c.bf16 %v2876_v34, %v2866_v35  ;;  %4904 = vmatprep.subr.bf16.mxu1 %v6825_v56  ;;  %v2885_v29 = vmul.f32 %v7138_v44, %v7932_v3  ;;  %v332_v44 = vld [vmem:[#allocation7 + $0x8] sm:$0x3] }
 0x1e6   :  { %v7142_v27 = vpop.eup %7141  ;;  %v2686_v23 = vadd.f32 1.0, %v7140_v10 }
 0x1e7   :  { %v7144_v54 = vpop.eup %7143  ;;  %4847 = vmatprep.mubr.bf16.mxu0 %v8024_v17  ;;  %v2886_v35 = vmul.f32 %v7142_v27, %v7940_v13  ;;  %v8042_v13 = vpop.f32.mrf.mxu1  ;;  %v6838_v27 = vld [vmem:[#allocation8 + $0x720] ss:$12 sps:$4 sm:$0xff]  }
 0x1e8   :  { %v7146_v46 = vpop.eup %7145  ;;  %v2695_v26 = vadd.f32 1.0, %v7144_v54  ;;  %4848 = vmatmul.mubr.bf16.vlgmr.msra.gmra.mxu0 %v8026_v32  ;;  %4905 = vmatpush2.bf16.msra.mxu1 %v6823_v40  ;;  %7159 = vrcp.f32 %v2686_v23  ;;  %v6833_v40 = vld [vmem:[#allocation8 + $0x738] ss:$12 sps:$4 sm:$0xff]  }
 0x1e9   :  { %v7148_v37 = vpop.eup %7147  ;;  %6006 = vmatpush3.bf16.msra.mxu0 %v6787_v57  ;;  %4906 = vmatprep.subr.bf16.mxu1 %v6830_v62  ;;  %v2895_v41 = vmul.f32 %v7146_v46, %v7943_v45  ;;  %v6797_v45 = vld [vmem:[#allocation8 + $0x80] ss:$12 sps:$4 sm:$0xff]   ;;  %v6840_v57 = vld [vmem:[#allocation8 + $0x724] ss:$12 sps:$4 sm:$0xff]  }
 0x1ea   :  { %v7150_v56 = vpop.eup %7149  ;;  %7161 = vrcp.f32 %v2695_v26  ;;  %v2696_v43 = vadd.f32 1.0, %v7148_v37  ;;  %6007 = vmatprep.subr.bf16.mxu0 %v6791_v50  ;;  %v6801_v50 = vld [vmem:[#allocation8 + $0x128] ss:$12 sps:$4 sm:$0xff]   ;;  %v6845_v46 = vld [vmem:[#allocation8 + $0x70c] ss:$12 sps:$4 sm:$0xff]  }
 0x1eb   :  { %v2896_v34 = vmul.f32 %v7150_v56, %v7952_v16  ;;  %7163 = vrcp.f32 %v2685_v8  ;;  %v8040_v23 = vpack.c.bf16 %v2895_v41, %v2885_v29  ;;  %v6802_v8 = vld [vmem:[#allocation8 + $0x68] ss:$12 sps:$4 sm:$0xff]   ;;  %v8052_v56 = vrot.slane %v332_v44, %v7532_v47 }
 0x1ec   :  { %7165 = vrcp.f32 %v2696_v43  ;;  %4907 = vmatpush2.bf16.msra.mxu1 %v6828_v15 }
 0x1ed   :  { %6008 = vmatpush3.bf16.msra.mxu0 %v6792_v52  ;;  %v8038_v10 = vpack.c.bf16 %v2896_v34, %v2886_v35  ;;  %4908 = vmatprep.subr.bf16.mxu1 %v6835_v2  ;;  %v7152_v62 = vpop.eup %7151  ;;  %v6806_v52 = vld [vmem:[#allocation8 + $0x110] ss:$12 sps:$4 sm:$0xff]   ;;  %v8049_v2 = vpop.f32.mrf.mxu1 }
 0x1ee   :  { %6009 = vmatprep.subr.bf16.mxu0 %v6796_v63  ;;  %v2906_v26 = vmul.f32 %v7152_v62, %v7962_v25  ;;  %v6843_v63 = vld [vmem:[#allocation8 + $0x708] ss:$12 sps:$4 sm:$0xff]   ;;  %v6807_v35 = vld [vmem:[#allocation8 + $0x50] ss:$12 sps:$4 sm:$0xff]   ;;  %v8058_v25 = vrot.slane %v332_v44, %v7537_v59 }
 0x1ef   :  { %v7154_v16 = vpop.eup %7153  ;;  %4857 = vmatprep.mubr.bf16.mxu0 %v8038_v10 }
 0x1f0   :  { %v7156_v3 = vpop.eup %7155  ;;  %4858 = vmatmul.mubr.bf16.gmra.mxu0 %v8040_v23  ;;  %4909 = vmatpush2.bf16.msra.mxu1 %v6833_v40  ;;  %v2915_v15 = vmul.f32 %v7154_v16, %v7970_v11  ;;  %v6850_v11 = vld [vmem:[#allocation8 + $0x6f4] ss:$12 sps:$4 sm:$0xff]   ;;  %v6811_v40 = vld [vmem:[#allocation8 + $0xf8] ss:$12 sps:$4 sm:$0xff]   ;;  %v6848_v16 = vld [vmem:[#allocation8 + $0x6f0] ss:$12 sps:$4 sm:$0xff]  }
 0x1f1   :  { %v7158_v54 = vpop.eup %7157  ;;  %6010 = vmatpush3.bf16.msra.mxu0 %v6797_v45  ;;  %4910 = vmatprep.subr.bf16.mxu1 %v6840_v57  ;;  %v2905_v41 = vmul.f32 %v7156_v3, %v7956_v24  ;;  %v8063_v24 = vpop.f32.mrf.mxu1 }
 0x1f2   :  { %v2916_v37 = vmul.f32 %v7158_v54, %v7974_v5  ;;  %6011 = vmatprep.subr.bf16.mxu0 %v6801_v50  ;;  %v6812_v54 = vld [vmem:[#allocation8 + $0x38] ss:$12 sps:$4 sm:$0xff]  }
 0x1f3   :  { %v8061_v29 = vpack.c.bf16 %v2915_v15, %v2905_v41  ;;  %v8074_v41 = vpop.f32.mrf.mxu1 }
 0x1f4   :  { %v8055_v43 = vpack.c.bf16 %v2916_v37, %v2906_v26  ;;  %4911 = vmatpush2.bf16.msra.mxu1 %v6838_v27 }
 0x1f5   :  { %6012 = vmatpush3.bf16.msra.mxu0 %v6802_v8  ;;  %4912 = vmatprep.subr.bf16.mxu1 %v6845_v46  ;;  %v7160_v5 = vpop.eup %7159  ;;  %v2267_v34 = vpop.f32.mrf.mxu0  ;;  %v6855_v8 = vld [vmem:[#allocation8 + $0x6dc] ss:$12 sps:$4 sm:$0xff]  }
 0x1f6   :  { %4867 = vmatprep.mubr.bf16.mxu0 %v8055_v43  ;;  %6013 = vmatprep.subr.bf16.mxu0 %v6806_v52  ;;  %v2268_v57 = vadd.f32 %v2267_v34, %v8052_v56  ;;  %v2926_v46 = vmul.f32 %v7160_v5, %v7987_v0  ;;  %v6816_v52 = vld [vmem:[#allocation8 + $0xe0] ss:$12 sps:$4 sm:$0xff]  }
 0x1f7   :  { %v7162_v45 = vpop.eup %7161  ;;  %v2269_v50 = vpop.f32.mrf.mxu0 }
 0x1f8   :  { %v7164_v62 = vpop.eup %7163  ;;  %4868 = vmatmul.mubr.bf16.gmra.mxu0 %v8061_v29  ;;  %4913 = vmatpush2.bf16.msra.mxu1 %v6843_v63  ;;  %v8068_v44 = vadd.f32 %v8010_v36, %v2268_v57  ;;  %v2270_v27 = vadd.f32 %v2269_v50, %v8058_v25  ;;  %v2935_v26 = vmul.f32 %v7162_v45, %v7996_v19  ;;  %v6853_v19 = vld [vmem:[#allocation8 + $0x6d8] ss:$12 sps:$4 sm:$0xff]   ;;  %v6821_v57 = vld [vmem:[#allocation8 + $0xc8] ss:$12 sps:$4 sm:$0xff]  }
 0x1f9   :  { %v7166_v3 = vpop.eup %7165  ;;  %6014 = vmatpush3.bf16.msra.mxu0 %v6807_v35  ;;  %4914 = vmatprep.subr.bf16.mxu1 %v6850_v11  ;;  %v2271_v37 = vpop.f32.mrf.mxu0  ;;  %v2925_v11 = vmul.f32 %v7164_v62, %v7984_v55  ;;  %v6860_v50 = vld [vmem:[#allocation8 + $0x6c4] ss:$12 sps:$4 sm:$0xff]  }
 0x1fa   :  { %v2936_v15 = vmul.f32 %v7166_v3, %v7999_v7  ;;  %6015 = vmatprep.subr.bf16.mxu0 %v6811_v40  ;;  %v5661_v36 = vmul.f32 -1.442695, %v8068_v44  ;;  %v8078_v63 = vadd.f32 %v8015_v28, %v2270_v27  ;;  %v2272_v35 = vadd.f32 %v2271_v37, %v8052_v56  ;;  %v6817_v28 = vld [vmem:[#allocation8 + $0x20] ss:$12 sps:$4 sm:$0xff]   ;;  %v2362_v62 = vpop.f32.mrf.mxu1 }
 0x1fb   :  { %v2273_v34 = vpop.f32.mrf.mxu0  ;;  %v8090_v55 = vpack.c.bf16 %v2935_v26, %v2925_v11 }
 0x1fc   :  { %v8082_v0 = vpack.c.bf16 %v2936_v15, %v2926_v46  ;;  %4915 = vmatpush2.bf16.msra.mxu1 %v6848_v16  ;;  %7167 = vpow2.f32 %v5661_v36  ;;  %v5662_v7 = vmul.f32 -1.442695, %v8078_v63  ;;  %v8086_v5 = vadd.f32 %v8019_v51, %v2272_v35  ;;  %v6863_v15 = vld [vmem:[#allocation8 + $0x470] ss:$12 sps:$4 sm:$0xff]  }
 0x1fd   :  { %6016 = vmatpush3.bf16.msra.mxu0 %v6812_v54  ;;  %v2274_v40 = vadd.f32 %v2273_v34, %v8058_v25  ;;  %4916 = vmatprep.subr.bf16.mxu1 %v6855_v8  ;;  %v2277_v45 = vpop.f32.mrf.mxu0  ;;  %v6858_v54 = vld [vmem:[#allocation8 + $0x6c0] ss:$12 sps:$4 sm:$0xff]   ;;  %v6826_v36 = vld [vmem:[#allocation8 + $0x2f0] ss:$12 sps:$4 sm:$0xff]  }
 0x1fe   :  { %4877 = vmatprep.mubr.bf16.mxu0 %v8082_v0  ;;  %6017 = vmatprep.subr.bf16.mxu0 %v6816_v52  ;;  %7169 = vpow2.f32 %v5662_v7  ;;  %v5671_v16 = vmul.f32 -1.442695, %v8086_v5  ;;  %v2278_v3 = vadd.f32 %v2277_v45, %v8052_v56  ;;  %v2364_v52 = vpop.f32.mrf.mxu1 }
 0x1ff   :  { %v8094_v51 = vadd.f32 %v8028_v22, %v2274_v40  ;;  %v2279_v27 = vpop.f32.mrf.mxu0  ;;  %v6822_v22 = vld [vmem:[#allocation8 + $0x8] ss:$12 sps:$4 sm:$0xff]   ;;  %v6827_v40 = vld [vmem:[#allocation8 + $0x230] ss:$12 sps:$4 sm:$0xff]  }
 0x200   :  { %4878 = vmatmul.mubr.bf16.gmra.mxu0 %v8090_v55  ;;  %4917 = vmatpush2.bf16.msra.mxu1 %v6853_v19  ;;  %7171 = vpow2.f32 %v5671_v16  ;;  %v8100_v46 = vadd.f32 %v8033_v21, %v2278_v3  ;;  %v2280_v26 = vadd.f32 %v2279_v27, %v8058_v25  ;;  %v2366_v45 = vpop.f32.mrf.mxu1 }
 0x201   :  { %v5672_v8 = vmul.f32 -1.442695, %v8094_v51  ;;  %6018 = vmatpush3.bf16.msra.mxu0 %v6817_v28  ;;  %4993 = vmatprep.mubr.bf16.mxu0 %v7678_v20  ;;  %v2281_v37 = vpop.f32.mrf.mxu0 }
 0x202   :  { %6019 = vmatprep.subr.bf16.mxu0 %v6821_v57  ;;  %4918 = vmatprep.subr.bf16.mxu1 %v6860_v50  ;;  %v5681_v35 = vmul.f32 -1.442695, %v8100_v46  ;;  %v8106_v11 = vadd.f32 %v8042_v13, %v2280_v26  ;;  %v2282_v21 = vadd.f32 %v2281_v37, %v8052_v56  ;;  %v6831_v13 = vld [vmem:[#allocation8 + $0x2d8] ss:$12 sps:$4 sm:$0xff]  }
 0x203   :  { %7173 = vpow2.f32 %v5672_v8  ;;  %v2283_v34 = vpop.f32.mrf.mxu0  ;;  %v6832_v8 = vld [vmem:[#allocation8 + $0x218] ss:$12 sps:$4 sm:$0xff]  }
 0x204   :  { %4919 = vmatpush2.bf16.msra.mxu1 %v6858_v54  ;;  %7175 = vpow2.f32 %v5681_v35  ;;  %v5682_v20 = vmul.f32 -1.442695, %v8106_v11  ;;  %v8111_v19 = vadd.f32 %v8049_v2, %v2282_v21  ;;  %v2284_v7 = vadd.f32 %v2283_v34, %v8058_v25 }
 0x205   :  { %6020 = vmatpush3.bf16.msra.mxu0 %v6822_v22  ;;  %6085 = vmatprep.subr.bf16.mxu1 %v6863_v15  ;;  %v2287_v28 = vpop.f32.mrf.mxu0  ;;  %v2370_v22 = vpop.f32.mrf.mxu1  ;;  %v6836_v15 = vld [vmem:[#allocation8 + $0x2c0] ss:$12 sps:$4 sm:$0xff]  }
 0x206   :  { %6045 = vmatprep.subr.bf16.mxu0 %v6826_v36  ;;  %7177 = vpow2.f32 %v5682_v20  ;;  %v5691_v57 = vmul.f32 -1.442695, %v8111_v19  ;;  %v8116_v50 = vadd.f32 %v8063_v24, %v2284_v7  ;;  %v2288_v16 = vadd.f32 %v2287_v28, %v8052_v56  ;;  %v6837_v7 = vld [vmem:[#allocation8 + $0x200] ss:$12 sps:$4 sm:$0xff]  }
 0x207   :  { %v2289_v2 = vpop.f32.mrf.mxu0 }
 0x208   :  { %4994 = vmatmul.mubr.bf16.vlgmr.msra.gmra.mxu0 %v7675_v38  ;;  %7179 = vpow2.f32 %v5691_v57  ;;  %v5692_v3 = vmul.f32 -1.442695, %v8116_v50  ;;  %v8122_v27 = vadd.f32 %v8074_v41, %v2288_v16  ;;  %v2290_v54 = vadd.f32 %v2289_v2, %v8058_v25 }
 0x209   :  { %5001 = vmatprep.mubr.bf16.mxu0 %v7705_v33  ;;  %6046 = vmatpush3.bf16.msra.mxu0 %v6827_v40  ;;  %v7168_v26 = vpop.eup %7167  ;;  %v2291_v24 = vpop.f32.mrf.mxu0 }
 0x20a   :  { %6047 = vmatprep.subr.bf16.mxu0 %v6831_v13  ;;  %v2627_v37 = vadd.f32 1.0, %v7168_v26  ;;  %7181 = vpow2.f32 %v5692_v3  ;;  %v5701_v38 = vmul.f32 -1.442695, %v8122_v27  ;;  %v8127_v36 = vadd.f32 %v2362_v62, %v2290_v54  ;;  %v2372_v13 = vpop.f32.mrf.mxu1  ;;  %v6841_v62 = vld [vmem:[#allocation8 + $0x2a8] ss:$12 sps:$4 sm:$0xff]  }
 0x20b   :  { %v7170_v35 = vpop.eup %7169  ;;  %v2292_v41 = vadd.f32 %v2291_v24, %v8052_v56  ;;  %v2293_v21 = vpop.f32.mrf.mxu0 }
 0x20c   :  { %7183 = vrcp.f32 %v2627_v37  ;;  %v2628_v33 = vadd.f32 1.0, %v7170_v35  ;;  %v5702_v34 = vmul.f32 -1.442695, %v8127_v36  ;;  %v2294_v20 = vadd.f32 %v2293_v21, %v8058_v25  ;;  %v6846_v21 = vld [vmem:[#allocation8 + $0x290] ss:$12 sps:$4 sm:$0xff]  }
 0x20d   :  { %6048 = vmatpush3.bf16.msra.mxu0 %v6832_v8  ;;  %v7172_v40 = vpop.eup %7171  ;;  %7185 = vpow2.f32 %v5701_v38  ;;  %v8132_v28 = vadd.f32 %v2364_v52, %v2292_v41  ;;  %v2297_v57 = vpop.f32.mrf.mxu0 }
 0x20e   :  { %6049 = vmatprep.subr.bf16.mxu0 %v6836_v15  ;;  %7187 = vrcp.f32 %v2628_v33  ;;  %v2637_v16 = vadd.f32 1.0, %v7172_v40  ;;  %v8134_v2 = vadd.f32 %v2366_v45, %v2294_v20  ;;  %v2298_v3 = vadd.f32 %v2297_v57, %v8052_v56  ;;  %v6842_v45 = vld [vmem:[#allocation8 + $0x1e8] ss:$12 sps:$4 sm:$0xff]   ;;  %v2374_v38 = vpop.f32.mrf.mxu1 }
 0x20f   :  { %7189 = vpow2.f32 %v5702_v34  ;;  %v5711_v8 = vmul.f32 -1.442695, %v8132_v28  ;;  %v2299_v26 = vpop.f32.mrf.mxu0 }
 0x210   :  { %v7174_v54 = vpop.eup %7173  ;;  %5002 = vmatmul.mubr.bf16.gmra.mxu0 %v7707_v58  ;;  %7191 = vrcp.f32 %v2637_v16  ;;  %v5712_v24 = vmul.f32 -1.442695, %v8134_v2  ;;  %v8140_v37 = vadd.f32 %v2370_v22, %v2298_v3  ;;  %v2300_v35 = vadd.f32 %v2299_v26, %v8058_v25 }
 0x211   :  { %v2638_v52 = vadd.f32 1.0, %v7174_v54  ;;  %5009 = vmatprep.mubr.bf16.mxu0 %v7731_v61  ;;  %6050 = vmatpush3.bf16.msra.mxu0 %v6837_v7  ;;  %v7176_v15 = vpop.eup %7175  ;;  %7193 = vpow2.f32 %v5711_v8  ;;  %v2301_v41 = vpop.f32.mrf.mxu0 }
 0x212   :  { %6051 = vmatprep.subr.bf16.mxu0 %v6841_v62  ;;  %v2647_v58 = vadd.f32 1.0, %v7176_v15  ;;  %v5721_v33 = vmul.f32 -1.442695, %v8140_v37  ;;  %v2302_v34 = vadd.f32 %v2301_v41, %v8052_v56  ;;  %v8146_v20 = vadd.f32 %v2372_v13, %v2300_v35  ;;  %v6847_v62 = vld [vmem:[#allocation8 + $0x1d0] ss:$12 sps:$4 sm:$0xff]   ;;  %v2376_v54 = vpop.f32.mrf.mxu1 }
 0x213   :  { %7195 = vrcp.f32 %v2638_v52  ;;  %v7178_v22 = vpop.eup %7177  ;;  %v2303_v61 = vpop.f32.mrf.mxu0  ;;  %v6851_v56 = vld [vmem:[#allocation8 + $0x278] ss:$12 sps:$4 sm:$0xff]  }
 0x214   :  { %7197 = vpow2.f32 %v5712_v24  ;;  %v2648_v7 = vadd.f32 1.0, %v7178_v22  ;;  %v8148_v40 = vadd.f32 %v2374_v38, %v2302_v34  ;;  %v2304_v57 = vadd.f32 %v2303_v61, %v8058_v25  ;;  %v6856_v38 = vld [vmem:[#allocation8 + $0x260] ss:$12 sps:$4 sm:$0xff]   ;;  %v6861_v34 = vld [vmem:[#allocation8 + $0x248] ss:$12 sps:$4 sm:$0xff]  }
 0x215   :  { %7199 = vrcp.f32 %v2647_v58  ;;  %6052 = vmatpush3.bf16.msra.mxu0 %v6842_v45  ;;  %v7180_v16 = vpop.eup %7179  ;;  %v5722_v3 = vmul.f32 -1.442695, %v8146_v20  ;;  %v6852_v45 = vld [vmem:[#allocation8 + $0x1b8] ss:$12 sps:$4 sm:$0xff]   ;;  %v6857_v58 = vld [vmem:[#allocation8 + $0x1a0] ss:$12 sps:$4 sm:$0xff]  }
 0x216   :  { %7201 = vpow2.f32 %v5721_v33  ;;  %6053 = vmatprep.subr.bf16.mxu0 %v6846_v21  ;;  %v2657_v8 = vadd.f32 1.0, %v7180_v16  ;;  %v5731_v13 = vmul.f32 -1.442695, %v8148_v40  ;;  %v8153_v26 = vadd.f32 %v2376_v54, %v2304_v57  ;;  %v6862_v54 = vld [vmem:[#allocation8 + $0x188] ss:$12 sps:$4 sm:$0xff]  }
 0x217   :  { %7203 = vrcp.f32 %v2648_v7  ;;  %v7182_v52 = vpop.eup %7181 }
 0x218   :  { %7205 = vpow2.f32 %v5722_v3  ;;  %5010 = vmatmul.mubr.bf16.gmra.mxu0 %v7733_v1  ;;  %v2658_v25 = vadd.f32 1.0, %v7182_v52  ;;  %v5732_v24 = vmul.f32 -1.442695, %v8153_v26 }
 0x219   :  { %7207 = vrcp.f32 %v2657_v8  ;;  %5017 = vmatprep.mubr.bf16.mxu0 %v7751_v6  ;;  %6054 = vmatpush3.bf16.msra.mxu0 %v6847_v62  ;;  %v7184_v15 = vpop.eup %7183 }
 0x21a   :  { %7209 = vpow2.f32 %v5731_v13  ;;  %6055 = vmatprep.subr.bf16.mxu0 %v6851_v56  ;;  %v7186_v35 = vpop.eup %7185  ;;  %v2867_v8 = vmul.f32 %v7184_v15, %v8068_v44 }
 0x21b   :  { %7211 = vrcp.f32 %v2658_v25  ;;  %v7188_v41 = vpop.eup %7187  ;;  %v2667_v61 = vadd.f32 1.0, %v7186_v35  ;;  %v6864_v25 = vld [vmem:[#allocation8 + $0x3b0] ss:$12 sps:$4 sm:$0xff]  }
 0x21c   :  { %7213 = vpow2.f32 %v5732_v24  ;;  %v7190_v21 = vpop.eup %7189  ;;  %v2868_v16 = vmul.f32 %v7188_v41, %v8078_v63 }
 0x21d   :  { %6056 = vmatpush3.bf16.msra.mxu0 %v6852_v45  ;;  %v7192_v1 = vpop.eup %7191  ;;  %v2668_v33 = vadd.f32 1.0, %v7190_v21  ;;  %v6868_v21 = vld [vmem:[#allocation8 + $0x398] ss:$12 sps:$4 sm:$0xff]  }
 0x21e   :  { %6057 = vmatprep.subr.bf16.mxu0 %v6856_v38  ;;  %v7194_v22 = vpop.eup %7193  ;;  %v2877_v7 = vmul.f32 %v7192_v1, %v8086_v5  ;;  %v6865_v5 = vld [vmem:[#allocation8 + $0x5f0] ss:$12 sps:$4 sm:$0xff]   ;;  %v6869_v38 = vld [vmem:[#allocation8 + $0x5d8] ss:$12 sps:$4 sm:$0xff]  }
 0x21f   :  { %v2677_v57 = vadd.f32 1.0, %v7194_v22  ;;  %7215 = vrcp.f32 %v2668_v33 }
 0x220   :  { %v7196_v6 = vpop.eup %7195  ;;  %5018 = vmatmul.mubr.bf16.gmra.mxu0 %v7755_v39  ;;  %v8166_v24 = vpack.c.bf16 %v2877_v7, %v2867_v8  ;;  %v6870_v7 = vld [vmem:[#allocation8 + $0x518] ss:$12 sps:$4 sm:$0xff]  }
 0x221   :  { %v7198_v62 = vpop.eup %7197  ;;  %v2878_v3 = vmul.f32 %v7196_v6, %v8094_v51  ;;  %6058 = vmatpush3.bf16.msra.mxu0 %v6857_v58  ;;  %5058 = vmatprep.mubr.bf16.mxu0 %v7767_v60  ;;  %7217 = vrcp.f32 %v2677_v57  ;;  %v6867_v51 = vld [vmem:[#allocation8 + $0x458] ss:$12 sps:$4 sm:$0xff]   ;;  %v6866_v60 = vld [vmem:[#allocation8 + $0x530] ss:$12 sps:$4 sm:$0xff]  }
 0x222   :  { %v7200_v56 = vpop.eup %7199  ;;  %v2678_v13 = vadd.f32 1.0, %v7198_v62  ;;  %6059 = vmatprep.subr.bf16.mxu0 %v6861_v34  ;;  %7219 = vrcp.f32 %v2667_v61  ;;  %v6871_v34 = vld [vmem:[#allocation8 + $0x440] ss:$12 sps:$4 sm:$0xff]  }
 0x223   :  { %v7202_v52 = vpop.eup %7201  ;;  %v8164_v39 = vpack.c.bf16 %v2878_v3, %v2868_v16  ;;  %v2887_v57 = vmul.f32 %v7200_v56, %v8100_v46  ;;  %v6872_v16 = vld [vmem:[#allocation8 + $0x380] ss:$12 sps:$4 sm:$0xff]   ;;  %v6877_v46 = vld [vmem:[#allocation8 + $0x5a8] ss:$12 sps:$4 sm:$0xff]  }
 0x224   :  { %v7204_v63 = vpop.eup %7203  ;;  %7221 = vrcp.f32 %v2678_v13  ;;  %v2687_v41 = vadd.f32 1.0, %v7202_v52  ;;  %v6876_v56 = vld [vmem:[#allocation8 + $0x368] ss:$12 sps:$4 sm:$0xff]   ;;  %v6879_v13 = vld [vmem:[#allocation8 + $0x410] ss:$12 sps:$4 sm:$0xff]  }
 0x225   :  { %v7206_v45 = vpop.eup %7205  ;;  %6060 = vmatpush3.bf16.msra.mxu0 %v6862_v54  ;;  %4920 = vmatprep.mubr.bf16.mxu1 %v8164_v39  ;;  %v2888_v61 = vmul.f32 %v7204_v63, %v8106_v11  ;;  %v6875_v11 = vld [vmem:[#allocation8 + $0x428] ss:$12 sps:$4 sm:$0xff]  }
 0x226   :  { %v7208_v44 = vpop.eup %7207  ;;  %v2688_v15 = vadd.f32 1.0, %v7206_v45  ;;  %4921 = vmatmul.mubr.bf16.vlgmr.msra.gmra.mxu1 %v8166_v24  ;;  %6125 = vmatprep.subr.bf16.mxu0 %v6865_v5  ;;  %v6881_v45 = vld [vmem:[#allocation8 + $0x590] ss:$12 sps:$4 sm:$0xff]  }
 0x227   :  { %v7210_v35 = vpop.eup %7209  ;;  %6086 = vmatpush3.bf16.msra.mxu1 %v6864_v25  ;;  %v2897_v1 = vmul.f32 %v7208_v44, %v8111_v19  ;;  %v6873_v19 = vld [vmem:[#allocation8 + $0x5c0] ss:$12 sps:$4 sm:$0xff]   ;;  %v6878_v25 = vld [vmem:[#allocation8 + $0x4e8] ss:$12 sps:$4 sm:$0xff]  }
 0x228   :  { %v7212_v58 = vpop.eup %7211  ;;  %v2697_v33 = vadd.f32 1.0, %v7210_v35  ;;  %5059 = vmatmul.mubr.bf16.vlgmr.msra.gmra.mxu0 %v7769_v53  ;;  %6087 = vmatprep.subr.bf16.mxu1 %v6867_v51  ;;  %7223 = vrcp.f32 %v2688_v15 }
 0x229   :  { %v7214_v22 = vpop.eup %7213  ;;  %v2898_v6 = vmul.f32 %v7212_v58, %v8116_v50  ;;  %5066 = vmatprep.mubr.bf16.mxu0 %v7783_v49  ;;  %6126 = vmatpush3.bf16.msra.mxu0 %v6866_v60  ;;  %v8178_v3 = vpack.c.bf16 %v2897_v1, %v2887_v57  ;;  %v6874_v49 = vld [vmem:[#allocation8 + $0x500] ss:$12 sps:$4 sm:$0xff]   ;;  %v6886_v58 = vld [vmem:[#allocation8 + $0x4b8] ss:$12 sps:$4 sm:$0xff]   ;;  %v6894_v57 = vld [vmem:[#allocation8 + $0x488] ss:$12 sps:$4 sm:$0xff]  }
 0x22a   :  { %7225 = vrcp.f32 %v2697_v33  ;;  %v2698_v62 = vadd.f32 1.0, %v7214_v22  ;;  %6127 = vmatprep.subr.bf16.mxu0 %v6869_v38  ;;  %v6885_v38 = vld [vmem:[#allocation8 + $0x578] ss:$12 sps:$4 sm:$0xff]   ;;  %v6887_v1 = vld [vmem:[#allocation8 + $0x3e0] ss:$12 sps:$4 sm:$0xff]  }
 0x22b   :  { %7227 = vrcp.f32 %v2687_v41  ;;  %6088 = vmatpush3.bf16.msra.mxu1 %v6868_v21  ;;  %v8176_v53 = vpack.c.bf16 %v2898_v6, %v2888_v61  ;;  %v6889_v22 = vld [vmem:[#allocation8 + $0x560] ss:$12 sps:$4 sm:$0xff]  }
 0x22c   :  { %7229 = vrcp.f32 %v2698_v62  ;;  %6089 = vmatprep.subr.bf16.mxu1 %v6871_v34  ;;  %v7216_v50 = vpop.eup %7215  ;;  %v6888_v6 = vld [vmem:[#allocation8 + $0x320] ss:$12 sps:$4 sm:$0xff]   ;;  %v6895_v62 = vld [vmem:[#allocation8 + $0x770] ss:$12 sps:$4 sm:$0xff]  }
 0x22d   :  { %6128 = vmatpush3.bf16.msra.mxu0 %v6870_v7  ;;  %4930 = vmatprep.mubr.bf16.mxu1 %v8176_v53  ;;  %v2908_v63 = vmul.f32 %v7216_v50, %v8127_v36  ;;  %v6883_v36 = vld [vmem:[#allocation8 + $0x3f8] ss:$12 sps:$4 sm:$0xff]   ;;  %v6899_v50 = vld [vmem:[#allocation8 + $0x740] ss:$12 sps:$4 sm:$0xff]  }
 0x22e   :  { %4931 = vmatmul.mubr.bf16.gmra.mxu1 %v8178_v3  ;;  %6129 = vmatprep.subr.bf16.mxu0 %v6873_v19  ;;  %v7218_v54 = vpop.eup %7217  ;;  %v6896_v19 = vld [vmem:[#allocation8 + $0x6b0] ss:$12 sps:$4 sm:$0xff]  }
 0x22f   :  { %6090 = vmatpush3.bf16.msra.mxu1 %v6872_v16  ;;  %v7220_v8 = vpop.eup %7219  ;;  %v2917_v52 = vmul.f32 %v7218_v54, %v8132_v28  ;;  %v6882_v28 = vld [vmem:[#allocation8 + $0x4d0] ss:$12 sps:$4 sm:$0xff]   ;;  %v6897_v16 = vld [vmem:[#allocation8 + $0x758] ss:$12 sps:$4 sm:$0xff]  }
 0x230   :  { %5067 = vmatmul.mubr.bf16.gmra.mxu0 %v7785_v12  ;;  %6091 = vmatprep.subr.bf16.mxu1 %v6875_v11  ;;  %v2907_v60 = vmul.f32 %v7220_v8, %v8122_v27  ;;  %v6880_v12 = vld [vmem:[#allocation8 + $0x350] ss:$12 sps:$4 sm:$0xff]   ;;  %v6884_v27 = vld [vmem:[#allocation8 + $0x338] ss:$12 sps:$4 sm:$0xff]   ;;  %v8592_v11 = vld [vmem:[#allocation16_spill] sm:$0xff] }
 0x231   :  { %v7222_v5 = vpop.eup %7221  ;;  %5074 = vmatprep.mubr.bf16.mxu0 %v7802_v4  ;;  %6130 = vmatpush3.bf16.msra.mxu0 %v6874_v49  ;;  %v8593_v49 = vld [vmem:[#allocation18_spill] sm:$0xff]  ;;  %v8594_v54 = vld [vmem:[#allocation19_spill] sm:$0xff] }
 0x232   :  { %v2918_v51 = vmul.f32 %v7222_v5, %v8134_v2  ;;  %6131 = vmatprep.subr.bf16.mxu0 %v6877_v46  ;;  %v8190_v15 = vpack.c.bf16 %v2917_v52, %v2907_v60  ;;  %v6901_v46 = vld [vmem:[#allocation8 + $0x728] ss:$12 sps:$4 sm:$0xff]   ;;  %v6905_v8 = vld [vmem:[#allocation8 + $0x6f8] ss:$12 sps:$4 sm:$0xff]  }
 0x233   :  { %6092 = vmatpush3.bf16.msra.mxu1 %v6876_v56  ;;  %v6902_v56 = vld [vmem:[#allocation8 + $0x668] ss:$12 sps:$4 sm:$0xff]  }
 0x234   :  { %v8188_v44 = vpack.c.bf16 %v2918_v51, %v2908_v63  ;;  %6093 = vmatprep.subr.bf16.mxu1 %v6879_v13  ;;  %v6906_v13 = vld [vmem:[#allocation8 + $0x638] ss:$12 sps:$4 sm:$0xff]  }
 0x235   :  { %6132 = vmatpush3.bf16.msra.mxu0 %v6878_v25  ;;  %v7224_v4 = vpop.eup %7223 }
 0x236   :  { %4940 = vmatprep.mubr.bf16.mxu1 %v8188_v44  ;;  %6133 = vmatprep.subr.bf16.mxu0 %v6881_v45  ;;  %v2928_v33 = vmul.f32 %v7224_v4, %v8146_v20  ;;  %v6891_v20 = vld [vmem:[#allocation8 + $0x3c8] ss:$12 sps:$4 sm:$0xff]  }
 0x237   :  { %v7226_v2 = vpop.eup %7225  ;;  %4941 = vmatmul.mubr.bf16.gmra.mxu1 %v8190_v15 }
 0x238   :  { %v7228_v35 = vpop.eup %7227  ;;  %5075 = vmatmul.mubr.bf16.gmra.mxu0 %v7808_v42  ;;  %6094 = vmatpush3.bf16.msra.mxu1 %v6880_v12  ;;  %v2937_v21 = vmul.f32 %v7226_v2, %v8148_v40  ;;  %v6893_v40 = vld [vmem:[#allocation8 + $0x548] ss:$12 sps:$4 sm:$0xff]  }
 0x239   :  { %v7230_v41 = vpop.eup %7229  ;;  %5082 = vmatprep.mubr.bf16.mxu0 %v7829_v48  ;;  %6134 = vmatpush3.bf16.msra.mxu0 %v6882_v28  ;;  %v2927_v61 = vmul.f32 %v7228_v35, %v8140_v37  ;;  %v6890_v48 = vld [vmem:[#allocation8 + $0x4a0] ss:$12 sps:$4 sm:$0xff]   ;;  %v6892_v37 = vld [vmem:[#allocation8 + $0x308] ss:$12 sps:$4 sm:$0xff]  }
 0x23a   :  { %v2938_v34 = vmul.f32 %v7230_v41, %v8153_v26  ;;  %6095 = vmatprep.subr.bf16.mxu1 %v6883_v36  ;;  %6135 = vmatprep.subr.bf16.mxu0 %v6885_v38  ;;  %v8591_v26 = vld [vmem:[#allocation17_spill] sm:$0xff] }
 0x23b   :  { %v8202_v7 = vpack.c.bf16 %v2937_v21, %v2927_v61 }
 0x23c   :  { %6096 = vmatpush3.bf16.msra.mxu1 %v6884_v27  ;;  %v8200_v42 = vpack.c.bf16 %v2938_v34, %v2928_v33 }
 0x23d   :  { %6136 = vmatpush3.bf16.msra.mxu0 %v6886_v58  ;;  %6097 = vmatprep.subr.bf16.mxu1 %v6887_v1 }
 0x23e   :  { %4950 = vmatprep.mubr.bf16.mxu1 %v8200_v42  ;;  %6137 = vmatprep.subr.bf16.mxu0 %v6889_v22 }
 0x23f   :  { %4951 = vmatmul.mubr.bf16.gmra.mxu1 %v8202_v7 }
 0x240   :  { %5083 = vmatmul.mubr.bf16.gmra.mxu0 %v7837_v31  ;;  %6098 = vmatpush3.bf16.msra.mxu1 %v6888_v6  ;;  %v6898_v31 = vld [vmem:[#allocation8 + $0x698] ss:$12 sps:$4 sm:$0xff]  }
 0x241   :  { %5123 = vmatprep.mubr.bf16.mxu1 %v8591_v26  ;;  %6138 = vmatpush3.bf16.msra.mxu0 %v6890_v48 }
 0x242   :  { %5188 = vmatprep.mubr.bf16.mxu0 %v8024_v17  ;;  %6099 = vmatprep.subr.bf16.mxu1 %v6891_v20  ;;  %v6900_v17 = vld [vmem:[#allocation8 + $0x680] ss:$12 sps:$4 sm:$0xff]  }
 0x243   :  { %6139 = vmatprep.subr.bf16.mxu0 %v6893_v40 }
 0x244   :  { %6100 = vmatpush3.bf16.msra.mxu1 %v6892_v37 }
 0x245   :  { %6140 = vmatpush3.bf16.msra.mxu0 %v6894_v57  ;;  %6165 = vmatprep.subr.bf16.mxu1 %v6895_v62 }
 0x247   :  { %5124 = vmatmul.mubr.bf16.vlgmr.msra.gmra.mxu1 %v8592_v11 }
 0x248   :  { %5189 = vmatmul.mubr.bf16.vlgmr.msra.gmra.mxu0 %v8026_v32  ;;  %6166 = vmatpush3.bf16.msra.mxu1 %v6896_v19  ;;  %v6903_v32 = vld [vmem:[#allocation8 + $0x710] ss:$12 sps:$4 sm:$0xff]  }
 0x249   :  { %5131 = vmatprep.mubr.bf16.mxu1 %v8593_v49  ;;  %5196 = vmatprep.mubr.bf16.mxu0 %v8038_v10  ;;  %v6904_v10 = vld [vmem:[#allocation8 + $0x650] ss:$12 sps:$4 sm:$0xff]  }
 0x24a   :  { %6167 = vmatprep.subr.bf16.mxu1 %v6897_v16 }
 0x24c   :  { %6168 = vmatpush3.bf16.msra.mxu1 %v6898_v31 }
 0x24d   :  { %6169 = vmatprep.subr.bf16.mxu1 %v6899_v50 }
 0x24f   :  { %5132 = vmatmul.mubr.bf16.gmra.mxu1 %v8594_v54 }
 0x250   :  { %5197 = vmatmul.mubr.bf16.gmra.mxu0 %v8040_v23  ;;  %6170 = vmatpush3.bf16.msra.mxu1 %v6900_v17  ;;  %v6907_v23 = vld [vmem:[#allocation8 + $0x6e0] ss:$12 sps:$4 sm:$0xff]  }
 0x251   :  { %5139 = vmatprep.mubr.bf16.mxu1 %v7990_v18  ;;  %5204 = vmatprep.mubr.bf16.mxu0 %v8055_v43  ;;  %v6908_v18 = vld [vmem:[#allocation8 + $0x620] ss:$12 sps:$4 sm:$0xff]   ;;  %v6909_v43 = vld [vmem:[#allocation8 + $0x6c8] ss:$12 sps:$4 sm:$0xff]  }
 0x252   :  { %6171 = vmatprep.subr.bf16.mxu1 %v6901_v46 }
 0x254   :  { %6172 = vmatpush3.bf16.msra.mxu1 %v6902_v56 }
 0x255   :  { %6173 = vmatprep.subr.bf16.mxu1 %v6903_v32 }
 0x257   :  { %5140 = vmatmul.mubr.bf16.gmra.mxu1 %v7992_v14  ;;  %v6910_v14 = vld [vmem:[#allocation8 + $0x608] ss:$12 sps:$4 sm:$0xff]  }
 0x258   :  { %5205 = vmatmul.mubr.bf16.gmra.mxu0 %v8061_v29  ;;  %6174 = vmatpush3.bf16.msra.mxu1 %v6904_v10  ;;  %v8228_v29 = vpop.f32.mrf.mxu0 }
 0x259   :  { %5147 = vmatprep.mubr.bf16.mxu1 %v8008_v9  ;;  %5212 = vmatprep.mubr.bf16.mxu0 %v8082_v0  ;;  %v8226_v9 = vpop.f32.mrf.mxu1 }
 0x25a   :  { %6175 = vmatprep.subr.bf16.mxu1 %v6905_v8  ;;  %v8232_v5 = vpop.f32.mrf.mxu0 }
 0x25b   :  { %v8230_v0 = vpop.f32.mrf.mxu1 }
 0x25c   :  { %6176 = vmatpush3.bf16.msra.mxu1 %v6906_v13 }
 0x25d   :  { %6177 = vmatprep.subr.bf16.mxu1 %v6907_v23 }
 0x25f   :  { %5148 = vmatmul.mubr.bf16.gmra.mxu1 %v8012_v30  ;;  %v8236_v30 = vpop.f32.mrf.mxu1 }
 0x260   :  { %5213 = vmatmul.mubr.bf16.gmra.mxu0 %v8090_v55  ;;  %6178 = vmatpush3.bf16.msra.mxu1 %v6908_v18  ;;  %v8238_v55 = vpop.f32.mrf.mxu0 }
 0x261   :  { %5253 = vmatprep.mubr.bf16.mxu1 %v8164_v39  ;;  %6179 = vmatprep.subr.bf16.mxu1 %v6909_v43  ;;  %v8240_v39 = vpop.f32.mrf.mxu1 }
 0x264   :  { %6180 = vmatpush3.bf16.msra.mxu1 %v6910_v14 }
 0x267   :  { %5254 = vmatmul.mubr.bf16.vlgmr.msra.gmra.mxu1 %v8166_v24  ;;  %v8242_v24 = vpop.f32.mrf.mxu0 }
 0x268   :  { %5261 = vmatprep.mubr.bf16.mxu1 %v8176_v53  ;;  %v8246_v53 = vpop.f32.mrf.mxu1 }
 0x269   :  { %v8248_v52 = vpop.f32.mrf.mxu0 }
 0x26a   :  { %v8250_v25 = vpop.f32.mrf.mxu1 }
 0x26c   :  { %v8255_v63 = vpop.f32.mrf.mxu1 }
 0x26e   :  { %v8259_v45 = vpop.f32.mrf.mxu1 }
 0x26f   :  { %5262 = vmatmul.mubr.bf16.gmra.mxu1 %v8178_v3  ;;  %v8252_v3 = vpop.f32.mrf.mxu0 }
 0x270   :  { %5269 = vmatprep.mubr.bf16.mxu1 %v8188_v44  ;;  %v8263_v44 = vpop.f32.mrf.mxu1 }
 0x271   :  { %v8257_v51 = vpop.f32.mrf.mxu0 }
 0x273   :  { %v8261_v60 = vpop.f32.mrf.mxu0 }
 0x275   :  { %v8265_v12 = vpop.f32.mrf.mxu0 }
 0x277   :  { %5270 = vmatmul.mubr.bf16.gmra.mxu1 %v8190_v15  ;;  %v8267_v15 = vpop.f32.mrf.mxu1  ;;  %v8269_v28 = vpop.f32.mrf.mxu0 }
 0x278   :  { %5277 = vmatprep.mubr.bf16.mxu1 %v8200_v42 }
 0x279   :  { %v8271_v4 = vpop.f32.mrf.mxu1  ;;  %v8273_v36 = vpop.f32.mrf.mxu0 }
 0x27b   :  { %v8275_v38 = vpop.f32.mrf.mxu1  ;;  %v8277_v2 = vpop.f32.mrf.mxu0 }
 0x27d   :  { %v8279_v35 = vpop.f32.mrf.mxu1  ;;  %v8281_v27 = vpop.f32.mrf.mxu0 }
 0x27f   :  { %5278 = vmatmul.mubr.bf16.gmra.mxu1 %v8202_v7  ;;  %v8283_v41 = vpop.f32.mrf.mxu1  ;;  %v8285_v21 = vpop.f32.mrf.mxu0 }
 0x281   :  { %v8287_v58 = vpop.f32.mrf.mxu1  ;;  %v8289_v1 = vpop.f32.mrf.mxu0 }
 0x282   :  { %8595 = vst [vmem:[#allocation17_spill] sm:$0xff] %v8287_v58  ;;  %8596 = vst [vmem:[#allocation16_spill] sm:$0xff] %v8289_v1 }
 0x283   :  { %v8291_v33 = vpop.f32.mrf.mxu1  ;;  %v8293_v34 = vpop.f32.mrf.mxu0 }
 0x284   :  { %8597 = vst [vmem:[#allocation18_spill] sm:$0xff] %v8291_v33  ;;  %8598 = vst [vmem:[#allocation19_spill] sm:$0xff] %v8293_v34 }
 0x286   :  { %v4776_v22 = vpop.f32.mrf.mxu1 }
 0x288   :  { %v4778_v6 = vpop.f32.mrf.mxu1 }
 0x28a   :  { %v4780_v20 = vpop.f32.mrf.mxu1 }
 0x28c   :  { %v4782_v26 = vpop.f32.mrf.mxu1 }
 0x28f   :  { %v8307_v19 = vpop.f32.mrf.mxu1 }
 0x291   :  { %v8313_v31 = vpop.f32.mrf.mxu1 }
 0x293   :  { %v8319_v17 = vpop.f32.mrf.mxu1 }
 0x295   :  { %v8325_v56 = vpop.f32.mrf.mxu1 }
 0x297   :  { %v8331_v8 = vpop.f32.mrf.mxu1 }
 0x299   :  { %v8337_v18 = vpop.f32.mrf.mxu1 }
 0x2a8   :  { %v4849_v61 = vpop.f32.mrf.mxu0 }
 0x2aa   :  { %v4851_v42 = vpop.f32.mrf.mxu0 }
 0x2ac   :  { %v8295_v7 = vpop.f32.mrf.mxu0 }
 0x2ae   :  { %v8297_v48 = vpop.f32.mrf.mxu0 }
 0x2b0   :  { %v8299_v40 = vpop.f32.mrf.mxu0 }
 0x2b2   :  { %v8301_v37 = vpop.f32.mrf.mxu0 }
 0x2b4   :  { %v8303_v57 = vpop.f32.mrf.mxu0 }
 0x2b6   :  { %v8305_v62 = vpop.f32.mrf.mxu0 }
 0x2b8   :  { %v8309_v16 = vpop.f32.mrf.mxu0 }
 0x2ba   :  { %v8311_v11 = vpop.f32.mrf.mxu0 }
 0x2bc   :  { %v8315_v49 = vpop.f32.mrf.mxu0 }
 0x2be   :  { %v8317_v50 = vpop.f32.mrf.mxu0 }
 0x2bf   :  { %8599 = vst [vmem:[#allocation20_spill] sm:$0xff] %v8317_v50 }
 0x2c0   :  { %v8321_v46 = vpop.f32.mrf.mxu0 }
 0x2c1   :  { %8600 = vst [vmem:[#allocation21_spill] sm:$0xff] %v8321_v46  ;;  %v8343_v46 = vpop.f32.mrf.mxu1 }
 0x2c2   :  { %v8323_v54 = vpop.f32.mrf.mxu0 }
 0x2c3   :  { %8601 = vst [vmem:[#allocation22_spill] sm:$0xff] %v8323_v54 }
 0x2c4   :  { %v8327_v32 = vpop.f32.mrf.mxu0 }
 0x2c5   :  { %8602 = vst [vmem:[#allocation23_spill] sm:$0xff] %v8327_v32  ;;  %v8349_v32 = vpop.f32.mrf.mxu1 }
 0x2c6   :  { %v8329_v10 = vpop.f32.mrf.mxu0 }
 0x2c7   :  { %8603 = vst [vmem:[#allocation24_spill] sm:$0xff] %v8329_v10 }
 0x2c8   :  { %v8333_v13 = vpop.f32.mrf.mxu0 }
 0x2c9   :  { %8604 = vst [vmem:[#allocation25_spill] sm:$0xff] %v8333_v13  ;;  %v8355_v13 = vpop.f32.mrf.mxu1 }
 0x2ca   :  { %v8335_v23 = vpop.f32.mrf.mxu0  ;;  %8612 = vst [vmem:[#allocation33_spill] sm:$0xff] %v8355_v13 }
 0x2cb   :  { %8605 = vst [vmem:[#allocation26_spill] sm:$0xff] %v8335_v23 }
 0x2cc   :  { %v8339_v43 = vpop.f32.mrf.mxu0 }
 0x2cd   :  { %8606 = vst [vmem:[#allocation27_spill] sm:$0xff] %v8339_v43 }
 0x2ce   :  { %v8341_v14 = vpop.f32.mrf.mxu0 }
 0x2cf   :  { %8607 = vst [vmem:[#allocation28_spill] sm:$0xff] %v8341_v14  ;;  %v8362_v14 = vld [vmem:[%s8577_s4] sm:$0x7]  ;;  %s7361_s4 = smov [#allocation10]  }
 0x2d0   :  { %v8345_v54 = vpop.f32.mrf.mxu0  ;;  %8614 = vst [vmem:[#allocation35_spill] sm:$0xff] %v8362_v14  ;;  %s5387_s15 = sshll.u32 %s7361_s4, 4  ;;  %s5388_s15 = int_to_ptr.vmem [resolvable:$true] %s5387_s15 }
 0x2d1   :  { %8608 = vst [vmem:[#allocation29_spill] sm:$0xff] %v8345_v54  ;;  %v8366_v54 = vpop.f32.mrf.mxu1  ;;  %s7324_s16 = scalar_lea.vmem %s5388_s15, 1536  ;;  %p7329_p7 = scmp.lt.s32.totalorder %s5388_s15, %s5388_s15 }
 0x2d2   :  { %v8347_v34 = vpop.f32.mrf.mxu0  ;;  %8616 = vst [vmem:[#allocation37_spill] sm:$0xff] %v8366_v54  ;;  %p7325_p6 = scmp.ne.s32.totalorder %s5388_s15, %s7324_s16  ;;  %p7330_p8 = scmp.lt.s32.totalorder %s7324_s16, %s7324_s16 }
 0x2d3   :  { %8609 = vst [vmem:[#allocation30_spill] sm:$0xff] %v8347_v34  ;;  %v8380_v13 = vpop.f32.mrf.mxu1 }
 0x2d4   :  { %v8351_v10 = vpop.f32.mrf.mxu0  ;;  %8619 = vst [vmem:[#allocation40_spill] sm:$0xff] %v8380_v13  ;;  %p7331_p9 = por %p7330_p8, %p7329_p7 }
 0x2d5   :  { %8610 = vst [vmem:[#allocation31_spill] sm:$0xff] %v8351_v10  ;;  %v8372_v10 = vrot.slane %v8362_v14, %v7532_v47 }
 0x2d6   :  { %v8353_v1 = vpop.f32.mrf.mxu0  ;;  %p7332_p10 = pnand %p7331_p9, %p7325_p6 }
 0x2d7   :  { %8611 = vst [vmem:[#allocation32_spill] sm:$0xff] %v8353_v1  ;;  %v8376_v1 = vrot.slane %v8362_v14, %v7537_v59  ;;  %v8392_v59 = vpop.f32.mrf.mxu1 }
 0x2d8   :  { %v8357_v23 = vpop.f32.mrf.mxu0 }
 0x2d9   :  { %8613 = vst [vmem:[#allocation34_spill] sm:$0xff] %v8357_v23 }
 0x2da   :  { %v8364_v43 = vpop.f32.mrf.mxu0 }
 0x2db   :  { %8615 = vst [vmem:[#allocation36_spill] sm:$0xff] %v8364_v43  ;;  %v4631_v43 = vadd.f32 %v8226_v9, %v8372_v10 }
 0x2dc   :  { %v8368_v34 = vpop.f32.mrf.mxu0 }
 0x2dd   :  { %8617 = vst [vmem:[#allocation38_spill] sm:$0xff] %v8368_v34  ;;  %v4633_v34 = vadd.f32 %v8230_v0, %v8376_v1  ;;  %v4704_v47 = vadd.f32 %v8228_v29, %v4631_v43  ;;  %v4641_v43 = vadd.f32 %v8246_v53, %v8372_v10 }
 0x2de   :  { %v8378_v23 = vpop.f32.mrf.mxu0 }
 0x2df   :  { %8618 = vst [vmem:[#allocation39_spill] sm:$0xff] %v8378_v23  ;;  %v4706_v58 = vadd.f32 %v8232_v5, %v4633_v34  ;;  %v4635_v23 = vadd.f32 %v8236_v30, %v8372_v10  ;;  %v4777_v9 = vadd.f32 %v4776_v22, %v4704_v47  ;;  %v4643_v30 = vadd.f32 %v8250_v25, %v8376_v1 }
 0x2e0   :  { %v8382_v33 = vpop.f32.mrf.mxu0  ;;  %v4645_v25 = vadd.f32 %v8255_v63, %v8372_v10 }
 0x2e1   :  { %8620 = vst [vmem:[#allocation41_spill] sm:$0xff] %v8382_v33  ;;  %v4637_v33 = vadd.f32 %v8240_v39, %v8376_v1  ;;  %v4779_v13 = vadd.f32 %v4778_v6, %v4706_v58  ;;  %v4850_v5 = vadd.f32 %v4849_v61, %v4777_v9 }
 0x2e2   :  { %v8388_v54 = vpop.f32.mrf.mxu0 }
 0x2e3   :  { %8621 = vst [vmem:[#allocation42_spill] sm:$0xff] %v8388_v54  ;;  %v4708_v54 = vadd.f32 %v8238_v55, %v4635_v23  ;;  %v4710_v29 = vadd.f32 %v8242_v24, %v4637_v33  ;;  %v4852_v34 = vadd.f32 %v4851_v42, %v4779_v13  ;;  %v4716_v33 = vadd.f32 %v8252_v3, %v4643_v30 }
 0x2e4   :  { %v8394_v14 = vpop.f32.mrf.mxu0 }
 0x2e5   :  { %8622 = vst [vmem:[#allocation43_spill] sm:$0xff] %v8394_v14  ;;  %v4781_v22 = vadd.f32 %v4780_v20, %v4708_v54  ;;  %v4783_v58 = vadd.f32 %v4782_v26, %v4710_v29  ;;  %v4647_v20 = vadd.f32 %v8259_v45, %v8376_v1  ;;  %v4789_v13 = vadd.f32 %v8313_v31, %v4716_v33 }
 0x2e6   :  { %v8400_v50 = vpop.f32.mrf.mxu0  ;;  %v4922_v0 = vpop.f32.mrf.mxu1 }
 0x2e7   :  { %8623 = vst [vmem:[#allocation44_spill] sm:$0xff] %v8400_v50  ;;  %v4923_v6 = vadd.f32 %v4922_v0, %v4850_v5  ;;  %v4714_v50 = vadd.f32 %v8248_v52, %v4641_v43  ;;  %v4854_v61 = vadd.f32 %v8295_v7, %v4781_v22  ;;  %v4856_v53 = vadd.f32 %v8297_v48, %v4783_v58 }
 0x2e8   :  { %v8408_v14 = vpop.f32.mrf.mxu0  ;;  %v4924_v39 = vpop.f32.mrf.mxu1  ;;  %v4718_v7 = vadd.f32 %v8257_v51, %v4645_v25  ;;  %v4720_v63 = vadd.f32 %v8261_v60, %v4647_v20  ;;  %v4862_v45 = vadd.f32 %v8301_v37, %v4789_v13  ;;  %v4651_v43 = vadd.f32 %v8263_v44, %v8372_v10 }
 0x2e9   :  { %v4925_v47 = vadd.f32 %v4924_v39, %v4852_v34  ;;  %v4787_v52 = vadd.f32 %v8307_v19, %v4714_v50  ;;  %v4653_v60 = vadd.f32 %v8267_v15, %v8376_v1  ;;  %v4655_v15 = vadd.f32 %v8271_v4, %v8372_v10 }
 0x2ea   :  { %v8411_v55 = vpop.f32.mrf.mxu0  ;;  %v4926_v24 = vpop.f32.mrf.mxu1  ;;  %v4791_v31 = vadd.f32 %v8319_v17, %v4718_v7  ;;  %v4793_v50 = vadd.f32 %v8325_v56, %v4720_v63  ;;  %v4724_v17 = vadd.f32 %v8265_v12, %v4651_v43  ;;  %v8630_v43 = vld [vmem:[#allocation19_spill] sm:$0xff] }
 0x2eb   :  { %v5989_v42 = vpack.c.bf16 %v4925_v47, %v4923_v6  ;;  %v4927_v3 = vadd.f32 %v4926_v24, %v4854_v61  ;;  %v4860_v0 = vadd.f32 %v8299_v40, %v4787_v52  ;;  %v4726_v56 = vadd.f32 %v8269_v28, %v4653_v60 }
 0x2ec   :  { %v8420_v26 = vpop.f32.mrf.mxu0  ;;  %v4928_v54 = vpop.f32.mrf.mxu1  ;;  %v4864_v30 = vadd.f32 %v8303_v57, %v4791_v31  ;;  %v4866_v39 = vadd.f32 %v8305_v62, %v4793_v50  ;;  %v4657_v24 = vadd.f32 %v8275_v38, %v8376_v1  ;;  %v4797_v57 = vadd.f32 %v8331_v8, %v4724_v17  ;;  %v8629_v50 = vld [vmem:[#allocation16_spill] sm:$0xff] }
 0x2ed   :  { %5366 = vst [vmem:[#allocation10] sm:$0xff] %v5989_v42  ;;  %v4929_v23 = vadd.f32 %v4928_v54, %v4856_v53  ;;  %v4799_v62 = vadd.f32 %v8337_v18, %v4726_v56  ;;  %v4728_v61 = vadd.f32 %v8273_v36, %v4655_v15  ;;  %v4661_v38 = vadd.f32 %v8279_v35, %v8372_v10  ;;  %v8633_v56 = vld [vmem:[#allocation40_spill] sm:$0xff] }
 0x2ee   :  { %v8425_v48 = vpop.f32.mrf.mxu0  ;;  %v4932_v9 = vpop.f32.mrf.mxu1  ;;  %v4730_v53 = vadd.f32 %v8277_v2, %v4657_v24  ;;  %v4870_v42 = vadd.f32 %v8309_v16, %v4797_v57  ;;  %v4663_v8 = vadd.f32 %v8283_v41, %v8376_v1 }
 0x2ef   :  { %v5991_v29 = vpack.c.bf16 %v4929_v23, %v4927_v3  ;;  %v4933_v34 = vadd.f32 %v4932_v9, %v4860_v0  ;;  %v4872_v25 = vadd.f32 %v8311_v11, %v4799_v62  ;;  %v4801_v20 = vadd.f32 %v8343_v46, %v4728_v61  ;;  %v8624_v3 = vld [vmem:[#allocation20_spill] sm:$0xff]  ;;  %v8625_v46 = vld [vmem:[#allocation17_spill] sm:$0xff]  ;;  %v8634_v62 = vld [vmem:[#allocation23_spill] sm:$0xff] }
 0x2f0   :  { %v8430_v5 = vpop.f32.mrf.mxu0  ;;  %v4934_v19 = vpop.f32.mrf.mxu1  ;;  %v4803_v36 = vadd.f32 %v8349_v32, %v4730_v53  ;;  %v4734_v16 = vadd.f32 %v8281_v27, %v4661_v38  ;;  %v4736_v13 = vadd.f32 %v8285_v21, %v4663_v8  ;;  %v4665_v9 = vadd.f32 %v8625_v46, %v8372_v10  ;;  %v8626_v32 = vld [vmem:[#allocation18_spill] sm:$0xff]  ;;  %v8628_v27 = vld [vmem:[#allocation37_spill] sm:$0xff] }
 0x2f1   :  { %5368 = vst [vmem:[#allocation10 + $0xc] sm:$0xff] %v5991_v29  ;;  %v4935_v51 = vadd.f32 %v4934_v19, %v4862_v45  ;;  %v4874_v35 = vadd.f32 %v8315_v49, %v4801_v20  ;;  %v4667_v63 = vadd.f32 %v8626_v32, %v8376_v1  ;;  %v8627_v45 = vld [vmem:[#allocation33_spill] sm:$0xff] }
 0x2f2   :  { %v8438_v40 = vpop.f32.mrf.mxu0  ;;  %v4936_v37 = vpop.f32.mrf.mxu1  ;;  %v4876_v23 = vadd.f32 %v8624_v3, %v4803_v36  ;;  %v4807_v29 = vadd.f32 %v8627_v45, %v4734_v16  ;;  %v4809_v19 = vadd.f32 %v8628_v27, %v4736_v13 }
 0x2f3   :  { %v5993_v22 = vpack.c.bf16 %v4935_v51, %v4933_v34  ;;  %v4937_v44 = vadd.f32 %v4936_v37, %v4864_v30  ;;  %v4738_v34 = vadd.f32 %v8629_v50, %v4665_v9  ;;  %v4740_v60 = vadd.f32 %v8630_v43, %v4667_v63  ;;  %v8631_v37 = vld [vmem:[#allocation21_spill] sm:$0xff]  ;;  %v8632_v30 = vld [vmem:[#allocation22_spill] sm:$0xff] }
 0x2f4   :  { %v8444_v58 = vpop.f32.mrf.mxu0  ;;  %v4938_v6 = vpop.f32.mrf.mxu1  ;;  %v4880_v10 = vadd.f32 %v8631_v37, %v4807_v29  ;;  %v6063_v37 = vadd.f32 %v8411_v55, %v8408_v14 }
 0x2f5   :  { %5370 = vst [vmem:[#allocation10 + $0x18] sm:$0xff] %v5993_v22  ;;  %v4939_v47 = vadd.f32 %v4938_v6, %v4866_v39  ;;  %v4882_v39 = vadd.f32 %v8632_v30, %v4809_v19  ;;  %v4811_v6 = vadd.f32 %v8633_v56, %v4738_v34  ;;  %v8636_v19 = vld [vmem:[#allocation15_spill] sm:$0xff]  ;;  %v8639_v34 = vld [vmem:[#allocation25_spill] sm:$0xff] }
 0x2f6   :  { %v8452_v33 = vpop.f32.mrf.mxu0 }
 0x2f7   :  { %v5995_v12 = vpack.c.bf16 %v4939_v47, %v4937_v44  ;;  %v4942_v28 = vpop.f32.mrf.mxu1  ;;  %v4813_v44 = vadd.f32 %v8392_v59, %v4740_v60 }
 0x2f8   :  { %v8458_v4 = vpop.f32.mrf.mxu0  ;;  %v4943_v54 = vadd.f32 %v4942_v28, %v4870_v42  ;;  %v8635_v28 = vld [vmem:[#allocation24_spill] sm:$0xff] }
 0x2f9   :  { %5372 = vst [vmem:[#allocation10 + $0x24] sm:$0xff] %v5995_v12  ;;  %v4944_v18 = vpop.f32.mrf.mxu1  ;;  %v4884_v12 = vadd.f32 %v8634_v62, %v4811_v6  ;;  %v4886_v61 = vadd.f32 %v8635_v28, %v4813_v44  ;;  %v8644_v62 = vld [vmem:[#allocation30_spill] sm:$0xff] }
 0x2fa   :  { %v4945_v2 = vadd.f32 %v4944_v18, %v4872_v25  ;;  %v8466_v52 = vpop.f32.mrf.mxu0 }
 0x2fb   :  { %v4946_v11 = vpop.f32.mrf.mxu1 }
 0x2fc   :  { %v5997_v41 = vpack.c.bf16 %v4945_v2, %v4943_v54  ;;  %v8472_v7 = vpop.f32.mrf.mxu0  ;;  %v4947_v21 = vadd.f32 %v4946_v11, %v4874_v35 }
 0x2fd   :  { %v4948_v0 = vpop.f32.mrf.mxu1 }
 0x2fe   :  { %5374 = vst [vmem:[#allocation10 + $0x30] sm:$0xff] %v5997_v41  ;;  %v4949_v31 = vadd.f32 %v4948_v0, %v4876_v23  ;;  %v8480_v49 = vpop.f32.mrf.mxu0 }
 0x2ff   :  { %v4952_v51 = vpop.f32.mrf.mxu1 }
 0x300   :  { %v5999_v1 = vpack.c.bf16 %v4949_v31, %v4947_v21  ;;  %v8486_v22 = vpop.f32.mrf.mxu0  ;;  %v4953_v47 = vadd.f32 %v4952_v51, %v4880_v10  ;;  %v8637_v21 = vsub.s32 2, %v8636_v19  ;;  %v8638_v31 = vld [vmem:[#allocation35_spill] sm:$0xff]  ;;  %v8640_v51 = vld [vmem:[#allocation26_spill] sm:$0xff] }
 0x301   :  { %v4954_v17 = vpop.f32.mrf.mxu1  ;;  %v6023_v43 = vadd.f32 %v8640_v51, %v8639_v34 }
 0x302   :  { %5376 = vst [vmem:[#allocation10 + $0x3c] sm:$0xff] %v5999_v1  ;;  %v4955_v15 = vadd.f32 %v4954_v17, %v4882_v39  ;;  %v8490_v24 = vpop.f32.mrf.mxu0  ;;  %v8507_v50 = vrot.slane %v8638_v31, %v8637_v21  ;;  %v8641_v1 = vld [vmem:[#allocation27_spill] sm:$0xff]  ;;  %v8642_v17 = vld [vmem:[#allocation28_spill] sm:$0xff] }
 0x303   :  { %v4956_v57 = vpop.f32.mrf.mxu1  ;;  %v6026_v56 = vadd.f32 %v8642_v17, %v8641_v1 }
 0x304   :  { %v6001_v53 = vpack.c.bf16 %v4955_v15, %v4953_v47  ;;  %v8494_v42 = vpop.f32.mrf.mxu0  ;;  %v4957_v38 = vadd.f32 %v4956_v57, %v4884_v12  ;;  %v4996_v39 = vadd.f32 %v6023_v43, %v8507_v50  ;;  %v6066_v15 = vadd.f32 %v8425_v48, %v8420_v26  ;;  %v8643_v57 = vld [vmem:[#allocation29_spill] sm:$0xff]  ;;  %v8645_v26 = vld [vmem:[#allocation31_spill] sm:$0xff]  ;;  %v8646_v48 = vld [vmem:[#allocation32_spill] sm:$0xff] }
 0x305   :  { %v4958_v25 = vpop.f32.mrf.mxu1  ;;  %v6029_v12 = vadd.f32 %v8644_v62, %v8643_v57  ;;  %v4999_v55 = vadd.f32 %v6026_v56, %v8507_v50 }
 0x306   :  { %5378 = vst [vmem:[#allocation10 + $0x48] sm:$0xff] %v6001_v53  ;;  %v4959_v8 = vadd.f32 %v4958_v25, %v4886_v61  ;;  %v8496_v18 = vpop.f32.mrf.mxu0  ;;  %v5061_v47 = vadd.f32 %v6063_v37, %v4996_v39  ;;  %v6069_v25 = vadd.f32 %v8438_v40, %v8430_v5 }
 0x307   :  { %v6101_v59 = vpop.f32.mrf.mxu1 }
 0x308   :  { %v6003_v20 = vpack.c.bf16 %v4959_v8, %v4957_v38  ;;  %v6141_v36 = vpop.f32.mrf.mxu0  ;;  %v5064_v8 = vadd.f32 %v6066_v15, %v4999_v55  ;;  %v8650_v55 = vld [vmem:[#allocation39_spill] sm:$0xff] }
 0x309   :  { %v6102_v54 = vpop.f32.mrf.mxu1 }
 0x30a   :  { %5380 = vst [vmem:[#allocation10 + $0x54] sm:$0xff] %v6003_v20  ;;  %v6142_v2 = vpop.f32.mrf.mxu0  ;;  %v6103_v6 = vadd.f32 %v6102_v54, %v6101_v59  ;;  %v5004_v20 = vadd.f32 %v6029_v12, %v8507_v50  ;;  %v6032_v54 = vadd.f32 %v8646_v48, %v8645_v26  ;;  %v8651_v48 = vld [vmem:[#allocation41_spill] sm:$0xff] }
 0x30b   :  { %v6104_v16 = vpop.f32.mrf.mxu1  ;;  %v6143_v59 = vadd.f32 %v6142_v2, %v6141_v36  ;;  %v8647_v2 = vld [vmem:[#allocation34_spill] sm:$0xff] }
 0x30c   :  { %v6144_v11 = vpop.f32.mrf.mxu0  ;;  %v5126_v61 = vadd.f32 %v6103_v6, %v5061_v47  ;;  %v5069_v37 = vadd.f32 %v6069_v25, %v5004_v20  ;;  %v5007_v36 = vadd.f32 %v6032_v54, %v8507_v50  ;;  %v8652_v54 = vld [vmem:[#allocation42_spill] sm:$0xff] }
 0x30d   :  { %v6105_v13 = vpop.f32.mrf.mxu1 }
 0x30e   :  { %v6145_v3 = vpop.f32.mrf.mxu0  ;;  %v6106_v53 = vadd.f32 %v6105_v13, %v6104_v16  ;;  %v5191_v34 = vadd.f32 %v6143_v59, %v5126_v61  ;;  %v6072_v16 = vadd.f32 %v8452_v33, %v8444_v58  ;;  %v8648_v13 = vld [vmem:[#allocation36_spill] sm:$0xff]  ;;  %v6075_v58 = vadd.f32 %v8466_v52, %v8458_v4 }
 0x30f   :  { %v6107_v35 = vpop.f32.mrf.mxu1  ;;  %v6146_v5 = vadd.f32 %v6145_v3, %v6144_v11  ;;  %v6035_v1 = vadd.f32 %v8648_v13, %v8647_v2  ;;  %v8649_v3 = vld [vmem:[#allocation38_spill] sm:$0xff] }
 0x310   :  { %v6147_v46 = vpop.f32.mrf.mxu0  ;;  %v5129_v51 = vadd.f32 %v6106_v53, %v5064_v8  ;;  %v5072_v12 = vadd.f32 %v6072_v16, %v5007_v36  ;;  %v6038_v61 = vadd.f32 %v8650_v55, %v8649_v3 }
 0x311   :  { %v6108_v23 = vpop.f32.mrf.mxu1  ;;  %v5012_v11 = vadd.f32 %v6035_v1, %v8507_v50 }
 0x312   :  { %v6148_v63 = vpop.f32.mrf.mxu0  ;;  %v6109_v19 = vadd.f32 %v6108_v23, %v6107_v35  ;;  %v5194_v23 = vadd.f32 %v6146_v5, %v5129_v51  ;;  %v5015_v26 = vadd.f32 %v6038_v61, %v8507_v50  ;;  %v8653_v5 = vld [vmem:[#allocation43_spill] sm:$0xff] }
 0x313   :  { %v6110_v41 = vpop.f32.mrf.mxu1  ;;  %v6149_v57 = vadd.f32 %v6148_v63, %v6147_v46  ;;  %v6078_v46 = vadd.f32 %v8480_v49, %v8472_v7  ;;  %v5077_v20 = vadd.f32 %v6075_v58, %v5012_v11 }
 0x314   :  { %v8500_v29 = vpop.f32.mrf.mxu0  ;;  %v5134_v17 = vadd.f32 %v6109_v19, %v5069_v37  ;;  %v6041_v19 = vadd.f32 %v8652_v54, %v8651_v48 }
 0x315   :  { %v6111_v9 = vpop.f32.mrf.mxu1  ;;  %v5080_v49 = vadd.f32 %v6078_v46, %v5015_v26 }
 0x316   :  { %v6151_v10 = vpop.f32.mrf.mxu0  ;;  %v6112_v6 = vadd.f32 %v6111_v9, %v6110_v41  ;;  %v5199_v53 = vadd.f32 %v6149_v57, %v5134_v17  ;;  %v5020_v16 = vadd.f32 %v6041_v19, %v8507_v50 }
 0x317   :  { %v6113_v32 = vpop.f32.mrf.mxu1  ;;  %v6152_v4 = vadd.f32 %v6151_v10, %v8500_v29  ;;  %v6081_v29 = vadd.f32 %v8490_v24, %v8486_v22 }
 0x318   :  { %v8526_v28 = vpop.f32.mrf.mxu0  ;;  %v5137_v8 = vadd.f32 %v6112_v6, %v5072_v12 }
 0x319   :  { %v6114_v0 = vpop.f32.mrf.mxu1  ;;  %v5085_v24 = vadd.f32 %v6081_v29, %v5020_v16 }
 0x31a   :  { %v6154_v21 = vpop.f32.mrf.mxu0  ;;  %v6115_v41 = vadd.f32 %v6114_v0, %v6113_v32 }
 0x31b   :  { %v8498_v45 = vpop.f32.mrf.mxu1  ;;  %v6155_v10 = vadd.f32 %v6154_v21, %v8526_v28  ;;  %v6084_v28 = vadd.f32 %v8496_v18, %v8494_v42 }
 0x31c   :  { %v6156_v56 = vpop.f32.mrf.mxu0  ;;  %v5142_v51 = vadd.f32 %v6115_v41, %v5077_v20 }
 0x31d   :  { %v8502_v27 = vpop.f32.mrf.mxu1 }
 0x31e   :  { %v6157_v25 = vpop.f32.mrf.mxu0  ;;  %v5207_v13 = vadd.f32 %v6155_v10, %v5142_v51 }
 0x31f   :  { %v8511_v60 = vpop.f32.mrf.mxu1 }
 0x320   :  { %v6159_v32 = vpop.f32.mrf.mxu0 }
 0x321   :  { %v8515_v30 = vpop.f32.mrf.mxu1 }
 0x322   :  { %v6160_v36 = vpop.f32.mrf.mxu0  ;;  %v6121_v1 = vadd.f32 %v8515_v30, %v8511_v60 }
 0x323   :  { %v8520_v44 = vpop.f32.mrf.mxu1 }
 0x325   :  { %v8528_v14 = vpop.f32.mrf.mxu1 }
 0x326   :  { %v6124_v12 = vadd.f32 %v8528_v14, %v8520_v44 }
 0x327   :  { %v6181_v38 = vpop.f32.mrf.mxu1 }
 0x329   :  { %v6182_v31 = vpop.f32.mrf.mxu1 }
 0x32a   :  { %v6183_v43 = vadd.f32 %v6182_v31, %v6181_v38  ;;  %v6118_v31 = vadd.f32 %v8502_v27, %v8498_v45 }
 0x32b   :  { %v6184_v39 = vpop.f32.mrf.mxu1 }
 0x32c   :  { %v5256_v40 = vadd.f32 %v6183_v43, %v5191_v34  ;;  %v5202_v34 = vadd.f32 %v6152_v4, %v5137_v8  ;;  %v5145_v27 = vadd.f32 %v6118_v31, %v5080_v49 }
 0x32d   :  { %v6185_v35 = vpop.f32.mrf.mxu1 }
 0x32e   :  { %v5990_v47 = vpack.c.bf16 %v5256_v40, %v5256_v40  ;;  %v6186_v15 = vadd.f32 %v6185_v35, %v6184_v39  ;;  %v8654_v40 = vld [vmem:[#allocation44_spill] sm:$0xff] }
 0x32f   :  { %v6187_v62 = vpop.f32.mrf.mxu1  ;;  %v6044_v45 = vadd.f32 %v8654_v40, %v8653_v5 }
 0x330   :  { %5367 = vst [vmem:[#allocation10 + $0x8] sm:$0xf] %v5990_v47  ;;  %v5259_v33 = vadd.f32 %v6186_v15, %v5194_v23  ;;  %v6158_v23 = vadd.f32 %v6157_v25, %v6156_v56  ;;  %v6162_v15 = vpop.f32.mrf.mxu0 }
 0x331   :  { %v6188_v38 = vpop.f32.mrf.mxu1  ;;  %v5023_v6 = vadd.f32 %v6044_v45, %v8507_v50 }
 0x332   :  { %v5992_v9 = vpack.c.bf16 %v5259_v33, %v5259_v33  ;;  %v6189_v59 = vadd.f32 %v6188_v38, %v6187_v62  ;;  %v5210_v47 = vadd.f32 %v6158_v23, %v5145_v27  ;;  %v5150_v62 = vadd.f32 %v6121_v1, %v5085_v24  ;;  %v6163_v3 = vpop.f32.mrf.mxu0 }
 0x333   :  { %v6190_v63 = vpop.f32.mrf.mxu1  ;;  %v5088_v56 = vadd.f32 %v6084_v28, %v5023_v6  ;;  %v6161_v33 = vadd.f32 %v6160_v36, %v6159_v32  ;;  %v6164_v25 = vadd.f32 %v6163_v3, %v6162_v15 }
 0x334   :  { %5369 = vst [vmem:[#allocation10 + $0x14] sm:$0xf] %v5992_v9  ;;  %v5264_v52 = vadd.f32 %v6189_v59, %v5199_v53 }
 0x335   :  { %v6191_v0 = vpop.f32.mrf.mxu1  ;;  %v5215_v18 = vadd.f32 %v6161_v33, %v5150_v62  ;;  %v5153_v55 = vadd.f32 %v6124_v12, %v5088_v56 }
 0x336   :  { %v5994_v43 = vpack.c.bf16 %v5264_v52, %v5264_v52  ;;  %v6192_v7 = vadd.f32 %v6191_v0, %v6190_v63 }
 0x337   :  { %v6193_v37 = vpop.f32.mrf.mxu1  ;;  %v5218_v41 = vadd.f32 %v6164_v25, %v5153_v55 }
 0x338   :  { %5371 = vst [vmem:[#allocation10 + $0x20] sm:$0xf] %v5994_v43  ;;  %v5267_v39 = vadd.f32 %v6192_v7, %v5202_v34 }
 0x339   :  { %v6194_v2 = vpop.f32.mrf.mxu1 }
 0x33a   :  { %v5996_v17 = vpack.c.bf16 %v5267_v39, %v5267_v39  ;;  %v6195_v35 = vadd.f32 %v6194_v2, %v6193_v37 }
 0x33b   :  { %v6196_v22 = vpop.f32.mrf.mxu1 }
 0x33c   :  { %5373 = vst [vmem:[#allocation10 + $0x2c] sm:$0xf] %v5996_v17  ;;  %v5272_v21 = vadd.f32 %v6195_v35, %v5207_v13 }
 0x33d   :  { %v6197_v57 = vpop.f32.mrf.mxu1 }
 0x33e   :  { %v5998_v60 = vpack.c.bf16 %v5272_v21, %v5272_v21  ;;  %v6198_v30 = vadd.f32 %v6197_v57, %v6196_v22 }
 0x33f   :  { %v6199_v58 = vpop.f32.mrf.mxu1 }
 0x340   :  { %5375 = vst [vmem:[#allocation10 + $0x38] sm:$0xf] %v5998_v60  ;;  %v5275_v11 = vadd.f32 %v6198_v30, %v5210_v47 }
 0x341   :  { %v6200_v42 = vpop.f32.mrf.mxu1 }
 0x342   :  { %v6000_v61 = vpack.c.bf16 %v5275_v11, %v5275_v11  ;;  %v6201_v50 = vadd.f32 %v6200_v42, %v6199_v58 }
 0x343   :  { %v6202_v53 = vpop.f32.mrf.mxu1 }
 0x344   :  { %5377 = vst [vmem:[#allocation10 + $0x44] sm:$0xf] %v6000_v61  ;;  %v5280_v38 = vadd.f32 %v6201_v50, %v5215_v18 }
 0x345   :  { %v6203_v8 = vpop.f32.mrf.mxu1 }
 0x346   :  { %v6002_v44 = vpack.c.bf16 %v5280_v38, %v5280_v38  ;;  %v6204_v14 = vadd.f32 %v6203_v8, %v6202_v53 }
 0x348   :  { %5379 = vst [vmem:[#allocation10 + $0x50] sm:$0xf] %v6002_v44  ;;  %v5283_v9 = vadd.f32 %v6204_v14, %v5218_v41 }
 0x34a   :  { %v6004_v59 = vpack.c.bf16 %v5283_v9, %v5283_v9 }
 0x34c   :  { %5381 = vst [vmem:[#allocation10 + $0x5c] sm:$0xf] %v6004_v59 }
 0x34d   :  { %7335 = shalt.err (!%p7332_p10)
}
 0x34e   :  { %5393 = dma.vmem_to_hbm [thread:$0]  %s5388_s15, 1536, %s8578_s5, [#allocation4], %s7356_s28, %s7356_s28, %s7357_s29  }
 0x34f   :  { %7350 = dma.done.wait [#allocation4], 1536  }
 0x350   :  { %7351 = vsyncadd [#allocation4], 4294965760 }
 0x351   :  { %5397 = vsyncpa [#allocation3], 1 }
 0x352   :  { %5398 = vsyncpa [#allocation6], 1 }
 0x353   :  { %5399 = vsyncpa [#allocation9], 1 }
 0x354   :  { %5400 = vsyncpa [#allocation4], 1 }

// kernel: tpu_custom_call.1
= control target key start
LH: loop header
LB: loop body
LE: loop exit
PB: predicated region body
PF: predicated region fallthrough
CT: control target
= control target key end

     0   :  { %10 = vsyncpa [#allocation3], 0  ;;  %s8573_s0 = inlined_call_operand.hbm [shape: bf16[64,384], index: 0, kind: input, shape index: {}]   ;;  %s8574_s1 = inlined_call_operand.hbm [shape: bf16[384,1280], index: 1, kind: input, shape index: {}]   ;;  %s8575_s2 = inlined_call_operand.hbm [shape: f32[1,1280], index: 2, kind: input, shape index: {}]   ;;  %s8576_s3 = inlined_call_operand.hbm [shape: bf16[1280,384], index: 3, kind: input, shape index: {}]   ;;  %s8577_s4 = inlined_call_operand.vmem [shape: f32[1,384], index: 4, kind: input, shape index: {}]   ;;  %s8578_s5 = inlined_call_operand.hbm [shape: bf16[64,384], index: 5, kind: output, shape index: {}]  }
   0x1   :  { %11 = vsyncpa [#allocation6], 0 }
   0x2   :  { %12 = vsyncpa [#allocation9], 0 }
   0x3   :  { %13 = vsyncpa [#allocation4], 0  ;;  %s7352_s18 = smov [#allocation5]  }
   0x4   :  { %s31_s19 = sshll.u32 %s7352_s18, 4  ;;  %s32_s19 = int_to_ptr.vmem [resolvable:$true] %s31_s19 }
   0x5   :  { %s7252_s20 = scalar_lea.vmem %s32_s19, 30720  ;;  %p7257_p1 = scmp.lt.s32.totalorder %s32_s19, %s32_s19 }
   0x6   :  { %p7253_p0 = scmp.ne.s32.totalorder %s32_s19, %s7252_s20  ;;  %p7258_p2 = scmp.lt.s32.totalorder %s7252_s20, %s7252_s20 }
   0x8   :  { %p7259_p3 = por %p7258_p2, %p7257_p1 }
   0xa   :  { %p7260_p4 = pnand %p7259_p3, %p7253_p0 }
   0xc   :  { %7263 = shalt.err (!%p7260_p4)
}
   0xd   :  { %s7353_s21 = smov 640   ;;  %s7354_s22 = smov 40  }
   0xe   :  { %37 = dma.hbm_to_vmem [thread:$0]  %s8574_s1, 30720, %s32_s19, [#allocation6], %s7353_s21, %s7353_s21, %s7354_s22  }
   0xf   :  { %s7355_s25 = smov [#allocation2]  }
  0x10   :  { %s19_s26 = sshll.u32 %s7355_s25, 4  ;;  %s20_s26 = int_to_ptr.vmem [resolvable:$true] %s19_s26 }
  0x11   :  { %s7272_s27 = scalar_lea.vmem %s20_s26, 1536  ;;  %p7277_p6 = scmp.lt.s32.totalorder %s20_s26, %s20_s26 }
  0x12   :  { %p7273_p5 = scmp.ne.s32.totalorder %s20_s26, %s7272_s27  ;;  %p7278_p7 = scmp.lt.s32.totalorder %s7272_s27, %s7272_s27 }
  0x14   :  { %p7279_p8 = por %p7278_p7, %p7277_p6 }
  0x16   :  { %p7280_p9 = pnand %p7279_p8, %p7273_p5 }
  0x18   :  { %7283 = shalt.err (!%p7280_p9)
}
  0x19   :  { %s7356_s28 = smov 192   ;;  %s7357_s29 = smov 12  }
  0x1a   :  { %25 = dma.hbm_to_vmem [thread:$0]  %s8573_s0, 1536, %s20_s26, [#allocation3], %s7356_s28, %s7356_s28, %s7357_s29  }
  0x1b   :  { %s7358_s1 = smov [#allocation7]   ;;  %s7359_s8 = smov [#allocation8]  }
  0x1c   :  { %s44_s7 = sshll.u32 %s7358_s1, 4  ;;  %s53_s9 = sshll.u32 %s7359_s8, 4  ;;  %s45_s7 = int_to_ptr.vmem [resolvable:$true] %s44_s7  ;;  %s54_s9 = int_to_ptr.vmem [resolvable:$true] %s53_s9 }
  0x1d   :  { %s7292_s10 = scalar_lea.vmem %s45_s7, 160  ;;  %p7297_p11 = scmp.lt.s32.totalorder %s45_s7, %s45_s7 }
  0x1e   :  { %p7293_p10 = scmp.ne.s32.totalorder %s45_s7, %s7292_s10  ;;  %p7298_p12 = scmp.lt.s32.totalorder %s7292_s10, %s7292_s10 }
  0x20   :  { %p7299_p13 = por %p7298_p12, %p7297_p11 }
  0x22   :  { %p7300_p0 = pnand %p7299_p13, %p7293_p10 }
  0x24   :  { %7303 = shalt.err (!%p7300_p0)
}
  0x25   :  { %47 = dma.hbm_to_vmem [thread:$0]  %s8575_s2, 160, %s45_s7, [#allocation6]  }
  0x26   :  { %s7312_s13 = scalar_lea.vmem %s54_s9, 30720  ;;  %p7317_p2 = scmp.lt.s32.totalorder %s54_s9, %s54_s9 }
  0x27   :  { %p7313_p1 = scmp.ne.s32.totalorder %s54_s9, %s7312_s13  ;;  %p7318_p3 = scmp.lt.s32.totalorder %s7312_s13, %s7312_s13 }
  0x29   :  { %p7319_p4 = por %p7318_p3, %p7317_p2 }
  0x2b   :  { %p7320_p5 = pnand %p7319_p4, %p7313_p1 }
  0x2d   :  { %7323 = shalt.err (!%p7320_p5)
}
  0x2e   :  { %59 = dma.hbm_to_vmem [thread:$0]  %s8576_s3, 30720, %s54_s9, [#allocation9], %s7356_s28, %s7356_s28, %s7357_s29  }
  0x2f   :  { %7344 = dma.done.wait [#allocation3], 1536  }
  0x30   :  { %7345 = vsyncadd [#allocation3], 4294965760 }
  0x31   :  { %7346 = dma.done.wait [#allocation6], 30880  }
  0x32   :  { %7347 = vsyncadd [#allocation6], 4294936416 }
  0x33   :  { %7348 = dma.done.wait [#allocation9], 30720  }
  0x34   :  { %7349 = vsyncadd [#allocation9], 4294936576  ;;  %v7360_v0 = vmov 0   ;;  %v6215_v1 = vld [vmem:[#allocation5 + $0x234] ss:$40 sps:$4 sm:$0xff]  }
  0x35   :  { %1754 = vmatprep.mubr.bf16.mxu1 %v7360_v0  ;;  %v6217_v2 = vld [vmem:[#allocation5 + $0x734] ss:$40 sps:$4 sm:$0xff]   ;;  %1649 = vmatprep.subr.bf16.mxu0 %v6215_v1  ;;  %v6219_v3 = vld [vmem:[#allocation5 + $0x230] ss:$40 sps:$4 sm:$0xff]   ;;  %v6221_v5 = vld [vmem:[#allocation5 + $0x1e4] ss:$40 sps:$4 sm:$0xff]  }
  0x36   :  { %v6220_v4 = vld [vmem:[#allocation5 + $0x730] ss:$40 sps:$4 sm:$0xff]   ;;  %1722 = vmatprep.subr.bf16.mxu1 %v6217_v2  ;;  %1650 = vmatpush1.bf16.msra.mxu0 %v6219_v3  ;;  %v6223_v6 = vld [vmem:[#allocation5 + $0x6e4] ss:$40 sps:$4 sm:$0xff]   ;;  %v6225_v7 = vld [vmem:[#allocation5 + $0x1e0] ss:$40 sps:$4 sm:$0xff]  }
  0x37   :  { %1723 = vmatpush1.bf16.msra.mxu1 %v6220_v4  ;;  %1651 = vmatprep.subr.bf16.mxu0 %v6221_v5  ;;  %v6226_v8 = vld [vmem:[#allocation5 + $0x6e0] ss:$40 sps:$4 sm:$0xff]   ;;  %v6227_v9 = vld [vmem:[#allocation5 + $0x194] ss:$40 sps:$4 sm:$0xff]   ;;  %v6231_v11 = vld [vmem:[#allocation5 + $0x190] ss:$40 sps:$4 sm:$0xff]  }
  0x38   :  { %1724 = vmatprep.subr.bf16.mxu1 %v6223_v6  ;;  %v6229_v10 = vld [vmem:[#allocation5 + $0x694] ss:$40 sps:$4 sm:$0xff]   ;;  %v6232_v12 = vld [vmem:[#allocation5 + $0x690] ss:$40 sps:$4 sm:$0xff]   ;;  %v6233_v13 = vld [vmem:[#allocation5 + $0x144] ss:$40 sps:$4 sm:$0xff]  }
  0x39   :  { %v6235_v14 = vld [vmem:[#allocation5 + $0x644] ss:$40 sps:$4 sm:$0xff]   ;;  %v6237_v15 = vld [vmem:[#allocation5 + $0x140] ss:$40 sps:$4 sm:$0xff]   ;;  %v6239_v17 = vld [vmem:[#allocation5 + $0xf4] ss:$40 sps:$4 sm:$0xff]  }
  0x3a   :  { %1652 = vmatpush1.bf16.msra.mxu0 %v6225_v7  ;;  %v6238_v16 = vld [vmem:[#allocation5 + $0x640] ss:$40 sps:$4 sm:$0xff]   ;;  %v6241_v18 = vld [vmem:[#allocation5 + $0x5f4] ss:$40 sps:$4 sm:$0xff]   ;;  %v6243_v19 = vld [vmem:[#allocation5 + $0xf0] ss:$40 sps:$4 sm:$0xff]  }
  0x3b   :  { %1725 = vmatpush1.bf16.msra.mxu1 %v6226_v8  ;;  %1653 = vmatprep.subr.bf16.mxu0 %v6227_v9  ;;  %v6244_v20 = vld [vmem:[#allocation5 + $0x5f0] ss:$40 sps:$4 sm:$0xff]   ;;  %v6245_v21 = vld [vmem:[#allocation5 + $0xa4] ss:$40 sps:$4 sm:$0xff]   ;;  %v6249_v23 = vld [vmem:[#allocation5 + $0xa0] ss:$40 sps:$4 sm:$0xff]  }
  0x3c   :  { %1726 = vmatprep.subr.bf16.mxu1 %v6229_v10  ;;  %v6247_v22 = vld [vmem:[#allocation5 + $0x5a4] ss:$40 sps:$4 sm:$0xff]   ;;  %v6250_v24 = vld [vmem:[#allocation5 + $0x5a0] ss:$40 sps:$4 sm:$0xff]   ;;  %v6251_v25 = vld [vmem:[#allocation5 + $0x54] ss:$40 sps:$4 sm:$0xff]  }
  0x3d   :  { %v6253_v26 = vld [vmem:[#allocation5 + $0x554] ss:$40 sps:$4 sm:$0xff]   ;;  %v6255_v27 = vld [vmem:[#allocation5 + $0x50] ss:$40 sps:$4 sm:$0xff]   ;;  %v6257_v29 = vld [vmem:[#allocation5 + $0x4] ss:$40 sps:$4 sm:$0xff]  }
  0x3e   :  { %1654 = vmatpush1.bf16.msra.mxu0 %v6231_v11  ;;  %v6256_v28 = vld [vmem:[#allocation5 + $0x550] ss:$40 sps:$4 sm:$0xff]   ;;  %v6259_v30 = vld [vmem:[#allocation5 + $0x504] ss:$40 sps:$4 sm:$0xff]   ;;  %v6261_v31 = vld [vmem:[#allocation5] ss:$40 sps:$4 sm:$0xff]  }
  0x3f   :  { %1727 = vmatpush1.bf16.msra.mxu1 %v6232_v12  ;;  %1655 = vmatprep.subr.bf16.mxu0 %v6233_v13  ;;  %v6262_v32 = vld [vmem:[#allocation5 + $0x500] ss:$40 sps:$4 sm:$0xff]   ;;  %v6263_v33 = vld [vmem:[#allocation5 + $0x4b4] ss:$40 sps:$4 sm:$0xff]   ;;  %v6268_v37 = vld [vmem:[#allocation5 + $0x4b0] ss:$40 sps:$4 sm:$0xff]  }
  0x40   :  { %1728 = vmatprep.subr.bf16.mxu1 %v6235_v14  ;;  %v6267_v34 = vld [vmem:[#allocation5 + $0x23c] ss:$40 sps:$4 sm:$0xff]   ;;  %v7411_v35 = vld [vmem:[#allocation2 + $0x8] ss:$12 sps:$4 sm:$0xff]   ;;  %v6265_v36 = vld [vmem:[#allocation5 + $0x238] ss:$40 sps:$4 sm:$0xff]  }
  0x41   :  { %v6270_v38 = vld [vmem:[#allocation5 + $0x464] ss:$40 sps:$4 sm:$0xff]   ;;  %v6272_v40 = vld [vmem:[#allocation5 + $0x1e8] ss:$40 sps:$4 sm:$0xff]   ;;  %v6276_v42 = vld [vmem:[#allocation5 + $0x414] ss:$40 sps:$4 sm:$0xff]  }
  0x42   :  { %1656 = vmatpush1.bf16.msra.mxu0 %v6237_v15  ;;  %v6274_v39 = vld [vmem:[#allocation5 + $0x1ec] ss:$40 sps:$4 sm:$0xff]   ;;  %v6275_v41 = vld [vmem:[#allocation5 + $0x460] ss:$40 sps:$4 sm:$0xff]   ;;  %v6280_v43 = vld [vmem:[#allocation5 + $0x19c] ss:$40 sps:$4 sm:$0xff]  }
  0x43   :  { %1729 = vmatpush1.bf16.msra.mxu1 %v6238_v16  ;;  %1657 = vmatprep.subr.bf16.mxu0 %v6239_v17  ;;  %v6278_v44 = vld [vmem:[#allocation5 + $0x198] ss:$40 sps:$4 sm:$0xff]   ;;  %v6282_v46 = vld [vmem:[#allocation5 + $0x3c4] ss:$40 sps:$4 sm:$0xff]   ;;  %v6284_v48 = vld [vmem:[#allocation5 + $0x148] ss:$40 sps:$4 sm:$0xff]  }
  0x44   :  { %1730 = vmatprep.subr.bf16.mxu1 %v6241_v18  ;;  %v6281_v45 = vld [vmem:[#allocation5 + $0x410] ss:$40 sps:$4 sm:$0xff]   ;;  %v6286_v47 = vld [vmem:[#allocation5 + $0x14c] ss:$40 sps:$4 sm:$0xff]   ;;  %v6287_v49 = vld [vmem:[#allocation5 + $0x3c0] ss:$40 sps:$4 sm:$0xff]  }
  0x45   :  { %v6288_v50 = vld [vmem:[#allocation5 + $0x374] ss:$40 sps:$4 sm:$0xff]   ;;  %v7415_v51 = vld [vmem:[#allocation2 + $0x4] ss:$12 sps:$4 sm:$0xff]   ;;  %v6290_v53 = vld [vmem:[#allocation5 + $0xf8] ss:$40 sps:$4 sm:$0xff]  }
  0x46   :  { %1658 = vmatpush1.bf16.msra.mxu0 %v6243_v19  ;;  %v6292_v52 = vld [vmem:[#allocation5 + $0xfc] ss:$40 sps:$4 sm:$0xff]   ;;  %1681 = vmatprep.mubr.bf16.mxu0 %v7415_v51  ;;  %v6293_v54 = vld [vmem:[#allocation5 + $0x370] ss:$40 sps:$4 sm:$0xff]   ;;  %v6298_v56 = vld [vmem:[#allocation5 + $0xac] ss:$40 sps:$4 sm:$0xff]  }
  0x47   :  { %1731 = vmatpush1.bf16.msra.mxu1 %v6244_v20  ;;  %1659 = vmatprep.subr.bf16.mxu0 %v6245_v21  ;;  %v6294_v55 = vld [vmem:[#allocation5 + $0x324] ss:$40 sps:$4 sm:$0xff]   ;;  %v6296_v57 = vld [vmem:[#allocation5 + $0xa8] ss:$40 sps:$4 sm:$0xff]   ;;  %v6300_v60 = vld [vmem:[#allocation5 + $0x2d4] ss:$40 sps:$4 sm:$0xff]  }
  0x48   :  { %1732 = vmatprep.subr.bf16.mxu1 %v6247_v22  ;;  %v6299_v58 = vld [vmem:[#allocation5 + $0x320] ss:$40 sps:$4 sm:$0xff]   ;;  %v6304_v61 = vld [vmem:[#allocation5 + $0x5c] ss:$40 sps:$4 sm:$0xff]   ;;  %v6305_v63 = vld [vmem:[#allocation5 + $0x2d0] ss:$40 sps:$4 sm:$0xff]  }
  0x49   :  { %v7418_v59 = vld [vmem:[#allocation2 + $0x20] ss:$12 sps:$4 sm:$0xff]   ;;  %v6308_v3 = vld [vmem:[#allocation5 + $0x8] ss:$40 sps:$4 sm:$0xff]   ;;  %v7422_v5 = vld [vmem:[#allocation2 + $0x38] ss:$12 sps:$4 sm:$0xff]  }
  0x4a   :  { %1660 = vmatpush1.bf16.msra.mxu0 %v6249_v23  ;;  %v6302_v62 = vld [vmem:[#allocation5 + $0x58] ss:$40 sps:$4 sm:$0xff]   ;;  %v6306_v1 = vld [vmem:[#allocation5 + $0x284] ss:$40 sps:$4 sm:$0xff]   ;;  %v6321_v13 = vld [vmem:[#allocation5 + $0x468] ss:$40 sps:$4 sm:$0xff]  }
  0x4b   :  { %1733 = vmatpush1.bf16.msra.mxu1 %v6250_v24  ;;  %1661 = vmatprep.subr.bf16.mxu0 %v6251_v25  ;;  %v6310_v2 = vld [vmem:[#allocation5 + $0xc] ss:$40 sps:$4 sm:$0xff]   ;;  %v6311_v4 = vld [vmem:[#allocation5 + $0x280] ss:$40 sps:$4 sm:$0xff]   ;;  %v6317_v6 = vld [vmem:[#allocation5 + $0x4bc] ss:$40 sps:$4 sm:$0xff]  }
  0x4c   :  { %1734 = vmatprep.subr.bf16.mxu1 %v6253_v26  ;;  %v6320_v7 = vld [vmem:[#allocation5 + $0x73c] ss:$40 sps:$4 sm:$0xff]   ;;  %v7424_v8 = vld [vmem:[#allocation2] ss:$12 sps:$4 sm:$0xff]   ;;  %v6324_v14 = vld [vmem:[#allocation5 + $0x6e8] ss:$40 sps:$4 sm:$0xff]  }
  0x4d   :  { %v6315_v9 = vld [vmem:[#allocation5 + $0x4b8] ss:$40 sps:$4 sm:$0xff]   ;;  %v6323_v11 = vld [vmem:[#allocation5 + $0x46c] ss:$40 sps:$4 sm:$0xff]   ;;  %v7428_v15 = vld [vmem:[#allocation2 + $0x1c] ss:$12 sps:$4 sm:$0xff]  }
  0x4e   :  { %1662 = vmatpush1.bf16.msra.mxu0 %v6255_v27  ;;  %v6318_v10 = vld [vmem:[#allocation5 + $0x738] ss:$40 sps:$4 sm:$0xff]   ;;  %v6326_v12 = vld [vmem:[#allocation5 + $0x6ec] ss:$40 sps:$4 sm:$0xff]   ;;  %v7431_v16 = vld [vmem:[#allocation2 + $0x50] ss:$12 sps:$4 sm:$0xff]  }
  0x4f   :  { %1735 = vmatpush1.bf16.msra.mxu1 %v6256_v28  ;;  %1663 = vmatprep.subr.bf16.mxu0 %v6257_v29  ;;  %v6333_v17 = vld [vmem:[#allocation5 + $0x41c] ss:$40 sps:$4 sm:$0xff]   ;;  %v6331_v20 = vld [vmem:[#allocation5 + $0x418] ss:$40 sps:$4 sm:$0xff]   ;;  %v6339_v22 = vld [vmem:[#allocation5 + $0x3cc] ss:$40 sps:$4 sm:$0xff]  }
  0x50   :  { %1736 = vmatprep.subr.bf16.mxu1 %v6259_v30  ;;  %v6336_v18 = vld [vmem:[#allocation5 + $0x69c] ss:$40 sps:$4 sm:$0xff]   ;;  %v6334_v21 = vld [vmem:[#allocation5 + $0x698] ss:$40 sps:$4 sm:$0xff]   ;;  %v6342_v23 = vld [vmem:[#allocation5 + $0x64c] ss:$40 sps:$4 sm:$0xff]  }
  0x51   :  { %v7434_v19 = vld [vmem:[#allocation2 + $0x18] ss:$12 sps:$4 sm:$0xff]   ;;  %v7438_v24 = vld [vmem:[#allocation2 + $0x34] ss:$12 sps:$4 sm:$0xff]   ;;  %v6337_v25 = vld [vmem:[#allocation5 + $0x3c8] ss:$40 sps:$4 sm:$0xff]  }
  0x52   :  { %1664 = vmatpush1.bf16.msra.mxu0 %v6261_v31  ;;  %v6340_v26 = vld [vmem:[#allocation5 + $0x648] ss:$40 sps:$4 sm:$0xff]   ;;  %v6349_v27 = vld [vmem:[#allocation5 + $0x37c] ss:$40 sps:$4 sm:$0xff]   ;;  %v6347_v30 = vld [vmem:[#allocation5 + $0x378] ss:$40 sps:$4 sm:$0xff]  }
  0x53   :  { %1737 = vmatpush1.bf16.msra.mxu1 %v6262_v32  ;;  %1665 = vmatprep.subr.bf16.mxu0 %v6263_v33  ;;  %v6352_v28 = vld [vmem:[#allocation5 + $0x5fc] ss:$40 sps:$4 sm:$0xff]   ;;  %v6350_v31 = vld [vmem:[#allocation5 + $0x5f8] ss:$40 sps:$4 sm:$0xff]   ;;  %v6355_v32 = vld [vmem:[#allocation5 + $0x32c] ss:$40 sps:$4 sm:$0xff]  }
  0x54   :  { %1795 = vmatprep.subr.bf16.mxu1 %v6267_v34  ;;  %v7442_v29 = vld [vmem:[#allocation2 + $0x30] ss:$12 sps:$4 sm:$0xff]   ;;  %v6358_v33 = vld [vmem:[#allocation5 + $0x5ac] ss:$40 sps:$4 sm:$0xff]  }
  0x55   :  { %v7444_v34 = vld [vmem:[#allocation2 + $0x4c] ss:$12 sps:$4 sm:$0xff]  }
  0x56   :  { %1755 = vmatmul.mubr.bf16.vlgmr.msra.gmra.mxu1 %v7411_v35  ;;  %1666 = vmatpush2.bf16.msra.mxu0 %v6268_v37  ;;  %v6356_v37 = vld [vmem:[#allocation5 + $0x5a8] ss:$40 sps:$4 sm:$0xff]  }
  0x57   :  { %1796 = vmatpush1.bf16.msra.mxu1 %v6265_v36  ;;  %1667 = vmatprep.subr.bf16.mxu0 %v6270_v38  ;;  %v6353_v36 = vld [vmem:[#allocation5 + $0x328] ss:$40 sps:$4 sm:$0xff]   ;;  %v6365_v38 = vld [vmem:[#allocation5 + $0x2dc] ss:$40 sps:$4 sm:$0xff]  }
  0x58   :  { %1797 = vmatprep.subr.bf16.mxu1 %v6274_v39  ;;  %1764 = vmatprep.mubr.bf16.mxu1 %v7360_v0  ;;  %v6368_v39 = vld [vmem:[#allocation5 + $0x55c] ss:$40 sps:$4 sm:$0xff]  }
  0x5a   :  { %1668 = vmatpush2.bf16.msra.mxu0 %v6275_v41  ;;  %v6363_v41 = vld [vmem:[#allocation5 + $0x2d8] ss:$40 sps:$4 sm:$0xff]  }
  0x5b   :  { %1798 = vmatpush1.bf16.msra.mxu1 %v6272_v40  ;;  %1669 = vmatprep.subr.bf16.mxu0 %v6276_v42  ;;  %v7448_v40 = vld [vmem:[#allocation2 + $0x48] ss:$12 sps:$4 sm:$0xff]   ;;  %v6366_v42 = vld [vmem:[#allocation5 + $0x558] ss:$40 sps:$4 sm:$0xff]  }
  0x5c   :  { %1799 = vmatprep.subr.bf16.mxu1 %v6280_v43  ;;  %v6371_v43 = vld [vmem:[#allocation5 + $0x28c] ss:$40 sps:$4 sm:$0xff]  }
  0x5e   :  { %1670 = vmatpush2.bf16.msra.mxu0 %v6281_v45  ;;  %1765 = vmatmul.mubr.bf16.gmra.mxu1 %v7418_v59  ;;  %v6369_v45 = vld [vmem:[#allocation5 + $0x288] ss:$40 sps:$4 sm:$0xff]  }
  0x5f   :  { %1800 = vmatpush1.bf16.msra.mxu1 %v6278_v44  ;;  %1671 = vmatprep.subr.bf16.mxu0 %v6282_v46  ;;  %v6374_v44 = vld [vmem:[#allocation5 + $0x50c] ss:$40 sps:$4 sm:$0xff]   ;;  %v6372_v46 = vld [vmem:[#allocation5 + $0x508] ss:$40 sps:$4 sm:$0xff]  }
  0x60   :  { %1801 = vmatprep.subr.bf16.mxu1 %v6286_v47  ;;  %1774 = vmatprep.mubr.bf16.mxu1 %v7360_v0  ;;  %v6377_v47 = vld [vmem:[#allocation5 + $0x244] ss:$40 sps:$4 sm:$0xff]  }
  0x62   :  { %1672 = vmatpush2.bf16.msra.mxu0 %v6287_v49  ;;  %v6375_v49 = vld [vmem:[#allocation5 + $0x240] ss:$40 sps:$4 sm:$0xff]  }
  0x63   :  { %1802 = vmatpush1.bf16.msra.mxu1 %v6284_v48  ;;  %1673 = vmatprep.subr.bf16.mxu0 %v6288_v50  ;;  %v6380_v48 = vld [vmem:[#allocation5 + $0x744] ss:$40 sps:$4 sm:$0xff]   ;;  %v6378_v50 = vld [vmem:[#allocation5 + $0x740] ss:$40 sps:$4 sm:$0xff]  }
  0x64   :  { %1803 = vmatprep.subr.bf16.mxu1 %v6292_v52  ;;  %v6383_v52 = vld [vmem:[#allocation5 + $0x1f4] ss:$40 sps:$4 sm:$0xff]  }
  0x66   :  { %1674 = vmatpush2.bf16.msra.mxu0 %v6293_v54  ;;  %1775 = vmatmul.mubr.bf16.gmra.mxu1 %v7422_v5  ;;  %v6381_v54 = vld [vmem:[#allocation5 + $0x1f0] ss:$40 sps:$4 sm:$0xff]  }
  0x67   :  { %1804 = vmatpush1.bf16.msra.mxu1 %v6290_v53  ;;  %1675 = vmatprep.subr.bf16.mxu0 %v6294_v55  ;;  %v6386_v53 = vld [vmem:[#allocation5 + $0x6f4] ss:$40 sps:$4 sm:$0xff]   ;;  %v6384_v55 = vld [vmem:[#allocation5 + $0x6f0] ss:$40 sps:$4 sm:$0xff]  }
  0x68   :  { %1805 = vmatprep.subr.bf16.mxu1 %v6298_v56  ;;  %1784 = vmatprep.mubr.bf16.mxu1 %v7360_v0  ;;  %v6389_v56 = vld [vmem:[#allocation5 + $0x1a4] ss:$40 sps:$4 sm:$0xff]  }
  0x6a   :  { %1676 = vmatpush2.bf16.msra.mxu0 %v6299_v58  ;;  %v6387_v58 = vld [vmem:[#allocation5 + $0x1a0] ss:$40 sps:$4 sm:$0xff]  }
  0x6b   :  { %1806 = vmatpush1.bf16.msra.mxu1 %v6296_v57  ;;  %1677 = vmatprep.subr.bf16.mxu0 %v6300_v60  ;;  %v6392_v57 = vld [vmem:[#allocation5 + $0x6a4] ss:$40 sps:$4 sm:$0xff]   ;;  %v6390_v60 = vld [vmem:[#allocation5 + $0x6a0] ss:$40 sps:$4 sm:$0xff]  }
  0x6c   :  { %1807 = vmatprep.subr.bf16.mxu1 %v6304_v61  ;;  %v6395_v61 = vld [vmem:[#allocation5 + $0x154] ss:$40 sps:$4 sm:$0xff]  }
  0x6e   :  { %1678 = vmatpush2.bf16.msra.mxu0 %v6305_v63  ;;  %1785 = vmatmul.mubr.bf16.gmra.mxu1 %v7431_v16  ;;  %v6393_v63 = vld [vmem:[#allocation5 + $0x150] ss:$40 sps:$4 sm:$0xff]  }
  0x6f   :  { %1808 = vmatpush1.bf16.msra.mxu1 %v6302_v62  ;;  %1679 = vmatprep.subr.bf16.mxu0 %v6306_v1  ;;  %v6398_v62 = vld [vmem:[#allocation5 + $0x654] ss:$40 sps:$4 sm:$0xff]   ;;  %v6396_v1 = vld [vmem:[#allocation5 + $0x650] ss:$40 sps:$4 sm:$0xff]  }
  0x70   :  { %1809 = vmatprep.subr.bf16.mxu1 %v6310_v2  ;;  %1827 = vmatprep.mubr.bf16.mxu1 %v7415_v51  ;;  %v6401_v2 = vld [vmem:[#allocation5 + $0x104] ss:$40 sps:$4 sm:$0xff]  }
  0x72   :  { %1680 = vmatpush2.bf16.msra.mxu0 %v6311_v4  ;;  %v6399_v4 = vld [vmem:[#allocation5 + $0x100] ss:$40 sps:$4 sm:$0xff]  }
  0x73   :  { %1810 = vmatpush1.bf16.msra.mxu1 %v6308_v3  ;;  %1868 = vmatprep.subr.bf16.mxu0 %v6320_v7  ;;  %v6404_v3 = vld [vmem:[#allocation5 + $0x604] ss:$40 sps:$4 sm:$0xff]   ;;  %v6407_v7 = vld [vmem:[#allocation5 + $0xb4] ss:$40 sps:$4 sm:$0xff]  }
  0x74   :  { %1811 = vmatprep.subr.bf16.mxu1 %v6317_v6  ;;  %v6402_v6 = vld [vmem:[#allocation5 + $0x600] ss:$40 sps:$4 sm:$0xff]  }
  0x75   :  { %1682 = vmatmul.mubr.bf16.vlgmr.msra.gmra.mxu0 %v7424_v8 }
  0x76   :  { %1869 = vmatpush1.bf16.msra.mxu0 %v6318_v10  ;;  %1691 = vmatprep.mubr.bf16.mxu0 %v7428_v15  ;;  %v6405_v10 = vld [vmem:[#allocation5 + $0xb0] ss:$40 sps:$4 sm:$0xff]  }
  0x77   :  { %1812 = vmatpush2.bf16.msra.mxu1 %v6315_v9  ;;  %1870 = vmatprep.subr.bf16.mxu0 %v6326_v12  ;;  %v6410_v9 = vld [vmem:[#allocation5 + $0x5b4] ss:$40 sps:$4 sm:$0xff]   ;;  %v6413_v12 = vld [vmem:[#allocation5 + $0x64] ss:$40 sps:$4 sm:$0xff]  }
  0x78   :  { %1813 = vmatprep.subr.bf16.mxu1 %v6323_v11  ;;  %v6408_v11 = vld [vmem:[#allocation5 + $0x5b0] ss:$40 sps:$4 sm:$0xff]  }
  0x7a   :  { %1871 = vmatpush1.bf16.msra.mxu0 %v6324_v14  ;;  %v6411_v14 = vld [vmem:[#allocation5 + $0x60] ss:$40 sps:$4 sm:$0xff]  }
  0x7b   :  { %1814 = vmatpush2.bf16.msra.mxu1 %v6321_v13  ;;  %1872 = vmatprep.subr.bf16.mxu0 %v6336_v18  ;;  %v6416_v13 = vld [vmem:[#allocation5 + $0x564] ss:$40 sps:$4 sm:$0xff]   ;;  %v6419_v18 = vld [vmem:[#allocation5 + $0x14] ss:$40 sps:$4 sm:$0xff]  }
  0x7c   :  { %1815 = vmatprep.subr.bf16.mxu1 %v6333_v17  ;;  %v6414_v17 = vld [vmem:[#allocation5 + $0x560] ss:$40 sps:$4 sm:$0xff]  }
  0x7d   :  { %1692 = vmatmul.mubr.bf16.gmra.mxu0 %v7434_v19 }
  0x7e   :  { %1873 = vmatpush1.bf16.msra.mxu0 %v6334_v21  ;;  %1701 = vmatprep.mubr.bf16.mxu0 %v7438_v24  ;;  %v6417_v21 = vld [vmem:[#allocation5 + $0x10] ss:$40 sps:$4 sm:$0xff]  }
  0x7f   :  { %1816 = vmatpush2.bf16.msra.mxu1 %v6331_v20  ;;  %1874 = vmatprep.subr.bf16.mxu0 %v6342_v23  ;;  %v6422_v20 = vld [vmem:[#allocation5 + $0x514] ss:$40 sps:$4 sm:$0xff]   ;;  %v6425_v23 = vld [vmem:[#allocation5 + $0x4c4] ss:$40 sps:$4 sm:$0xff]  }
  0x80   :  { %1817 = vmatprep.subr.bf16.mxu1 %v6339_v22  ;;  %v6420_v22 = vld [vmem:[#allocation5 + $0x510] ss:$40 sps:$4 sm:$0xff]  }
  0x82   :  { %1875 = vmatpush1.bf16.msra.mxu0 %v6340_v26  ;;  %v6423_v26 = vld [vmem:[#allocation5 + $0x4c0] ss:$40 sps:$4 sm:$0xff]  }
  0x83   :  { %1818 = vmatpush2.bf16.msra.mxu1 %v6337_v25  ;;  %1876 = vmatprep.subr.bf16.mxu0 %v6352_v28  ;;  %v6428_v25 = vld [vmem:[#allocation5 + $0x24c] ss:$40 sps:$4 sm:$0xff]  }
  0x84   :  { %1819 = vmatprep.subr.bf16.mxu1 %v6349_v27  ;;  %v6426_v27 = vld [vmem:[#allocation5 + $0x248] ss:$40 sps:$4 sm:$0xff]   ;;  %v6431_v28 = vld [vmem:[#allocation5 + $0x474] ss:$40 sps:$4 sm:$0xff]  }
  0x85   :  { %1702 = vmatmul.mubr.bf16.gmra.mxu0 %v7442_v29 }
  0x86   :  { %1877 = vmatpush1.bf16.msra.mxu0 %v6350_v31  ;;  %1711 = vmatprep.mubr.bf16.mxu0 %v7444_v34  ;;  %v6429_v31 = vld [vmem:[#allocation5 + $0x470] ss:$40 sps:$4 sm:$0xff]  }
  0x87   :  { %1820 = vmatpush2.bf16.msra.mxu1 %v6347_v30  ;;  %1878 = vmatprep.subr.bf16.mxu0 %v6358_v33  ;;  %v6434_v30 = vld [vmem:[#allocation5 + $0x1fc] ss:$40 sps:$4 sm:$0xff]  }
  0x88   :  { %1821 = vmatprep.subr.bf16.mxu1 %v6355_v32  ;;  %v6432_v32 = vld [vmem:[#allocation5 + $0x1f8] ss:$40 sps:$4 sm:$0xff]   ;;  %v6437_v33 = vld [vmem:[#allocation5 + $0x424] ss:$40 sps:$4 sm:$0xff]  }
  0x8a   :  { %1879 = vmatpush1.bf16.msra.mxu0 %v6356_v37  ;;  %v6435_v37 = vld [vmem:[#allocation5 + $0x420] ss:$40 sps:$4 sm:$0xff]  }
  0x8b   :  { %1822 = vmatpush2.bf16.msra.mxu1 %v6353_v36  ;;  %1880 = vmatprep.subr.bf16.mxu0 %v6368_v39  ;;  %v6440_v36 = vld [vmem:[#allocation5 + $0x1ac] ss:$40 sps:$4 sm:$0xff]  }
  0x8c   :  { %1823 = vmatprep.subr.bf16.mxu1 %v6365_v38  ;;  %v6438_v38 = vld [vmem:[#allocation5 + $0x1a8] ss:$40 sps:$4 sm:$0xff]   ;;  %v6443_v39 = vld [vmem:[#allocation5 + $0x3d4] ss:$40 sps:$4 sm:$0xff]  }
  0x8d   :  { %1712 = vmatmul.mubr.bf16.gmra.mxu0 %v7448_v40 }
  0x8e   :  { %1881 = vmatpush1.bf16.msra.mxu0 %v6366_v42  ;;  %1900 = vmatprep.mubr.bf16.mxu0 %v7360_v0  ;;  %v6441_v42 = vld [vmem:[#allocation5 + $0x3d0] ss:$40 sps:$4 sm:$0xff]  }
  0x8f   :  { %1824 = vmatpush2.bf16.msra.mxu1 %v6363_v41  ;;  %1882 = vmatprep.subr.bf16.mxu0 %v6374_v44  ;;  %v6446_v41 = vld [vmem:[#allocation5 + $0x15c] ss:$40 sps:$4 sm:$0xff]   ;;  %v6452_v44 = vld [vmem:[#allocation5 + $0x10c] ss:$40 sps:$4 sm:$0xff]  }
  0x90   :  { %1825 = vmatprep.subr.bf16.mxu1 %v6371_v43  ;;  %v6449_v43 = vld [vmem:[#allocation5 + $0x384] ss:$40 sps:$4 sm:$0xff]  }
  0x92   :  { %1883 = vmatpush1.bf16.msra.mxu0 %v6372_v46  ;;  %v6450_v46 = vld [vmem:[#allocation5 + $0x108] ss:$40 sps:$4 sm:$0xff]  }
  0x93   :  { %1826 = vmatpush2.bf16.msra.mxu1 %v6369_v45  ;;  %1941 = vmatprep.subr.bf16.mxu0 %v6377_v47  ;;  %v6447_v45 = vld [vmem:[#allocation5 + $0x380] ss:$40 sps:$4 sm:$0xff]   ;;  %v6455_v47 = vld [vmem:[#allocation5 + $0x334] ss:$40 sps:$4 sm:$0xff]  }
  0x94   :  { %2014 = vmatprep.subr.bf16.mxu1 %v6380_v48  ;;  %v6458_v48 = vld [vmem:[#allocation5 + $0xbc] ss:$40 sps:$4 sm:$0xff]  }
  0x95   :  { %1901 = vmatmul.mubr.bf16.vlgmr.msra.gmra.mxu0 %v7411_v35 }
  0x96   :  { %1828 = vmatmul.mubr.bf16.vlgmr.msra.gmra.mxu1 %v7424_v8  ;;  %1942 = vmatpush1.bf16.msra.mxu0 %v6375_v49  ;;  %v6453_v49 = vld [vmem:[#allocation5 + $0x330] ss:$40 sps:$4 sm:$0xff]  }
  0x97   :  { %2015 = vmatpush1.bf16.msra.mxu1 %v6378_v50  ;;  %1943 = vmatprep.subr.bf16.mxu0 %v6383_v52  ;;  %v6456_v50 = vld [vmem:[#allocation5 + $0xb8] ss:$40 sps:$4 sm:$0xff]   ;;  %v6464_v52 = vld [vmem:[#allocation5 + $0x6c] ss:$40 sps:$4 sm:$0xff]  }
  0x98   :  { %2016 = vmatprep.subr.bf16.mxu1 %v6386_v53  ;;  %1837 = vmatprep.mubr.bf16.mxu1 %v7428_v15  ;;  %v6459_v53 = vld [vmem:[#allocation5 + $0x2e0] ss:$40 sps:$4 sm:$0xff]  }
  0x99   :  { %1910 = vmatprep.mubr.bf16.mxu0 %v7360_v0 }
  0x9a   :  { %1944 = vmatpush1.bf16.msra.mxu0 %v6381_v54  ;;  %v6462_v54 = vld [vmem:[#allocation5 + $0x68] ss:$40 sps:$4 sm:$0xff]  }
  0x9b   :  { %2017 = vmatpush1.bf16.msra.mxu1 %v6384_v55  ;;  %1945 = vmatprep.subr.bf16.mxu0 %v6389_v56  ;;  %v6467_v55 = vld [vmem:[#allocation5 + $0x294] ss:$40 sps:$4 sm:$0xff]  }
  0x9c   :  { %2018 = vmatprep.subr.bf16.mxu1 %v6392_v57  ;;  %v6470_v56 = vld [vmem:[#allocation5 + $0x1c] ss:$40 sps:$4 sm:$0xff]   ;;  %v6465_v57 = vld [vmem:[#allocation5 + $0x290] ss:$40 sps:$4 sm:$0xff]  }
  0x9d   :  { %1911 = vmatmul.mubr.bf16.gmra.mxu0 %v7418_v59 }
  0x9e   :  { %1838 = vmatmul.mubr.bf16.gmra.mxu1 %v7434_v19  ;;  %1946 = vmatpush1.bf16.msra.mxu0 %v6387_v58  ;;  %v6468_v58 = vld [vmem:[#allocation5 + $0x18] ss:$40 sps:$4 sm:$0xff]  }
  0x9f   :  { %2019 = vmatpush1.bf16.msra.mxu1 %v6390_v60  ;;  %1947 = vmatprep.subr.bf16.mxu0 %v6395_v61  ;;  %v6476_v60 = vld [vmem:[#allocation5 + $0x74c] ss:$40 sps:$4 sm:$0xff]   ;;  %v6471_v61 = vld [vmem:[#allocation5 + $0x4c8] ss:$40 sps:$4 sm:$0xff]  }
  0xa0   :  { %2020 = vmatprep.subr.bf16.mxu1 %v6398_v62  ;;  %1847 = vmatprep.mubr.bf16.mxu1 %v7438_v24  ;;  %v6474_v62 = vld [vmem:[#allocation5 + $0x748] ss:$40 sps:$4 sm:$0xff]  }
  0xa1   :  { %1920 = vmatprep.mubr.bf16.mxu0 %v7360_v0 }
  0xa2   :  { %1948 = vmatpush1.bf16.msra.mxu0 %v6393_v63  ;;  %v6479_v63 = vld [vmem:[#allocation5 + $0x47c] ss:$40 sps:$4 sm:$0xff]  }
  0xa3   :  { %2021 = vmatpush1.bf16.msra.mxu1 %v6396_v1  ;;  %1949 = vmatprep.subr.bf16.mxu0 %v6401_v2  ;;  %v6482_v1 = vld [vmem:[#allocation5 + $0x6fc] ss:$40 sps:$4 sm:$0xff]   ;;  %v6477_v2 = vld [vmem:[#allocation5 + $0x478] ss:$40 sps:$4 sm:$0xff]  }
  0xa4   :  { %2022 = vmatprep.subr.bf16.mxu1 %v6404_v3  ;;  %v6485_v3 = vld [vmem:[#allocation5 + $0x42c] ss:$40 sps:$4 sm:$0xff]  }
  0xa5   :  { %1921 = vmatmul.mubr.bf16.gmra.mxu0 %v7422_v5 }
  0xa6   :  { %1848 = vmatmul.mubr.bf16.gmra.mxu1 %v7442_v29  ;;  %1950 = vmatpush1.bf16.msra.mxu0 %v6399_v4  ;;  %v6488_v4 = vld [vmem:[#allocation5 + $0x6ac] ss:$40 sps:$4 sm:$0xff]  }
  0xa7   :  { %2023 = vmatpush1.bf16.msra.mxu1 %v6402_v6  ;;  %1951 = vmatprep.subr.bf16.mxu0 %v6407_v7  ;;  %v6486_v6 = vld [vmem:[#allocation5 + $0x6a8] ss:$40 sps:$4 sm:$0xff]   ;;  %v6491_v7 = vld [vmem:[#allocation5 + $0x3dc] ss:$40 sps:$4 sm:$0xff]  }
  0xa8   :  { %2024 = vmatprep.subr.bf16.mxu1 %v6410_v9  ;;  %1857 = vmatprep.mubr.bf16.mxu1 %v7444_v34  ;;  %v6494_v9 = vld [vmem:[#allocation5 + $0x65c] ss:$40 sps:$4 sm:$0xff]  }
  0xa9   :  { %1930 = vmatprep.mubr.bf16.mxu0 %v7360_v0 }
  0xaa   :  { %1952 = vmatpush1.bf16.msra.mxu0 %v6405_v10  ;;  %v6492_v10 = vld [vmem:[#allocation5 + $0x658] ss:$40 sps:$4 sm:$0xff]  }
  0xab   :  { %2025 = vmatpush1.bf16.msra.mxu1 %v6408_v11  ;;  %1953 = vmatprep.subr.bf16.mxu0 %v6413_v12  ;;  %v6497_v11 = vld [vmem:[#allocation5 + $0x38c] ss:$40 sps:$4 sm:$0xff]  }
  0xac   :  { %2026 = vmatprep.subr.bf16.mxu1 %v6416_v13  ;;  %v6500_v12 = vld [vmem:[#allocation5 + $0x60c] ss:$40 sps:$4 sm:$0xff]   ;;  %v6495_v13 = vld [vmem:[#allocation5 + $0x388] ss:$40 sps:$4 sm:$0xff]  }
  0xad   :  { %1931 = vmatmul.mubr.bf16.gmra.mxu0 %v7431_v16 }
  0xae   :  { %1858 = vmatmul.mubr.bf16.gmra.mxu1 %v7448_v40  ;;  %1954 = vmatpush1.bf16.msra.mxu0 %v6411_v14  ;;  %v6498_v14 = vld [vmem:[#allocation5 + $0x608] ss:$40 sps:$4 sm:$0xff]  }
  0xaf   :  { %2027 = vmatpush1.bf16.msra.mxu1 %v6414_v17  ;;  %1955 = vmatprep.subr.bf16.mxu0 %v6419_v18  ;;  %v6503_v17 = vld [vmem:[#allocation5 + $0x33c] ss:$40 sps:$4 sm:$0xff]  }
  0xb0   :  { %2028 = vmatprep.subr.bf16.mxu1 %v6422_v20  ;;  %2046 = vmatprep.mubr.bf16.mxu1 %v7360_v0  ;;  %v6506_v18 = vld [vmem:[#allocation5 + $0x5bc] ss:$40 sps:$4 sm:$0xff]   ;;  %v6501_v20 = vld [vmem:[#allocation5 + $0x338] ss:$40 sps:$4 sm:$0xff]  }
  0xb1   :  { %1973 = vmatprep.mubr.bf16.mxu0 %v7415_v51 }
  0xb2   :  { %1956 = vmatpush1.bf16.msra.mxu0 %v6417_v21  ;;  %v6504_v21 = vld [vmem:[#allocation5 + $0x5b8] ss:$40 sps:$4 sm:$0xff]  }
  0xb3   :  { %2029 = vmatpush1.bf16.msra.mxu1 %v6420_v22  ;;  %1957 = vmatprep.subr.bf16.mxu0 %v6425_v23  ;;  %v6509_v22 = vld [vmem:[#allocation5 + $0x2ec] ss:$40 sps:$4 sm:$0xff]  }
  0xb4   :  { %2087 = vmatprep.subr.bf16.mxu1 %v6428_v25  ;;  %v6512_v23 = vld [vmem:[#allocation5 + $0x56c] ss:$40 sps:$4 sm:$0xff]   ;;  %v6507_v25 = vld [vmem:[#allocation5 + $0x2e8] ss:$40 sps:$4 sm:$0xff]  }
  0xb6   :  { %2047 = vmatmul.mubr.bf16.vlgmr.msra.gmra.mxu1 %v7411_v35  ;;  %1958 = vmatpush2.bf16.msra.mxu0 %v6423_v26  ;;  %v6444_v35 = vld [vmem:[#allocation5 + $0x158] ss:$40 sps:$4 sm:$0xff]   ;;  %v6510_v26 = vld [vmem:[#allocation5 + $0x568] ss:$40 sps:$4 sm:$0xff]  }
  0xb7   :  { %2088 = vmatpush1.bf16.msra.mxu1 %v6426_v27  ;;  %1959 = vmatprep.subr.bf16.mxu0 %v6431_v28  ;;  %v6515_v27 = vld [vmem:[#allocation5 + $0x29c] ss:$40 sps:$4 sm:$0xff]  }
  0xb8   :  { %2089 = vmatprep.subr.bf16.mxu1 %v6434_v30  ;;  %2056 = vmatprep.mubr.bf16.mxu1 %v7360_v0  ;;  %v6518_v28 = vld [vmem:[#allocation5 + $0x51c] ss:$40 sps:$4 sm:$0xff]   ;;  %v6513_v30 = vld [vmem:[#allocation5 + $0x298] ss:$40 sps:$4 sm:$0xff]  }
  0xba   :  { %1960 = vmatpush2.bf16.msra.mxu0 %v6429_v31  ;;  %v6516_v31 = vld [vmem:[#allocation5 + $0x518] ss:$40 sps:$4 sm:$0xff]  }
  0xbb   :  { %2090 = vmatpush1.bf16.msra.mxu1 %v6432_v32  ;;  %1961 = vmatprep.subr.bf16.mxu0 %v6437_v33  ;;  %v6521_v32 = vld [vmem:[#allocation5 + $0x254] ss:$40 sps:$4 sm:$0xff]  }
  0xbc   :  { %2091 = vmatprep.subr.bf16.mxu1 %v6440_v36  ;;  %v6536_v33 = vld [vmem:[#allocation5 + $0x754] ss:$40 sps:$4 sm:$0xff]   ;;  %v6519_v36 = vld [vmem:[#allocation5 + $0x250] ss:$40 sps:$4 sm:$0xff]  }
  0xbe   :  { %2057 = vmatmul.mubr.bf16.gmra.mxu1 %v7418_v59  ;;  %1962 = vmatpush2.bf16.msra.mxu0 %v6435_v37  ;;  %v6461_v59 = vld [vmem:[#allocation5 + $0x2e4] ss:$40 sps:$4 sm:$0xff]  }
  0xbf   :  { %2092 = vmatpush1.bf16.msra.mxu1 %v6438_v38  ;;  %1963 = vmatprep.subr.bf16.mxu0 %v6443_v39  ;;  %v6524_v37 = vld [vmem:[#allocation5 + $0x204] ss:$40 sps:$4 sm:$0xff]   ;;  %v6534_v38 = vld [vmem:[#allocation5 + $0x750] ss:$40 sps:$4 sm:$0xff]  }
  0xc0   :  { %2093 = vmatprep.subr.bf16.mxu1 %v6446_v41  ;;  %2066 = vmatprep.mubr.bf16.mxu1 %v7360_v0  ;;  %v7484_v39 = vld [vmem:[#allocation2] ss:$12 sps:$4 sm:$0xff]   ;;  %v7487_v41 = vld [vmem:[#allocation2 + $0x8] ss:$12 sps:$4 sm:$0xff]  }
  0xc2   :  { %1964 = vmatpush2.bf16.msra.mxu0 %v6441_v42  ;;  %v6542_v42 = vld [vmem:[#allocation5 + $0x704] ss:$40 sps:$4 sm:$0xff]  }
  0xc3   :  { %2094 = vmatpush1.bf16.msra.mxu1 %v6444_v35  ;;  %1965 = vmatprep.subr.bf16.mxu0 %v6449_v43  ;;  %v6522_v35 = vld [vmem:[#allocation5 + $0x200] ss:$40 sps:$4 sm:$0xff]   ;;  %v6527_v43 = vld [vmem:[#allocation5 + $0x1b4] ss:$40 sps:$4 sm:$0xff]  }
  0xc4   :  { %2095 = vmatprep.subr.bf16.mxu1 %v6452_v44  ;;  %v6540_v44 = vld [vmem:[#allocation5 + $0x700] ss:$40 sps:$4 sm:$0xff]  }
  0xc6   :  { %2067 = vmatmul.mubr.bf16.gmra.mxu1 %v7422_v5  ;;  %1966 = vmatpush2.bf16.msra.mxu0 %v6447_v45  ;;  %v6473_v5 = vld [vmem:[#allocation5 + $0x4cc] ss:$40 sps:$4 sm:$0xff]   ;;  %v6525_v45 = vld [vmem:[#allocation5 + $0x1b0] ss:$40 sps:$4 sm:$0xff]  }
  0xc7   :  { %2096 = vmatpush1.bf16.msra.mxu1 %v6450_v46  ;;  %1967 = vmatprep.subr.bf16.mxu0 %v6455_v47  ;;  %v6530_v46 = vld [vmem:[#allocation5 + $0x164] ss:$40 sps:$4 sm:$0xff]   ;;  %v6528_v47 = vld [vmem:[#allocation5 + $0x160] ss:$40 sps:$4 sm:$0xff]  }
  0xc8   :  { %2097 = vmatprep.subr.bf16.mxu1 %v6458_v48  ;;  %2076 = vmatprep.mubr.bf16.mxu1 %v7360_v0  ;;  %v6548_v48 = vld [vmem:[#allocation5 + $0x6b4] ss:$40 sps:$4 sm:$0xff]  }
  0xca   :  { %1968 = vmatpush2.bf16.msra.mxu0 %v6453_v49  ;;  %v7493_v49 = vld [vmem:[#allocation2 + $0x20] ss:$12 sps:$4 sm:$0xff]  }
  0xcb   :  { %2098 = vmatpush1.bf16.msra.mxu1 %v6456_v50  ;;  %1969 = vmatprep.subr.bf16.mxu0 %v6461_v59  ;;  %v6554_v50 = vld [vmem:[#allocation5 + $0x664] ss:$40 sps:$4 sm:$0xff]   ;;  %v6533_v59 = vld [vmem:[#allocation5 + $0x114] ss:$40 sps:$4 sm:$0xff]  }
  0xcc   :  { %2099 = vmatprep.subr.bf16.mxu1 %v6464_v52  ;;  %v6531_v52 = vld [vmem:[#allocation5 + $0x110] ss:$40 sps:$4 sm:$0xff]  }
  0xce   :  { %2077 = vmatmul.mubr.bf16.gmra.mxu1 %v7431_v16  ;;  %1970 = vmatpush2.bf16.msra.mxu0 %v6459_v53  ;;  %v6480_v16 = vld [vmem:[#allocation5 + $0x6f8] ss:$40 sps:$4 sm:$0xff]  }
  0xcf   :  { %2100 = vmatpush1.bf16.msra.mxu1 %v6462_v54  ;;  %1971 = vmatprep.subr.bf16.mxu0 %v6467_v55  ;;  %v6552_v53 = vld [vmem:[#allocation5 + $0x660] ss:$40 sps:$4 sm:$0xff]   ;;  %v7499_v54 = vld [vmem:[#allocation2 + $0x38] ss:$12 sps:$4 sm:$0xff]  }
  0xd0   :  { %2101 = vmatprep.subr.bf16.mxu1 %v6470_v56  ;;  %2119 = vmatprep.mubr.bf16.mxu1 %v7415_v51  ;;  %v6483_v51 = vld [vmem:[#allocation5 + $0x428] ss:$40 sps:$4 sm:$0xff]   ;;  %v6545_v56 = vld [vmem:[#allocation5 + $0x74] ss:$40 sps:$4 sm:$0xff]  }
  0xd1   :  { %v6537_v55 = vld [vmem:[#allocation5 + $0xc0] ss:$40 sps:$4 sm:$0xff]  }
  0xd2   :  { %1972 = vmatpush2.bf16.msra.mxu0 %v6465_v57  ;;  %v6558_v57 = vld [vmem:[#allocation5 + $0x610] ss:$40 sps:$4 sm:$0xff]  }
  0xd3   :  { %2102 = vmatpush1.bf16.msra.mxu1 %v6468_v58  ;;  %2160 = vmatprep.subr.bf16.mxu0 %v6476_v60  ;;  %v6543_v58 = vld [vmem:[#allocation5 + $0x70] ss:$40 sps:$4 sm:$0xff]   ;;  %v6566_v60 = vld [vmem:[#allocation5 + $0x5c4] ss:$40 sps:$4 sm:$0xff]  }
  0xd4   :  { %2103 = vmatprep.subr.bf16.mxu1 %v6473_v5  ;;  %v6551_v5 = vld [vmem:[#allocation5 + $0x24] ss:$40 sps:$4 sm:$0xff]  }
  0xd5   :  { %1974 = vmatmul.mubr.bf16.vlgmr.msra.gmra.mxu0 %v7424_v8  ;;  %v6489_v8 = vld [vmem:[#allocation5 + $0x3d8] ss:$40 sps:$4 sm:$0xff]  }
  0xd6   :  { %2161 = vmatpush1.bf16.msra.mxu0 %v6474_v62  ;;  %1983 = vmatprep.mubr.bf16.mxu0 %v7428_v15  ;;  %v7505_v62 = vld [vmem:[#allocation2 + $0x50] ss:$12 sps:$4 sm:$0xff]  }
  0xd7   :  { %2104 = vmatpush2.bf16.msra.mxu1 %v6471_v61  ;;  %2162 = vmatprep.subr.bf16.mxu0 %v6482_v1  ;;  %v6549_v61 = vld [vmem:[#allocation5 + $0x20] ss:$40 sps:$4 sm:$0xff]   ;;  %v6570_v1 = vld [vmem:[#allocation5 + $0x570] ss:$40 sps:$4 sm:$0xff]  }
  0xd8   :  { %2105 = vmatprep.subr.bf16.mxu1 %v6479_v63  ;;  %v6572_v63 = vld [vmem:[#allocation5 + $0x574] ss:$40 sps:$4 sm:$0xff]  }
  0xda   :  { %2163 = vmatpush1.bf16.msra.mxu0 %v6480_v16  ;;  %v7236_v16 = vld [vmem:[#allocation2 + $0x4] ss:$12 sps:$4 sm:$0xff]  }
  0xdb   :  { %2106 = vmatpush2.bf16.msra.mxu1 %v6477_v2  ;;  %2164 = vmatprep.subr.bf16.mxu0 %v6488_v4  ;;  %v6555_v2 = vld [vmem:[#allocation5 + $0x4d0] ss:$40 sps:$4 sm:$0xff]   ;;  %v6578_v4 = vld [vmem:[#allocation5 + $0x524] ss:$40 sps:$4 sm:$0xff]  }
  0xdc   :  { %2107 = vmatprep.subr.bf16.mxu1 %v6485_v3  ;;  %v6563_v3 = vld [vmem:[#allocation5 + $0x484] ss:$40 sps:$4 sm:$0xff]  }
  0xdd   :  { %1984 = vmatmul.mubr.bf16.gmra.mxu0 %v7434_v19 }
  0xde   :  { %2165 = vmatpush1.bf16.msra.mxu0 %v6486_v6  ;;  %1993 = vmatprep.mubr.bf16.mxu0 %v7438_v24  ;;  %v6569_v6 = vld [vmem:[#allocation5 + $0x434] ss:$40 sps:$4 sm:$0xff]  }
  0xdf   :  { %2108 = vmatpush2.bf16.msra.mxu1 %v6483_v51  ;;  %2166 = vmatprep.subr.bf16.mxu0 %v6494_v9  ;;  %v6561_v51 = vld [vmem:[#allocation5 + $0x480] ss:$40 sps:$4 sm:$0xff]  }
  0xe0   :  { %2109 = vmatprep.subr.bf16.mxu1 %v6491_v7  ;;  %v6584_v7 = vld [vmem:[#allocation8 + $0xac] ss:$12 sps:$4 sm:$0xff]   ;;  %v6582_v9 = vld [vmem:[#allocation8 + $0xa8] ss:$12 sps:$4 sm:$0xff]  }
  0xe2   :  { %2167 = vmatpush1.bf16.msra.mxu0 %v6492_v10  ;;  %v6575_v10 = vld [vmem:[#allocation5 + $0x3e4] ss:$40 sps:$4 sm:$0xff]  }
  0xe3   :  { %2110 = vmatpush2.bf16.msra.mxu1 %v6489_v8  ;;  %2168 = vmatprep.subr.bf16.mxu0 %v6500_v12  ;;  %v6567_v8 = vld [vmem:[#allocation5 + $0x430] ss:$40 sps:$4 sm:$0xff]  }
  0xe4   :  { %2111 = vmatprep.subr.bf16.mxu1 %v6497_v11  ;;  %v6590_v11 = vld [vmem:[#allocation8 + $0x94] ss:$12 sps:$4 sm:$0xff]   ;;  %v6588_v12 = vld [vmem:[#allocation8 + $0x90] ss:$12 sps:$4 sm:$0xff]  }
  0xe5   :  { %1994 = vmatmul.mubr.bf16.gmra.mxu0 %v7442_v29 }
  0xe6   :  { %2169 = vmatpush1.bf16.msra.mxu0 %v6498_v14  ;;  %2003 = vmatprep.mubr.bf16.mxu0 %v7444_v34  ;;  %v6573_v14 = vld [vmem:[#allocation5 + $0x3e0] ss:$40 sps:$4 sm:$0xff]  }
  0xe7   :  { %2112 = vmatpush2.bf16.msra.mxu1 %v6495_v13  ;;  %2170 = vmatprep.subr.bf16.mxu0 %v6506_v18  ;;  %v6596_v18 = vld [vmem:[#allocation8 + $0x7c] ss:$12 sps:$4 sm:$0xff]  }
  0xe8   :  { %2113 = vmatprep.subr.bf16.mxu1 %v6503_v17  ;;  %v6581_v17 = vld [vmem:[#allocation5 + $0x394] ss:$40 sps:$4 sm:$0xff]  }
  0xea   :  { %2171 = vmatpush1.bf16.msra.mxu0 %v6504_v21 }
  0xeb   :  { %2114 = vmatpush2.bf16.msra.mxu1 %v6501_v20  ;;  %2172 = vmatprep.subr.bf16.mxu0 %v6512_v23  ;;  %v6594_v20 = vld [vmem:[#allocation8 + $0x78] ss:$12 sps:$4 sm:$0xff]  }
  0xec   :  { %2115 = vmatprep.subr.bf16.mxu1 %v6509_v22  ;;  %v6579_v22 = vld [vmem:[#allocation5 + $0x390] ss:$40 sps:$4 sm:$0xff]   ;;  %v6587_v23 = vld [vmem:[#allocation5 + $0x344] ss:$40 sps:$4 sm:$0xff]  }
  0xed   :  { %2004 = vmatmul.mubr.bf16.gmra.mxu0 %v7448_v40 }
  0xee   :  { %2173 = vmatpush1.bf16.msra.mxu0 %v6510_v26  ;;  %2192 = vmatprep.mubr.bf16.mxu0 %v7360_v0  ;;  %v6600_v26 = vld [vmem:[#allocation8 + $0x60] ss:$12 sps:$4 sm:$0xff]  }
  0xef   :  { %2116 = vmatpush2.bf16.msra.mxu1 %v6507_v25  ;;  %2174 = vmatprep.subr.bf16.mxu0 %v6518_v28  ;;  %v6602_v25 = vld [vmem:[#allocation8 + $0x64] ss:$12 sps:$4 sm:$0xff]   ;;  %v335_v28 = vlaneseq }
  0xf0   :  { %2117 = vmatprep.subr.bf16.mxu1 %v6515_v27 }
  0xf2   :  { %2175 = vmatpush1.bf16.msra.mxu0 %v6516_v31  ;;  %v6605_v31 = vld [vmem:[#allocation8 + $0x4c] ss:$12 sps:$4 sm:$0xff]  }
  0xf3   :  { %2118 = vmatpush2.bf16.msra.mxu1 %v6513_v30  ;;  %2233 = vmatprep.subr.bf16.mxu0 %v6521_v32  ;;  %v6585_v30 = vld [vmem:[#allocation5 + $0x340] ss:$40 sps:$4 sm:$0xff]   ;;  %v6593_v32 = vld [vmem:[#allocation5 + $0x2f4] ss:$40 sps:$4 sm:$0xff]  }
  0xf4   :  { %2306 = vmatprep.subr.bf16.mxu1 %v6536_v33 }
  0xf5   :  { %2193 = vmatmul.mubr.bf16.vlgmr.msra.gmra.mxu0 %v7487_v41 }
  0xf6   :  { %2120 = vmatmul.mubr.bf16.vlgmr.msra.gmra.mxu1 %v7484_v39  ;;  %2234 = vmatpush1.bf16.msra.mxu0 %v6519_v36  ;;  %v6603_v36 = vld [vmem:[#allocation8 + $0x48] ss:$12 sps:$4 sm:$0xff]  }
  0xf7   :  { %2129 = vmatprep.mubr.bf16.mxu1 %v7428_v15  ;;  %2235 = vmatprep.subr.bf16.mxu0 %v6524_v37  ;;  %v6546_v15 = vld [vmem:[#allocation5 + $0x6b0] ss:$40 sps:$4 sm:$0xff]   ;;  %v7521_v37 = vshrl.u32 %v335_v28, 7 }
  0xf8   :  { %2202 = vmatprep.mubr.bf16.mxu0 %v7360_v0  ;;  %2307 = vmatpush1.bf16.msra.mxu1 %v6534_v38 }
  0xf9   :  { %2308 = vmatprep.subr.bf16.mxu1 %v6542_v42  ;;  %8586 = vst [vmem:[#allocation15_spill] sm:$0xff] %v7521_v37  ;;  %v6608_v42 = vld [vmem:[#allocation8 + $0x34] ss:$12 sps:$4 sm:$0xff]  }
  0xfa   :  { %2236 = vmatpush1.bf16.msra.mxu0 %v6522_v35  ;;  %v6599_v35 = vld [vmem:[#allocation5 + $0x2a4] ss:$40 sps:$4 sm:$0xff]  }
  0xfb   :  { %2237 = vmatprep.subr.bf16.mxu0 %v6527_v43  ;;  %v6606_v43 = vld [vmem:[#allocation8 + $0x30] ss:$12 sps:$4 sm:$0xff]  }
  0xfc   :  { %2309 = vmatpush1.bf16.msra.mxu1 %v6540_v44 }
  0xfd   :  { %2203 = vmatmul.mubr.bf16.gmra.mxu0 %v7493_v49  ;;  %2310 = vmatprep.subr.bf16.mxu1 %v6548_v48  ;;  %v6611_v48 = vld [vmem:[#allocation8 + $0x1c] ss:$12 sps:$4 sm:$0xff]  }
  0xfe   :  { %2130 = vmatmul.mubr.bf16.gmra.mxu1 %v7434_v19  ;;  %2238 = vmatpush1.bf16.msra.mxu0 %v6525_v45  ;;  %v6539_v19 = vld [vmem:[#allocation5 + $0xc4] ss:$40 sps:$4 sm:$0xff]   ;;  %v6597_v45 = vld [vmem:[#allocation5 + $0x2a0] ss:$40 sps:$4 sm:$0xff]  }
  0xff   :  { %2139 = vmatprep.mubr.bf16.mxu1 %v7438_v24  ;;  %2239 = vmatprep.subr.bf16.mxu0 %v6530_v46  ;;  %v6560_v24 = vld [vmem:[#allocation5 + $0x614] ss:$40 sps:$4 sm:$0xff]   ;;  %v7529_v46 = vld [vmem:[#allocation7] sm:$0xff] }
 0x100   :  { %2212 = vmatprep.mubr.bf16.mxu0 %v7360_v0  ;;  %2311 = vmatpush1.bf16.msra.mxu1 %v6546_v15  ;;  %v6609_v15 = vld [vmem:[#allocation8 + $0x18] ss:$12 sps:$4 sm:$0xff]  }
 0x101   :  { %2312 = vmatprep.subr.bf16.mxu1 %v6554_v50  ;;  %v6620_v50 = vld [vmem:[#allocation8 + $0x22c] ss:$12 sps:$4 sm:$0xff]  }
 0x102   :  { %2240 = vmatpush1.bf16.msra.mxu0 %v6528_v47  ;;  %v7532_v47 = vsub.s32 0, %v7521_v37 }
 0x103   :  { %2241 = vmatprep.subr.bf16.mxu0 %v6533_v59  ;;  %v7537_v59 = vsub.s32 1, %v7521_v37 }
 0x104   :  { %2313 = vmatpush1.bf16.msra.mxu1 %v6552_v53  ;;  %v6612_v53 = vld [vmem:[#allocation8] ss:$12 sps:$4 sm:$0xff]  }
 0x105   :  { %2213 = vmatmul.mubr.bf16.gmra.mxu0 %v7499_v54  ;;  %2314 = vmatprep.subr.bf16.mxu1 %v6560_v24  ;;  %v6626_v24 = vld [vmem:[#allocation8 + $0x214] ss:$12 sps:$4 sm:$0xff]  }
 0x106   :  { %2140 = vmatmul.mubr.bf16.gmra.mxu1 %v7442_v29  ;;  %2242 = vmatpush1.bf16.msra.mxu0 %v6531_v52  ;;  %v6564_v29 = vld [vmem:[#allocation5 + $0x5c0] ss:$40 sps:$4 sm:$0xff]   ;;  %v6614_v52 = vld [vmem:[#allocation8 + $0x4] ss:$12 sps:$4 sm:$0xff]  }
 0x107   :  { %2149 = vmatprep.mubr.bf16.mxu1 %v7444_v34  ;;  %2243 = vmatprep.subr.bf16.mxu0 %v6539_v19  ;;  %v6557_v34 = vld [vmem:[#allocation5 + $0x4d4] ss:$40 sps:$4 sm:$0xff]   ;;  %v7543_v19 = vrot.slane %v7529_v46, %v7532_v47 }
 0x108   :  { %2222 = vmatprep.mubr.bf16.mxu0 %v7360_v0  ;;  %2315 = vmatpush1.bf16.msra.mxu1 %v6558_v57 }
 0x109   :  { %2316 = vmatprep.subr.bf16.mxu1 %v6566_v60  ;;  %v6615_v60 = vld [vmem:[#allocation8 + $0x168] ss:$12 sps:$4 sm:$0xff]  }
 0x10a   :  { %2244 = vmatpush1.bf16.msra.mxu0 %v6537_v55  ;;  %v7548_v55 = vrot.slane %v7529_v46, %v7537_v59 }
 0x10b   :  { %2245 = vmatprep.subr.bf16.mxu0 %v6545_v56 }
 0x10c   :  { %2317 = vmatpush1.bf16.msra.mxu1 %v6564_v29  ;;  %v7237_v29 = vld [vmem:[#allocation2 + $0x1c] ss:$12 sps:$4 sm:$0xff]  }
 0x10d   :  { %2223 = vmatmul.mubr.bf16.gmra.mxu0 %v7505_v62  ;;  %2318 = vmatprep.subr.bf16.mxu1 %v6572_v63 }
 0x10e   :  { %2150 = vmatmul.mubr.bf16.gmra.mxu1 %v7448_v40  ;;  %2246 = vmatpush1.bf16.msra.mxu0 %v6543_v58  ;;  %v6576_v40 = vld [vmem:[#allocation5 + $0x520] ss:$40 sps:$4 sm:$0xff]  }
 0x10f   :  { %2247 = vmatprep.subr.bf16.mxu0 %v6551_v5  ;;  %2338 = vmatprep.mubr.bf16.mxu1 %v7360_v0  ;;  %v6617_v58 = vld [vmem:[#allocation8 + $0x16c] ss:$12 sps:$4 sm:$0xff]  }
 0x110   :  { %2265 = vmatprep.mubr.bf16.mxu0 %v7236_v16  ;;  %2319 = vmatpush1.bf16.msra.mxu1 %v6570_v1  ;;  %v6623_v16 = vld [vmem:[#allocation8 + $0x154] ss:$12 sps:$4 sm:$0xff]  }
 0x111   :  { %2320 = vmatprep.subr.bf16.mxu1 %v6578_v4 }
 0x112   :  { %2248 = vmatpush1.bf16.msra.mxu0 %v6549_v61  ;;  %v6624_v61 = vld [vmem:[#allocation8 + $0x210] ss:$12 sps:$4 sm:$0xff]  }
 0x113   :  { %2249 = vmatprep.subr.bf16.mxu0 %v6557_v34 }
 0x114   :  { %2321 = vmatpush1.bf16.msra.mxu1 %v6576_v40 }
 0x115   :  { %4596 = vmatprep.subr.bf16.mxu1 %v6584_v7  ;;  %v6638_v7 = vld [vmem:[#allocation8 + $0x1e4] ss:$12 sps:$4 sm:$0xff]  }
 0x116   :  { %2250 = vmatpush2.bf16.msra.mxu0 %v6555_v2  ;;  %v7509_v13 = vpop.f32.mrf.mxu1 }
 0x117   :  { %2251 = vmatprep.subr.bf16.mxu0 %v6563_v3  ;;  %2339 = vmatmul.mubr.bf16.vlgmr.msra.gmra.mxu1 %v7487_v41  ;;  %v6591_v41 = vld [vmem:[#allocation5 + $0x2f0] ss:$40 sps:$4 sm:$0xff]  }
 0x118   :  { %4597 = vmatpush1.bf16.msra.mxu1 %v6582_v9  ;;  %2348 = vmatprep.mubr.bf16.mxu1 %v7360_v0  ;;  %v7513_v21 = vpop.f32.mrf.mxu1 }
 0x119   :  { %4598 = vmatprep.subr.bf16.mxu1 %v6590_v11 }
 0x11a   :  { %2252 = vmatpush2.bf16.msra.mxu0 %v6561_v51  ;;  %v7515_v27 = vpop.f32.mrf.mxu1  ;;  %v6621_v51 = vld [vmem:[#allocation8 + $0x150] ss:$12 sps:$4 sm:$0xff]  }
 0x11b   :  { %2253 = vmatprep.subr.bf16.mxu0 %v6569_v6  ;;  %v6630_v6 = vld [vmem:[#allocation8 + $0x1f8] ss:$12 sps:$4 sm:$0xff]  }
 0x11c   :  { %4599 = vmatpush1.bf16.msra.mxu1 %v6588_v12  ;;  %v7519_v33 = vpop.f32.mrf.mxu1 }
 0x11d   :  { %4600 = vmatprep.subr.bf16.mxu1 %v6596_v18 }
 0x11e   :  { %2254 = vmatpush2.bf16.msra.mxu0 %v6567_v8  ;;  %v7523_v38 = vpop.f32.mrf.mxu1 }
 0x11f   :  { %2255 = vmatprep.subr.bf16.mxu0 %v6575_v10  ;;  %2349 = vmatmul.mubr.bf16.gmra.mxu1 %v7493_v49 }
 0x120   :  { %4601 = vmatpush1.bf16.msra.mxu1 %v6594_v20  ;;  %2358 = vmatprep.mubr.bf16.mxu1 %v7360_v0  ;;  %v7525_v44 = vpop.f32.mrf.mxu1 }
 0x121   :  { %4602 = vmatprep.subr.bf16.mxu1 %v6602_v25  ;;  %v6636_v25 = vld [vmem:[#allocation8 + $0x1e0] ss:$12 sps:$4 sm:$0xff]  }
 0x122   :  { %2256 = vmatpush2.bf16.msra.mxu0 %v6573_v14  ;;  %v7534_v49 = vpop.f32.mrf.mxu1 }
 0x123   :  { %2257 = vmatprep.subr.bf16.mxu0 %v6581_v17  ;;  %v6629_v17 = vld [vmem:[#allocation8 + $0x13c] ss:$12 sps:$4 sm:$0xff]  }
 0x124   :  { %4603 = vmatpush1.bf16.msra.mxu1 %v6600_v26  ;;  %v6644_v26 = vld [vmem:[#allocation8 + $0x1cc] ss:$12 sps:$4 sm:$0xff]  }
 0x125   :  { %4604 = vmatprep.subr.bf16.mxu1 %v6605_v31 }
 0x126   :  { %2258 = vmatpush2.bf16.msra.mxu0 %v6579_v22  ;;  %v7239_v22 = vld [vmem:[#allocation2 + $0x34] ss:$12 sps:$4 sm:$0xff]  }
 0x127   :  { %2259 = vmatprep.subr.bf16.mxu0 %v6587_v23  ;;  %2359 = vmatmul.mubr.bf16.gmra.mxu1 %v7499_v54  ;;  %v6618_v54 = vld [vmem:[#allocation8 + $0x228] ss:$12 sps:$4 sm:$0xff]   ;;  %v6627_v23 = vld [vmem:[#allocation8 + $0x138] ss:$12 sps:$4 sm:$0xff]  }
 0x128   :  { %4605 = vmatpush1.bf16.msra.mxu1 %v6603_v36  ;;  %2368 = vmatprep.mubr.bf16.mxu1 %v7360_v0  ;;  %v7539_v0 = vpop.f32.mrf.mxu1  ;;  %v6635_v36 = vld [vmem:[#allocation8 + $0x124] ss:$12 sps:$4 sm:$0xff]  }
 0x129   :  { %4606 = vmatprep.subr.bf16.mxu1 %v6608_v42 }
 0x12a   :  { %2260 = vmatpush2.bf16.msra.mxu0 %v6585_v30  ;;  %v7551_v57 = vpop.f32.mrf.mxu1 }
 0x12b   :  { %2261 = vmatprep.subr.bf16.mxu0 %v6593_v32 }
 0x12c   :  { %4607 = vmatpush1.bf16.msra.mxu1 %v6606_v43  ;;  %v7558_v2 = vpop.f32.mrf.mxu1  ;;  %v6633_v43 = vld [vmem:[#allocation8 + $0x120] ss:$12 sps:$4 sm:$0xff]  }
 0x12d   :  { %4608 = vmatprep.subr.bf16.mxu1 %v6611_v48 }
 0x12e   :  { %2262 = vmatpush2.bf16.msra.mxu0 %v6591_v41  ;;  %v7570_v14 = vpop.f32.mrf.mxu1 }
 0x12f   :  { %2263 = vmatprep.subr.bf16.mxu0 %v6599_v35  ;;  %2369 = vmatmul.mubr.bf16.gmra.mxu1 %v7505_v62  ;;  %v6632_v62 = vld [vmem:[#allocation8 + $0x1fc] ss:$12 sps:$4 sm:$0xff]  }
 0x130   :  { %4609 = vmatpush1.bf16.msra.mxu1 %v6609_v15  ;;  %v8579_v15 = vsub.s32 2, %v7521_v37 }
 0x131   :  { %4610 = vmatprep.subr.bf16.mxu1 %v6614_v52 }
 0x132   :  { %2264 = vmatpush2.bf16.msra.mxu0 %v6597_v45  ;;  %v6650_v45 = vld [vmem:[#allocation8 + $0x1b4] ss:$12 sps:$4 sm:$0xff]  }
 0x133   :  { %4669 = vmatprep.subr.bf16.mxu0 %v6620_v50  ;;  %v6641_v50 = vld [vmem:[#allocation8 + $0x10c] ss:$12 sps:$4 sm:$0xff]  }
 0x134   :  { %4611 = vmatpush1.bf16.msra.mxu1 %v6612_v53 }
 0x135   :  { %v1683_v56 = vpop.f32.mrf.mxu0  ;;  %2266 = vmatmul.mubr.bf16.vlgmr.msra.gmra.mxu0 %v7484_v39  ;;  %4612 = vmatprep.subr.bf16.mxu1 %v6617_v58  ;;  %v6648_v58 = vld [vmem:[#allocation8 + $0x1b0] ss:$12 sps:$4 sm:$0xff]  }
 0x136   :  { %v1684_v5 = vadd.f32 %v1683_v56, %v7543_v19  ;;  %2275 = vmatprep.mubr.bf16.mxu0 %v7237_v29  ;;  %4670 = vmatpush1.bf16.msra.mxu0 %v6618_v54 }
 0x137   :  { %v1685_v34 = vpop.f32.mrf.mxu0  ;;  %4671 = vmatprep.subr.bf16.mxu0 %v6626_v24  ;;  %v7240_v24 = vld [vmem:[#allocation2 + $0x30] ss:$12 sps:$4 sm:$0xff]  }
 0x138   :  { %v7555_v63 = vadd.f32 %v7509_v13, %v1684_v5  ;;  %v1686_v1 = vadd.f32 %v1685_v34, %v7548_v55  ;;  %4613 = vmatpush2.bf16.msra.mxu1 %v6615_v60  ;;  %v7238_v13 = vld [vmem:[#allocation2 + $0x18] ss:$12 sps:$4 sm:$0xff]  }
 0x139   :  { %v1687_v39 = vpop.f32.mrf.mxu0  ;;  %4614 = vmatprep.subr.bf16.mxu1 %v6623_v16 }
 0x13a   :  { %v5653_v3 = vmul.f32 -1.442695, %v7555_v63  ;;  %v7562_v4 = vadd.f32 %v7513_v21, %v1686_v1  ;;  %v1688_v40 = vadd.f32 %v1687_v39, %v7543_v19  ;;  %4672 = vmatpush1.bf16.msra.mxu0 %v6624_v61  ;;  %v6639_v61 = vld [vmem:[#allocation8 + $0x108] ss:$12 sps:$4 sm:$0xff]  }
 0x13b   :  { %v1689_v9 = vpop.f32.mrf.mxu0  ;;  %4673 = vmatprep.subr.bf16.mxu0 %v6632_v62  ;;  %v6656_v62 = vld [vmem:[#allocation8 + $0x19c] ss:$12 sps:$4 sm:$0xff]   ;;  %v6647_v1 = vld [vmem:[#allocation8 + $0xf4] ss:$12 sps:$4 sm:$0xff]  }
 0x13c   :  { %6911 = vpow2.f32 %v5653_v3  ;;  %v5654_v8 = vmul.f32 -1.442695, %v7562_v4  ;;  %v7567_v10 = vadd.f32 %v7515_v27, %v1688_v40  ;;  %v1690_v11 = vadd.f32 %v1689_v9, %v7548_v55  ;;  %4615 = vmatpush2.bf16.msra.mxu1 %v6621_v51 }
 0x13d   :  { %v1693_v12 = vpop.f32.mrf.mxu0  ;;  %2276 = vmatmul.mubr.bf16.gmra.mxu0 %v7238_v13  ;;  %4616 = vmatprep.subr.bf16.mxu1 %v6629_v17 }
 0x13e   :  { %6913 = vpow2.f32 %v5654_v8  ;;  %v5663_v18 = vmul.f32 -1.442695, %v7567_v10  ;;  %v7574_v20 = vadd.f32 %v7519_v33, %v1690_v11  ;;  %v1694_v21 = vadd.f32 %v1693_v12, %v7543_v19  ;;  %2285 = vmatprep.mubr.bf16.mxu0 %v7239_v22  ;;  %4674 = vmatpush1.bf16.msra.mxu0 %v6630_v6  ;;  %v7582_v33 = vpop.f32.mrf.mxu1  ;;  %v6654_v6 = vld [vmem:[#allocation8 + $0x198] ss:$12 sps:$4 sm:$0xff]   ;;  %v6645_v11 = vld [vmem:[#allocation8 + $0xf0] ss:$12 sps:$4 sm:$0xff]  }
 0x13f   :  { %v1695_v27 = vpop.f32.mrf.mxu0  ;;  %4675 = vmatprep.subr.bf16.mxu0 %v6638_v7 }
 0x140   :  { %6915 = vpow2.f32 %v5663_v18  ;;  %v5664_v28 = vmul.f32 -1.442695, %v7574_v20  ;;  %v7579_v30 = vadd.f32 %v7523_v38, %v1694_v21  ;;  %v1696_v31 = vadd.f32 %v1695_v27, %v7548_v55  ;;  %v6642_v38 = vld [vmem:[#allocation8 + $0x1c8] ss:$12 sps:$4 sm:$0xff]   ;;  %4617 = vmatpush2.bf16.msra.mxu1 %v6627_v23  ;;  %v7595_v56 = vpop.f32.mrf.mxu1 }
 0x141   :  { %v1697_v32 = vpop.f32.mrf.mxu0  ;;  %4618 = vmatprep.subr.bf16.mxu1 %v6635_v36  ;;  %v349_v18 = vsub.s32 3, %v7521_v37  ;;  %v6653_v21 = vld [vmem:[#allocation8 + $0xdc] ss:$12 sps:$4 sm:$0xff]  }
 0x142   :  { %6917 = vpow2.f32 %v5664_v28  ;;  %v5673_v41 = vmul.f32 -1.442695, %v7579_v30  ;;  %v7586_v42 = vadd.f32 %v7525_v44, %v1696_v31  ;;  %v1698_v35 = vadd.f32 %v1697_v32, %v7543_v19  ;;  %4676 = vmatpush1.bf16.msra.mxu0 %v6636_v25  ;;  %v7607_v51 = vpop.f32.mrf.mxu1  ;;  %v7242_v28 = vld [vmem:[#allocation2 + $0x48] ss:$12 sps:$4 sm:$0xff]  }
 0x143   :  { %v1699_v48 = vpop.f32.mrf.mxu0  ;;  %4677 = vmatprep.subr.bf16.mxu0 %v6644_v26  ;;  %v6660_v32 = vld [vmem:[#allocation8 + $0x180] ss:$12 sps:$4 sm:$0xff]  }
 0x144   :  { %6919 = vpow2.f32 %v5673_v41  ;;  %v5674_v52 = vmul.f32 -1.442695, %v7586_v42  ;;  %v7592_v53 = vadd.f32 %v7534_v49, %v1698_v35  ;;  %v1700_v44 = vadd.f32 %v1699_v48, %v7548_v55  ;;  %v7241_v49 = vld [vmem:[#allocation2 + $0x4c] ss:$12 sps:$4 sm:$0xff]   ;;  %4619 = vmatpush2.bf16.msra.mxu1 %v6633_v43  ;;  %v1790_v31 = vpop.f32.mrf.mxu1 }
 0x145   :  { %v1703_v54 = vpop.f32.mrf.mxu0  ;;  %2286 = vmatmul.mubr.bf16.gmra.mxu0 %v7240_v24  ;;  %4620 = vmatprep.subr.bf16.mxu1 %v6641_v50  ;;  %v6651_v43 = vld [vmem:[#allocation8 + $0xd8] ss:$12 sps:$4 sm:$0xff]  }
 0x146   :  { %6921 = vpow2.f32 %v5674_v52  ;;  %v5683_v5 = vmul.f32 -1.442695, %v7592_v53  ;;  %v7599_v29 = vadd.f32 %v7539_v0, %v1700_v44  ;;  %v1704_v60 = vadd.f32 %v1703_v54, %v7543_v19  ;;  %2295 = vmatprep.mubr.bf16.mxu0 %v7241_v49  ;;  %4678 = vmatpush1.bf16.msra.mxu0 %v6642_v38  ;;  %v6665_v38 = vld [vmem:[#allocation8 + $0x2ec] ss:$12 sps:$4 sm:$0xff]   ;;  %v6659_v50 = vld [vmem:[#allocation8 + $0xc4] ss:$12 sps:$4 sm:$0xff]  }
 0x147   :  { %v1705_v34 = vpop.f32.mrf.mxu0  ;;  %4679 = vmatprep.subr.bf16.mxu0 %v6650_v45 }
 0x148   :  { %6923 = vpow2.f32 %v5683_v5  ;;  %v5684_v39 = vmul.f32 -1.442695, %v7599_v29  ;;  %v7604_v16 = vadd.f32 %v7551_v57, %v1704_v60  ;;  %v1706_v3 = vadd.f32 %v1705_v34, %v7548_v55  ;;  %v6662_v57 = vld [vmem:[#allocation8 + $0x184] ss:$12 sps:$4 sm:$0xff]   ;;  %4621 = vmatpush2.bf16.msra.mxu1 %v6639_v61  ;;  %v1792_v5 = vpop.f32.mrf.mxu1  ;;  %v6663_v60 = vld [vmem:[#allocation8 + $0x2e8] ss:$12 sps:$4 sm:$0xff]  }
 0x149   :  { %v6912_v0 = vpop.eup %6911  ;;  %v1707_v40 = vpop.f32.mrf.mxu0  ;;  %4622 = vmatprep.subr.bf16.mxu1 %v6647_v1  ;;  %v6657_v34 = vld [vmem:[#allocation8 + $0xc0] ss:$12 sps:$4 sm:$0xff]  }
 0x14a   :  { %v2619_v7 = vadd.f32 1.0, %v6912_v0  ;;  %6925 = vpow2.f32 %v5684_v39  ;;  %v5693_v9 = vmul.f32 -1.442695, %v7604_v16  ;;  %v7611_v8 = vadd.f32 %v7558_v2, %v1706_v3  ;;  %4680 = vmatpush1.bf16.msra.mxu0 %v6648_v58  ;;  %v6668_v1 = vld [vmem:[#allocation8 + $0x2d4] ss:$12 sps:$4 sm:$0xff]  }
 0x14b   :  { %v6914_v12 = vpop.eup %6913  ;;  %v1708_v13 = vadd.f32 %v1707_v40, %v7543_v19  ;;  %v1709_v17 = vpop.f32.mrf.mxu0  ;;  %4681 = vmatprep.subr.bf16.mxu0 %v6656_v62  ;;  %v7638_v0 = vrot.slane %v7529_v46, %v8579_v15  ;;  %v7641_v40 = vrot.slane %v7529_v46, %v349_v18 }
 0x14c   :  { %6927 = vrcp.f32 %v2619_v7  ;;  %v2620_v22 = vadd.f32 1.0, %v6914_v12  ;;  %v5694_v23 = vmul.f32 -1.442695, %v7611_v8  ;;  %v1710_v25 = vadd.f32 %v1709_v17, %v7548_v55  ;;  %4623 = vmatpush2.bf16.msra.mxu1 %v6645_v11 }
 0x14d   :  { %v6916_v2 = vpop.eup %6915  ;;  %6929 = vpow2.f32 %v5693_v9  ;;  %v7618_v26 = vadd.f32 %v7570_v14, %v1708_v13  ;;  %v1713_v27 = vpop.f32.mrf.mxu0  ;;  %2296 = vmatmul.mubr.bf16.gmra.mxu0 %v7242_v28  ;;  %4624 = vmatprep.subr.bf16.mxu1 %v6653_v21  ;;  %v6666_v9 = vld [vmem:[#allocation8 + $0x2d0] ss:$12 sps:$4 sm:$0xff]   ;;  %v6689_v13 = vld [vmem:[#allocation8 + $0x3ac] ss:$12 sps:$4 sm:$0xff]  }
 0x14e   :  { %6931 = vrcp.f32 %v2620_v22  ;;  %v2629_v36 = vadd.f32 1.0, %v6916_v2  ;;  %v7621_v41 = vadd.f32 %v7582_v33, %v1710_v25  ;;  %v1714_v35 = vadd.f32 %v1713_v27, %v7543_v19  ;;  %4682 = vmatpush1.bf16.msra.mxu0 %v6654_v6  ;;  %v6671_v21 = vld [vmem:[#allocation8 + $0x2bc] ss:$12 sps:$4 sm:$0xff]  }
 0x14f   :  { %v6918_v45 = vpop.eup %6917  ;;  %6933 = vpow2.f32 %v5694_v23  ;;  %v5703_v14 = vmul.f32 -1.442695, %v7618_v26  ;;  %v1715_v48 = vpop.f32.mrf.mxu0  ;;  %4683 = vmatprep.subr.bf16.mxu0 %v6662_v57 }
 0x150   :  { %6935 = vrcp.f32 %v2629_v36  ;;  %v2630_v52 = vadd.f32 1.0, %v6918_v45  ;;  %v5704_v44 = vmul.f32 -1.442695, %v7621_v41  ;;  %v7627_v54 = vadd.f32 %v7595_v56, %v1714_v35  ;;  %4625 = vmatpush2.bf16.msra.mxu1 %v6651_v43  ;;  %v6669_v43 = vld [vmem:[#allocation8 + $0x2b8] ss:$12 sps:$4 sm:$0xff]  }
 0x151   :  { %v6920_v33 = vpop.eup %6919  ;;  %6937 = vpow2.f32 %v5703_v14  ;;  %v1716_v24 = vadd.f32 %v1715_v48, %v7548_v55  ;;  %v1717_v58 = vpop.f32.mrf.mxu0  ;;  %4626 = vmatprep.subr.bf16.mxu1 %v6659_v50  ;;  %v6674_v48 = vld [vmem:[#allocation8 + $0x2a4] ss:$12 sps:$4 sm:$0xff]  }
 0x152   :  { %6939 = vrcp.f32 %v2630_v52  ;;  %v2639_v49 = vadd.f32 1.0, %v6920_v33  ;;  %v5713_v61 = vmul.f32 -1.442695, %v7627_v54  ;;  %v1718_v62 = vadd.f32 %v1717_v58, %v7543_v19  ;;  %4684 = vmatpush1.bf16.msra.mxu0 %v6660_v32 }
 0x153   :  { %v6922_v56 = vpop.eup %6921  ;;  %6941 = vpow2.f32 %v5704_v44  ;;  %v7633_v39 = vadd.f32 %v7607_v51, %v1716_v24  ;;  %v1719_v3 = vpop.f32.mrf.mxu0  ;;  %4685 = vmatprep.subr.bf16.mxu0 %v6665_v38 }
 0x154   :  { %6943 = vrcp.f32 %v2639_v49  ;;  %v2640_v19 = vadd.f32 1.0, %v6922_v56  ;;  %v7643_v6 = vadd.f32 %v1790_v31, %v1718_v62  ;;  %v1720_v7 = vadd.f32 %v1719_v3, %v7548_v55  ;;  %4627 = vmatpush2.bf16.msra.mxu1 %v6657_v34  ;;  %v6672_v56 = vld [vmem:[#allocation8 + $0x2a0] ss:$12 sps:$4 sm:$0xff]  }
 0x155   :  { %v6924_v51 = vpop.eup %6923  ;;  %6945 = vpow2.f32 %v5713_v61  ;;  %v5714_v11 = vmul.f32 -1.442695, %v7633_v39  ;;  %v1902_v12 = vpop.f32.mrf.mxu0  ;;  %4742 = vmatprep.subr.bf16.mxu1 %v6689_v13 }
 0x156   :  { %v1829_v57 = vpop.f32.mrf.mxu1  ;;  %6947 = vrcp.f32 %v2640_v19  ;;  %v2649_v46 = vadd.f32 1.0, %v6924_v51  ;;  %v5723_v17 = vmul.f32 -1.442695, %v7643_v6  ;;  %v7648_v18 = vadd.f32 %v1792_v5, %v1720_v7  ;;  %4686 = vmatpush2.bf16.msra.mxu0 %v6663_v60  ;;  %v6677_v51 = vld [vmem:[#allocation8 + $0x28c] ss:$12 sps:$4 sm:$0xff]  }
 0x157   :  { %v6926_v22 = vpop.eup %6925  ;;  %6949 = vpow2.f32 %v5714_v11  ;;  %v1830_v55 = vadd.f32 %v1829_v57, %v7638_v0  ;;  %v1904_v25 = vpop.f32.mrf.mxu0  ;;  %4687 = vmatprep.subr.bf16.mxu0 %v6668_v1 }
 0x158   :  { %v1831_v23 = vpop.f32.mrf.mxu1  ;;  %6951 = vrcp.f32 %v2649_v46  ;;  %v2650_v2 = vadd.f32 1.0, %v6926_v22  ;;  %v5724_v27 = vmul.f32 -1.442695, %v7648_v18 }
 0x159   :  { %v1832_v28 = vadd.f32 %v1831_v23, %v7641_v40  ;;  %v6928_v31 = vpop.eup %6927  ;;  %6953 = vpow2.f32 %v5723_v17  ;;  %v7653_v32 = vadd.f32 %v1902_v12, %v1830_v55  ;;  %v1906_v35 = vpop.f32.mrf.mxu0  ;;  %v6675_v23 = vld [vmem:[#allocation8 + $0x288] ss:$12 sps:$4 sm:$0xff]  }
 0x15a   :  { %v1833_v36 = vpop.f32.mrf.mxu1  ;;  %v6930_v38 = vpop.eup %6929  ;;  %6955 = vrcp.f32 %v2650_v2  ;;  %4688 = vmatpush2.bf16.msra.mxu0 %v6666_v9  ;;  %v2859_v57 = vmul.f32 %v6928_v31, %v7555_v63 }
 0x15b   :  { %v7655_v45 = vadd.f32 %v1904_v25, %v1832_v28  ;;  %v1834_v14 = vadd.f32 %v1833_v36, %v7638_v0  ;;  %v6932_v50 = vpop.eup %6931  ;;  %v2659_v52 = vadd.f32 1.0, %v6930_v38  ;;  %6957 = vpow2.f32 %v5724_v27  ;;  %v1908_v24 = vpop.f32.mrf.mxu0  ;;  %4689 = vmatprep.subr.bf16.mxu0 %v6671_v21  ;;  %v6680_v36 = vld [vmem:[#allocation8 + $0x274] ss:$12 sps:$4 sm:$0xff]  }
 0x15c   :  { %v5655_v44 = vmul.f32 -1.442695, %v7653_v32  ;;  %v1835_v33 = vpop.f32.mrf.mxu1  ;;  %v6934_v58 = vpop.eup %6933 }
 0x15d   :  { %v5656_v5 = vmul.f32 -1.442695, %v7655_v45  ;;  %v7660_v60 = vadd.f32 %v1906_v35, %v1834_v14  ;;  %v1836_v49 = vadd.f32 %v1835_v33, %v7641_v40  ;;  %v6936_v61 = vpop.eup %6935  ;;  %6959 = vrcp.f32 %v2659_v52  ;;  %v1912_v1 = vpop.f32.mrf.mxu0  ;;  %v6687_v35 = vld [vmem:[#allocation8 + $0x3a8] ss:$12 sps:$4 sm:$0xff]  }
 0x15e   :  { %v2660_v62 = vadd.f32 1.0, %v6934_v58  ;;  %v1839_v34 = vpop.f32.mrf.mxu1  ;;  %v6938_v3 = vpop.eup %6937  ;;  %v2869_v19 = vmul.f32 %v6936_v61, %v7567_v10  ;;  %6961 = vpow2.f32 %v5655_v44  ;;  %4690 = vmatpush2.bf16.msra.mxu0 %v6669_v43  ;;  %v2860_v10 = vmul.f32 %v6932_v50, %v7562_v4  ;;  %v6692_v14 = vld [vmem:[#allocation8 + $0x394] ss:$12 sps:$4 sm:$0xff]  }
 0x15f   :  { %v5665_v7 = vmul.f32 -1.442695, %v7660_v60  ;;  %v7665_v9 = vadd.f32 %v1908_v24, %v1836_v49  ;;  %v6940_v11 = vpop.eup %6939  ;;  %v2669_v12 = vadd.f32 1.0, %v6938_v3  ;;  %v1840_v13 = vadd.f32 %v1839_v34, %v7638_v0  ;;  %v1914_v17 = vpop.f32.mrf.mxu0  ;;  %4691 = vmatprep.subr.bf16.mxu0 %v6674_v48  ;;  %v6678_v3 = vld [vmem:[#allocation8 + $0x270] ss:$12 sps:$4 sm:$0xff]  }
 0x160   :  { %6963 = vrcp.f32 %v2660_v62  ;;  %v1841_v46 = vpop.f32.mrf.mxu1  ;;  %v6942_v21 = vpop.eup %6941  ;;  %v2870_v22 = vmul.f32 %v6940_v11, %v7574_v20  ;;  %v7675_v38 = vpack.c.bf16 %v2869_v19, %v2859_v57  ;;  %v6683_v57 = vld [vmem:[#allocation8 + $0x25c] ss:$12 sps:$4 sm:$0xff]  }
 0x161   :  { %6965 = vpow2.f32 %v5656_v5  ;;  %v5666_v55 = vmul.f32 -1.442695, %v7665_v9  ;;  %v6944_v25 = vpop.eup %6943  ;;  %v2670_v2 = vadd.f32 1.0, %v6942_v21  ;;  %v1842_v63 = vadd.f32 %v1841_v46, %v7641_v40  ;;  %v1916_v31 = vpop.f32.mrf.mxu0 }
 0x162   :  { %6967 = vrcp.f32 %v2669_v12  ;;  %v7673_v27 = vadd.f32 %v1912_v1, %v1840_v13  ;;  %v1843_v28 = vpop.f32.mrf.mxu1  ;;  %v6946_v43 = vpop.eup %6945  ;;  %v7678_v20 = vpack.c.bf16 %v2870_v22, %v2860_v10  ;;  %4692 = vmatpush2.bf16.msra.mxu0 %v6672_v56  ;;  %v6690_v12 = vld [vmem:[#allocation8 + $0x390] ss:$12 sps:$4 sm:$0xff]  }
 0x163   :  { %6969 = vpow2.f32 %v5665_v7  ;;  %v1844_v4 = vadd.f32 %v1843_v28, %v7638_v0  ;;  %v6948_v48 = vpop.eup %6947  ;;  %v2679_v50 = vadd.f32 1.0, %v6946_v43  ;;  %v7681_v44 = vadd.f32 %v1914_v17, %v1842_v63  ;;  %v1918_v24 = vpop.f32.mrf.mxu0  ;;  %4693 = vmatprep.subr.bf16.mxu0 %v6677_v51  ;;  %v6681_v43 = vld [vmem:[#allocation8 + $0x258] ss:$12 sps:$4 sm:$0xff]  }
 0x164   :  { %6971 = vrcp.f32 %v2670_v2  ;;  %v5675_v52 = vmul.f32 -1.442695, %v7673_v27  ;;  %v1845_v33 = vpop.f32.mrf.mxu1  ;;  %v6950_v58 = vpop.eup %6949  ;;  %4628 = vmatprep.mubr.bf16.mxu1 %v7678_v20  ;;  %v2879_v7 = vmul.f32 %v6944_v25, %v7579_v30  ;;  %v6695_v30 = vld [vmem:[#allocation8 + $0x37c] ss:$12 sps:$4 sm:$0xff]   ;;  %v2880_v63 = vmul.f32 %v6948_v48, %v7586_v42 }
 0x165   :  { %6973 = vpow2.f32 %v5666_v55  ;;  %v1846_v5 = vadd.f32 %v1845_v33, %v7641_v40  ;;  %v7684_v49 = vadd.f32 %v1916_v31, %v1844_v4  ;;  %v6952_v61 = vpop.eup %6951  ;;  %v2680_v62 = vadd.f32 1.0, %v6950_v58  ;;  %4629 = vmatmul.mubr.bf16.vlgmr.msra.gmra.mxu1 %v7675_v38  ;;  %v1922_v56 = vpop.f32.mrf.mxu0 }
 0x166   :  { %6975 = vrcp.f32 %v2679_v50  ;;  %v5676_v34 = vmul.f32 -1.442695, %v7681_v44  ;;  %v1849_v1 = vpop.f32.mrf.mxu1  ;;  %v6954_v19 = vpop.eup %6953  ;;  %4694 = vmatpush2.bf16.msra.mxu0 %v6675_v23  ;;  %4743 = vmatpush1.bf16.msra.mxu1 %v6687_v35  ;;  %v2889_v46 = vmul.f32 %v6952_v61, %v7592_v53  ;;  %v6686_v50 = vld [vmem:[#allocation8 + $0x244] ss:$12 sps:$4 sm:$0xff]  }
 0x167   :  { %6977 = vpow2.f32 %v5675_v52  ;;  %v5685_v51 = vmul.f32 -1.442695, %v7684_v49  ;;  %v1850_v11 = vadd.f32 %v1849_v1, %v7638_v0  ;;  %v6956_v13 = vpop.eup %6955  ;;  %v2689_v17 = vadd.f32 1.0, %v6954_v19  ;;  %v1924_v22 = vpop.f32.mrf.mxu0  ;;  %4695 = vmatprep.subr.bf16.mxu0 %v6680_v36  ;;  %4744 = vmatprep.subr.bf16.mxu1 %v6692_v14  ;;  %v6693_v52 = vld [vmem:[#allocation8 + $0x378] ss:$12 sps:$4 sm:$0xff]  }
 0x168   :  { %6979 = vrcp.f32 %v2680_v62  ;;  %v7693_v21 = vadd.f32 %v1918_v24, %v1846_v5  ;;  %v1851_v10 = vpop.f32.mrf.mxu1  ;;  %v6958_v55 = vpop.eup %6957  ;;  %v2890_v25 = vmul.f32 %v6956_v13, %v7599_v29  ;;  %v7707_v58 = vpack.c.bf16 %v2889_v46, %v2879_v7  ;;  %v6698_v5 = vld [vmem:[#allocation8 + $0x364] ss:$12 sps:$4 sm:$0xff]   ;;  %v6684_v7 = vld [vmem:[#allocation8 + $0x240] ss:$12 sps:$4 sm:$0xff]  }
 0x169   :  { %6981 = vpow2.f32 %v5676_v34  ;;  %v1852_v23 = vadd.f32 %v1851_v10, %v7641_v40  ;;  %v7697_v2 = vadd.f32 %v1922_v56, %v1850_v11  ;;  %v2690_v53 = vadd.f32 1.0, %v6958_v55  ;;  %v1926_v35 = vpop.f32.mrf.mxu0  ;;  %v6696_v11 = vld [vmem:[#allocation8 + $0x360] ss:$12 sps:$4 sm:$0xff]  }
 0x16a   :  { %6983 = vrcp.f32 %v2689_v17  ;;  %v5686_v28 = vmul.f32 -1.442695, %v7693_v21  ;;  %v1853_v31 = vpop.f32.mrf.mxu1  ;;  %v6960_v36 = vpop.eup %6959  ;;  %4696 = vmatpush2.bf16.msra.mxu0 %v6678_v3  ;;  %4745 = vmatpush1.bf16.msra.mxu1 %v6690_v12  ;;  %v7705_v33 = vpack.c.bf16 %v2890_v25, %v2880_v63  ;;  %v6701_v17 = vld [vmem:[#allocation8 + $0x34c] ss:$12 sps:$4 sm:$0xff]  }
 0x16b   :  { %6985 = vpow2.f32 %v5685_v51  ;;  %v5695_v4 = vmul.f32 -1.442695, %v7697_v2  ;;  %v1854_v29 = vadd.f32 %v1853_v31, %v7638_v0  ;;  %v7703_v14 = vadd.f32 %v1924_v22, %v1852_v23  ;;  %v6962_v42 = vpop.eup %6961  ;;  %v1928_v24 = vpop.f32.mrf.mxu0  ;;  %4697 = vmatprep.subr.bf16.mxu0 %v6683_v57  ;;  %4746 = vmatprep.subr.bf16.mxu1 %v6695_v30  ;;  %v6716_v10 = vld [vmem:[#allocation8 + $0x52c] ss:$12 sps:$4 sm:$0xff]  }
 0x16c   :  { %6987 = vrcp.f32 %v2690_v53  ;;  %v1855_v48 = vpop.f32.mrf.mxu1  ;;  %v2621_v62 = vadd.f32 1.0, %v6962_v42  ;;  %4638 = vmatprep.mubr.bf16.mxu1 %v7705_v33  ;;  %v2899_v30 = vmul.f32 %v6960_v36, %v7604_v16 }
 0x16d   :  { %v6964_v61 = vpop.eup %6963  ;;  %6989 = vpow2.f32 %v5686_v28  ;;  %v5696_v34 = vmul.f32 -1.442695, %v7703_v14  ;;  %v1856_v1 = vadd.f32 %v1855_v48, %v7641_v40  ;;  %v7711_v3 = vadd.f32 %v1926_v35, %v1854_v29  ;;  %v1932_v51 = vpop.f32.mrf.mxu0  ;;  %4639 = vmatmul.mubr.bf16.gmra.mxu1 %v7707_v58 }
 0x16e   :  { %v6966_v56 = vpop.eup %6965  ;;  %6991 = vpow2.f32 %v5695_v4  ;;  %v1859_v19 = vpop.f32.mrf.mxu1  ;;  %4698 = vmatpush2.bf16.msra.mxu0 %v6681_v43  ;;  %4747 = vmatpush1.bf16.msra.mxu1 %v6693_v52  ;;  %v2900_v16 = vmul.f32 %v6964_v61, %v7611_v8 }
 0x16f   :  { %v6968_v57 = vpop.eup %6967  ;;  %6993 = vrcp.f32 %v2621_v62  ;;  %v2622_v12 = vadd.f32 1.0, %v6966_v56  ;;  %v1860_v13 = vadd.f32 %v1859_v19, %v7638_v0  ;;  %v7715_v46 = vadd.f32 %v1928_v24, %v1856_v1  ;;  %v1934_v63 = vpop.f32.mrf.mxu0  ;;  %4699 = vmatprep.subr.bf16.mxu0 %v6686_v50  ;;  %4748 = vmatprep.subr.bf16.mxu1 %v6698_v5  ;;  %v6699_v24 = vld [vmem:[#allocation8 + $0x348] ss:$12 sps:$4 sm:$0xff]  }
 0x170   :  { %v6970_v22 = vpop.eup %6969  ;;  %v2909_v55 = vmul.f32 %v6968_v57, %v7618_v26  ;;  %6995 = vpow2.f32 %v5696_v34  ;;  %v5705_v25 = vmul.f32 -1.442695, %v7711_v3  ;;  %v1861_v23 = vpop.f32.mrf.mxu1  ;;  %v6704_v5 = vld [vmem:[#allocation8 + $0x334] ss:$12 sps:$4 sm:$0xff]  }
 0x171   :  { %v6972_v53 = vpop.eup %6971  ;;  %6997 = vrcp.f32 %v2622_v12  ;;  %v2631_v28 = vadd.f32 1.0, %v6970_v22  ;;  %v5706_v31 = vmul.f32 -1.442695, %v7715_v46  ;;  %v1862_v35 = vadd.f32 %v1861_v23, %v7641_v40  ;;  %v1936_v29 = vpop.f32.mrf.mxu0 }
 0x172   :  { %v6974_v43 = vpop.eup %6973  ;;  %v2910_v26 = vmul.f32 %v6972_v53, %v7621_v41  ;;  %6999 = vpow2.f32 %v5705_v25  ;;  %v7725_v36 = vadd.f32 %v1932_v51, %v1860_v13  ;;  %v1863_v4 = vpop.f32.mrf.mxu1  ;;  %4700 = vmatpush2.bf16.msra.mxu0 %v6684_v7  ;;  %v7733_v1 = vpack.c.bf16 %v2909_v55, %v2899_v30  ;;  %4749 = vmatpush1.bf16.msra.mxu1 %v6696_v11  ;;  %v6702_v11 = vld [vmem:[#allocation8 + $0x330] ss:$12 sps:$4 sm:$0xff]  }
 0x173   :  { %v6976_v50 = vpop.eup %6975  ;;  %7001 = vrcp.f32 %v2631_v28  ;;  %v2632_v52 = vadd.f32 1.0, %v6974_v43  ;;  %v1864_v42 = vadd.f32 %v1863_v4, %v7638_v0  ;;  %v7728_v48 = vadd.f32 %v1934_v63, %v1862_v35  ;;  %v1938_v34 = vpop.f32.mrf.mxu0  ;;  %4815 = vmatprep.subr.bf16.mxu0 %v6716_v10  ;;  %4750 = vmatprep.subr.bf16.mxu1 %v6701_v17  ;;  %v6707_v10 = vld [vmem:[#allocation8 + $0x31c] ss:$12 sps:$4 sm:$0xff]  }
 0x174   :  { %v6978_v62 = vpop.eup %6977  ;;  %7003 = vpow2.f32 %v5706_v31  ;;  %v5715_v8 = vmul.f32 -1.442695, %v7725_v36  ;;  %v1865_v41 = vpop.f32.mrf.mxu1  ;;  %v7731_v61 = vpack.c.bf16 %v2910_v26, %v2900_v16  ;;  %v2919_v43 = vmul.f32 %v6976_v50, %v7627_v54  ;;  %v6705_v26 = vld [vmem:[#allocation8 + $0x318] ss:$12 sps:$4 sm:$0xff]   ;;  %v6708_v54 = vld [vmem:[#allocation8 + $0x300] ss:$12 sps:$4 sm:$0xff]  }
 0x175   :  { %v6980_v56 = vpop.eup %6979  ;;  %7005 = vrcp.f32 %v2632_v52  ;;  %v2641_v0 = vadd.f32 1.0, %v6978_v62  ;;  %v5716_v19 = vmul.f32 -1.442695, %v7728_v48  ;;  %v1866_v51 = vadd.f32 %v1865_v41, %v7641_v40  ;;  %v6710_v52 = vld [vmem:[#allocation8 + $0x304] ss:$12 sps:$4 sm:$0xff]  }
 0x176   :  { %v6982_v7 = vpop.eup %6981  ;;  %7007 = vpow2.f32 %v5715_v8  ;;  %v7737_v57 = vadd.f32 %v1936_v29, %v1864_v42  ;;  %4648 = vmatprep.mubr.bf16.mxu1 %v7731_v61  ;;  %v7744_v17 = vpop.f32.mrf.mxu1  ;;  %4751 = vmatpush1.bf16.msra.mxu1 %v6699_v24  ;;  %v2920_v28 = vmul.f32 %v6980_v56, %v7633_v39  ;;  %v6713_v62 = vld [vmem:[#allocation8 + $0x46c] ss:$12 sps:$4 sm:$0xff]  }
 0x177   :  { %v6984_v12 = vpop.eup %6983  ;;  %7009 = vrcp.f32 %v2641_v0  ;;  %v2642_v13 = vadd.f32 1.0, %v6982_v7  ;;  %v7740_v22 = vadd.f32 %v1938_v34, %v1866_v51  ;;  %4649 = vmatmul.mubr.bf16.gmra.mxu1 %v7733_v1  ;;  %4752 = vmatprep.subr.bf16.mxu1 %v6704_v5 }
 0x178   :  { %v6986_v30 = vpop.eup %6985  ;;  %7011 = vpow2.f32 %v5716_v19  ;;  %v5725_v40 = vmul.f32 -1.442695, %v7737_v57  ;;  %v2929_v25 = vmul.f32 %v6984_v12, %v7643_v6  ;;  %v7753_v29 = vpop.f32.mrf.mxu1 }
 0x179   :  { %v6988_v55 = vpop.eup %6987  ;;  %7013 = vrcp.f32 %v2642_v13  ;;  %v2651_v23 = vadd.f32 1.0, %v6986_v30  ;;  %v5726_v63 = vmul.f32 -1.442695, %v7740_v22 }
 0x17a   :  { %v6990_v53 = vpop.eup %6989  ;;  %v2930_v31 = vmul.f32 %v6988_v55, %v7648_v18  ;;  %7015 = vpow2.f32 %v5725_v40  ;;  %4753 = vmatpush1.bf16.msra.mxu1 %v6702_v11  ;;  %v7755_v39 = vpack.c.bf16 %v2929_v25, %v2919_v43  ;;  %v7759_v34 = vpop.f32.mrf.mxu1  ;;  %v6711_v11 = vld [vmem:[#allocation8 + $0x468] ss:$12 sps:$4 sm:$0xff]  }
 0x17b   :  { %v6992_v35 = vpop.eup %6991  ;;  %7017 = vrcp.f32 %v2651_v23  ;;  %v2652_v16 = vadd.f32 1.0, %v6990_v53  ;;  %4754 = vmatprep.subr.bf16.mxu1 %v6707_v10  ;;  %v6714_v10 = vld [vmem:[#allocation8 + $0x528] ss:$12 sps:$4 sm:$0xff]  }
 0x17c   :  { %v6994_v4 = vpop.eup %6993  ;;  %7019 = vpow2.f32 %v5726_v63  ;;  %v7751_v6 = vpack.c.bf16 %v2930_v31, %v2920_v28  ;;  %v2661_v5 = vadd.f32 1.0, %v6992_v35  ;;  %v7765_v55 = vpop.f32.mrf.mxu1  ;;  %v6719_v25 = vld [vmem:[#allocation8 + $0x454] ss:$12 sps:$4 sm:$0xff]   ;;  %v6717_v28 = vld [vmem:[#allocation8 + $0x450] ss:$12 sps:$4 sm:$0xff]  }
 0x17d   :  { %v6996_v42 = vpop.eup %6995  ;;  %7021 = vrcp.f32 %v2652_v16  ;;  %v2861_v40 = vmul.f32 %v6994_v4, %v7653_v32  ;;  %v6722_v31 = vld [vmem:[#allocation8 + $0x514] ss:$12 sps:$4 sm:$0xff]   ;;  %v6720_v32 = vld [vmem:[#allocation8 + $0x510] ss:$12 sps:$4 sm:$0xff]  }
 0x17e   :  { %v6998_v18 = vpop.eup %6997  ;;  %v2662_v24 = vadd.f32 1.0, %v6996_v42  ;;  %4658 = vmatprep.mubr.bf16.mxu1 %v7751_v6  ;;  %4755 = vmatpush1.bf16.msra.mxu1 %v6705_v26  ;;  %v6725_v16 = vld [vmem:[#allocation8 + $0x43c] ss:$12 sps:$4 sm:$0xff]  }
 0x17f   :  { %v7000_v50 = vpop.eup %6999  ;;  %4659 = vmatmul.mubr.bf16.gmra.mxu1 %v7755_v39  ;;  %4756 = vmatprep.subr.bf16.mxu1 %v6710_v52  ;;  %v2862_v12 = vmul.f32 %v6998_v18, %v7655_v45  ;;  %v353_v52 = vsub.s32 4, %v7521_v37 }
 0x180   :  { %v7002_v8 = vpop.eup %7001  ;;  %v2671_v41 = vadd.f32 1.0, %v7000_v50  ;;  %7023 = vrcp.f32 %v2662_v24  ;;  %v357_v50 = vsub.s32 5, %v7521_v37 }
 0x181   :  { %v7004_v56 = vpop.eup %7003  ;;  %v2871_v19 = vmul.f32 %v7002_v8, %v7660_v60  ;;  %v6728_v8 = vld [vmem:[#allocation8 + $0x4fc] ss:$12 sps:$4 sm:$0xff]  }
 0x182   :  { %v7006_v0 = vpop.eup %7005  ;;  %7025 = vrcp.f32 %v2671_v41  ;;  %v2672_v51 = vadd.f32 1.0, %v7004_v56  ;;  %4757 = vmatpush1.bf16.msra.mxu1 %v6708_v54 }
 0x183   :  { %v7008_v7 = vpop.eup %7007  ;;  %v2872_v13 = vmul.f32 %v7006_v0, %v7665_v9  ;;  %7027 = vrcp.f32 %v2661_v5  ;;  %4758 = vmatprep.subr.bf16.mxu1 %v6713_v62  ;;  %v7769_v53 = vpack.c.bf16 %v2871_v19, %v2861_v40  ;;  %v7771_v9 = vpop.f32.mrf.mxu1  ;;  %v6723_v62 = vld [vmem:[#allocation8 + $0x438] ss:$12 sps:$4 sm:$0xff]  }
 0x184   :  { %v7010_v30 = vpop.eup %7009  ;;  %7029 = vrcp.f32 %v2672_v51  ;;  %v2681_v43 = vadd.f32 1.0, %v7008_v7  ;;  %v6726_v0 = vld [vmem:[#allocation8 + $0x4f8] ss:$12 sps:$4 sm:$0xff]  }
 0x185   :  { %v7012_v23 = vpop.eup %7011  ;;  %v7767_v60 = vpack.c.bf16 %v2872_v13, %v2862_v12  ;;  %v7778_v5 = vpop.f32.mrf.mxu1  ;;  %v6731_v19 = vld [vmem:[#allocation8 + $0x424] ss:$12 sps:$4 sm:$0xff]   ;;  %v2881_v51 = vmul.f32 %v7010_v30, %v7673_v27  ;;  %v6737_v40 = vld [vmem:[#allocation8 + $0x40c] ss:$12 sps:$4 sm:$0xff]  }
 0x186   :  { %v7014_v63 = vpop.eup %7013  ;;  %v2682_v45 = vadd.f32 1.0, %v7012_v23  ;;  %4759 = vmatpush2.bf16.msra.mxu1 %v6711_v11  ;;  %v6734_v11 = vld [vmem:[#allocation8 + $0x4e4] ss:$12 sps:$4 sm:$0xff]  }
 0x187   :  { %v7016_v35 = vpop.eup %7015  ;;  %4701 = vmatprep.mubr.bf16.mxu0 %v7767_v60  ;;  %4760 = vmatprep.subr.bf16.mxu1 %v6719_v25  ;;  %v2882_v41 = vmul.f32 %v7014_v63, %v7681_v44  ;;  %v7787_v13 = vpop.f32.mrf.mxu1  ;;  %v6729_v44 = vld [vmem:[#allocation8 + $0x420] ss:$12 sps:$4 sm:$0xff]  }
 0x188   :  { %v7018_v26 = vpop.eup %7017  ;;  %v2691_v4 = vadd.f32 1.0, %v7016_v35  ;;  %4702 = vmatmul.mubr.bf16.vlgmr.msra.gmra.mxu0 %v7769_v53  ;;  %7031 = vrcp.f32 %v2682_v45  ;;  %v7796_v35 = vld [vmem:[#allocation7] sm:$0xff] }
 0x189   :  { %v7020_v42 = vpop.eup %7019  ;;  %4816 = vmatpush1.bf16.msra.mxu0 %v6714_v10  ;;  %v2891_v24 = vmul.f32 %v7018_v26, %v7684_v49  ;;  %v6732_v10 = vld [vmem:[#allocation8 + $0x4e0] ss:$12 sps:$4 sm:$0xff]   ;;  %v7794_v45 = vpop.f32.mrf.mxu1 }
 0x18a   :  { %v7022_v18 = vpop.eup %7021  ;;  %7033 = vrcp.f32 %v2691_v4  ;;  %v2692_v54 = vadd.f32 1.0, %v7020_v42  ;;  %4817 = vmatprep.subr.bf16.mxu0 %v6722_v31  ;;  %4761 = vmatpush2.bf16.msra.mxu1 %v6717_v28  ;;  %v6735_v28 = vld [vmem:[#allocation8 + $0x408] ss:$12 sps:$4 sm:$0xff]   ;;  %v6740_v31 = vld [vmem:[#allocation8 + $0x4cc] ss:$12 sps:$4 sm:$0xff]  }
 0x18b   :  { %v2892_v56 = vmul.f32 %v7022_v18, %v7693_v21  ;;  %7035 = vrcp.f32 %v2681_v43  ;;  %4762 = vmatprep.subr.bf16.mxu1 %v6725_v16  ;;  %v7785_v12 = vpack.c.bf16 %v2891_v24, %v2881_v51  ;;  %v7799_v43 = vrot.slane %v7796_v35, %v353_v52  ;;  %v6743_v16 = vld [vmem:[#allocation8 + $0x3f4] ss:$12 sps:$4 sm:$0xff]   ;;  %v7810_v52 = vpop.f32.mrf.mxu1 }
 0x18c   :  { %7037 = vrcp.f32 %v2692_v54  ;;  %v6746_v18 = vld [vmem:[#allocation8 + $0x4b4] ss:$12 sps:$4 sm:$0xff]  }
 0x18d   :  { %v7783_v49 = vpack.c.bf16 %v2892_v56, %v2882_v41  ;;  %4818 = vmatpush1.bf16.msra.mxu0 %v6720_v32  ;;  %v7024_v7 = vpop.eup %7023  ;;  %v6738_v32 = vld [vmem:[#allocation8 + $0x4c8] ss:$12 sps:$4 sm:$0xff]  }
 0x18e   :  { %4819 = vmatprep.subr.bf16.mxu0 %v6728_v8  ;;  %4763 = vmatpush2.bf16.msra.mxu1 %v6723_v62  ;;  %v2902_v25 = vmul.f32 %v7024_v7, %v7703_v14  ;;  %v7805_v14 = vrot.slane %v7796_v35, %v357_v50  ;;  %v6741_v62 = vld [vmem:[#allocation8 + $0x3f0] ss:$12 sps:$4 sm:$0xff]  }
 0x18f   :  { %v7026_v21 = vpop.eup %7025  ;;  %4711 = vmatprep.mubr.bf16.mxu0 %v7783_v49  ;;  %4764 = vmatprep.subr.bf16.mxu1 %v6731_v19  ;;  %v6749_v19 = vld [vmem:[#allocation8 + $0x3dc] ss:$12 sps:$4 sm:$0xff]  }
 0x190   :  { %v7028_v27 = vpop.eup %7027  ;;  %4712 = vmatmul.mubr.bf16.gmra.mxu0 %v7785_v12  ;;  %v2911_v23 = vmul.f32 %v7026_v21, %v7711_v3  ;;  %v7821_v21 = vpop.f32.mrf.mxu1 }
 0x191   :  { %v7030_v30 = vpop.eup %7029  ;;  %4820 = vmatpush1.bf16.msra.mxu0 %v6726_v0  ;;  %v2901_v26 = vmul.f32 %v7028_v27, %v7697_v2  ;;  %v6744_v0 = vld [vmem:[#allocation8 + $0x4b0] ss:$12 sps:$4 sm:$0xff]  }
 0x192   :  { %v2912_v63 = vmul.f32 %v7030_v30, %v7715_v46  ;;  %4821 = vmatprep.subr.bf16.mxu0 %v6734_v11  ;;  %4765 = vmatpush2.bf16.msra.mxu1 %v6729_v44 }
 0x193   :  { %4766 = vmatprep.subr.bf16.mxu1 %v6737_v40  ;;  %v7808_v42 = vpack.c.bf16 %v2911_v23, %v2901_v26 }
 0x194   :  { %v7802_v4 = vpack.c.bf16 %v2912_v63, %v2902_v25 }
 0x195   :  { %4822 = vmatpush1.bf16.msra.mxu0 %v6732_v10  ;;  %v7032_v3 = vpop.eup %7031  ;;  %v1975_v46 = vpop.f32.mrf.mxu0  ;;  %v6752_v10 = vld [vmem:[#allocation8 + $0x49c] ss:$12 sps:$4 sm:$0xff]  }
 0x196   :  { %4721 = vmatprep.mubr.bf16.mxu0 %v7802_v4  ;;  %4823 = vmatprep.subr.bf16.mxu0 %v6740_v31  ;;  %v1976_v2 = vadd.f32 %v1975_v46, %v7799_v43  ;;  %v2922_v51 = vmul.f32 %v7032_v3, %v7728_v48 }
 0x197   :  { %v7034_v24 = vpop.eup %7033  ;;  %v1977_v50 = vpop.f32.mrf.mxu0  ;;  %4767 = vmatpush2.bf16.msra.mxu1 %v6735_v28  ;;  %v6755_v28 = vld [vmem:[#allocation8 + $0x3c4] ss:$12 sps:$4 sm:$0xff]  }
 0x198   :  { %v7036_v54 = vpop.eup %7035  ;;  %4722 = vmatmul.mubr.bf16.gmra.mxu0 %v7808_v42  ;;  %v7815_v41 = vadd.f32 %v7744_v17, %v1976_v2  ;;  %v1978_v56 = vadd.f32 %v1977_v50, %v7805_v14  ;;  %4768 = vmatprep.subr.bf16.mxu1 %v6743_v16  ;;  %v2931_v7 = vmul.f32 %v7034_v24, %v7737_v57  ;;  %v6747_v57 = vld [vmem:[#allocation8 + $0x3d8] ss:$12 sps:$4 sm:$0xff]   ;;  %v6756_v50 = vld [vmem:[#allocation8 + $0x480] ss:$12 sps:$4 sm:$0xff]  }
 0x199   :  { %v7038_v8 = vpop.eup %7037  ;;  %4824 = vmatpush1.bf16.msra.mxu0 %v6738_v32  ;;  %v1979_v11 = vpop.f32.mrf.mxu0  ;;  %v2921_v30 = vmul.f32 %v7036_v54, %v7725_v36  ;;  %v6758_v16 = vld [vmem:[#allocation8 + $0x484] ss:$12 sps:$4 sm:$0xff]  }
 0x19a   :  { %v2932_v44 = vmul.f32 %v7038_v8, %v7740_v22  ;;  %4825 = vmatprep.subr.bf16.mxu0 %v6746_v18  ;;  %v5657_v17 = vmul.f32 -1.442695, %v7815_v41  ;;  %v7825_v40 = vadd.f32 %v7753_v29, %v1978_v56  ;;  %v1980_v27 = vadd.f32 %v1979_v11, %v7799_v43  ;;  %v6750_v29 = vld [vmem:[#allocation8 + $0x498] ss:$12 sps:$4 sm:$0xff]   ;;  %v7839_v32 = vpop.f32.mrf.mxu1  ;;  %v6753_v18 = vld [vmem:[#allocation8 + $0x3c0] ss:$12 sps:$4 sm:$0xff]  }
 0x19b   :  { %v1981_v25 = vpop.f32.mrf.mxu0  ;;  %4769 = vmatpush2.bf16.msra.mxu1 %v6741_v62  ;;  %v7837_v31 = vpack.c.bf16 %v2931_v7, %v2921_v30  ;;  %v6761_v56 = vld [vmem:[#allocation8 + $0x5ec] ss:$12 sps:$4 sm:$0xff]  }
 0x19c   :  { %v7829_v48 = vpack.c.bf16 %v2932_v44, %v2922_v51  ;;  %7039 = vpow2.f32 %v5657_v17  ;;  %v5658_v22 = vmul.f32 -1.442695, %v7825_v40  ;;  %v7833_v23 = vadd.f32 %v7759_v34, %v1980_v27  ;;  %4770 = vmatprep.subr.bf16.mxu1 %v6749_v19  ;;  %v2074_v8 = vpop.f32.mrf.mxu1 }
 0x19d   :  { %v1982_v63 = vadd.f32 %v1981_v25, %v7805_v14  ;;  %4826 = vmatpush1.bf16.msra.mxu0 %v6744_v0  ;;  %v1985_v36 = vpop.f32.mrf.mxu0 }
 0x19e   :  { %4731 = vmatprep.mubr.bf16.mxu0 %v7829_v48  ;;  %4827 = vmatprep.subr.bf16.mxu0 %v6752_v10  ;;  %7041 = vpow2.f32 %v5658_v22  ;;  %v5667_v26 = vmul.f32 -1.442695, %v7833_v23  ;;  %v1986_v3 = vadd.f32 %v1985_v36, %v7799_v43  ;;  %v6759_v10 = vld [vmem:[#allocation8 + $0x5e8] ss:$12 sps:$4 sm:$0xff]   ;;  %v2078_v27 = vpop.f32.mrf.mxu1 }
 0x19f   :  { %v7843_v34 = vadd.f32 %v7765_v55, %v1982_v63  ;;  %v1987_v46 = vpop.f32.mrf.mxu0  ;;  %4771 = vmatpush2.bf16.msra.mxu1 %v6747_v57  ;;  %v6785_v55 = vld [vmem:[#allocation8 + $0x6ac] ss:$12 sps:$4 sm:$0xff]  }
 0x1a0   :  { %4732 = vmatmul.mubr.bf16.gmra.mxu0 %v7837_v31  ;;  %7043 = vpow2.f32 %v5667_v26  ;;  %v7849_v2 = vadd.f32 %v7771_v9, %v1986_v3  ;;  %v1988_v54 = vadd.f32 %v1987_v46, %v7805_v14  ;;  %4772 = vmatprep.subr.bf16.mxu1 %v6755_v28  ;;  %v6762_v28 = vld [vmem:[#allocation8 + $0x5d0] ss:$12 sps:$4 sm:$0xff]   ;;  %v2080_v26 = vpop.f32.mrf.mxu1 }
 0x1a1   :  { %v5668_v24 = vmul.f32 -1.442695, %v7843_v34  ;;  %4828 = vmatpush1.bf16.msra.mxu0 %v6750_v29  ;;  %v1989_v62 = vpop.f32.mrf.mxu0  ;;  %v6767_v3 = vld [vmem:[#allocation8 + $0x5bc] ss:$12 sps:$4 sm:$0xff]  }
 0x1a2   :  { %4829 = vmatprep.subr.bf16.mxu0 %v6758_v16  ;;  %v5677_v0 = vmul.f32 -1.442695, %v7849_v2  ;;  %v7854_v19 = vadd.f32 %v7778_v5, %v1988_v54  ;;  %v1990_v51 = vadd.f32 %v1989_v62, %v7799_v43  ;;  %v6764_v5 = vld [vmem:[#allocation8 + $0x5d4] ss:$12 sps:$4 sm:$0xff]  }
 0x1a3   :  { %7045 = vpow2.f32 %v5668_v24  ;;  %v1991_v9 = vpop.f32.mrf.mxu0  ;;  %4773 = vmatpush2.bf16.msra.mxu1 %v6753_v18 }
 0x1a4   :  { %7047 = vpow2.f32 %v5677_v0  ;;  %v5678_v7 = vmul.f32 -1.442695, %v7854_v19  ;;  %v7859_v44 = vadd.f32 %v7787_v13, %v1990_v51  ;;  %v1992_v11 = vadd.f32 %v1991_v9, %v7805_v14  ;;  %4888 = vmatprep.subr.bf16.mxu1 %v6785_v55 }
 0x1a5   :  { %4830 = vmatpush1.bf16.msra.mxu0 %v6756_v50  ;;  %v1995_v17 = vpop.f32.mrf.mxu0 }
 0x1a6   :  { %4831 = vmatprep.subr.bf16.mxu0 %v6761_v56  ;;  %7049 = vpow2.f32 %v5678_v7  ;;  %v5687_v30 = vmul.f32 -1.442695, %v7859_v44  ;;  %v7864_v25 = vadd.f32 %v7794_v45, %v1992_v11  ;;  %v1996_v57 = vadd.f32 %v1995_v17, %v7799_v43  ;;  %v6765_v56 = vld [vmem:[#allocation8 + $0x5b8] ss:$12 sps:$4 sm:$0xff]  }
 0x1a7   :  { %v1997_v22 = vpop.f32.mrf.mxu0  ;;  %v6770_v7 = vld [vmem:[#allocation8 + $0x5a4] ss:$12 sps:$4 sm:$0xff]  }
 0x1a8   :  { %7051 = vpow2.f32 %v5687_v30  ;;  %v5688_v13 = vmul.f32 -1.442695, %v7864_v25  ;;  %v7869_v63 = vadd.f32 %v7810_v52, %v1996_v57  ;;  %v1998_v29 = vadd.f32 %v1997_v22, %v7805_v14 }
 0x1a9   :  { %4832 = vmatpush2.bf16.msra.mxu0 %v6759_v10  ;;  %v7040_v36 = vpop.eup %7039  ;;  %v1999_v16 = vpop.f32.mrf.mxu0  ;;  %v361_v22 = vsub.s32 6, %v7521_v37 }
 0x1aa   :  { %4833 = vmatprep.subr.bf16.mxu0 %v6764_v5  ;;  %v2623_v45 = vadd.f32 1.0, %v7040_v36  ;;  %7053 = vpow2.f32 %v5688_v13  ;;  %v5697_v46 = vmul.f32 -1.442695, %v7869_v63  ;;  %v7874_v18 = vadd.f32 %v7821_v21, %v1998_v29  ;;  %v2082_v21 = vpop.f32.mrf.mxu1 }
 0x1ab   :  { %v7042_v24 = vpop.eup %7041  ;;  %v2000_v52 = vadd.f32 %v1999_v16, %v7799_v43  ;;  %v2001_v54 = vpop.f32.mrf.mxu0 }
 0x1ac   :  { %7055 = vrcp.f32 %v2623_v45  ;;  %v2624_v50 = vadd.f32 1.0, %v7042_v24  ;;  %v5698_v55 = vmul.f32 -1.442695, %v7874_v18  ;;  %v2002_v62 = vadd.f32 %v2001_v54, %v7805_v14  ;;  %v2084_v45 = vpop.f32.mrf.mxu1 }
 0x1ad   :  { %4834 = vmatpush2.bf16.msra.mxu0 %v6762_v28  ;;  %v7044_v0 = vpop.eup %7043  ;;  %7057 = vpow2.f32 %v5697_v46  ;;  %v7880_v51 = vadd.f32 %v7839_v32, %v2000_v52  ;;  %v2005_v9 = vpop.f32.mrf.mxu0  ;;  %v365_v32 = vsub.s32 7, %v7521_v37  ;;  %v6773_v46 = vld [vmem:[#allocation8 + $0x58c] ss:$12 sps:$4 sm:$0xff]  }
 0x1ae   :  { %4835 = vmatprep.subr.bf16.mxu0 %v6767_v3  ;;  %7059 = vrcp.f32 %v2624_v50  ;;  %v2633_v11 = vadd.f32 1.0, %v7044_v0  ;;  %v7882_v10 = vadd.f32 %v2074_v8, %v2002_v62  ;;  %v2006_v17 = vadd.f32 %v2005_v9, %v7799_v43  ;;  %v6768_v8 = vld [vmem:[#allocation8 + $0x5a0] ss:$12 sps:$4 sm:$0xff]  }
 0x1af   :  { %7061 = vpow2.f32 %v5698_v55  ;;  %v5707_v30 = vmul.f32 -1.442695, %v7880_v51  ;;  %v2007_v57 = vpop.f32.mrf.mxu0  ;;  %v7897_v62 = vrot.slane %v7796_v35, %v361_v22 }
 0x1b0   :  { %v7046_v5 = vpop.eup %7045  ;;  %7063 = vrcp.f32 %v2633_v11  ;;  %v5708_v29 = vmul.f32 -1.442695, %v7882_v10  ;;  %v7889_v28 = vadd.f32 %v2078_v27, %v2006_v17  ;;  %v2008_v16 = vadd.f32 %v2007_v57, %v7805_v14  ;;  %v6771_v11 = vld [vmem:[#allocation8 + $0x588] ss:$12 sps:$4 sm:$0xff]  }
 0x1b1   :  { %v2634_v13 = vadd.f32 1.0, %v7046_v5  ;;  %4836 = vmatpush2.bf16.msra.mxu0 %v6765_v56  ;;  %v7048_v36 = vpop.eup %7047  ;;  %7065 = vpow2.f32 %v5707_v30  ;;  %v2009_v3 = vpop.f32.mrf.mxu0  ;;  %v7900_v56 = vrot.slane %v7796_v35, %v365_v32  ;;  %v6776_v30 = vld [vmem:[#allocation8 + $0x574] ss:$12 sps:$4 sm:$0xff]  }
 0x1b2   :  { %4837 = vmatprep.subr.bf16.mxu0 %v6770_v7  ;;  %v2643_v24 = vadd.f32 1.0, %v7048_v36  ;;  %v5717_v52 = vmul.f32 -1.442695, %v7889_v28  ;;  %v2010_v54 = vadd.f32 %v2009_v3, %v7799_v43  ;;  %v7894_v27 = vadd.f32 %v2080_v26, %v2008_v16  ;;  %v6774_v16 = vld [vmem:[#allocation8 + $0x570] ss:$12 sps:$4 sm:$0xff]  }
 0x1b3   :  { %7067 = vrcp.f32 %v2634_v13  ;;  %v7050_v50 = vpop.eup %7049  ;;  %v2011_v55 = vpop.f32.mrf.mxu0 }
 0x1b4   :  { %7069 = vpow2.f32 %v5708_v29  ;;  %v2644_v0 = vadd.f32 1.0, %v7050_v50  ;;  %v7902_v9 = vadd.f32 %v2082_v21, %v2010_v54  ;;  %v2012_v7 = vadd.f32 %v2011_v55, %v7805_v14 }
 0x1b5   :  { %7071 = vrcp.f32 %v2643_v24  ;;  %4838 = vmatpush2.bf16.msra.mxu0 %v6768_v8  ;;  %v7052_v43 = vpop.eup %7051  ;;  %v5718_v26 = vmul.f32 -1.442695, %v7894_v27  ;;  %v2194_v5 = vpop.f32.mrf.mxu0 }
 0x1b6   :  { %7073 = vpow2.f32 %v5717_v52  ;;  %v2121_v17 = vpop.f32.mrf.mxu1  ;;  %4839 = vmatprep.subr.bf16.mxu0 %v6773_v46  ;;  %v2653_v57 = vadd.f32 1.0, %v7052_v43  ;;  %v5727_v35 = vmul.f32 -1.442695, %v7902_v9  ;;  %v7907_v22 = vadd.f32 %v2084_v45, %v2012_v7  ;;  %v6779_v52 = vld [vmem:[#allocation8 + $0x55c] ss:$12 sps:$4 sm:$0xff]  }
 0x1b7   :  { %7075 = vrcp.f32 %v2644_v0  ;;  %v7054_v21 = vpop.eup %7053  ;;  %v2122_v14 = vadd.f32 %v2121_v17, %v7897_v62  ;;  %v2196_v13 = vpop.f32.mrf.mxu0 }
 0x1b8   :  { %7077 = vpow2.f32 %v5718_v26  ;;  %v2123_v32 = vpop.f32.mrf.mxu1  ;;  %v2654_v29 = vadd.f32 1.0, %v7054_v21  ;;  %v5728_v8 = vmul.f32 -1.442695, %v7907_v22 }
 0x1b9   :  { %7079 = vrcp.f32 %v2653_v57  ;;  %v2124_v36 = vadd.f32 %v2123_v32, %v7900_v56  ;;  %4840 = vmatpush2.bf16.msra.mxu0 %v6771_v11  ;;  %v7056_v3 = vpop.eup %7055  ;;  %v7912_v46 = vadd.f32 %v2194_v5, %v2122_v14  ;;  %v2198_v24 = vpop.f32.mrf.mxu0 }
 0x1ba   :  { %7081 = vpow2.f32 %v5727_v35  ;;  %v2125_v45 = vpop.f32.mrf.mxu1  ;;  %4841 = vmatprep.subr.bf16.mxu0 %v6776_v30  ;;  %v7058_v54 = vpop.eup %7057  ;;  %v6777_v35 = vld [vmem:[#allocation8 + $0x558] ss:$12 sps:$4 sm:$0xff]  }
 0x1bb   :  { %7083 = vrcp.f32 %v2654_v29  ;;  %v7914_v50 = vadd.f32 %v2196_v13, %v2124_v36  ;;  %v2126_v55 = vadd.f32 %v2125_v45, %v7897_v62  ;;  %v7060_v0 = vpop.eup %7059  ;;  %v2663_v7 = vadd.f32 1.0, %v7058_v54  ;;  %v2200_v26 = vpop.f32.mrf.mxu0  ;;  %v6782_v29 = vld [vmem:[#allocation8 + $0x544] ss:$12 sps:$4 sm:$0xff]  }
 0x1bc   :  { %7085 = vpow2.f32 %v5728_v8  ;;  %v5659_v11 = vmul.f32 -1.442695, %v7912_v46  ;;  %v2127_v43 = vpop.f32.mrf.mxu1  ;;  %v7062_v17 = vpop.eup %7061 }
 0x1bd   :  { %v5660_v5 = vmul.f32 -1.442695, %v7914_v50  ;;  %v7919_v57 = vadd.f32 %v2198_v24, %v2126_v55  ;;  %v2128_v30 = vadd.f32 %v2127_v43, %v7900_v56  ;;  %4842 = vmatpush2.bf16.msra.mxu0 %v6774_v16  ;;  %v7064_v21 = vpop.eup %7063  ;;  %7087 = vrcp.f32 %v2663_v7  ;;  %v2204_v13 = vpop.f32.mrf.mxu0 }
 0x1be   :  { %v2664_v14 = vadd.f32 1.0, %v7062_v17  ;;  %v2131_v32 = vpop.f32.mrf.mxu1  ;;  %4843 = vmatprep.subr.bf16.mxu0 %v6779_v52  ;;  %v7066_v8 = vpop.eup %7065  ;;  %v2873_v36 = vmul.f32 %v7064_v21, %v7833_v23  ;;  %7089 = vpow2.f32 %v5659_v11  ;;  %v2863_v55 = vmul.f32 %v7056_v3, %v7815_v41  ;;  %v6780_v11 = vld [vmem:[#allocation8 + $0x540] ss:$12 sps:$4 sm:$0xff]  }
 0x1bf   :  { %v5669_v45 = vmul.f32 -1.442695, %v7919_v57  ;;  %v7924_v54 = vadd.f32 %v2200_v26, %v2128_v30  ;;  %v2673_v16 = vadd.f32 1.0, %v7066_v8  ;;  %v2132_v7 = vadd.f32 %v2131_v32, %v7897_v62  ;;  %v2206_v17 = vpop.f32.mrf.mxu0  ;;  %v6786_v32 = vld [vmem:[#allocation8 + $0x170] ss:$12 sps:$4 sm:$0xff]  }
 0x1c0   :  { %v7068_v24 = vpop.eup %7067  ;;  %7091 = vrcp.f32 %v2664_v14  ;;  %v2133_v43 = vpop.f32.mrf.mxu1  ;;  %v2864_v52 = vmul.f32 %v7060_v0, %v7825_v40  ;;  %v7934_v40 = vpack.c.bf16 %v2873_v36, %v2863_v55 }
 0x1c1   :  { %v7070_v15 = vpop.eup %7069  ;;  %v2874_v37 = vmul.f32 %v7068_v24, %v7843_v34  ;;  %7093 = vpow2.f32 %v5660_v5  ;;  %v5670_v23 = vmul.f32 -1.442695, %v7924_v54  ;;  %4844 = vmatpush2.bf16.msra.mxu0 %v6777_v35  ;;  %v2134_v41 = vadd.f32 %v2133_v43, %v7900_v56  ;;  %v2208_v14 = vpop.f32.mrf.mxu0  ;;  %v6783_v5 = vld [vmem:[#allocation8 + $0x6a8] ss:$12 sps:$4 sm:$0xff]  }
 0x1c2   :  { %v7072_v26 = vpop.eup %7071  ;;  %7095 = vrcp.f32 %v2673_v16  ;;  %v2674_v30 = vadd.f32 1.0, %v7070_v15  ;;  %v7932_v3 = vadd.f32 %v2204_v13, %v2132_v7  ;;  %v2135_v21 = vpop.f32.mrf.mxu1  ;;  %4845 = vmatprep.subr.bf16.mxu0 %v6782_v29  ;;  %8587 = vst [vmem:[#allocation16_spill] sm:$0xff] %v7934_v40  ;;  %v6790_v29 = vld [vmem:[#allocation8 + $0x694] ss:$12 sps:$4 sm:$0xff]  }
 0x1c3   :  { %v7074_v8 = vpop.eup %7073  ;;  %7097 = vpow2.f32 %v5669_v45  ;;  %v2136_v34 = vadd.f32 %v2135_v21, %v7897_v62  ;;  %v7937_v0 = vpack.c.bf16 %v2874_v37, %v2864_v52  ;;  %v7940_v13 = vadd.f32 %v2206_v17, %v2134_v41  ;;  %v2210_v7 = vpop.f32.mrf.mxu0 }
 0x1c4   :  { %v7076_v35 = vpop.eup %7075  ;;  %7099 = vrcp.f32 %v2674_v30  ;;  %v2683_v15 = vadd.f32 1.0, %v7074_v8  ;;  %v5679_v24 = vmul.f32 -1.442695, %v7932_v3  ;;  %v2137_v16 = vpop.f32.mrf.mxu1 }
 0x1c5   :  { %8588 = vst [vmem:[#allocation17_spill] sm:$0xff] %v7937_v0  ;;  %v7078_v43 = vpop.eup %7077  ;;  %7101 = vpow2.f32 %v5670_v23  ;;  %v2138_v36 = vadd.f32 %v2137_v16, %v7900_v56  ;;  %v7943_v45 = vadd.f32 %v2208_v14, %v2136_v34  ;;  %4774 = vmatprep.mubr.bf16.mxu1 %v7937_v0  ;;  %4846 = vmatpush2.bf16.msra.mxu0 %v6780_v11  ;;  %v5680_v52 = vmul.f32 -1.442695, %v7940_v13  ;;  %v2214_v17 = vpop.f32.mrf.mxu0  ;;  %v6788_v11 = vld [vmem:[#allocation8 + $0x690] ss:$12 sps:$4 sm:$0xff]  }
 0x1c6   :  { %v7080_v37 = vpop.eup %7079  ;;  %7103 = vrcp.f32 %v2683_v15  ;;  %v2684_v55 = vadd.f32 1.0, %v7078_v43  ;;  %v2141_v30 = vpop.f32.mrf.mxu1  ;;  %4775 = vmatmul.mubr.bf16.vlgmr.msra.gmra.mxu1 %v7934_v40  ;;  %6005 = vmatprep.subr.bf16.mxu0 %v6786_v32  ;;  %v2883_v23 = vmul.f32 %v7072_v26, %v7849_v2  ;;  %v6795_v32 = vld [vmem:[#allocation8 + $0x67c] ss:$12 sps:$4 sm:$0xff]  }
 0x1c7   :  { %v7082_v41 = vpop.eup %7081  ;;  %7105 = vpow2.f32 %v5679_v24  ;;  %v5689_v21 = vmul.f32 -1.442695, %v7943_v45  ;;  %v2142_v14 = vadd.f32 %v2141_v30, %v7897_v62  ;;  %4889 = vmatpush1.bf16.msra.mxu1 %v6783_v5  ;;  %v2893_v34 = vmul.f32 %v7080_v37, %v7859_v44  ;;  %v2216_v40 = vpop.f32.mrf.mxu0 }
 0x1c8   :  { %v7084_v8 = vpop.eup %7083  ;;  %7107 = vrcp.f32 %v2684_v55  ;;  %v2693_v15 = vadd.f32 1.0, %v7082_v41  ;;  %v7952_v16 = vadd.f32 %v2210_v7, %v2138_v36  ;;  %v2143_v43 = vpop.f32.mrf.mxu1  ;;  %4890 = vmatprep.subr.bf16.mxu1 %v6790_v29  ;;  %v2884_v5 = vmul.f32 %v7076_v35, %v7854_v19  ;;  %v6793_v35 = vld [vmem:[#allocation8 + $0x678] ss:$12 sps:$4 sm:$0xff]  }
 0x1c9   :  { %v7086_v0 = vpop.eup %7085  ;;  %v2894_v2 = vmul.f32 %v7084_v8, %v7864_v25  ;;  %7109 = vpow2.f32 %v5680_v52  ;;  %v2144_v26 = vadd.f32 %v2143_v43, %v7900_v56  ;;  %v7956_v24 = vadd.f32 %v2214_v17, %v2142_v14  ;;  %v2218_v36 = vpop.f32.mrf.mxu0 }
 0x1ca   :  { %7111 = vrcp.f32 %v2693_v15  ;;  %v2694_v44 = vadd.f32 1.0, %v7086_v0  ;;  %v5690_v37 = vmul.f32 -1.442695, %v7952_v16  ;;  %v2145_v7 = vpop.f32.mrf.mxu1  ;;  %v7088_v55 = vpop.eup %7087  ;;  %v7966_v0 = vpack.c.bf16 %v2893_v34, %v2883_v23 }
 0x1cb   :  { %7113 = vpow2.f32 %v5689_v21  ;;  %v5699_v29 = vmul.f32 -1.442695, %v7956_v24  ;;  %v2146_v30 = vadd.f32 %v2145_v7, %v7897_v62  ;;  %v7962_v25 = vadd.f32 %v2216_v40, %v2144_v26  ;;  %4891 = vmatpush1.bf16.msra.mxu1 %v6788_v11  ;;  %v7090_v52 = vpop.eup %7089  ;;  %v2220_v19 = vpop.f32.mrf.mxu0  ;;  %v6800_v40 = vld [vmem:[#allocation8 + $0x664] ss:$12 sps:$4 sm:$0xff]  }
 0x1cc   :  { %7115 = vrcp.f32 %v2694_v44  ;;  %v2147_v17 = vpop.f32.mrf.mxu1  ;;  %v7964_v41 = vpack.c.bf16 %v2894_v2, %v2884_v5  ;;  %8590 = vst [vmem:[#allocation19_spill] sm:$0xff] %v7966_v0  ;;  %4892 = vmatprep.subr.bf16.mxu1 %v6795_v32  ;;  %v2625_v8 = vadd.f32 1.0, %v7090_v52  ;;  %v6798_v52 = vld [vmem:[#allocation8 + $0x660] ss:$12 sps:$4 sm:$0xff]  }
 0x1cd   :  { %v7092_v14 = vpop.eup %7091  ;;  %7117 = vpow2.f32 %v5690_v37  ;;  %v5700_v21 = vmul.f32 -1.442695, %v7962_v25  ;;  %v2148_v15 = vadd.f32 %v2147_v17, %v7900_v56  ;;  %v7970_v11 = vadd.f32 %v2218_v36, %v2146_v30  ;;  %v2224_v26 = vpop.f32.mrf.mxu0 }
 0x1ce   :  { %8589 = vst [vmem:[#allocation18_spill] sm:$0xff] %v7964_v41  ;;  %v7094_v43 = vpop.eup %7093  ;;  %7119 = vpow2.f32 %v5699_v29  ;;  %4784 = vmatprep.mubr.bf16.mxu1 %v7964_v41  ;;  %v2151_v2 = vpop.f32.mrf.mxu1  ;;  %v2903_v37 = vmul.f32 %v7088_v55, %v7869_v63  ;;  %v2904_v63 = vmul.f32 %v7092_v14, %v7874_v18 }
 0x1cf   :  { %v7096_v23 = vpop.eup %7095  ;;  %7121 = vrcp.f32 %v2625_v8  ;;  %v2626_v34 = vadd.f32 1.0, %v7094_v43  ;;  %v2152_v32 = vadd.f32 %v2151_v2, %v7897_v62  ;;  %v7974_v5 = vadd.f32 %v2220_v19, %v2148_v15  ;;  %4785 = vmatmul.mubr.bf16.gmra.mxu1 %v7966_v0  ;;  %v2226_v30 = vpop.f32.mrf.mxu0  ;;  %v6805_v43 = vld [vmem:[#allocation8 + $0x64c] ss:$12 sps:$4 sm:$0xff]  }
 0x1d0   :  { %v7098_v44 = vpop.eup %7097  ;;  %v2913_v7 = vmul.f32 %v7096_v23, %v7880_v51  ;;  %7123 = vpow2.f32 %v5700_v21  ;;  %v5709_v36 = vmul.f32 -1.442695, %v7970_v11  ;;  %v2153_v29 = vpop.f32.mrf.mxu1  ;;  %4893 = vmatpush1.bf16.msra.mxu1 %v6793_v35 }
 0x1d1   :  { %v7100_v17 = vpop.eup %7099  ;;  %7125 = vrcp.f32 %v2626_v34  ;;  %v2635_v8 = vadd.f32 1.0, %v7098_v44  ;;  %v5710_v19 = vmul.f32 -1.442695, %v7974_v5  ;;  %v2154_v15 = vadd.f32 %v2153_v29, %v7900_v56  ;;  %4894 = vmatprep.subr.bf16.mxu1 %v6800_v40  ;;  %v2228_v35 = vpop.f32.mrf.mxu0 }
 0x1d2   :  { %v7102_v2 = vpop.eup %7101  ;;  %v2914_v51 = vmul.f32 %v7100_v17, %v7882_v10  ;;  %7127 = vpow2.f32 %v5709_v36  ;;  %v7984_v55 = vadd.f32 %v2224_v26, %v2152_v32  ;;  %v2155_v21 = vpop.f32.mrf.mxu1  ;;  %v7992_v14 = vpack.c.bf16 %v2913_v7, %v2903_v37  ;;  %v6803_v26 = vld [vmem:[#allocation8 + $0x648] ss:$12 sps:$4 sm:$0xff]  }
 0x1d3   :  { %v7104_v23 = vpop.eup %7103  ;;  %7129 = vrcp.f32 %v2635_v8  ;;  %v2636_v34 = vadd.f32 1.0, %v7102_v2  ;;  %v2156_v44 = vadd.f32 %v2155_v21, %v7897_v62  ;;  %v7987_v0 = vadd.f32 %v2226_v30, %v2154_v15  ;;  %v2230_v10 = vpop.f32.mrf.mxu0  ;;  %v6810_v30 = vld [vmem:[#allocation8 + $0x634] ss:$12 sps:$4 sm:$0xff]   ;;  %v6815_v21 = vld [vmem:[#allocation8 + $0x61c] ss:$12 sps:$4 sm:$0xff]  }
 0x1d4   :  { %v7106_v29 = vpop.eup %7105  ;;  %7131 = vpow2.f32 %v5710_v19  ;;  %v5719_v40 = vmul.f32 -1.442695, %v7984_v55  ;;  %v2157_v41 = vpop.f32.mrf.mxu1  ;;  %v7990_v18 = vpack.c.bf16 %v2914_v51, %v2904_v63  ;;  %4895 = vmatpush1.bf16.msra.mxu1 %v6798_v52 }
 0x1d5   :  { %v7108_v32 = vpop.eup %7107  ;;  %7133 = vrcp.f32 %v2636_v34  ;;  %v2645_v36 = vadd.f32 1.0, %v7106_v29  ;;  %v5720_v17 = vmul.f32 -1.442695, %v7987_v0  ;;  %v2158_v62 = vadd.f32 %v2157_v41, %v7900_v56  ;;  %4896 = vmatprep.subr.bf16.mxu1 %v6805_v43  ;;  %v6808_v56 = vld [vmem:[#allocation8 + $0x630] ss:$12 sps:$4 sm:$0xff]  }
 0x1d6   :  { %v7110_v8 = vpop.eup %7109  ;;  %7135 = vpow2.f32 %v5719_v40  ;;  %v7996_v19 = vadd.f32 %v2228_v35, %v2156_v44  ;;  %4794 = vmatprep.mubr.bf16.mxu1 %v7990_v18  ;;  %v2924_v34 = vmul.f32 %v7108_v32, %v7894_v27  ;;  %v2923_v40 = vmul.f32 %v7104_v23, %v7889_v28  ;;  %v6820_v27 = vld [vmem:[#allocation8 + $0x604] ss:$12 sps:$4 sm:$0xff]  }
 0x1d7   :  { %v7112_v15 = vpop.eup %7111  ;;  %7137 = vrcp.f32 %v2645_v36  ;;  %v2646_v37 = vadd.f32 1.0, %v7110_v8  ;;  %v7999_v7 = vadd.f32 %v2230_v10, %v2158_v62  ;;  %4795 = vmatmul.mubr.bf16.gmra.mxu1 %v7992_v14  ;;  %v8010_v36 = vpop.f32.mrf.mxu1 }
 0x1d8   :  { %v7114_v52 = vpop.eup %7113  ;;  %7139 = vpow2.f32 %v5720_v17  ;;  %v5729_v2 = vmul.f32 -1.442695, %v7996_v19  ;;  %4897 = vmatpush1.bf16.msra.mxu1 %v6803_v26  ;;  %v2933_v43 = vmul.f32 %v7112_v15, %v7902_v9  ;;  %v6813_v17 = vld [vmem:[#allocation8 + $0x618] ss:$12 sps:$4 sm:$0xff]  }
 0x1d9   :  { %v7116_v41 = vpop.eup %7115  ;;  %7141 = vrcp.f32 %v2646_v37  ;;  %v2655_v63 = vadd.f32 1.0, %v7114_v52  ;;  %v5730_v51 = vmul.f32 -1.442695, %v7999_v7  ;;  %4898 = vmatprep.subr.bf16.mxu1 %v6810_v30  ;;  %v8015_v28 = vpop.f32.mrf.mxu1  ;;  %v6818_v52 = vld [vmem:[#allocation8 + $0x600] ss:$12 sps:$4 sm:$0xff]  }
 0x1da   :  { %v7118_v35 = vpop.eup %7117  ;;  %v2934_v44 = vmul.f32 %v7116_v41, %v7907_v22  ;;  %7143 = vpow2.f32 %v5729_v2  ;;  %v8012_v30 = vpack.c.bf16 %v2933_v43, %v2923_v40  ;;  %v6823_v40 = vld [vmem:[#allocation8 + $0x768] ss:$12 sps:$4 sm:$0xff]  }
 0x1db   :  { %v7120_v29 = vpop.eup %7119  ;;  %7145 = vrcp.f32 %v2655_v63  ;;  %v2656_v10 = vadd.f32 1.0, %v7118_v35 }
 0x1dc   :  { %v7122_v26 = vpop.eup %7121  ;;  %7147 = vpow2.f32 %v5730_v51  ;;  %v8008_v9 = vpack.c.bf16 %v2934_v44, %v2924_v34  ;;  %4899 = vmatpush1.bf16.msra.mxu1 %v6808_v56  ;;  %v2665_v8 = vadd.f32 1.0, %v7120_v29  ;;  %v6825_v56 = vld [vmem:[#allocation8 + $0x76c] ss:$12 sps:$4 sm:$0xff]   ;;  %v8019_v51 = vpop.f32.mrf.mxu1 }
 0x1dd   :  { %v7124_v62 = vpop.eup %7123  ;;  %7149 = vrcp.f32 %v2656_v10  ;;  %4900 = vmatprep.subr.bf16.mxu1 %v6815_v21  ;;  %v2865_v29 = vmul.f32 %v7122_v26, %v7912_v46 }
 0x1de   :  { %v7126_v22 = vpop.eup %7125  ;;  %v2666_v32 = vadd.f32 1.0, %v7124_v62  ;;  %4804 = vmatprep.mubr.bf16.mxu1 %v8008_v9  ;;  %v6830_v62 = vld [vmem:[#allocation8 + $0x754] ss:$12 sps:$4 sm:$0xff]  }
 0x1df   :  { %v7128_v23 = vpop.eup %7127  ;;  %4805 = vmatmul.mubr.bf16.gmra.mxu1 %v8012_v30  ;;  %v2866_v35 = vmul.f32 %v7126_v22, %v7914_v50  ;;  %v6791_v50 = vld [vmem:[#allocation8 + $0x158] ss:$12 sps:$4 sm:$0xff]   ;;  %v8028_v22 = vpop.f32.mrf.mxu1 }
 0x1e0   :  { %v7130_v15 = vpop.eup %7129  ;;  %v2675_v37 = vadd.f32 1.0, %v7128_v23  ;;  %4901 = vmatpush1.bf16.msra.mxu1 %v6813_v17  ;;  %7151 = vrcp.f32 %v2666_v32 }
 0x1e1   :  { %v7132_v2 = vpop.eup %7131  ;;  %4902 = vmatprep.subr.bf16.mxu1 %v6820_v27  ;;  %v2875_v43 = vmul.f32 %v7130_v15, %v7919_v57  ;;  %v6787_v57 = vld [vmem:[#allocation8 + $0xb0] ss:$12 sps:$4 sm:$0xff]  }
 0x1e2   :  { %v7134_v41 = vpop.eup %7133  ;;  %7153 = vrcp.f32 %v2675_v37  ;;  %v2676_v63 = vadd.f32 1.0, %v7132_v2  ;;  %v6828_v15 = vld [vmem:[#allocation8 + $0x750] ss:$12 sps:$4 sm:$0xff]  }
 0x1e3   :  { %v7136_v21 = vpop.eup %7135  ;;  %v2876_v34 = vmul.f32 %v7134_v41, %v7924_v54  ;;  %7155 = vrcp.f32 %v2665_v8  ;;  %v8026_v32 = vpack.c.bf16 %v2875_v43, %v2865_v29  ;;  %v6835_v2 = vld [vmem:[#allocation8 + $0x73c] ss:$12 sps:$4 sm:$0xff]  }
 0x1e4   :  { %v7138_v44 = vpop.eup %7137  ;;  %7157 = vrcp.f32 %v2676_v63  ;;  %4903 = vmatpush1.bf16.msra.mxu1 %v6818_v52  ;;  %v2685_v8 = vadd.f32 1.0, %v7136_v21  ;;  %v6792_v52 = vld [vmem:[#allocation8 + $0x98] ss:$12 sps:$4 sm:$0xff]   ;;  %v6796_v63 = vld [vmem:[#allocation8 + $0x140] ss:$12 sps:$4 sm:$0xff]   ;;  %v8033_v21 = vpop.f32.mrf.mxu1 }
 0x1e5   :  { %v7140_v10 = vpop.eup %7139  ;;  %v8024_v17 = vpack.c.bf16 %v2876_v34, %v2866_v35  ;;  %4904 = vmatprep.subr.bf16.mxu1 %v6825_v56  ;;  %v2885_v29 = vmul.f32 %v7138_v44, %v7932_v3  ;;  %v332_v44 = vld [vmem:[#allocation7 + $0x8] sm:$0x3] }
 0x1e6   :  { %v7142_v27 = vpop.eup %7141  ;;  %v2686_v23 = vadd.f32 1.0, %v7140_v10 }
 0x1e7   :  { %v7144_v54 = vpop.eup %7143  ;;  %4847 = vmatprep.mubr.bf16.mxu0 %v8024_v17  ;;  %v2886_v35 = vmul.f32 %v7142_v27, %v7940_v13  ;;  %v8042_v13 = vpop.f32.mrf.mxu1  ;;  %v6838_v27 = vld [vmem:[#allocation8 + $0x720] ss:$12 sps:$4 sm:$0xff]  }
 0x1e8   :  { %v7146_v46 = vpop.eup %7145  ;;  %v2695_v26 = vadd.f32 1.0, %v7144_v54  ;;  %4848 = vmatmul.mubr.bf16.vlgmr.msra.gmra.mxu0 %v8026_v32  ;;  %4905 = vmatpush2.bf16.msra.mxu1 %v6823_v40  ;;  %7159 = vrcp.f32 %v2686_v23  ;;  %v6833_v40 = vld [vmem:[#allocation8 + $0x738] ss:$12 sps:$4 sm:$0xff]  }
 0x1e9   :  { %v7148_v37 = vpop.eup %7147  ;;  %6006 = vmatpush3.bf16.msra.mxu0 %v6787_v57  ;;  %4906 = vmatprep.subr.bf16.mxu1 %v6830_v62  ;;  %v2895_v41 = vmul.f32 %v7146_v46, %v7943_v45  ;;  %v6797_v45 = vld [vmem:[#allocation8 + $0x80] ss:$12 sps:$4 sm:$0xff]   ;;  %v6840_v57 = vld [vmem:[#allocation8 + $0x724] ss:$12 sps:$4 sm:$0xff]  }
 0x1ea   :  { %v7150_v56 = vpop.eup %7149  ;;  %7161 = vrcp.f32 %v2695_v26  ;;  %v2696_v43 = vadd.f32 1.0, %v7148_v37  ;;  %6007 = vmatprep.subr.bf16.mxu0 %v6791_v50  ;;  %v6801_v50 = vld [vmem:[#allocation8 + $0x128] ss:$12 sps:$4 sm:$0xff]   ;;  %v6845_v46 = vld [vmem:[#allocation8 + $0x70c] ss:$12 sps:$4 sm:$0xff]  }
 0x1eb   :  { %v2896_v34 = vmul.f32 %v7150_v56, %v7952_v16  ;;  %7163 = vrcp.f32 %v2685_v8  ;;  %v8040_v23 = vpack.c.bf16 %v2895_v41, %v2885_v29  ;;  %v6802_v8 = vld [vmem:[#allocation8 + $0x68] ss:$12 sps:$4 sm:$0xff]   ;;  %v8052_v56 = vrot.slane %v332_v44, %v7532_v47 }
 0x1ec   :  { %7165 = vrcp.f32 %v2696_v43  ;;  %4907 = vmatpush2.bf16.msra.mxu1 %v6828_v15 }
 0x1ed   :  { %6008 = vmatpush3.bf16.msra.mxu0 %v6792_v52  ;;  %v8038_v10 = vpack.c.bf16 %v2896_v34, %v2886_v35  ;;  %4908 = vmatprep.subr.bf16.mxu1 %v6835_v2  ;;  %v7152_v62 = vpop.eup %7151  ;;  %v6806_v52 = vld [vmem:[#allocation8 + $0x110] ss:$12 sps:$4 sm:$0xff]   ;;  %v8049_v2 = vpop.f32.mrf.mxu1 }
 0x1ee   :  { %6009 = vmatprep.subr.bf16.mxu0 %v6796_v63  ;;  %v2906_v26 = vmul.f32 %v7152_v62, %v7962_v25  ;;  %v6843_v63 = vld [vmem:[#allocation8 + $0x708] ss:$12 sps:$4 sm:$0xff]   ;;  %v6807_v35 = vld [vmem:[#allocation8 + $0x50] ss:$12 sps:$4 sm:$0xff]   ;;  %v8058_v25 = vrot.slane %v332_v44, %v7537_v59 }
 0x1ef   :  { %v7154_v16 = vpop.eup %7153  ;;  %4857 = vmatprep.mubr.bf16.mxu0 %v8038_v10 }
 0x1f0   :  { %v7156_v3 = vpop.eup %7155  ;;  %4858 = vmatmul.mubr.bf16.gmra.mxu0 %v8040_v23  ;;  %4909 = vmatpush2.bf16.msra.mxu1 %v6833_v40  ;;  %v2915_v15 = vmul.f32 %v7154_v16, %v7970_v11  ;;  %v6850_v11 = vld [vmem:[#allocation8 + $0x6f4] ss:$12 sps:$4 sm:$0xff]   ;;  %v6811_v40 = vld [vmem:[#allocation8 + $0xf8] ss:$12 sps:$4 sm:$0xff]   ;;  %v6848_v16 = vld [vmem:[#allocation8 + $0x6f0] ss:$12 sps:$4 sm:$0xff]  }
 0x1f1   :  { %v7158_v54 = vpop.eup %7157  ;;  %6010 = vmatpush3.bf16.msra.mxu0 %v6797_v45  ;;  %4910 = vmatprep.subr.bf16.mxu1 %v6840_v57  ;;  %v2905_v41 = vmul.f32 %v7156_v3, %v7956_v24  ;;  %v8063_v24 = vpop.f32.mrf.mxu1 }
 0x1f2   :  { %v2916_v37 = vmul.f32 %v7158_v54, %v7974_v5  ;;  %6011 = vmatprep.subr.bf16.mxu0 %v6801_v50  ;;  %v6812_v54 = vld [vmem:[#allocation8 + $0x38] ss:$12 sps:$4 sm:$0xff]  }
 0x1f3   :  { %v8061_v29 = vpack.c.bf16 %v2915_v15, %v2905_v41  ;;  %v8074_v41 = vpop.f32.mrf.mxu1 }
 0x1f4   :  { %v8055_v43 = vpack.c.bf16 %v2916_v37, %v2906_v26  ;;  %4911 = vmatpush2.bf16.msra.mxu1 %v6838_v27 }
 0x1f5   :  { %6012 = vmatpush3.bf16.msra.mxu0 %v6802_v8  ;;  %4912 = vmatprep.subr.bf16.mxu1 %v6845_v46  ;;  %v7160_v5 = vpop.eup %7159  ;;  %v2267_v34 = vpop.f32.mrf.mxu0  ;;  %v6855_v8 = vld [vmem:[#allocation8 + $0x6dc] ss:$12 sps:$4 sm:$0xff]  }
 0x1f6   :  { %4867 = vmatprep.mubr.bf16.mxu0 %v8055_v43  ;;  %6013 = vmatprep.subr.bf16.mxu0 %v6806_v52  ;;  %v2268_v57 = vadd.f32 %v2267_v34, %v8052_v56  ;;  %v2926_v46 = vmul.f32 %v7160_v5, %v7987_v0  ;;  %v6816_v52 = vld [vmem:[#allocation8 + $0xe0] ss:$12 sps:$4 sm:$0xff]  }
 0x1f7   :  { %v7162_v45 = vpop.eup %7161  ;;  %v2269_v50 = vpop.f32.mrf.mxu0 }
 0x1f8   :  { %v7164_v62 = vpop.eup %7163  ;;  %4868 = vmatmul.mubr.bf16.gmra.mxu0 %v8061_v29  ;;  %4913 = vmatpush2.bf16.msra.mxu1 %v6843_v63  ;;  %v8068_v44 = vadd.f32 %v8010_v36, %v2268_v57  ;;  %v2270_v27 = vadd.f32 %v2269_v50, %v8058_v25  ;;  %v2935_v26 = vmul.f32 %v7162_v45, %v7996_v19  ;;  %v6853_v19 = vld [vmem:[#allocation8 + $0x6d8] ss:$12 sps:$4 sm:$0xff]   ;;  %v6821_v57 = vld [vmem:[#allocation8 + $0xc8] ss:$12 sps:$4 sm:$0xff]  }
 0x1f9   :  { %v7166_v3 = vpop.eup %7165  ;;  %6014 = vmatpush3.bf16.msra.mxu0 %v6807_v35  ;;  %4914 = vmatprep.subr.bf16.mxu1 %v6850_v11  ;;  %v2271_v37 = vpop.f32.mrf.mxu0  ;;  %v2925_v11 = vmul.f32 %v7164_v62, %v7984_v55  ;;  %v6860_v50 = vld [vmem:[#allocation8 + $0x6c4] ss:$12 sps:$4 sm:$0xff]  }
 0x1fa   :  { %v2936_v15 = vmul.f32 %v7166_v3, %v7999_v7  ;;  %6015 = vmatprep.subr.bf16.mxu0 %v6811_v40  ;;  %v5661_v36 = vmul.f32 -1.442695, %v8068_v44  ;;  %v8078_v63 = vadd.f32 %v8015_v28, %v2270_v27  ;;  %v2272_v35 = vadd.f32 %v2271_v37, %v8052_v56  ;;  %v6817_v28 = vld [vmem:[#allocation8 + $0x20] ss:$12 sps:$4 sm:$0xff]   ;;  %v2362_v62 = vpop.f32.mrf.mxu1 }
 0x1fb   :  { %v2273_v34 = vpop.f32.mrf.mxu0  ;;  %v8090_v55 = vpack.c.bf16 %v2935_v26, %v2925_v11 }
 0x1fc   :  { %v8082_v0 = vpack.c.bf16 %v2936_v15, %v2926_v46  ;;  %4915 = vmatpush2.bf16.msra.mxu1 %v6848_v16  ;;  %7167 = vpow2.f32 %v5661_v36  ;;  %v5662_v7 = vmul.f32 -1.442695, %v8078_v63  ;;  %v8086_v5 = vadd.f32 %v8019_v51, %v2272_v35  ;;  %v6863_v15 = vld [vmem:[#allocation8 + $0x470] ss:$12 sps:$4 sm:$0xff]  }
 0x1fd   :  { %6016 = vmatpush3.bf16.msra.mxu0 %v6812_v54  ;;  %v2274_v40 = vadd.f32 %v2273_v34, %v8058_v25  ;;  %4916 = vmatprep.subr.bf16.mxu1 %v6855_v8  ;;  %v2277_v45 = vpop.f32.mrf.mxu0  ;;  %v6858_v54 = vld [vmem:[#allocation8 + $0x6c0] ss:$12 sps:$4 sm:$0xff]   ;;  %v6826_v36 = vld [vmem:[#allocation8 + $0x2f0] ss:$12 sps:$4 sm:$0xff]  }
 0x1fe   :  { %4877 = vmatprep.mubr.bf16.mxu0 %v8082_v0  ;;  %6017 = vmatprep.subr.bf16.mxu0 %v6816_v52  ;;  %7169 = vpow2.f32 %v5662_v7  ;;  %v5671_v16 = vmul.f32 -1.442695, %v8086_v5  ;;  %v2278_v3 = vadd.f32 %v2277_v45, %v8052_v56  ;;  %v2364_v52 = vpop.f32.mrf.mxu1 }
 0x1ff   :  { %v8094_v51 = vadd.f32 %v8028_v22, %v2274_v40  ;;  %v2279_v27 = vpop.f32.mrf.mxu0  ;;  %v6822_v22 = vld [vmem:[#allocation8 + $0x8] ss:$12 sps:$4 sm:$0xff]   ;;  %v6827_v40 = vld [vmem:[#allocation8 + $0x230] ss:$12 sps:$4 sm:$0xff]  }
 0x200   :  { %4878 = vmatmul.mubr.bf16.gmra.mxu0 %v8090_v55  ;;  %4917 = vmatpush2.bf16.msra.mxu1 %v6853_v19  ;;  %7171 = vpow2.f32 %v5671_v16  ;;  %v8100_v46 = vadd.f32 %v8033_v21, %v2278_v3  ;;  %v2280_v26 = vadd.f32 %v2279_v27, %v8058_v25  ;;  %v2366_v45 = vpop.f32.mrf.mxu1 }
 0x201   :  { %v5672_v8 = vmul.f32 -1.442695, %v8094_v51  ;;  %6018 = vmatpush3.bf16.msra.mxu0 %v6817_v28  ;;  %4993 = vmatprep.mubr.bf16.mxu0 %v7678_v20  ;;  %v2281_v37 = vpop.f32.mrf.mxu0 }
 0x202   :  { %6019 = vmatprep.subr.bf16.mxu0 %v6821_v57  ;;  %4918 = vmatprep.subr.bf16.mxu1 %v6860_v50  ;;  %v5681_v35 = vmul.f32 -1.442695, %v8100_v46  ;;  %v8106_v11 = vadd.f32 %v8042_v13, %v2280_v26  ;;  %v2282_v21 = vadd.f32 %v2281_v37, %v8052_v56  ;;  %v6831_v13 = vld [vmem:[#allocation8 + $0x2d8] ss:$12 sps:$4 sm:$0xff]  }
 0x203   :  { %7173 = vpow2.f32 %v5672_v8  ;;  %v2283_v34 = vpop.f32.mrf.mxu0  ;;  %v6832_v8 = vld [vmem:[#allocation8 + $0x218] ss:$12 sps:$4 sm:$0xff]  }
 0x204   :  { %4919 = vmatpush2.bf16.msra.mxu1 %v6858_v54  ;;  %7175 = vpow2.f32 %v5681_v35  ;;  %v5682_v20 = vmul.f32 -1.442695, %v8106_v11  ;;  %v8111_v19 = vadd.f32 %v8049_v2, %v2282_v21  ;;  %v2284_v7 = vadd.f32 %v2283_v34, %v8058_v25 }
 0x205   :  { %6020 = vmatpush3.bf16.msra.mxu0 %v6822_v22  ;;  %6085 = vmatprep.subr.bf16.mxu1 %v6863_v15  ;;  %v2287_v28 = vpop.f32.mrf.mxu0  ;;  %v2370_v22 = vpop.f32.mrf.mxu1  ;;  %v6836_v15 = vld [vmem:[#allocation8 + $0x2c0] ss:$12 sps:$4 sm:$0xff]  }
 0x206   :  { %6045 = vmatprep.subr.bf16.mxu0 %v6826_v36  ;;  %7177 = vpow2.f32 %v5682_v20  ;;  %v5691_v57 = vmul.f32 -1.442695, %v8111_v19  ;;  %v8116_v50 = vadd.f32 %v8063_v24, %v2284_v7  ;;  %v2288_v16 = vadd.f32 %v2287_v28, %v8052_v56  ;;  %v6837_v7 = vld [vmem:[#allocation8 + $0x200] ss:$12 sps:$4 sm:$0xff]  }
 0x207   :  { %v2289_v2 = vpop.f32.mrf.mxu0 }
 0x208   :  { %4994 = vmatmul.mubr.bf16.vlgmr.msra.gmra.mxu0 %v7675_v38  ;;  %7179 = vpow2.f32 %v5691_v57  ;;  %v5692_v3 = vmul.f32 -1.442695, %v8116_v50  ;;  %v8122_v27 = vadd.f32 %v8074_v41, %v2288_v16  ;;  %v2290_v54 = vadd.f32 %v2289_v2, %v8058_v25 }
 0x209   :  { %5001 = vmatprep.mubr.bf16.mxu0 %v7705_v33  ;;  %6046 = vmatpush3.bf16.msra.mxu0 %v6827_v40  ;;  %v7168_v26 = vpop.eup %7167  ;;  %v2291_v24 = vpop.f32.mrf.mxu0 }
 0x20a   :  { %6047 = vmatprep.subr.bf16.mxu0 %v6831_v13  ;;  %v2627_v37 = vadd.f32 1.0, %v7168_v26  ;;  %7181 = vpow2.f32 %v5692_v3  ;;  %v5701_v38 = vmul.f32 -1.442695, %v8122_v27  ;;  %v8127_v36 = vadd.f32 %v2362_v62, %v2290_v54  ;;  %v2372_v13 = vpop.f32.mrf.mxu1  ;;  %v6841_v62 = vld [vmem:[#allocation8 + $0x2a8] ss:$12 sps:$4 sm:$0xff]  }
 0x20b   :  { %v7170_v35 = vpop.eup %7169  ;;  %v2292_v41 = vadd.f32 %v2291_v24, %v8052_v56  ;;  %v2293_v21 = vpop.f32.mrf.mxu0 }
 0x20c   :  { %7183 = vrcp.f32 %v2627_v37  ;;  %v2628_v33 = vadd.f32 1.0, %v7170_v35  ;;  %v5702_v34 = vmul.f32 -1.442695, %v8127_v36  ;;  %v2294_v20 = vadd.f32 %v2293_v21, %v8058_v25  ;;  %v6846_v21 = vld [vmem:[#allocation8 + $0x290] ss:$12 sps:$4 sm:$0xff]  }
 0x20d   :  { %6048 = vmatpush3.bf16.msra.mxu0 %v6832_v8  ;;  %v7172_v40 = vpop.eup %7171  ;;  %7185 = vpow2.f32 %v5701_v38  ;;  %v8132_v28 = vadd.f32 %v2364_v52, %v2292_v41  ;;  %v2297_v57 = vpop.f32.mrf.mxu0 }
 0x20e   :  { %6049 = vmatprep.subr.bf16.mxu0 %v6836_v15  ;;  %7187 = vrcp.f32 %v2628_v33  ;;  %v2637_v16 = vadd.f32 1.0, %v7172_v40  ;;  %v8134_v2 = vadd.f32 %v2366_v45, %v2294_v20  ;;  %v2298_v3 = vadd.f32 %v2297_v57, %v8052_v56  ;;  %v6842_v45 = vld [vmem:[#allocation8 + $0x1e8] ss:$12 sps:$4 sm:$0xff]   ;;  %v2374_v38 = vpop.f32.mrf.mxu1 }
 0x20f   :  { %7189 = vpow2.f32 %v5702_v34  ;;  %v5711_v8 = vmul.f32 -1.442695, %v8132_v28  ;;  %v2299_v26 = vpop.f32.mrf.mxu0 }
 0x210   :  { %v7174_v54 = vpop.eup %7173  ;;  %5002 = vmatmul.mubr.bf16.gmra.mxu0 %v7707_v58  ;;  %7191 = vrcp.f32 %v2637_v16  ;;  %v5712_v24 = vmul.f32 -1.442695, %v8134_v2  ;;  %v8140_v37 = vadd.f32 %v2370_v22, %v2298_v3  ;;  %v2300_v35 = vadd.f32 %v2299_v26, %v8058_v25 }
 0x211   :  { %v2638_v52 = vadd.f32 1.0, %v7174_v54  ;;  %5009 = vmatprep.mubr.bf16.mxu0 %v7731_v61  ;;  %6050 = vmatpush3.bf16.msra.mxu0 %v6837_v7  ;;  %v7176_v15 = vpop.eup %7175  ;;  %7193 = vpow2.f32 %v5711_v8  ;;  %v2301_v41 = vpop.f32.mrf.mxu0 }
 0x212   :  { %6051 = vmatprep.subr.bf16.mxu0 %v6841_v62  ;;  %v2647_v58 = vadd.f32 1.0, %v7176_v15  ;;  %v5721_v33 = vmul.f32 -1.442695, %v8140_v37  ;;  %v2302_v34 = vadd.f32 %v2301_v41, %v8052_v56  ;;  %v8146_v20 = vadd.f32 %v2372_v13, %v2300_v35  ;;  %v6847_v62 = vld [vmem:[#allocation8 + $0x1d0] ss:$12 sps:$4 sm:$0xff]   ;;  %v2376_v54 = vpop.f32.mrf.mxu1 }
 0x213   :  { %7195 = vrcp.f32 %v2638_v52  ;;  %v7178_v22 = vpop.eup %7177  ;;  %v2303_v61 = vpop.f32.mrf.mxu0  ;;  %v6851_v56 = vld [vmem:[#allocation8 + $0x278] ss:$12 sps:$4 sm:$0xff]  }
 0x214   :  { %7197 = vpow2.f32 %v5712_v24  ;;  %v2648_v7 = vadd.f32 1.0, %v7178_v22  ;;  %v8148_v40 = vadd.f32 %v2374_v38, %v2302_v34  ;;  %v2304_v57 = vadd.f32 %v2303_v61, %v8058_v25  ;;  %v6856_v38 = vld [vmem:[#allocation8 + $0x260] ss:$12 sps:$4 sm:$0xff]   ;;  %v6861_v34 = vld [vmem:[#allocation8 + $0x248] ss:$12 sps:$4 sm:$0xff]  }
 0x215   :  { %7199 = vrcp.f32 %v2647_v58  ;;  %6052 = vmatpush3.bf16.msra.mxu0 %v6842_v45  ;;  %v7180_v16 = vpop.eup %7179  ;;  %v5722_v3 = vmul.f32 -1.442695, %v8146_v20  ;;  %v6852_v45 = vld [vmem:[#allocation8 + $0x1b8] ss:$12 sps:$4 sm:$0xff]   ;;  %v6857_v58 = vld [vmem:[#allocation8 + $0x1a0] ss:$12 sps:$4 sm:$0xff]  }
 0x216   :  { %7201 = vpow2.f32 %v5721_v33  ;;  %6053 = vmatprep.subr.bf16.mxu0 %v6846_v21  ;;  %v2657_v8 = vadd.f32 1.0, %v7180_v16  ;;  %v5731_v13 = vmul.f32 -1.442695, %v8148_v40  ;;  %v8153_v26 = vadd.f32 %v2376_v54, %v2304_v57  ;;  %v6862_v54 = vld [vmem:[#allocation8 + $0x188] ss:$12 sps:$4 sm:$0xff]  }
 0x217   :  { %7203 = vrcp.f32 %v2648_v7  ;;  %v7182_v52 = vpop.eup %7181 }
 0x218   :  { %7205 = vpow2.f32 %v5722_v3  ;;  %5010 = vmatmul.mubr.bf16.gmra.mxu0 %v7733_v1  ;;  %v2658_v25 = vadd.f32 1.0, %v7182_v52  ;;  %v5732_v24 = vmul.f32 -1.442695, %v8153_v26 }
 0x219   :  { %7207 = vrcp.f32 %v2657_v8  ;;  %5017 = vmatprep.mubr.bf16.mxu0 %v7751_v6  ;;  %6054 = vmatpush3.bf16.msra.mxu0 %v6847_v62  ;;  %v7184_v15 = vpop.eup %7183 }
 0x21a   :  { %7209 = vpow2.f32 %v5731_v13  ;;  %6055 = vmatprep.subr.bf16.mxu0 %v6851_v56  ;;  %v7186_v35 = vpop.eup %7185  ;;  %v2867_v8 = vmul.f32 %v7184_v15, %v8068_v44 }
 0x21b   :  { %7211 = vrcp.f32 %v2658_v25  ;;  %v7188_v41 = vpop.eup %7187  ;;  %v2667_v61 = vadd.f32 1.0, %v7186_v35  ;;  %v6864_v25 = vld [vmem:[#allocation8 + $0x3b0] ss:$12 sps:$4 sm:$0xff]  }
 0x21c   :  { %7213 = vpow2.f32 %v5732_v24  ;;  %v7190_v21 = vpop.eup %7189  ;;  %v2868_v16 = vmul.f32 %v7188_v41, %v8078_v63 }
 0x21d   :  { %6056 = vmatpush3.bf16.msra.mxu0 %v6852_v45  ;;  %v7192_v1 = vpop.eup %7191  ;;  %v2668_v33 = vadd.f32 1.0, %v7190_v21  ;;  %v6868_v21 = vld [vmem:[#allocation8 + $0x398] ss:$12 sps:$4 sm:$0xff]  }
 0x21e   :  { %6057 = vmatprep.subr.bf16.mxu0 %v6856_v38  ;;  %v7194_v22 = vpop.eup %7193  ;;  %v2877_v7 = vmul.f32 %v7192_v1, %v8086_v5  ;;  %v6865_v5 = vld [vmem:[#allocation8 + $0x5f0] ss:$12 sps:$4 sm:$0xff]   ;;  %v6869_v38 = vld [vmem:[#allocation8 + $0x5d8] ss:$12 sps:$4 sm:$0xff]  }
 0x21f   :  { %v2677_v57 = vadd.f32 1.0, %v7194_v22  ;;  %7215 = vrcp.f32 %v2668_v33 }
 0x220   :  { %v7196_v6 = vpop.eup %7195  ;;  %5018 = vmatmul.mubr.bf16.gmra.mxu0 %v7755_v39  ;;  %v8166_v24 = vpack.c.bf16 %v2877_v7, %v2867_v8  ;;  %v6870_v7 = vld [vmem:[#allocation8 + $0x518] ss:$12 sps:$4 sm:$0xff]  }
 0x221   :  { %v7198_v62 = vpop.eup %7197  ;;  %v2878_v3 = vmul.f32 %v7196_v6, %v8094_v51  ;;  %6058 = vmatpush3.bf16.msra.mxu0 %v6857_v58  ;;  %5058 = vmatprep.mubr.bf16.mxu0 %v7767_v60  ;;  %7217 = vrcp.f32 %v2677_v57  ;;  %v6867_v51 = vld [vmem:[#allocation8 + $0x458] ss:$12 sps:$4 sm:$0xff]   ;;  %v6866_v60 = vld [vmem:[#allocation8 + $0x530] ss:$12 sps:$4 sm:$0xff]  }
 0x222   :  { %v7200_v56 = vpop.eup %7199  ;;  %v2678_v13 = vadd.f32 1.0, %v7198_v62  ;;  %6059 = vmatprep.subr.bf16.mxu0 %v6861_v34  ;;  %7219 = vrcp.f32 %v2667_v61  ;;  %v6871_v34 = vld [vmem:[#allocation8 + $0x440] ss:$12 sps:$4 sm:$0xff]  }
 0x223   :  { %v7202_v52 = vpop.eup %7201  ;;  %v8164_v39 = vpack.c.bf16 %v2878_v3, %v2868_v16  ;;  %v2887_v57 = vmul.f32 %v7200_v56, %v8100_v46  ;;  %v6872_v16 = vld [vmem:[#allocation8 + $0x380] ss:$12 sps:$4 sm:$0xff]   ;;  %v6877_v46 = vld [vmem:[#allocation8 + $0x5a8] ss:$12 sps:$4 sm:$0xff]  }
 0x224   :  { %v7204_v63 = vpop.eup %7203  ;;  %7221 = vrcp.f32 %v2678_v13  ;;  %v2687_v41 = vadd.f32 1.0, %v7202_v52  ;;  %v6876_v56 = vld [vmem:[#allocation8 + $0x368] ss:$12 sps:$4 sm:$0xff]   ;;  %v6879_v13 = vld [vmem:[#allocation8 + $0x410] ss:$12 sps:$4 sm:$0xff]  }
 0x225   :  { %v7206_v45 = vpop.eup %7205  ;;  %6060 = vmatpush3.bf16.msra.mxu0 %v6862_v54  ;;  %4920 = vmatprep.mubr.bf16.mxu1 %v8164_v39  ;;  %v2888_v61 = vmul.f32 %v7204_v63, %v8106_v11  ;;  %v6875_v11 = vld [vmem:[#allocation8 + $0x428] ss:$12 sps:$4 sm:$0xff]  }
 0x226   :  { %v7208_v44 = vpop.eup %7207  ;;  %v2688_v15 = vadd.f32 1.0, %v7206_v45  ;;  %4921 = vmatmul.mubr.bf16.vlgmr.msra.gmra.mxu1 %v8166_v24  ;;  %6125 = vmatprep.subr.bf16.mxu0 %v6865_v5  ;;  %v6881_v45 = vld [vmem:[#allocation8 + $0x590] ss:$12 sps:$4 sm:$0xff]  }
 0x227   :  { %v7210_v35 = vpop.eup %7209  ;;  %6086 = vmatpush3.bf16.msra.mxu1 %v6864_v25  ;;  %v2897_v1 = vmul.f32 %v7208_v44, %v8111_v19  ;;  %v6873_v19 = vld [vmem:[#allocation8 + $0x5c0] ss:$12 sps:$4 sm:$0xff]   ;;  %v6878_v25 = vld [vmem:[#allocation8 + $0x4e8] ss:$12 sps:$4 sm:$0xff]  }
 0x228   :  { %v7212_v58 = vpop.eup %7211  ;;  %v2697_v33 = vadd.f32 1.0, %v7210_v35  ;;  %5059 = vmatmul.mubr.bf16.vlgmr.msra.gmra.mxu0 %v7769_v53  ;;  %6087 = vmatprep.subr.bf16.mxu1 %v6867_v51  ;;  %7223 = vrcp.f32 %v2688_v15 }
 0x229   :  { %v7214_v22 = vpop.eup %7213  ;;  %v2898_v6 = vmul.f32 %v7212_v58, %v8116_v50  ;;  %5066 = vmatprep.mubr.bf16.mxu0 %v7783_v49  ;;  %6126 = vmatpush3.bf16.msra.mxu0 %v6866_v60  ;;  %v8178_v3 = vpack.c.bf16 %v2897_v1, %v2887_v57  ;;  %v6874_v49 = vld [vmem:[#allocation8 + $0x500] ss:$12 sps:$4 sm:$0xff]   ;;  %v6886_v58 = vld [vmem:[#allocation8 + $0x4b8] ss:$12 sps:$4 sm:$0xff]   ;;  %v6894_v57 = vld [vmem:[#allocation8 + $0x488] ss:$12 sps:$4 sm:$0xff]  }
 0x22a   :  { %7225 = vrcp.f32 %v2697_v33  ;;  %v2698_v62 = vadd.f32 1.0, %v7214_v22  ;;  %6127 = vmatprep.subr.bf16.mxu0 %v6869_v38  ;;  %v6885_v38 = vld [vmem:[#allocation8 + $0x578] ss:$12 sps:$4 sm:$0xff]   ;;  %v6887_v1 = vld [vmem:[#allocation8 + $0x3e0] ss:$12 sps:$4 sm:$0xff]  }
 0x22b   :  { %7227 = vrcp.f32 %v2687_v41  ;;  %6088 = vmatpush3.bf16.msra.mxu1 %v6868_v21  ;;  %v8176_v53 = vpack.c.bf16 %v2898_v6, %v2888_v61  ;;  %v6889_v22 = vld [vmem:[#allocation8 + $0x560] ss:$12 sps:$4 sm:$0xff]  }
 0x22c   :  { %7229 = vrcp.f32 %v2698_v62  ;;  %6089 = vmatprep.subr.bf16.mxu1 %v6871_v34  ;;  %v7216_v50 = vpop.eup %7215  ;;  %v6888_v6 = vld [vmem:[#allocation8 + $0x320] ss:$12 sps:$4 sm:$0xff]   ;;  %v6895_v62 = vld [vmem:[#allocation8 + $0x770] ss:$12 sps:$4 sm:$0xff]  }
 0x22d   :  { %6128 = vmatpush3.bf16.msra.mxu0 %v6870_v7  ;;  %4930 = vmatprep.mubr.bf16.mxu1 %v8176_v53  ;;  %v2908_v63 = vmul.f32 %v7216_v50, %v8127_v36  ;;  %v6883_v36 = vld [vmem:[#allocation8 + $0x3f8] ss:$12 sps:$4 sm:$0xff]   ;;  %v6899_v50 = vld [vmem:[#allocation8 + $0x740] ss:$12 sps:$4 sm:$0xff]  }
 0x22e   :  { %4931 = vmatmul.mubr.bf16.gmra.mxu1 %v8178_v3  ;;  %6129 = vmatprep.subr.bf16.mxu0 %v6873_v19  ;;  %v7218_v54 = vpop.eup %7217  ;;  %v6896_v19 = vld [vmem:[#allocation8 + $0x6b0] ss:$12 sps:$4 sm:$0xff]  }
 0x22f   :  { %6090 = vmatpush3.bf16.msra.mxu1 %v6872_v16  ;;  %v7220_v8 = vpop.eup %7219  ;;  %v2917_v52 = vmul.f32 %v7218_v54, %v8132_v28  ;;  %v6882_v28 = vld [vmem:[#allocation8 + $0x4d0] ss:$12 sps:$4 sm:$0xff]   ;;  %v6897_v16 = vld [vmem:[#allocation8 + $0x758] ss:$12 sps:$4 sm:$0xff]  }
 0x230   :  { %5067 = vmatmul.mubr.bf16.gmra.mxu0 %v7785_v12  ;;  %6091 = vmatprep.subr.bf16.mxu1 %v6875_v11  ;;  %v2907_v60 = vmul.f32 %v7220_v8, %v8122_v27  ;;  %v6880_v12 = vld [vmem:[#allocation8 + $0x350] ss:$12 sps:$4 sm:$0xff]   ;;  %v6884_v27 = vld [vmem:[#allocation8 + $0x338] ss:$12 sps:$4 sm:$0xff]   ;;  %v8592_v11 = vld [vmem:[#allocation16_spill] sm:$0xff] }
 0x231   :  { %v7222_v5 = vpop.eup %7221  ;;  %5074 = vmatprep.mubr.bf16.mxu0 %v7802_v4  ;;  %6130 = vmatpush3.bf16.msra.mxu0 %v6874_v49  ;;  %v8593_v49 = vld [vmem:[#allocation18_spill] sm:$0xff]  ;;  %v8594_v54 = vld [vmem:[#allocation19_spill] sm:$0xff] }
 0x232   :  { %v2918_v51 = vmul.f32 %v7222_v5, %v8134_v2  ;;  %6131 = vmatprep.subr.bf16.mxu0 %v6877_v46  ;;  %v8190_v15 = vpack.c.bf16 %v2917_v52, %v2907_v60  ;;  %v6901_v46 = vld [vmem:[#allocation8 + $0x728] ss:$12 sps:$4 sm:$0xff]   ;;  %v6905_v8 = vld [vmem:[#allocation8 + $0x6f8] ss:$12 sps:$4 sm:$0xff]  }
 0x233   :  { %6092 = vmatpush3.bf16.msra.mxu1 %v6876_v56  ;;  %v6902_v56 = vld [vmem:[#allocation8 + $0x668] ss:$12 sps:$4 sm:$0xff]  }
 0x234   :  { %v8188_v44 = vpack.c.bf16 %v2918_v51, %v2908_v63  ;;  %6093 = vmatprep.subr.bf16.mxu1 %v6879_v13  ;;  %v6906_v13 = vld [vmem:[#allocation8 + $0x638] ss:$12 sps:$4 sm:$0xff]  }
 0x235   :  { %6132 = vmatpush3.bf16.msra.mxu0 %v6878_v25  ;;  %v7224_v4 = vpop.eup %7223 }
 0x236   :  { %4940 = vmatprep.mubr.bf16.mxu1 %v8188_v44  ;;  %6133 = vmatprep.subr.bf16.mxu0 %v6881_v45  ;;  %v2928_v33 = vmul.f32 %v7224_v4, %v8146_v20  ;;  %v6891_v20 = vld [vmem:[#allocation8 + $0x3c8] ss:$12 sps:$4 sm:$0xff]  }
 0x237   :  { %v7226_v2 = vpop.eup %7225  ;;  %4941 = vmatmul.mubr.bf16.gmra.mxu1 %v8190_v15 }
 0x238   :  { %v7228_v35 = vpop.eup %7227  ;;  %5075 = vmatmul.mubr.bf16.gmra.mxu0 %v7808_v42  ;;  %6094 = vmatpush3.bf16.msra.mxu1 %v6880_v12  ;;  %v2937_v21 = vmul.f32 %v7226_v2, %v8148_v40  ;;  %v6893_v40 = vld [vmem:[#allocation8 + $0x548] ss:$12 sps:$4 sm:$0xff]  }
 0x239   :  { %v7230_v41 = vpop.eup %7229  ;;  %5082 = vmatprep.mubr.bf16.mxu0 %v7829_v48  ;;  %6134 = vmatpush3.bf16.msra.mxu0 %v6882_v28  ;;  %v2927_v61 = vmul.f32 %v7228_v35, %v8140_v37  ;;  %v6890_v48 = vld [vmem:[#allocation8 + $0x4a0] ss:$12 sps:$4 sm:$0xff]   ;;  %v6892_v37 = vld [vmem:[#allocation8 + $0x308] ss:$12 sps:$4 sm:$0xff]  }
 0x23a   :  { %v2938_v34 = vmul.f32 %v7230_v41, %v8153_v26  ;;  %6095 = vmatprep.subr.bf16.mxu1 %v6883_v36  ;;  %6135 = vmatprep.subr.bf16.mxu0 %v6885_v38  ;;  %v8591_v26 = vld [vmem:[#allocation17_spill] sm:$0xff] }
 0x23b   :  { %v8202_v7 = vpack.c.bf16 %v2937_v21, %v2927_v61 }
 0x23c   :  { %6096 = vmatpush3.bf16.msra.mxu1 %v6884_v27  ;;  %v8200_v42 = vpack.c.bf16 %v2938_v34, %v2928_v33 }
 0x23d   :  { %6136 = vmatpush3.bf16.msra.mxu0 %v6886_v58  ;;  %6097 = vmatprep.subr.bf16.mxu1 %v6887_v1 }
 0x23e   :  { %4950 = vmatprep.mubr.bf16.mxu1 %v8200_v42  ;;  %6137 = vmatprep.subr.bf16.mxu0 %v6889_v22 }
 0x23f   :  { %4951 = vmatmul.mubr.bf16.gmra.mxu1 %v8202_v7 }
 0x240   :  { %5083 = vmatmul.mubr.bf16.gmra.mxu0 %v7837_v31  ;;  %6098 = vmatpush3.bf16.msra.mxu1 %v6888_v6  ;;  %v6898_v31 = vld [vmem:[#allocation8 + $0x698] ss:$12 sps:$4 sm:$0xff]  }
 0x241   :  { %5123 = vmatprep.mubr.bf16.mxu1 %v8591_v26  ;;  %6138 = vmatpush3.bf16.msra.mxu0 %v6890_v48 }
 0x242   :  { %5188 = vmatprep.mubr.bf16.mxu0 %v8024_v17  ;;  %6099 = vmatprep.subr.bf16.mxu1 %v6891_v20  ;;  %v6900_v17 = vld [vmem:[#allocation8 + $0x680] ss:$12 sps:$4 sm:$0xff]  }
 0x243   :  { %6139 = vmatprep.subr.bf16.mxu0 %v6893_v40 }
 0x244   :  { %6100 = vmatpush3.bf16.msra.mxu1 %v6892_v37 }
 0x245   :  { %6140 = vmatpush3.bf16.msra.mxu0 %v6894_v57  ;;  %6165 = vmatprep.subr.bf16.mxu1 %v6895_v62 }
 0x247   :  { %5124 = vmatmul.mubr.bf16.vlgmr.msra.gmra.mxu1 %v8592_v11 }
 0x248   :  { %5189 = vmatmul.mubr.bf16.vlgmr.msra.gmra.mxu0 %v8026_v32  ;;  %6166 = vmatpush3.bf16.msra.mxu1 %v6896_v19  ;;  %v6903_v32 = vld [vmem:[#allocation8 + $0x710] ss:$12 sps:$4 sm:$0xff]  }
 0x249   :  { %5131 = vmatprep.mubr.bf16.mxu1 %v8593_v49  ;;  %5196 = vmatprep.mubr.bf16.mxu0 %v8038_v10  ;;  %v6904_v10 = vld [vmem:[#allocation8 + $0x650] ss:$12 sps:$4 sm:$0xff]  }
 0x24a   :  { %6167 = vmatprep.subr.bf16.mxu1 %v6897_v16 }
 0x24c   :  { %6168 = vmatpush3.bf16.msra.mxu1 %v6898_v31 }
 0x24d   :  { %6169 = vmatprep.subr.bf16.mxu1 %v6899_v50 }
 0x24f   :  { %5132 = vmatmul.mubr.bf16.gmra.mxu1 %v8594_v54 }
 0x250   :  { %5197 = vmatmul.mubr.bf16.gmra.mxu0 %v8040_v23  ;;  %6170 = vmatpush3.bf16.msra.mxu1 %v6900_v17  ;;  %v6907_v23 = vld [vmem:[#allocation8 + $0x6e0] ss:$12 sps:$4 sm:$0xff]  }
 0x251   :  { %5139 = vmatprep.mubr.bf16.mxu1 %v7990_v18  ;;  %5204 = vmatprep.mubr.bf16.mxu0 %v8055_v43  ;;  %v6908_v18 = vld [vmem:[#allocation8 + $0x620] ss:$12 sps:$4 sm:$0xff]   ;;  %v6909_v43 = vld [vmem:[#allocation8 + $0x6c8] ss:$12 sps:$4 sm:$0xff]  }
 0x252   :  { %6171 = vmatprep.subr.bf16.mxu1 %v6901_v46 }
 0x254   :  { %6172 = vmatpush3.bf16.msra.mxu1 %v6902_v56 }
 0x255   :  { %6173 = vmatprep.subr.bf16.mxu1 %v6903_v32 }
 0x257   :  { %5140 = vmatmul.mubr.bf16.gmra.mxu1 %v7992_v14  ;;  %v6910_v14 = vld [vmem:[#allocation8 + $0x608] ss:$12 sps:$4 sm:$0xff]  }
 0x258   :  { %5205 = vmatmul.mubr.bf16.gmra.mxu0 %v8061_v29  ;;  %6174 = vmatpush3.bf16.msra.mxu1 %v6904_v10  ;;  %v8228_v29 = vpop.f32.mrf.mxu0 }
 0x259   :  { %5147 = vmatprep.mubr.bf16.mxu1 %v8008_v9  ;;  %5212 = vmatprep.mubr.bf16.mxu0 %v8082_v0  ;;  %v8226_v9 = vpop.f32.mrf.mxu1 }
 0x25a   :  { %6175 = vmatprep.subr.bf16.mxu1 %v6905_v8  ;;  %v8232_v5 = vpop.f32.mrf.mxu0 }
 0x25b   :  { %v8230_v0 = vpop.f32.mrf.mxu1 }
 0x25c   :  { %6176 = vmatpush3.bf16.msra.mxu1 %v6906_v13 }
 0x25d   :  { %6177 = vmatprep.subr.bf16.mxu1 %v6907_v23 }
 0x25f   :  { %5148 = vmatmul.mubr.bf16.gmra.mxu1 %v8012_v30  ;;  %v8236_v30 = vpop.f32.mrf.mxu1 }
 0x260   :  { %5213 = vmatmul.mubr.bf16.gmra.mxu0 %v8090_v55  ;;  %6178 = vmatpush3.bf16.msra.mxu1 %v6908_v18  ;;  %v8238_v55 = vpop.f32.mrf.mxu0 }
 0x261   :  { %5253 = vmatprep.mubr.bf16.mxu1 %v8164_v39  ;;  %6179 = vmatprep.subr.bf16.mxu1 %v6909_v43  ;;  %v8240_v39 = vpop.f32.mrf.mxu1 }
 0x264   :  { %6180 = vmatpush3.bf16.msra.mxu1 %v6910_v14 }
 0x267   :  { %5254 = vmatmul.mubr.bf16.vlgmr.msra.gmra.mxu1 %v8166_v24  ;;  %v8242_v24 = vpop.f32.mrf.mxu0 }
 0x268   :  { %5261 = vmatprep.mubr.bf16.mxu1 %v8176_v53  ;;  %v8246_v53 = vpop.f32.mrf.mxu1 }
 0x269   :  { %v8248_v52 = vpop.f32.mrf.mxu0 }
 0x26a   :  { %v8250_v25 = vpop.f32.mrf.mxu1 }
 0x26c   :  { %v8255_v63 = vpop.f32.mrf.mxu1 }
 0x26e   :  { %v8259_v45 = vpop.f32.mrf.mxu1 }
 0x26f   :  { %5262 = vmatmul.mubr.bf16.gmra.mxu1 %v8178_v3  ;;  %v8252_v3 = vpop.f32.mrf.mxu0 }
 0x270   :  { %5269 = vmatprep.mubr.bf16.mxu1 %v8188_v44  ;;  %v8263_v44 = vpop.f32.mrf.mxu1 }
 0x271   :  { %v8257_v51 = vpop.f32.mrf.mxu0 }
 0x273   :  { %v8261_v60 = vpop.f32.mrf.mxu0 }
 0x275   :  { %v8265_v12 = vpop.f32.mrf.mxu0 }
 0x277   :  { %5270 = vmatmul.mubr.bf16.gmra.mxu1 %v8190_v15  ;;  %v8267_v15 = vpop.f32.mrf.mxu1  ;;  %v8269_v28 = vpop.f32.mrf.mxu0 }
 0x278   :  { %5277 = vmatprep.mubr.bf16.mxu1 %v8200_v42 }
 0x279   :  { %v8271_v4 = vpop.f32.mrf.mxu1  ;;  %v8273_v36 = vpop.f32.mrf.mxu0 }
 0x27b   :  { %v8275_v38 = vpop.f32.mrf.mxu1  ;;  %v8277_v2 = vpop.f32.mrf.mxu0 }
 0x27d   :  { %v8279_v35 = vpop.f32.mrf.mxu1  ;;  %v8281_v27 = vpop.f32.mrf.mxu0 }
 0x27f   :  { %5278 = vmatmul.mubr.bf16.gmra.mxu1 %v8202_v7  ;;  %v8283_v41 = vpop.f32.mrf.mxu1  ;;  %v8285_v21 = vpop.f32.mrf.mxu0 }
 0x281   :  { %v8287_v58 = vpop.f32.mrf.mxu1  ;;  %v8289_v1 = vpop.f32.mrf.mxu0 }
 0x282   :  { %8595 = vst [vmem:[#allocation17_spill] sm:$0xff] %v8287_v58  ;;  %8596 = vst [vmem:[#allocation16_spill] sm:$0xff] %v8289_v1 }
 0x283   :  { %v8291_v33 = vpop.f32.mrf.mxu1  ;;  %v8293_v34 = vpop.f32.mrf.mxu0 }
 0x284   :  { %8597 = vst [vmem:[#allocation18_spill] sm:$0xff] %v8291_v33  ;;  %8598 = vst [vmem:[#allocation19_spill] sm:$0xff] %v8293_v34 }
 0x286   :  { %v4776_v22 = vpop.f32.mrf.mxu1 }
 0x288   :  { %v4778_v6 = vpop.f32.mrf.mxu1 }
 0x28a   :  { %v4780_v20 = vpop.f32.mrf.mxu1 }
 0x28c   :  { %v4782_v26 = vpop.f32.mrf.mxu1 }
 0x28f   :  { %v8307_v19 = vpop.f32.mrf.mxu1 }
 0x291   :  { %v8313_v31 = vpop.f32.mrf.mxu1 }
 0x293   :  { %v8319_v17 = vpop.f32.mrf.mxu1 }
 0x295   :  { %v8325_v56 = vpop.f32.mrf.mxu1 }
 0x297   :  { %v8331_v8 = vpop.f32.mrf.mxu1 }
 0x299   :  { %v8337_v18 = vpop.f32.mrf.mxu1 }
 0x2a8   :  { %v4849_v61 = vpop.f32.mrf.mxu0 }
 0x2aa   :  { %v4851_v42 = vpop.f32.mrf.mxu0 }
 0x2ac   :  { %v8295_v7 = vpop.f32.mrf.mxu0 }
 0x2ae   :  { %v8297_v48 = vpop.f32.mrf.mxu0 }
 0x2b0   :  { %v8299_v40 = vpop.f32.mrf.mxu0 }
 0x2b2   :  { %v8301_v37 = vpop.f32.mrf.mxu0 }
 0x2b4   :  { %v8303_v57 = vpop.f32.mrf.mxu0 }
 0x2b6   :  { %v8305_v62 = vpop.f32.mrf.mxu0 }
 0x2b8   :  { %v8309_v16 = vpop.f32.mrf.mxu0 }
 0x2ba   :  { %v8311_v11 = vpop.f32.mrf.mxu0 }
 0x2bc   :  { %v8315_v49 = vpop.f32.mrf.mxu0 }
 0x2be   :  { %v8317_v50 = vpop.f32.mrf.mxu0 }
 0x2bf   :  { %8599 = vst [vmem:[#allocation20_spill] sm:$0xff] %v8317_v50 }
 0x2c0   :  { %v8321_v46 = vpop.f32.mrf.mxu0 }
 0x2c1   :  { %8600 = vst [vmem:[#allocation21_spill] sm:$0xff] %v8321_v46  ;;  %v8343_v46 = vpop.f32.mrf.mxu1 }
 0x2c2   :  { %v8323_v54 = vpop.f32.mrf.mxu0 }
 0x2c3   :  { %8601 = vst [vmem:[#allocation22_spill] sm:$0xff] %v8323_v54 }
 0x2c4   :  { %v8327_v32 = vpop.f32.mrf.mxu0 }
 0x2c5   :  { %8602 = vst [vmem:[#allocation23_spill] sm:$0xff] %v8327_v32  ;;  %v8349_v32 = vpop.f32.mrf.mxu1 }
 0x2c6   :  { %v8329_v10 = vpop.f32.mrf.mxu0 }
 0x2c7   :  { %8603 = vst [vmem:[#allocation24_spill] sm:$0xff] %v8329_v10 }
 0x2c8   :  { %v8333_v13 = vpop.f32.mrf.mxu0 }
 0x2c9   :  { %8604 = vst [vmem:[#allocation25_spill] sm:$0xff] %v8333_v13  ;;  %v8355_v13 = vpop.f32.mrf.mxu1 }
 0x2ca   :  { %v8335_v23 = vpop.f32.mrf.mxu0  ;;  %8612 = vst [vmem:[#allocation33_spill] sm:$0xff] %v8355_v13 }
 0x2cb   :  { %8605 = vst [vmem:[#allocation26_spill] sm:$0xff] %v8335_v23 }
 0x2cc   :  { %v8339_v43 = vpop.f32.mrf.mxu0 }
 0x2cd   :  { %8606 = vst [vmem:[#allocation27_spill] sm:$0xff] %v8339_v43 }
 0x2ce   :  { %v8341_v14 = vpop.f32.mrf.mxu0 }
 0x2cf   :  { %8607 = vst [vmem:[#allocation28_spill] sm:$0xff] %v8341_v14  ;;  %v8362_v14 = vld [vmem:[%s8577_s4] sm:$0x7]  ;;  %s7361_s4 = smov [#allocation10]  }
 0x2d0   :  { %v8345_v54 = vpop.f32.mrf.mxu0  ;;  %8614 = vst [vmem:[#allocation35_spill] sm:$0xff] %v8362_v14  ;;  %s5387_s15 = sshll.u32 %s7361_s4, 4  ;;  %s5388_s15 = int_to_ptr.vmem [resolvable:$true] %s5387_s15 }
 0x2d1   :  { %8608 = vst [vmem:[#allocation29_spill] sm:$0xff] %v8345_v54  ;;  %v8366_v54 = vpop.f32.mrf.mxu1  ;;  %s7324_s16 = scalar_lea.vmem %s5388_s15, 1536  ;;  %p7329_p7 = scmp.lt.s32.totalorder %s5388_s15, %s5388_s15 }
 0x2d2   :  { %v8347_v34 = vpop.f32.mrf.mxu0  ;;  %8616 = vst [vmem:[#allocation37_spill] sm:$0xff] %v8366_v54  ;;  %p7325_p6 = scmp.ne.s32.totalorder %s5388_s15, %s7324_s16  ;;  %p7330_p8 = scmp.lt.s32.totalorder %s7324_s16, %s7324_s16 }
 0x2d3   :  { %8609 = vst [vmem:[#allocation30_spill] sm:$0xff] %v8347_v34  ;;  %v8380_v13 = vpop.f32.mrf.mxu1 }
 0x2d4   :  { %v8351_v10 = vpop.f32.mrf.mxu0  ;;  %8619 = vst [vmem:[#allocation40_spill] sm:$0xff] %v8380_v13  ;;  %p7331_p9 = por %p7330_p8, %p7329_p7 }
 0x2d5   :  { %8610 = vst [vmem:[#allocation31_spill] sm:$0xff] %v8351_v10  ;;  %v8372_v10 = vrot.slane %v8362_v14, %v7532_v47 }
 0x2d6   :  { %v8353_v1 = vpop.f32.mrf.mxu0  ;;  %p7332_p10 = pnand %p7331_p9, %p7325_p6 }
 0x2d7   :  { %8611 = vst [vmem:[#allocation32_spill] sm:$0xff] %v8353_v1  ;;  %v8376_v1 = vrot.slane %v8362_v14, %v7537_v59  ;;  %v8392_v59 = vpop.f32.mrf.mxu1 }
 0x2d8   :  { %v8357_v23 = vpop.f32.mrf.mxu0 }
 0x2d9   :  { %8613 = vst [vmem:[#allocation34_spill] sm:$0xff] %v8357_v23 }
 0x2da   :  { %v8364_v43 = vpop.f32.mrf.mxu0 }
 0x2db   :  { %8615 = vst [vmem:[#allocation36_spill] sm:$0xff] %v8364_v43  ;;  %v4631_v43 = vadd.f32 %v8226_v9, %v8372_v10 }
 0x2dc   :  { %v8368_v34 = vpop.f32.mrf.mxu0 }
 0x2dd   :  { %8617 = vst [vmem:[#allocation38_spill] sm:$0xff] %v8368_v34  ;;  %v4633_v34 = vadd.f32 %v8230_v0, %v8376_v1  ;;  %v4704_v47 = vadd.f32 %v8228_v29, %v4631_v43  ;;  %v4641_v43 = vadd.f32 %v8246_v53, %v8372_v10 }
 0x2de   :  { %v8378_v23 = vpop.f32.mrf.mxu0 }
 0x2df   :  { %8618 = vst [vmem:[#allocation39_spill] sm:$0xff] %v8378_v23  ;;  %v4706_v58 = vadd.f32 %v8232_v5, %v4633_v34  ;;  %v4635_v23 = vadd.f32 %v8236_v30, %v8372_v10  ;;  %v4777_v9 = vadd.f32 %v4776_v22, %v4704_v47  ;;  %v4643_v30 = vadd.f32 %v8250_v25, %v8376_v1 }
 0x2e0   :  { %v8382_v33 = vpop.f32.mrf.mxu0  ;;  %v4645_v25 = vadd.f32 %v8255_v63, %v8372_v10 }
 0x2e1   :  { %8620 = vst [vmem:[#allocation41_spill] sm:$0xff] %v8382_v33  ;;  %v4637_v33 = vadd.f32 %v8240_v39, %v8376_v1  ;;  %v4779_v13 = vadd.f32 %v4778_v6, %v4706_v58  ;;  %v4850_v5 = vadd.f32 %v4849_v61, %v4777_v9 }
 0x2e2   :  { %v8388_v54 = vpop.f32.mrf.mxu0 }
 0x2e3   :  { %8621 = vst [vmem:[#allocation42_spill] sm:$0xff] %v8388_v54  ;;  %v4708_v54 = vadd.f32 %v8238_v55, %v4635_v23  ;;  %v4710_v29 = vadd.f32 %v8242_v24, %v4637_v33  ;;  %v4852_v34 = vadd.f32 %v4851_v42, %v4779_v13  ;;  %v4716_v33 = vadd.f32 %v8252_v3, %v4643_v30 }
 0x2e4   :  { %v8394_v14 = vpop.f32.mrf.mxu0 }
 0x2e5   :  { %8622 = vst [vmem:[#allocation43_spill] sm:$0xff] %v8394_v14  ;;  %v4781_v22 = vadd.f32 %v4780_v20, %v4708_v54  ;;  %v4783_v58 = vadd.f32 %v4782_v26, %v4710_v29  ;;  %v4647_v20 = vadd.f32 %v8259_v45, %v8376_v1  ;;  %v4789_v13 = vadd.f32 %v8313_v31, %v4716_v33 }
 0x2e6   :  { %v8400_v50 = vpop.f32.mrf.mxu0  ;;  %v4922_v0 = vpop.f32.mrf.mxu1 }
 0x2e7   :  { %8623 = vst [vmem:[#allocation44_spill] sm:$0xff] %v8400_v50  ;;  %v4923_v6 = vadd.f32 %v4922_v0, %v4850_v5  ;;  %v4714_v50 = vadd.f32 %v8248_v52, %v4641_v43  ;;  %v4854_v61 = vadd.f32 %v8295_v7, %v4781_v22  ;;  %v4856_v53 = vadd.f32 %v8297_v48, %v4783_v58 }
 0x2e8   :  { %v8408_v14 = vpop.f32.mrf.mxu0  ;;  %v4924_v39 = vpop.f32.mrf.mxu1  ;;  %v4718_v7 = vadd.f32 %v8257_v51, %v4645_v25  ;;  %v4720_v63 = vadd.f32 %v8261_v60, %v4647_v20  ;;  %v4862_v45 = vadd.f32 %v8301_v37, %v4789_v13  ;;  %v4651_v43 = vadd.f32 %v8263_v44, %v8372_v10 }
 0x2e9   :  { %v4925_v47 = vadd.f32 %v4924_v39, %v4852_v34  ;;  %v4787_v52 = vadd.f32 %v8307_v19, %v4714_v50  ;;  %v4653_v60 = vadd.f32 %v8267_v15, %v8376_v1  ;;  %v4655_v15 = vadd.f32 %v8271_v4, %v8372_v10 }
 0x2ea   :  { %v8411_v55 = vpop.f32.mrf.mxu0  ;;  %v4926_v24 = vpop.f32.mrf.mxu1  ;;  %v4791_v31 = vadd.f32 %v8319_v17, %v4718_v7  ;;  %v4793_v50 = vadd.f32 %v8325_v56, %v4720_v63  ;;  %v4724_v17 = vadd.f32 %v8265_v12, %v4651_v43  ;;  %v8630_v43 = vld [vmem:[#allocation19_spill] sm:$0xff] }
 0x2eb   :  { %v5989_v42 = vpack.c.bf16 %v4925_v47, %v4923_v6  ;;  %v4927_v3 = vadd.f32 %v4926_v24, %v4854_v61  ;;  %v4860_v0 = vadd.f32 %v8299_v40, %v4787_v52  ;;  %v4726_v56 = vadd.f32 %v8269_v28, %v4653_v60 }
 0x2ec   :  { %v8420_v26 = vpop.f32.mrf.mxu0  ;;  %v4928_v54 = vpop.f32.mrf.mxu1  ;;  %v4864_v30 = vadd.f32 %v8303_v57, %v4791_v31  ;;  %v4866_v39 = vadd.f32 %v8305_v62, %v4793_v50  ;;  %v4657_v24 = vadd.f32 %v8275_v38, %v8376_v1  ;;  %v4797_v57 = vadd.f32 %v8331_v8, %v4724_v17  ;;  %v8629_v50 = vld [vmem:[#allocation16_spill] sm:$0xff] }
 0x2ed   :  { %5366 = vst [vmem:[#allocation10] sm:$0xff] %v5989_v42  ;;  %v4929_v23 = vadd.f32 %v4928_v54, %v4856_v53  ;;  %v4799_v62 = vadd.f32 %v8337_v18, %v4726_v56  ;;  %v4728_v61 = vadd.f32 %v8273_v36, %v4655_v15  ;;  %v4661_v38 = vadd.f32 %v8279_v35, %v8372_v10  ;;  %v8633_v56 = vld [vmem:[#allocation40_spill] sm:$0xff] }
 0x2ee   :  { %v8425_v48 = vpop.f32.mrf.mxu0  ;;  %v4932_v9 = vpop.f32.mrf.mxu1  ;;  %v4730_v53 = vadd.f32 %v8277_v2, %v4657_v24  ;;  %v4870_v42 = vadd.f32 %v8309_v16, %v4797_v57  ;;  %v4663_v8 = vadd.f32 %v8283_v41, %v8376_v1 }
 0x2ef   :  { %v5991_v29 = vpack.c.bf16 %v4929_v23, %v4927_v3  ;;  %v4933_v34 = vadd.f32 %v4932_v9, %v4860_v0  ;;  %v4872_v25 = vadd.f32 %v8311_v11, %v4799_v62  ;;  %v4801_v20 = vadd.f32 %v8343_v46, %v4728_v61  ;;  %v8624_v3 = vld [vmem:[#allocation20_spill] sm:$0xff]  ;;  %v8625_v46 = vld [vmem:[#allocation17_spill] sm:$0xff]  ;;  %v8634_v62 = vld [vmem:[#allocation23_spill] sm:$0xff] }
 0x2f0   :  { %v8430_v5 = vpop.f32.mrf.mxu0  ;;  %v4934_v19 = vpop.f32.mrf.mxu1  ;;  %v4803_v36 = vadd.f32 %v8349_v32, %v4730_v53  ;;  %v4734_v16 = vadd.f32 %v8281_v27, %v4661_v38  ;;  %v4736_v13 = vadd.f32 %v8285_v21, %v4663_v8  ;;  %v4665_v9 = vadd.f32 %v8625_v46, %v8372_v10  ;;  %v8626_v32 = vld [vmem:[#allocation18_spill] sm:$0xff]  ;;  %v8628_v27 = vld [vmem:[#allocation37_spill] sm:$0xff] }
 0x2f1   :  { %5368 = vst [vmem:[#allocation10 + $0xc] sm:$0xff] %v5991_v29  ;;  %v4935_v51 = vadd.f32 %v4934_v19, %v4862_v45  ;;  %v4874_v35 = vadd.f32 %v8315_v49, %v4801_v20  ;;  %v4667_v63 = vadd.f32 %v8626_v32, %v8376_v1  ;;  %v8627_v45 = vld [vmem:[#allocation33_spill] sm:$0xff] }
 0x2f2   :  { %v8438_v40 = vpop.f32.mrf.mxu0  ;;  %v4936_v37 = vpop.f32.mrf.mxu1  ;;  %v4876_v23 = vadd.f32 %v8624_v3, %v4803_v36  ;;  %v4807_v29 = vadd.f32 %v8627_v45, %v4734_v16  ;;  %v4809_v19 = vadd.f32 %v8628_v27, %v4736_v13 }
 0x2f3   :  { %v5993_v22 = vpack.c.bf16 %v4935_v51, %v4933_v34  ;;  %v4937_v44 = vadd.f32 %v4936_v37, %v4864_v30  ;;  %v4738_v34 = vadd.f32 %v8629_v50, %v4665_v9  ;;  %v4740_v60 = vadd.f32 %v8630_v43, %v4667_v63  ;;  %v8631_v37 = vld [vmem:[#allocation21_spill] sm:$0xff]  ;;  %v8632_v30 = vld [vmem:[#allocation22_spill] sm:$0xff] }
 0x2f4   :  { %v8444_v58 = vpop.f32.mrf.mxu0  ;;  %v4938_v6 = vpop.f32.mrf.mxu1  ;;  %v4880_v10 = vadd.f32 %v8631_v37, %v4807_v29  ;;  %v6063_v37 = vadd.f32 %v8411_v55, %v8408_v14 }
 0x2f5   :  { %5370 = vst [vmem:[#allocation10 + $0x18] sm:$0xff] %v5993_v22  ;;  %v4939_v47 = vadd.f32 %v4938_v6, %v4866_v39  ;;  %v4882_v39 = vadd.f32 %v8632_v30, %v4809_v19  ;;  %v4811_v6 = vadd.f32 %v8633_v56, %v4738_v34  ;;  %v8636_v19 = vld [vmem:[#allocation15_spill] sm:$0xff]  ;;  %v8639_v34 = vld [vmem:[#allocation25_spill] sm:$0xff] }
 0x2f6   :  { %v8452_v33 = vpop.f32.mrf.mxu0 }
 0x2f7   :  { %v5995_v12 = vpack.c.bf16 %v4939_v47, %v4937_v44  ;;  %v4942_v28 = vpop.f32.mrf.mxu1  ;;  %v4813_v44 = vadd.f32 %v8392_v59, %v4740_v60 }
 0x2f8   :  { %v8458_v4 = vpop.f32.mrf.mxu0  ;;  %v4943_v54 = vadd.f32 %v4942_v28, %v4870_v42  ;;  %v8635_v28 = vld [vmem:[#allocation24_spill] sm:$0xff] }
 0x2f9   :  { %5372 = vst [vmem:[#allocation10 + $0x24] sm:$0xff] %v5995_v12  ;;  %v4944_v18 = vpop.f32.mrf.mxu1  ;;  %v4884_v12 = vadd.f32 %v8634_v62, %v4811_v6  ;;  %v4886_v61 = vadd.f32 %v8635_v28, %v4813_v44  ;;  %v8644_v62 = vld [vmem:[#allocation30_spill] sm:$0xff] }
 0x2fa   :  { %v4945_v2 = vadd.f32 %v4944_v18, %v4872_v25  ;;  %v8466_v52 = vpop.f32.mrf.mxu0 }
 0x2fb   :  { %v4946_v11 = vpop.f32.mrf.mxu1 }
 0x2fc   :  { %v5997_v41 = vpack.c.bf16 %v4945_v2, %v4943_v54  ;;  %v8472_v7 = vpop.f32.mrf.mxu0  ;;  %v4947_v21 = vadd.f32 %v4946_v11, %v4874_v35 }
 0x2fd   :  { %v4948_v0 = vpop.f32.mrf.mxu1 }
 0x2fe   :  { %5374 = vst [vmem:[#allocation10 + $0x30] sm:$0xff] %v5997_v41  ;;  %v4949_v31 = vadd.f32 %v4948_v0, %v4876_v23  ;;  %v8480_v49 = vpop.f32.mrf.mxu0 }
 0x2ff   :  { %v4952_v51 = vpop.f32.mrf.mxu1 }
 0x300   :  { %v5999_v1 = vpack.c.bf16 %v4949_v31, %v4947_v21  ;;  %v8486_v22 = vpop.f32.mrf.mxu0  ;;  %v4953_v47 = vadd.f32 %v4952_v51, %v4880_v10  ;;  %v8637_v21 = vsub.s32 2, %v8636_v19  ;;  %v8638_v31 = vld [vmem:[#allocation35_spill] sm:$0xff]  ;;  %v8640_v51 = vld [vmem:[#allocation26_spill] sm:$0xff] }
 0x301   :  { %v4954_v17 = vpop.f32.mrf.mxu1  ;;  %v6023_v43 = vadd.f32 %v8640_v51, %v8639_v34 }
 0x302   :  { %5376 = vst [vmem:[#allocation10 + $0x3c] sm:$0xff] %v5999_v1  ;;  %v4955_v15 = vadd.f32 %v4954_v17, %v4882_v39  ;;  %v8490_v24 = vpop.f32.mrf.mxu0  ;;  %v8507_v50 = vrot.slane %v8638_v31, %v8637_v21  ;;  %v8641_v1 = vld [vmem:[#allocation27_spill] sm:$0xff]  ;;  %v8642_v17 = vld [vmem:[#allocation28_spill] sm:$0xff] }
 0x303   :  { %v4956_v57 = vpop.f32.mrf.mxu1  ;;  %v6026_v56 = vadd.f32 %v8642_v17, %v8641_v1 }
 0x304   :  { %v6001_v53 = vpack.c.bf16 %v4955_v15, %v4953_v47  ;;  %v8494_v42 = vpop.f32.mrf.mxu0  ;;  %v4957_v38 = vadd.f32 %v4956_v57, %v4884_v12  ;;  %v4996_v39 = vadd.f32 %v6023_v43, %v8507_v50  ;;  %v6066_v15 = vadd.f32 %v8425_v48, %v8420_v26  ;;  %v8643_v57 = vld [vmem:[#allocation29_spill] sm:$0xff]  ;;  %v8645_v26 = vld [vmem:[#allocation31_spill] sm:$0xff]  ;;  %v8646_v48 = vld [vmem:[#allocation32_spill] sm:$0xff] }
 0x305   :  { %v4958_v25 = vpop.f32.mrf.mxu1  ;;  %v6029_v12 = vadd.f32 %v8644_v62, %v8643_v57  ;;  %v4999_v55 = vadd.f32 %v6026_v56, %v8507_v50 }
 0x306   :  { %5378 = vst [vmem:[#allocation10 + $0x48] sm:$0xff] %v6001_v53  ;;  %v4959_v8 = vadd.f32 %v4958_v25, %v4886_v61  ;;  %v8496_v18 = vpop.f32.mrf.mxu0  ;;  %v5061_v47 = vadd.f32 %v6063_v37, %v4996_v39  ;;  %v6069_v25 = vadd.f32 %v8438_v40, %v8430_v5 }
 0x307   :  { %v6101_v59 = vpop.f32.mrf.mxu1 }
 0x308   :  { %v6003_v20 = vpack.c.bf16 %v4959_v8, %v4957_v38  ;;  %v6141_v36 = vpop.f32.mrf.mxu0  ;;  %v5064_v8 = vadd.f32 %v6066_v15, %v4999_v55  ;;  %v8650_v55 = vld [vmem:[#allocation39_spill] sm:$0xff] }
 0x309   :  { %v6102_v54 = vpop.f32.mrf.mxu1 }
 0x30a   :  { %5380 = vst [vmem:[#allocation10 + $0x54] sm:$0xff] %v6003_v20  ;;  %v6142_v2 = vpop.f32.mrf.mxu0  ;;  %v6103_v6 = vadd.f32 %v6102_v54, %v6101_v59  ;;  %v5004_v20 = vadd.f32 %v6029_v12, %v8507_v50  ;;  %v6032_v54 = vadd.f32 %v8646_v48, %v8645_v26  ;;  %v8651_v48 = vld [vmem:[#allocation41_spill] sm:$0xff] }
 0x30b   :  { %v6104_v16 = vpop.f32.mrf.mxu1  ;;  %v6143_v59 = vadd.f32 %v6142_v2, %v6141_v36  ;;  %v8647_v2 = vld [vmem:[#allocation34_spill] sm:$0xff] }
 0x30c   :  { %v6144_v11 = vpop.f32.mrf.mxu0  ;;  %v5126_v61 = vadd.f32 %v6103_v6, %v5061_v47  ;;  %v5069_v37 = vadd.f32 %v6069_v25, %v5004_v20  ;;  %v5007_v36 = vadd.f32 %v6032_v54, %v8507_v50  ;;  %v8652_v54 = vld [vmem:[#allocation42_spill] sm:$0xff] }
 0x30d   :  { %v6105_v13 = vpop.f32.mrf.mxu1 }
 0x30e   :  { %v6145_v3 = vpop.f32.mrf.mxu0  ;;  %v6106_v53 = vadd.f32 %v6105_v13, %v6104_v16  ;;  %v5191_v34 = vadd.f32 %v6143_v59, %v5126_v61  ;;  %v6072_v16 = vadd.f32 %v8452_v33, %v8444_v58  ;;  %v8648_v13 = vld [vmem:[#allocation36_spill] sm:$0xff]  ;;  %v6075_v58 = vadd.f32 %v8466_v52, %v8458_v4 }
 0x30f   :  { %v6107_v35 = vpop.f32.mrf.mxu1  ;;  %v6146_v5 = vadd.f32 %v6145_v3, %v6144_v11  ;;  %v6035_v1 = vadd.f32 %v8648_v13, %v8647_v2  ;;  %v8649_v3 = vld [vmem:[#allocation38_spill] sm:$0xff] }
 0x310   :  { %v6147_v46 = vpop.f32.mrf.mxu0  ;;  %v5129_v51 = vadd.f32 %v6106_v53, %v5064_v8  ;;  %v5072_v12 = vadd.f32 %v6072_v16, %v5007_v36  ;;  %v6038_v61 = vadd.f32 %v8650_v55, %v8649_v3 }
 0x311   :  { %v6108_v23 = vpop.f32.mrf.mxu1  ;;  %v5012_v11 = vadd.f32 %v6035_v1, %v8507_v50 }
 0x312   :  { %v6148_v63 = vpop.f32.mrf.mxu0  ;;  %v6109_v19 = vadd.f32 %v6108_v23, %v6107_v35  ;;  %v5194_v23 = vadd.f32 %v6146_v5, %v5129_v51  ;;  %v5015_v26 = vadd.f32 %v6038_v61, %v8507_v50  ;;  %v8653_v5 = vld [vmem:[#allocation43_spill] sm:$0xff] }
 0x313   :  { %v6110_v41 = vpop.f32.mrf.mxu1  ;;  %v6149_v57 = vadd.f32 %v6148_v63, %v6147_v46  ;;  %v6078_v46 = vadd.f32 %v8480_v49, %v8472_v7  ;;  %v5077_v20 = vadd.f32 %v6075_v58, %v5012_v11 }
 0x314   :  { %v8500_v29 = vpop.f32.mrf.mxu0  ;;  %v5134_v17 = vadd.f32 %v6109_v19, %v5069_v37  ;;  %v6041_v19 = vadd.f32 %v8652_v54, %v8651_v48 }
 0x315   :  { %v6111_v9 = vpop.f32.mrf.mxu1  ;;  %v5080_v49 = vadd.f32 %v6078_v46, %v5015_v26 }
 0x316   :  { %v6151_v10 = vpop.f32.mrf.mxu0  ;;  %v6112_v6 = vadd.f32 %v6111_v9, %v6110_v41  ;;  %v5199_v53 = vadd.f32 %v6149_v57, %v5134_v17  ;;  %v5020_v16 = vadd.f32 %v6041_v19, %v8507_v50 }
 0x317   :  { %v6113_v32 = vpop.f32.mrf.mxu1  ;;  %v6152_v4 = vadd.f32 %v6151_v10, %v8500_v29  ;;  %v6081_v29 = vadd.f32 %v8490_v24, %v8486_v22 }
 0x318   :  { %v8526_v28 = vpop.f32.mrf.mxu0  ;;  %v5137_v8 = vadd.f32 %v6112_v6, %v5072_v12 }
 0x319   :  { %v6114_v0 = vpop.f32.mrf.mxu1  ;;  %v5085_v24 = vadd.f32 %v6081_v29, %v5020_v16 }
 0x31a   :  { %v6154_v21 = vpop.f32.mrf.mxu0  ;;  %v6115_v41 = vadd.f32 %v6114_v0, %v6113_v32 }
 0x31b   :  { %v8498_v45 = vpop.f32.mrf.mxu1  ;;  %v6155_v10 = vadd.f32 %v6154_v21, %v8526_v28  ;;  %v6084_v28 = vadd.f32 %v8496_v18, %v8494_v42 }
 0x31c   :  { %v6156_v56 = vpop.f32.mrf.mxu0  ;;  %v5142_v51 = vadd.f32 %v6115_v41, %v5077_v20 }
 0x31d   :  { %v8502_v27 = vpop.f32.mrf.mxu1 }
 0x31e   :  { %v6157_v25 = vpop.f32.mrf.mxu0  ;;  %v5207_v13 = vadd.f32 %v6155_v10, %v5142_v51 }
 0x31f   :  { %v8511_v60 = vpop.f32.mrf.mxu1 }
 0x320   :  { %v6159_v32 = vpop.f32.mrf.mxu0 }
 0x321   :  { %v8515_v30 = vpop.f32.mrf.mxu1 }
 0x322   :  { %v6160_v36 = vpop.f32.mrf.mxu0  ;;  %v6121_v1 = vadd.f32 %v8515_v30, %v8511_v60 }
 0x323   :  { %v8520_v44 = vpop.f32.mrf.mxu1 }
 0x325   :  { %v8528_v14 = vpop.f32.mrf.mxu1 }
 0x326   :  { %v6124_v12 = vadd.f32 %v8528_v14, %v8520_v44 }
 0x327   :  { %v6181_v38 = vpop.f32.mrf.mxu1 }
 0x329   :  { %v6182_v31 = vpop.f32.mrf.mxu1 }
 0x32a   :  { %v6183_v43 = vadd.f32 %v6182_v31, %v6181_v38  ;;  %v6118_v31 = vadd.f32 %v8502_v27, %v8498_v45 }
 0x32b   :  { %v6184_v39 = vpop.f32.mrf.mxu1 }
 0x32c   :  { %v5256_v40 = vadd.f32 %v6183_v43, %v5191_v34  ;;  %v5202_v34 = vadd.f32 %v6152_v4, %v5137_v8  ;;  %v5145_v27 = vadd.f32 %v6118_v31, %v5080_v49 }
 0x32d   :  { %v6185_v35 = vpop.f32.mrf.mxu1 }
 0x32e   :  { %v5990_v47 = vpack.c.bf16 %v5256_v40, %v5256_v40  ;;  %v6186_v15 = vadd.f32 %v6185_v35, %v6184_v39  ;;  %v8654_v40 = vld [vmem:[#allocation44_spill] sm:$0xff] }
 0x32f   :  { %v6187_v62 = vpop.f32.mrf.mxu1  ;;  %v6044_v45 = vadd.f32 %v8654_v40, %v8653_v5 }
 0x330   :  { %5367 = vst [vmem:[#allocation10 + $0x8] sm:$0xf] %v5990_v47  ;;  %v5259_v33 = vadd.f32 %v6186_v15, %v5194_v23  ;;  %v6158_v23 = vadd.f32 %v6157_v25, %v6156_v56  ;;  %v6162_v15 = vpop.f32.mrf.mxu0 }
 0x331   :  { %v6188_v38 = vpop.f32.mrf.mxu1  ;;  %v5023_v6 = vadd.f32 %v6044_v45, %v8507_v50 }
 0x332   :  { %v5992_v9 = vpack.c.bf16 %v5259_v33, %v5259_v33  ;;  %v6189_v59 = vadd.f32 %v6188_v38, %v6187_v62  ;;  %v5210_v47 = vadd.f32 %v6158_v23, %v5145_v27  ;;  %v5150_v62 = vadd.f32 %v6121_v1, %v5085_v24  ;;  %v6163_v3 = vpop.f32.mrf.mxu0 }
 0x333   :  { %v6190_v63 = vpop.f32.mrf.mxu1  ;;  %v5088_v56 = vadd.f32 %v6084_v28, %v5023_v6  ;;  %v6161_v33 = vadd.f32 %v6160_v36, %v6159_v32  ;;  %v6164_v25 = vadd.f32 %v6163_v3, %v6162_v15 }
 0x334   :  { %5369 = vst [vmem:[#allocation10 + $0x14] sm:$0xf] %v5992_v9  ;;  %v5264_v52 = vadd.f32 %v6189_v59, %v5199_v53 }
 0x335   :  { %v6191_v0 = vpop.f32.mrf.mxu1  ;;  %v5215_v18 = vadd.f32 %v6161_v33, %v5150_v62  ;;  %v5153_v55 = vadd.f32 %v6124_v12, %v5088_v56 }
 0x336   :  { %v5994_v43 = vpack.c.bf16 %v5264_v52, %v5264_v52  ;;  %v6192_v7 = vadd.f32 %v6191_v0, %v6190_v63 }
 0x337   :  { %v6193_v37 = vpop.f32.mrf.mxu1  ;;  %v5218_v41 = vadd.f32 %v6164_v25, %v5153_v55 }
 0x338   :  { %5371 = vst [vmem:[#allocation10 + $0x20] sm:$0xf] %v5994_v43  ;;  %v5267_v39 = vadd.f32 %v6192_v7, %v5202_v34 }
 0x339   :  { %v6194_v2 = vpop.f32.mrf.mxu1 }
 0x33a   :  { %v5996_v17 = vpack.c.bf16 %v5267_v39, %v5267_v39  ;;  %v6195_v35 = vadd.f32 %v6194_v2, %v6193_v37 }
 0x33b   :  { %v6196_v22 = vpop.f32.mrf.mxu1 }
 0x33c   :  { %5373 = vst [vmem:[#allocation10 + $0x2c] sm:$0xf] %v5996_v17  ;;  %v5272_v21 = vadd.f32 %v6195_v35, %v5207_v13 }
 0x33d   :  { %v6197_v57 = vpop.f32.mrf.mxu1 }
 0x33e   :  { %v5998_v60 = vpack.c.bf16 %v5272_v21, %v5272_v21  ;;  %v6198_v30 = vadd.f32 %v6197_v57, %v6196_v22 }
 0x33f   :  { %v6199_v58 = vpop.f32.mrf.mxu1 }
 0x340   :  { %5375 = vst [vmem:[#allocation10 + $0x38] sm:$0xf] %v5998_v60  ;;  %v5275_v11 = vadd.f32 %v6198_v30, %v5210_v47 }
 0x341   :  { %v6200_v42 = vpop.f32.mrf.mxu1 }
 0x342   :  { %v6000_v61 = vpack.c.bf16 %v5275_v11, %v5275_v11  ;;  %v6201_v50 = vadd.f32 %v6200_v42, %v6199_v58 }
 0x343   :  { %v6202_v53 = vpop.f32.mrf.mxu1 }
 0x344   :  { %5377 = vst [vmem:[#allocation10 + $0x44] sm:$0xf] %v6000_v61  ;;  %v5280_v38 = vadd.f32 %v6201_v50, %v5215_v18 }
 0x345   :  { %v6203_v8 = vpop.f32.mrf.mxu1 }
 0x346   :  { %v6002_v44 = vpack.c.bf16 %v5280_v38, %v5280_v38  ;;  %v6204_v14 = vadd.f32 %v6203_v8, %v6202_v53 }
 0x348   :  { %5379 = vst [vmem:[#allocation10 + $0x50] sm:$0xf] %v6002_v44  ;;  %v5283_v9 = vadd.f32 %v6204_v14, %v5218_v41 }
 0x34a   :  { %v6004_v59 = vpack.c.bf16 %v5283_v9, %v5283_v9 }
 0x34c   :  { %5381 = vst [vmem:[#allocation10 + $0x5c] sm:$0xf] %v6004_v59 }
 0x34d   :  { %7335 = shalt.err (!%p7332_p10)
}
 0x34e   :  { %5393 = dma.vmem_to_hbm [thread:$0]  %s5388_s15, 1536, %s8578_s5, [#allocation4], %s7356_s28, %s7356_s28, %s7357_s29  }
 0x34f   :  { %7350 = dma.done.wait [#allocation4], 1536  }
 0x350   :  { %7351 = vsyncadd [#allocation4], 4294965760 }
 0x351   :  { %5397 = vsyncpa [#allocation3], 1 }
 0x352   :  { %5398 = vsyncpa [#allocation6], 1 }
 0x353   :  { %5399 = vsyncpa [#allocation9], 1 }
 0x354   :  { %5400 = vsyncpa [#allocation4], 1 }

</bundles_post_ra>
